<compile_context>
chip_gen: v7x
topology: tpu7x:2x2x1
jax: 0.10.0
libtpu: 0.0.40
codegen_flags: <defaults>
</compile_context>

<pallas_src>
import numpy as np
import jax
import jax.numpy as jnp
from jax import lax
from jax.experimental import pallas as pl
from jax.experimental.pallas import tpu as pltpu


def _inception_aux_kernel(x_ref, pm_ref, w0_ref, b0_ref, w1_ref, b1_ref,
                          wfc_ref, bfc_ref, o_ref, h0_scr):
    """One grid step = one block of NB batch elements (whole aux head computed in-step).

    x_ref   : (NB, HW, Cin)  bf16  flattened channels-last input block
    pm_ref  : (PP, HW)       bf16  0/1 avg-pool gather matrix (1/25 folded into w0)
    w0_ref  : (Cin, C0)      bf16  conv0 1x1 weight * bn0_scale / 25
    b0_ref  : (1, C0)        f32   folded bn0 bias
    w1_ref  : (PP, C0, C1)   bf16  whole conv1 5x5 weight * bn1_scale (VMEM resident)
    b1_ref  : (1, C1)        f32   folded bn1 bias
    wfc_ref : (C1, CP)       bf16  fc weight (classes lane-padded to CP=128)
    bfc_ref : (1, CP)        f32   fc bias (lane-padded)
    o_ref   : (NB, 1, CP)    f32   logits block
    h0_scr  : (NB, PP, C0)   bf16  conv0+pool output for the batch block
    """
    nb = x_ref.shape[0]
    pp = pm_ref.shape[0]
    c1 = w1_ref.shape[2]

    pm = pm_ref[...]
    w0 = w0_ref[...]
    b0 = b0_ref[...]

    # Stage 1 -- conv0 (1x1) at full resolution (M = HW = 289 MXU rows), then
    # avg_pool2d(5, stride=3) as an exact 0/1 gather-matrix matmul.  The 1x1 conv
    # commutes with the spatial average pool (1/25 is folded into w0), so this matches
    # the module's pool-then-conv.  BN bias + ReLU are applied after the pool.
    for b in range(nb):                                      # static unroll, NB small
        hb = jnp.dot(x_ref[b], w0, preferred_element_type=jnp.float32)        # (HW, C0)
        pooled = jnp.dot(pm, hb.astype(jnp.bfloat16),
                         preferred_element_type=jnp.float32)                  # (PP, C0)
        h0_scr[b] = jnp.maximum(pooled + b0, 0.0).astype(h0_scr.dtype)

    # Stage 2 -- conv1: 5x5 VALID conv over the 5x5 pooled map -> one output position.
    # 25 taps, each an (NB, C0) x (C0, C1) MXU matmul: the per-tap weight load is
    # amortized over the whole batch block instead of a single row.
    h0 = h0_scr[...]                                                          # (NB, PP, C0)
    acc = jnp.zeros((nb, c1), jnp.float32)
    for p in range(pp):                                      # static unroll (25 taps)
        acc = acc + jnp.dot(h0[:, p, :], w1_ref[p],
                            preferred_element_type=jnp.float32)
    y1 = jnp.maximum(acc + b1_ref[...], 0.0)                                  # (NB, C1)
    # adaptive_avg_pool2d((1,1)) is the identity here (conv1 output is already 1x1).

    # Stage 3 -- fc over the full 768 features; single lane-dense store, no revisit.
    logits = jnp.dot(y1.astype(jnp.bfloat16), wfc_ref[...],
                     preferred_element_type=jnp.float32) + bfc_ref[...]       # (NB, CP)
    o_ref[...] = logits[:, None, :]


def _prepare(x_nchw, params, *, num_classes, eps=1e-3):
    """Layout changes + BN/pool folding (zero-FLOP XLA glue). Returns kernel inputs."""
    N, Cin, H, W = x_nchw.shape
    KP, KS = 5, 3                                   # F.avg_pool2d(kernel_size=5, stride=3)
    PH, PW = (H - KP) // KS + 1, (W - KP) // KS + 1
    # Canonical InceptionV3 aux-head geometry: pooled map is 5x5 so the 5x5 VALID conv1
    # yields 1x1 and adaptive_avg_pool2d((1,1)) is the identity.
    assert PH == 5 and PW == 5, "TODO(synk): general (non-17x17-ish) spatial sizes"
    PP = PH * PW

    w0 = params["conv0_w"]                          # (C0, Cin, 1, 1)
    w1 = params["conv1_w"]                          # (C1, C0, 5, 5)
    C0, C1 = w0.shape[0], w1.shape[0]
    assert w1.shape[1] == C0 and w1.shape[2:] == (5, 5)

    # BatchNorm (eval mode) folded into per-channel scale/bias; scale goes into the weights.
    s0 = params["bn0_gamma"] / jnp.sqrt(params["bn0_var"] + eps)
    b0 = params["bn0_beta"] - params["bn0_mean"] * s0
    s1 = params["bn1_gamma"] / jnp.sqrt(params["bn1_var"] + eps)
    b1 = params["bn1_beta"] - params["bn1_mean"] * s1

    # conv0 (1x1): OIHW -> (Cin, C0); fold BN0 scale AND the 1/25 of the average pool.
    w0f = (w0[:, :, 0, 0].T * s0[None, :] / float(KP * KP)).astype(jnp.bfloat16)
    # conv1 (5x5): OIHW -> (KH*KW, Cin1, Cout1); fold BN1 scale.
    w1f = (jnp.transpose(w1, (2, 3, 1, 0)).reshape(PP, C0, C1)
           * s1[None, None, :]).astype(jnp.bfloat16)

    # fc: (num_classes, C1) -> (C1, CP) with the class axis padded to a lane-dense 128.
    CP = max(128, ((num_classes + 127) // 128) * 128)
    wfc = jnp.zeros((C1, CP), jnp.float32).at[:, :num_classes].set(params["fc_w"].T)
    bfc = jnp.zeros((1, CP), jnp.float32).at[0, :num_classes].set(params["fc_b"])

    # Input: NCHW -> (N, H*W, Cin) so channels live on the lane axis inside the kernel.
    x_flat = jnp.transpose(x_nchw, (0, 2, 3, 1)).reshape(N, H * W, Cin).astype(jnp.bfloat16)

    # avg_pool2d(5, stride=3) as a (PP, H*W) 0/1 gather matrix; the 1/25 lives in w0f.
    pm = np.zeros((PP, H * W), np.float32)
    for ph in range(PH):
        for pw in range(PW):
            for kh in range(KP):
                for kw in range(KP):
                    pm[ph * PW + pw, (KS * ph + kh) * W + (KS * pw + kw)] = 1.0
    pm = jnp.asarray(pm, jnp.bfloat16)

    args = (x_flat, pm, w0f, b0.reshape(1, C0).astype(jnp.float32),
            w1f, b1.reshape(1, C1).astype(jnp.float32),
            wfc.astype(jnp.bfloat16), bfc)
    meta = dict(N=N, HW=H * W, Cin=Cin, PP=PP, C0=C0, C1=C1, CP=CP)
    return args, meta


def inception_aux_forward(x_nchw, params, *, num_classes, eps=1e-3, batch_block=8):
    """InceptionAux forward (eval-mode BN). Input NCHW, PyTorch-layout parameters.

    batch_block = NB batch elements per grid step.  All weights are constant-index blocks
    (DMA'd once per core regardless of N); NB additionally sets the MXU M-occupancy of the
    conv1 taps.  NB=8 uses ~18 MiB VMEM (fits v5e/v6e/v7x); up to ~16 fits v7x's 64 MiB,
    more is fine on v5e/v6e (128 MiB).
    """
    args, m = _prepare(x_nchw, params, num_classes=num_classes, eps=eps)
    x_flat, pm, w0f, b0, w1f, b1, wfc, bfc = args
    N, HW, Cin, PP, C0, C1, CP = (m["N"], m["HW"], m["Cin"], m["PP"],
                                  m["C0"], m["C1"], m["CP"])

    # Keep >= 2 grid steps when N > 1 so both v7x TensorCores get work on the "parallel"
    # axis; otherwise take the largest batch block allowed.
    NB = max(1, min(batch_block, pl.cdiv(N, 2)))
    n_blk = pl.cdiv(N, NB)
    N_pad = n_blk * NB
    if N_pad != N:
        x_flat = jnp.pad(x_flat, ((0, N_pad - N), (0, 0), (0, 0)))

    grid_spec = pltpu.PrefetchScalarGridSpec(
        num_scalar_prefetch=0,
        grid=(n_blk,),
        in_specs=[
            pl.BlockSpec((NB, HW, Cin), lambda g: (g, 0, 0)),   # x (batch block)
            pl.BlockSpec((PP, HW), lambda g: (0, 0)),           # pool gather matrix
            pl.BlockSpec((Cin, C0), lambda g: (0, 0)),          # conv0 weight (folded)
            pl.BlockSpec((1, C0), lambda g: (0, 0)),            # bn0 bias
            pl.BlockSpec((PP, C0, C1), lambda g: (0, 0, 0)),    # conv1 weight (whole, 4.9 MB)
            pl.BlockSpec((1, C1), lambda g: (0, 0)),            # bn1 bias
            pl.BlockSpec((C1, CP), lambda g: (0, 0)),           # fc weight
            pl.BlockSpec((1, CP), lambda g: (0, 0)),            # fc bias
        ],
        out_specs=pl.BlockSpec((NB, 1, CP), lambda g: (g, 0, 0)),   # logits (no revisit)
        scratch_shapes=[pltpu.VMEM((NB, PP, C0), jnp.bfloat16)],    # conv0+pool output
    )

    logits_padded = pl.pallas_call(
        _inception_aux_kernel,
        out_shape=jax.ShapeDtypeStruct((N_pad, 1, CP), jnp.float32),
        grid_spec=grid_spec,
        compiler_params=pltpu.CompilerParams(
            dimension_semantics=("parallel",),
            vmem_limit_bytes=48 * 1024 * 1024,   # ~18 MiB used at NB=8; fits v5e/v6e/v7x
        ),
    )(x_flat, pm, w0f, b0, w1f, b1, wfc, bfc)

    return logits_padded[:N, 0, :num_classes]


# ---------------------------------------------------------------------------- references

def _reference_folded(args):
    """Pure-JAX mirror of the kernel math (same folded bf16 params / casts): tight check."""
    x_flat, pm, w0f, b0, w1f, b1, wfc, bfc = args
    f32, hi = jnp.float32, lax.Precision.HIGHEST
    x = x_flat.astype(f32)
    h = jnp.einsum("nqc,ck->nqk", x, w0f.astype(f32), precision=hi)           # conv0 @ full res
    h = h.astype(jnp.bfloat16).astype(f32)
    h0 = jnp.einsum("pq,nqk->npk", pm.astype(f32), h, precision=hi) + b0      # avg-pool gather
    h0 = jnp.maximum(h0, 0.0).astype(jnp.bfloat16).astype(f32)
    y1 = jnp.einsum("npk,pkc->nc", h0, w1f.astype(f32), precision=hi) + b1    # conv1 (5x5->1x1)
    y1 = jnp.maximum(y1, 0.0).astype(jnp.bfloat16).astype(f32)
    return jnp.einsum("nc,cp->np", y1, wfc.astype(f32), precision=hi) + bfc   # fc


def _reference_module(x, params, *, eps=1e-3):
    """Op-for-op f32 reference of the PyTorch module (eval-mode BatchNorm)."""
    hi = lax.Precision.HIGHEST
    f = x.astype(jnp.float32)
    f = lax.reduce_window(f, 0.0, lax.add, (1, 1, 5, 5), (1, 1, 3, 3), "VALID") / 25.0

    def conv_bn_relu(z, w, g, b, mean, var):
        z = lax.conv_general_dilated(z, w.astype(jnp.float32), (1, 1), "VALID",
                                     dimension_numbers=("NCHW", "OIHW", "NCHW"),
                                     precision=hi)
        s = g / jnp.sqrt(var + eps)
        z = z * s[None, :, None, None] + (b - mean * s)[None, :, None, None]
        return jnp.maximum(z, 0.0)

    f = conv_bn_relu(f, params["conv0_w"], params["bn0_gamma"], params["bn0_beta"],
                     params["bn0_mean"], params["bn0_var"])
    f = conv_bn_relu(f, params["conv1_w"], params["bn1_gamma"], params["bn1_beta"],
                     params["bn1_mean"], params["bn1_var"])
    f = jnp.mean(f, axis=(2, 3))                     # adaptive_avg_pool2d((1,1)) + flatten
    return jnp.dot(f, params["fc_w"].T, precision=hi) + params["fc_b"]


if __name__ == "__main__":
    key = jax.random.PRNGKey(0)
    ks = jax.random.split(key, 13)

    # Canonical InceptionV3 aux-head input (small batch): x is (2, 768, 17, 17).
    N, Cin, H, W = 2, 768, 17, 17
    C0, C1, num_classes = 128, 768, 10

    x = jax.random.normal(ks[0], (N, Cin, H, W), jnp.float32)
    params = dict(
        conv0_w=0.1 * jax.random.normal(ks[1], (C0, Cin, 1, 1), jnp.float32),
        bn0_gamma=1.0 + 0.1 * jax.random.normal(ks[2], (C0,), jnp.float32),
        bn0_beta=0.1 * jax.random.normal(ks[3], (C0,), jnp.float32),
        bn0_mean=0.1 * jax.random.normal(ks[4], (C0,), jnp.float32),
        bn0_var=0.5 + 0.2 * jnp.abs(jax.random.normal(ks[5], (C0,), jnp.float32)),
        conv1_w=0.01 * jax.random.normal(ks[6], (C1, C0, 5, 5), jnp.float32),
        bn1_gamma=1.0 + 0.1 * jax.random.normal(ks[7], (C1,), jnp.float32),
        bn1_beta=0.1 * jax.random.normal(ks[8], (C1,), jnp.float32),
        bn1_mean=0.1 * jax.random.normal(ks[9], (C1,), jnp.float32),
        bn1_var=0.5 + 0.2 * jnp.abs(jax.random.normal(ks[10], (C1,), jnp.float32)),
        fc_w=0.03 * jax.random.normal(ks[11], (num_classes, C1), jnp.float32),
        fc_b=0.01 * jax.random.normal(ks[12], (num_classes,), jnp.float32),
    )

    logits = inception_aux_forward(x, params, num_classes=num_classes)
    logits = jax.block_until_ready(logits)

    # (1) Tight check: kernel vs a pure-JAX mirror of its exact (bf16-folded) math.
    args, _ = _prepare(x, params, num_classes=num_classes)
    ref_folded = _reference_folded(args)[:, :num_classes]
    np.testing.assert_allclose(np.asarray(logits), np.asarray(ref_folded),
                               rtol=2e-3, atol=2e-3)

    # (2) Semantics check: kernel vs op-for-op f32 PyTorch-style reference
    #     (loose tolerance accounts for bf16 weights/activations in the kernel).
    ref_module = _reference_module(x, params)
    np.testing.assert_allclose(np.asarray(logits), np.asarray(ref_module),
                               rtol=5e-2, atol=5e-2)

    print("KERNEL_OK")
</pallas_src>

<mosaic_0001>
module attributes {stable_mosaic.version = 11 : i64} {
  func.func @_inception_aux_kernel(%arg0: i32, %arg1: memref<1x289x768xbf16, #tpu.memory_space<vmem>>, %arg2: memref<25x289xbf16, #tpu.memory_space<vmem>>, %arg3: memref<768x128xbf16, #tpu.memory_space<vmem>>, %arg4: memref<1x128xf32, #tpu.memory_space<vmem>>, %arg5: memref<25x128x768xbf16, #tpu.memory_space<vmem>>, %arg6: memref<1x768xf32, #tpu.memory_space<vmem>>, %arg7: memref<768x128xbf16, #tpu.memory_space<vmem>>, %arg8: memref<1x128xf32, #tpu.memory_space<vmem>>, %arg9: memref<1x1x128xf32, #tpu.memory_space<vmem>>, %arg10: memref<1x25x128xbf16, #tpu.memory_space<vmem>>) attributes {dimension_semantics = [#tpu.dimension_semantics<parallel>], iteration_bounds = array<i64: 2>, scalar_prefetch = 0 : i64, scratch_operands = 1 : i64, tpu.core_type = #tpu.core_type<tc>, window_params = [{transform_indices = @transform_0, window_bounds = array<i64: 1, 289, 768>}, {pipeline_mode = #tpu.pipeline_mode<synchronous>, transform_indices = @transform_1, window_bounds = array<i64: 25, 289>}, {pipeline_mode = #tpu.pipeline_mode<synchronous>, transform_indices = @transform_2, window_bounds = array<i64: 768, 128>}, {pipeline_mode = #tpu.pipeline_mode<synchronous>, transform_indices = @transform_3, window_bounds = array<i64: 1, 128>}, {pipeline_mode = #tpu.pipeline_mode<synchronous>, transform_indices = @transform_4, window_bounds = array<i64: 25, 128, 768>}, {pipeline_mode = #tpu.pipeline_mode<synchronous>, transform_indices = @transform_5, window_bounds = array<i64: 1, 768>}, {pipeline_mode = #tpu.pipeline_mode<synchronous>, transform_indices = @transform_6, window_bounds = array<i64: 768, 128>}, {pipeline_mode = #tpu.pipeline_mode<synchronous>, transform_indices = @transform_7, window_bounds = array<i64: 1, 128>}, {transform_indices = @transform_8, window_bounds = array<i64: 1, 1, 128>}]} {
    %c0 = arith.constant 0 : index
    %c0_0 = arith.constant 0 : index
    %0 = vector.load %arg2[%c0, %c0_0] : memref<25x289xbf16, #tpu.memory_space<vmem>>, vector<25x289xbf16>
    %c0_1 = arith.constant 0 : index
    %c0_2 = arith.constant 0 : index
    %1 = vector.load %arg3[%c0_1, %c0_2] : memref<768x128xbf16, #tpu.memory_space<vmem>>, vector<768x128xbf16>
    %c0_3 = arith.constant 0 : index
    %c0_4 = arith.constant 0 : index
    %2 = vector.load %arg4[%c0_3, %c0_4] : memref<1x128xf32, #tpu.memory_space<vmem>>, vector<1x128xf32>
    %c0_5 = arith.constant 0 : index
    %c0_6 = arith.constant 0 : index
    %c0_7 = arith.constant 0 : index
    %3 = vector.load %arg1[%c0_5, %c0_6, %c0_7] : memref<1x289x768xbf16, #tpu.memory_space<vmem>>, vector<1x289x768xbf16>
    %4 = vector.shape_cast %3 : vector<1x289x768xbf16> to vector<289x768xbf16>
    %cst = arith.constant dense<0.000000e+00> : vector<289x128xf32>
    %5 = tpu.matmul %4, %1, %cst {dimension_numbers = #tpu.dot_dimension_numbers<[1], [0], [0], [1], [0, 0, 1, 1], [], []>} : vector<289x768xbf16>, vector<768x128xbf16>, vector<289x128xf32> -> vector<289x128xf32>
    %6 = arith.truncf %5 : vector<289x128xf32> to vector<289x128xbf16>
    %cst_8 = arith.constant dense<0.000000e+00> : vector<25x128xf32>
    %7 = tpu.matmul %0, %6, %cst_8 {dimension_numbers = #tpu.dot_dimension_numbers<[1], [0], [0], [1], [0, 0, 1, 1], [], []>} : vector<25x289xbf16>, vector<289x128xbf16>, vector<25x128xf32> -> vector<25x128xf32>
    %8 = vector.broadcast %2 : vector<1x128xf32> to vector<25x128xf32>
    %9 = arith.addf %7, %8 : vector<25x128xf32>
    %cst_9 = arith.constant 0.000000e+00 : f32
    %10 = vector.broadcast %cst_9 : f32 to vector<25x128xf32>
    %11 = arith.maximumf %9, %10 : vector<25x128xf32>
    %12 = arith.truncf %11 : vector<25x128xf32> to vector<25x128xbf16>
    %c0_10 = arith.constant 0 : index
    %c0_11 = arith.constant 0 : index
    %c0_12 = arith.constant 0 : index
    %13 = vector.load %arg10[%c0_10, %c0_11, %c0_12] : memref<1x25x128xbf16, #tpu.memory_space<vmem>>, vector<1x25x128xbf16>
    %14 = vector.shape_cast %13 : vector<1x25x128xbf16> to vector<25x128xbf16>
    %15 = vector.shape_cast %12 : vector<25x128xbf16> to vector<1x25x128xbf16>
    tpu.vector_store %arg10[%c0_10, %c0_11, %c0_12], %15 {strides = array<i32>} : memref<1x25x128xbf16, #tpu.memory_space<vmem>>, vector<1x25x128xbf16>,
    %c0_13 = arith.constant 0 : index
    %c0_14 = arith.constant 0 : index
    %c0_15 = arith.constant 0 : index
    %16 = vector.load %arg10[%c0_13, %c0_14, %c0_15] : memref<1x25x128xbf16, #tpu.memory_space<vmem>>, vector<1x25x128xbf16>
    %cst_16 = arith.constant 0.000000e+00 : f32
    %17 = vector.broadcast %cst_16 : f32 to vector<1x768xf32>
    %18 = vector.extract_strided_slice %16 {offsets = [0, 0, 0], sizes = [1, 1, 128], strides = [1, 1, 1]} : vector<1x25x128xbf16> to vector<1x1x128xbf16>
    %19 = vector.shape_cast %18 : vector<1x1x128xbf16> to vector<1x128xbf16>
    %c0_17 = arith.constant 0 : index
    %c0_18 = arith.constant 0 : index
    %c0_19 = arith.constant 0 : index
    %20 = vector.load %arg5[%c0_17, %c0_18, %c0_19] : memref<25x128x768xbf16, #tpu.memory_space<vmem>>, vector<1x128x768xbf16>
    %21 = vector.shape_cast %20 : vector<1x128x768xbf16> to vector<128x768xbf16>
    %cst_20 = arith.constant dense<0.000000e+00> : vector<1x768xf32>
    %22 = tpu.matmul %19, %21, %cst_20 {dimension_numbers = #tpu.dot_dimension_numbers<[1], [0], [0], [1], [0, 0, 1, 1], [], []>} : vector<1x128xbf16>, vector<128x768xbf16>, vector<1x768xf32> -> vector<1x768xf32>
    %23 = arith.addf %17, %22 : vector<1x768xf32>
    %24 = vector.extract_strided_slice %16 {offsets = [0, 1, 0], sizes = [1, 1, 128], strides = [1, 1, 1]} : vector<1x25x128xbf16> to vector<1x1x128xbf16>
    %25 = vector.shape_cast %24 : vector<1x1x128xbf16> to vector<1x128xbf16>
    %c1 = arith.constant 1 : index
    %c0_21 = arith.constant 0 : index
    %c0_22 = arith.constant 0 : index
    %26 = vector.load %arg5[%c1, %c0_21, %c0_22] : memref<25x128x768xbf16, #tpu.memory_space<vmem>>, vector<1x128x768xbf16>
    %27 = vector.shape_cast %26 : vector<1x128x768xbf16> to vector<128x768xbf16>
    %cst_23 = arith.constant dense<0.000000e+00> : vector<1x768xf32>
    %28 = tpu.matmul %25, %27, %cst_23 {dimension_numbers = #tpu.dot_dimension_numbers<[1], [0], [0], [1], [0, 0, 1, 1], [], []>} : vector<1x128xbf16>, vector<128x768xbf16>, vector<1x768xf32> -> vector<1x768xf32>
    %29 = arith.addf %23, %28 : vector<1x768xf32>
    %30 = vector.extract_strided_slice %16 {offsets = [0, 2, 0], sizes = [1, 1, 128], strides = [1, 1, 1]} : vector<1x25x128xbf16> to vector<1x1x128xbf16>
    %31 = vector.shape_cast %30 : vector<1x1x128xbf16> to vector<1x128xbf16>
    %c2 = arith.constant 2 : index
    %c0_24 = arith.constant 0 : index
    %c0_25 = arith.constant 0 : index
    %32 = vector.load %arg5[%c2, %c0_24, %c0_25] : memref<25x128x768xbf16, #tpu.memory_space<vmem>>, vector<1x128x768xbf16>
    %33 = vector.shape_cast %32 : vector<1x128x768xbf16> to vector<128x768xbf16>
    %cst_26 = arith.constant dense<0.000000e+00> : vector<1x768xf32>
    %34 = tpu.matmul %31, %33, %cst_26 {dimension_numbers = #tpu.dot_dimension_numbers<[1], [0], [0], [1], [0, 0, 1, 1], [], []>} : vector<1x128xbf16>, vector<128x768xbf16>, vector<1x768xf32> -> vector<1x768xf32>
    %35 = arith.addf %29, %34 : vector<1x768xf32>
    %36 = vector.extract_strided_slice %16 {offsets = [0, 3, 0], sizes = [1, 1, 128], strides = [1, 1, 1]} : vector<1x25x128xbf16> to vector<1x1x128xbf16>
    %37 = vector.shape_cast %36 : vector<1x1x128xbf16> to vector<1x128xbf16>
    %c3 = arith.constant 3 : index
    %c0_27 = arith.constant 0 : index
    %c0_28 = arith.constant 0 : index
    %38 = vector.load %arg5[%c3, %c0_27, %c0_28] : memref<25x128x768xbf16, #tpu.memory_space<vmem>>, vector<1x128x768xbf16>
    %39 = vector.shape_cast %38 : vector<1x128x768xbf16> to vector<128x768xbf16>
    %cst_29 = arith.constant dense<0.000000e+00> : vector<1x768xf32>
    %40 = tpu.matmul %37, %39, %cst_29 {dimension_numbers = #tpu.dot_dimension_numbers<[1], [0], [0], [1], [0, 0, 1, 1], [], []>} : vector<1x128xbf16>, vector<128x768xbf16>, vector<1x768xf32> -> vector<1x768xf32>
    %41 = arith.addf %35, %40 : vector<1x768xf32>
    %42 = vector.extract_strided_slice %16 {offsets = [0, 4, 0], sizes = [1, 1, 128], strides = [1, 1, 1]} : vector<1x25x128xbf16> to vector<1x1x128xbf16>
    %43 = vector.shape_cast %42 : vector<1x1x128xbf16> to vector<1x128xbf16>
    %c4 = arith.constant 4 : index
    %c0_30 = arith.constant 0 : index
    %c0_31 = arith.constant 0 : index
    %44 = vector.load %arg5[%c4, %c0_30, %c0_31] : memref<25x128x768xbf16, #tpu.memory_space<vmem>>, vector<1x128x768xbf16>
    %45 = vector.shape_cast %44 : vector<1x128x768xbf16> to vector<128x768xbf16>
    %cst_32 = arith.constant dense<0.000000e+00> : vector<1x768xf32>
    %46 = tpu.matmul %43, %45, %cst_32 {dimension_numbers = #tpu.dot_dimension_numbers<[1], [0], [0], [1], [0, 0, 1, 1], [], []>} : vector<1x128xbf16>, vector<128x768xbf16>, vector<1x768xf32> -> vector<1x768xf32>
    %47 = arith.addf %41, %46 : vector<1x768xf32>
    %48 = vector.extract_strided_slice %16 {offsets = [0, 5, 0], sizes = [1, 1, 128], strides = [1, 1, 1]} : vector<1x25x128xbf16> to vector<1x1x128xbf16>
    %49 = vector.shape_cast %48 : vector<1x1x128xbf16> to vector<1x128xbf16>
    %c5 = arith.constant 5 : index
    %c0_33 = arith.constant 0 : index
    %c0_34 = arith.constant 0 : index
    %50 = vector.load %arg5[%c5, %c0_33, %c0_34] : memref<25x128x768xbf16, #tpu.memory_space<vmem>>, vector<1x128x768xbf16>
    %51 = vector.shape_cast %50 : vector<1x128x768xbf16> to vector<128x768xbf16>
    %cst_35 = arith.constant dense<0.000000e+00> : vector<1x768xf32>
    %52 = tpu.matmul %49, %51, %cst_35 {dimension_numbers = #tpu.dot_dimension_numbers<[1], [0], [0], [1], [0, 0, 1, 1], [], []>} : vector<1x128xbf16>, vector<128x768xbf16>, vector<1x768xf32> -> vector<1x768xf32>
    %53 = arith.addf %47, %52 : vector<1x768xf32>
    %54 = vector.extract_strided_slice %16 {offsets = [0, 6, 0], sizes = [1, 1, 128], strides = [1, 1, 1]} : vector<1x25x128xbf16> to vector<1x1x128xbf16>
    %55 = vector.shape_cast %54 : vector<1x1x128xbf16> to vector<1x128xbf16>
    %c6 = arith.constant 6 : index
    %c0_36 = arith.constant 0 : index
    %c0_37 = arith.constant 0 : index
    %56 = vector.load %arg5[%c6, %c0_36, %c0_37] : memref<25x128x768xbf16, #tpu.memory_space<vmem>>, vector<1x128x768xbf16>
    %57 = vector.shape_cast %56 : vector<1x128x768xbf16> to vector<128x768xbf16>
    %cst_38 = arith.constant dense<0.000000e+00> : vector<1x768xf32>
    %58 = tpu.matmul %55, %57, %cst_38 {dimension_numbers = #tpu.dot_dimension_numbers<[1], [0], [0], [1], [0, 0, 1, 1], [], []>} : vector<1x128xbf16>, vector<128x768xbf16>, vector<1x768xf32> -> vector<1x768xf32>
    %59 = arith.addf %53, %58 : vector<1x768xf32>
    %60 = vector.extract_strided_slice %16 {offsets = [0, 7, 0], sizes = [1, 1, 128], strides = [1, 1, 1]} : vector<1x25x128xbf16> to vector<1x1x128xbf16>
    %61 = vector.shape_cast %60 : vector<1x1x128xbf16> to vector<1x128xbf16>
    %c7 = arith.constant 7 : index
    %c0_39 = arith.constant 0 : index
    %c0_40 = arith.constant 0 : index
    %62 = vector.load %arg5[%c7, %c0_39, %c0_40] : memref<25x128x768xbf16, #tpu.memory_space<vmem>>, vector<1x128x768xbf16>
    %63 = vector.shape_cast %62 : vector<1x128x768xbf16> to vector<128x768xbf16>
    %cst_41 = arith.constant dense<0.000000e+00> : vector<1x768xf32>
    %64 = tpu.matmul %61, %63, %cst_41 {dimension_numbers = #tpu.dot_dimension_numbers<[1], [0], [0], [1], [0, 0, 1, 1], [], []>} : vector<1x128xbf16>, vector<128x768xbf16>, vector<1x768xf32> -> vector<1x768xf32>
    %65 = arith.addf %59, %64 : vector<1x768xf32>
    %66 = vector.extract_strided_slice %16 {offsets = [0, 8, 0], sizes = [1, 1, 128], strides = [1, 1, 1]} : vector<1x25x128xbf16> to vector<1x1x128xbf16>
    %67 = vector.shape_cast %66 : vector<1x1x128xbf16> to vector<1x128xbf16>
    %c8 = arith.constant 8 : index
    %c0_42 = arith.constant 0 : index
    %c0_43 = arith.constant 0 : index
    %68 = vector.load %arg5[%c8, %c0_42, %c0_43] : memref<25x128x768xbf16, #tpu.memory_space<vmem>>, vector<1x128x768xbf16>
    %69 = vector.shape_cast %68 : vector<1x128x768xbf16> to vector<128x768xbf16>
    %cst_44 = arith.constant dense<0.000000e+00> : vector<1x768xf32>
    %70 = tpu.matmul %67, %69, %cst_44 {dimension_numbers = #tpu.dot_dimension_numbers<[1], [0], [0], [1], [0, 0, 1, 1], [], []>} : vector<1x128xbf16>, vector<128x768xbf16>, vector<1x768xf32> -> vector<1x768xf32>
    %71 = arith.addf %65, %70 : vector<1x768xf32>
    %72 = vector.extract_strided_slice %16 {offsets = [0, 9, 0], sizes = [1, 1, 128], strides = [1, 1, 1]} : vector<1x25x128xbf16> to vector<1x1x128xbf16>
    %73 = vector.shape_cast %72 : vector<1x1x128xbf16> to vector<1x128xbf16>
    %c9 = arith.constant 9 : index
    %c0_45 = arith.constant 0 : index
    %c0_46 = arith.constant 0 : index
    %74 = vector.load %arg5[%c9, %c0_45, %c0_46] : memref<25x128x768xbf16, #tpu.memory_space<vmem>>, vector<1x128x768xbf16>
    %75 = vector.shape_cast %74 : vector<1x128x768xbf16> to vector<128x768xbf16>
    %cst_47 = arith.constant dense<0.000000e+00> : vector<1x768xf32>
    %76 = tpu.matmul %73, %75, %cst_47 {dimension_numbers = #tpu.dot_dimension_numbers<[1], [0], [0], [1], [0, 0, 1, 1], [], []>} : vector<1x128xbf16>, vector<128x768xbf16>, vector<1x768xf32> -> vector<1x768xf32>
    %77 = arith.addf %71, %76 : vector<1x768xf32>
    %78 = vector.extract_strided_slice %16 {offsets = [0, 10, 0], sizes = [1, 1, 128], strides = [1, 1, 1]} : vector<1x25x128xbf16> to vector<1x1x128xbf16>
    %79 = vector.shape_cast %78 : vector<1x1x128xbf16> to vector<1x128xbf16>
    %c10 = arith.constant 10 : index
    %c0_48 = arith.constant 0 : index
    %c0_49 = arith.constant 0 : index
    %80 = vector.load %arg5[%c10, %c0_48, %c0_49] : memref<25x128x768xbf16, #tpu.memory_space<vmem>>, vector<1x128x768xbf16>
    %81 = vector.shape_cast %80 : vector<1x128x768xbf16> to vector<128x768xbf16>
    %cst_50 = arith.constant dense<0.000000e+00> : vector<1x768xf32>
    %82 = tpu.matmul %79, %81, %cst_50 {dimension_numbers = #tpu.dot_dimension_numbers<[1], [0], [0], [1], [0, 0, 1, 1], [], []>} : vector<1x128xbf16>, vector<128x768xbf16>, vector<1x768xf32> -> vector<1x768xf32>
    %83 = arith.addf %77, %82 : vector<1x768xf32>
    %84 = vector.extract_strided_slice %16 {offsets = [0, 11, 0], sizes = [1, 1, 128], strides = [1, 1, 1]} : vector<1x25x128xbf16> to vector<1x1x128xbf16>
    %85 = vector.shape_cast %84 : vector<1x1x128xbf16> to vector<1x128xbf16>
    %c11 = arith.constant 11 : index
    %c0_51 = arith.constant 0 : index
    %c0_52 = arith.constant 0 : index
    %86 = vector.load %arg5[%c11, %c0_51, %c0_52] : memref<25x128x768xbf16, #tpu.memory_space<vmem>>, vector<1x128x768xbf16>
    %87 = vector.shape_cast %86 : vector<1x128x768xbf16> to vector<128x768xbf16>
    %cst_53 = arith.constant dense<0.000000e+00> : vector<1x768xf32>
    %88 = tpu.matmul %85, %87, %cst_53 {dimension_numbers = #tpu.dot_dimension_numbers<[1], [0], [0], [1], [0, 0, 1, 1], [], []>} : vector<1x128xbf16>, vector<128x768xbf16>, vector<1x768xf32> -> vector<1x768xf32>
    %89 = arith.addf %83, %88 : vector<1x768xf32>
    %90 = vector.extract_strided_slice %16 {offsets = [0, 12, 0], sizes = [1, 1, 128], strides = [1, 1, 1]} : vector<1x25x128xbf16> to vector<1x1x128xbf16>
    %91 = vector.shape_cast %90 : vector<1x1x128xbf16> to vector<1x128xbf16>
    %c12 = arith.constant 12 : index
    %c0_54 = arith.constant 0 : index
    %c0_55 = arith.constant 0 : index
    %92 = vector.load %arg5[%c12, %c0_54, %c0_55] : memref<25x128x768xbf16, #tpu.memory_space<vmem>>, vector<1x128x768xbf16>
    %93 = vector.shape_cast %92 : vector<1x128x768xbf16> to vector<128x768xbf16>
    %cst_56 = arith.constant dense<0.000000e+00> : vector<1x768xf32>
    %94 = tpu.matmul %91, %93, %cst_56 {dimension_numbers = #tpu.dot_dimension_numbers<[1], [0], [0], [1], [0, 0, 1, 1], [], []>} : vector<1x128xbf16>, vector<128x768xbf16>, vector<1x768xf32> -> vector<1x768xf32>
    %95 = arith.addf %89, %94 : vector<1x768xf32>
    %96 = vector.extract_strided_slice %16 {offsets = [0, 13, 0], sizes = [1, 1, 128], strides = [1, 1, 1]} : vector<1x25x128xbf16> to vector<1x1x128xbf16>
    %97 = vector.shape_cast %96 : vector<1x1x128xbf16> to vector<1x128xbf16>
    %c13 = arith.constant 13 : index
    %c0_57 = arith.constant 0 : index
    %c0_58 = arith.constant 0 : index
    %98 = vector.load %arg5[%c13, %c0_57, %c0_58] : memref<25x128x768xbf16, #tpu.memory_space<vmem>>, vector<1x128x768xbf16>
    %99 = vector.shape_cast %98 : vector<1x128x768xbf16> to vector<128x768xbf16>
    %cst_59 = arith.constant dense<0.000000e+00> : vector<1x768xf32>
    %100 = tpu.matmul %97, %99, %cst_59 {dimension_numbers = #tpu.dot_dimension_numbers<[1], [0], [0], [1], [0, 0, 1, 1], [], []>} : vector<1x128xbf16>, vector<128x768xbf16>, vector<1x768xf32> -> vector<1x768xf32>
    %101 = arith.addf %95, %100 : vector<1x768xf32>
    %102 = vector.extract_strided_slice %16 {offsets = [0, 14, 0], sizes = [1, 1, 128], strides = [1, 1, 1]} : vector<1x25x128xbf16> to vector<1x1x128xbf16>
    %103 = vector.shape_cast %102 : vector<1x1x128xbf16> to vector<1x128xbf16>
    %c14 = arith.constant 14 : index
    %c0_60 = arith.constant 0 : index
    %c0_61 = arith.constant 0 : index
    %104 = vector.load %arg5[%c14, %c0_60, %c0_61] : memref<25x128x768xbf16, #tpu.memory_space<vmem>>, vector<1x128x768xbf16>
    %105 = vector.shape_cast %104 : vector<1x128x768xbf16> to vector<128x768xbf16>
    %cst_62 = arith.constant dense<0.000000e+00> : vector<1x768xf32>
    %106 = tpu.matmul %103, %105, %cst_62 {dimension_numbers = #tpu.dot_dimension_numbers<[1], [0], [0], [1], [0, 0, 1, 1], [], []>} : vector<1x128xbf16>, vector<128x768xbf16>, vector<1x768xf32> -> vector<1x768xf32>
    %107 = arith.addf %101, %106 : vector<1x768xf32>
    %108 = vector.extract_strided_slice %16 {offsets = [0, 15, 0], sizes = [1, 1, 128], strides = [1, 1, 1]} : vector<1x25x128xbf16> to vector<1x1x128xbf16>
    %109 = vector.shape_cast %108 : vector<1x1x128xbf16> to vector<1x128xbf16>
    %c15 = arith.constant 15 : index
    %c0_63 = arith.constant 0 : index
    %c0_64 = arith.constant 0 : index
    %110 = vector.load %arg5[%c15, %c0_63, %c0_64] : memref<25x128x768xbf16, #tpu.memory_space<vmem>>, vector<1x128x768xbf16>
    %111 = vector.shape_cast %110 : vector<1x128x768xbf16> to vector<128x768xbf16>
    %cst_65 = arith.constant dense<0.000000e+00> : vector<1x768xf32>
    %112 = tpu.matmul %109, %111, %cst_65 {dimension_numbers = #tpu.dot_dimension_numbers<[1], [0], [0], [1], [0, 0, 1, 1], [], []>} : vector<1x128xbf16>, vector<128x768xbf16>, vector<1x768xf32> -> vector<1x768xf32>
    %113 = arith.addf %107, %112 : vector<1x768xf32>
    %114 = vector.extract_strided_slice %16 {offsets = [0, 16, 0], sizes = [1, 1, 128], strides = [1, 1, 1]} : vector<1x25x128xbf16> to vector<1x1x128xbf16>
    %115 = vector.shape_cast %114 : vector<1x1x128xbf16> to vector<1x128xbf16>
    %c16 = arith.constant 16 : index
    %c0_66 = arith.constant 0 : index
    %c0_67 = arith.constant 0 : index
    %116 = vector.load %arg5[%c16, %c0_66, %c0_67] : memref<25x128x768xbf16, #tpu.memory_space<vmem>>, vector<1x128x768xbf16>
    %117 = vector.shape_cast %116 : vector<1x128x768xbf16> to vector<128x768xbf16>
    %cst_68 = arith.constant dense<0.000000e+00> : vector<1x768xf32>
    %118 = tpu.matmul %115, %117, %cst_68 {dimension_numbers = #tpu.dot_dimension_numbers<[1], [0], [0], [1], [0, 0, 1, 1], [], []>} : vector<1x128xbf16>, vector<128x768xbf16>, vector<1x768xf32> -> vector<1x768xf32>
    %119 = arith.addf %113, %118 : vector<1x768xf32>
    %120 = vector.extract_strided_slice %16 {offsets = [0, 17, 0], sizes = [1, 1, 128], strides = [1, 1, 1]} : vector<1x25x128xbf16> to vector<1x1x128xbf16>
    %121 = vector.shape_cast %120 : vector<1x1x128xbf16> to vector<1x128xbf16>
    %c17 = arith.constant 17 : index
    %c0_69 = arith.constant 0 : index
    %c0_70 = arith.constant 0 : index
    %122 = vector.load %arg5[%c17, %c0_69, %c0_70] : memref<25x128x768xbf16, #tpu.memory_space<vmem>>, vector<1x128x768xbf16>
    %123 = vector.shape_cast %122 : vector<1x128x768xbf16> to vector<128x768xbf16>
    %cst_71 = arith.constant dense<0.000000e+00> : vector<1x768xf32>
    %124 = tpu.matmul %121, %123, %cst_71 {dimension_numbers = #tpu.dot_dimension_numbers<[1], [0], [0], [1], [0, 0, 1, 1], [], []>} : vector<1x128xbf16>, vector<128x768xbf16>, vector<1x768xf32> -> vector<1x768xf32>
    %125 = arith.addf %119, %124 : vector<1x768xf32>
    %126 = vector.extract_strided_slice %16 {offsets = [0, 18, 0], sizes = [1, 1, 128], strides = [1, 1, 1]} : vector<1x25x128xbf16> to vector<1x1x128xbf16>
    %127 = vector.shape_cast %126 : vector<1x1x128xbf16> to vector<1x128xbf16>
    %c18 = arith.constant 18 : index
    %c0_72 = arith.constant 0 : index
    %c0_73 = arith.constant 0 : index
    %128 = vector.load %arg5[%c18, %c0_72, %c0_73] : memref<25x128x768xbf16, #tpu.memory_space<vmem>>, vector<1x128x768xbf16>
    %129 = vector.shape_cast %128 : vector<1x128x768xbf16> to vector<128x768xbf16>
    %cst_74 = arith.constant dense<0.000000e+00> : vector<1x768xf32>
    %130 = tpu.matmul %127, %129, %cst_74 {dimension_numbers = #tpu.dot_dimension_numbers<[1], [0], [0], [1], [0, 0, 1, 1], [], []>} : vector<1x128xbf16>, vector<128x768xbf16>, vector<1x768xf32> -> vector<1x768xf32>
    %131 = arith.addf %125, %130 : vector<1x768xf32>
    %132 = vector.extract_strided_slice %16 {offsets = [0, 19, 0], sizes = [1, 1, 128], strides = [1, 1, 1]} : vector<1x25x128xbf16> to vector<1x1x128xbf16>
    %133 = vector.shape_cast %132 : vector<1x1x128xbf16> to vector<1x128xbf16>
    %c19 = arith.constant 19 : index
    %c0_75 = arith.constant 0 : index
    %c0_76 = arith.constant 0 : index
    %134 = vector.load %arg5[%c19, %c0_75, %c0_76] : memref<25x128x768xbf16, #tpu.memory_space<vmem>>, vector<1x128x768xbf16>
    %135 = vector.shape_cast %134 : vector<1x128x768xbf16> to vector<128x768xbf16>
    %cst_77 = arith.constant dense<0.000000e+00> : vector<1x768xf32>
    %136 = tpu.matmul %133, %135, %cst_77 {dimension_numbers = #tpu.dot_dimension_numbers<[1], [0], [0], [1], [0, 0, 1, 1], [], []>} : vector<1x128xbf16>, vector<128x768xbf16>, vector<1x768xf32> -> vector<1x768xf32>
    %137 = arith.addf %131, %136 : vector<1x768xf32>
    %138 = vector.extract_strided_slice %16 {offsets = [0, 20, 0], sizes = [1, 1, 128], strides = [1, 1, 1]} : vector<1x25x128xbf16> to vector<1x1x128xbf16>
    %139 = vector.shape_cast %138 : vector<1x1x128xbf16> to vector<1x128xbf16>
    %c20 = arith.constant 20 : index
    %c0_78 = arith.constant 0 : index
    %c0_79 = arith.constant 0 : index
    %140 = vector.load %arg5[%c20, %c0_78, %c0_79] : memref<25x128x768xbf16, #tpu.memory_space<vmem>>, vector<1x128x768xbf16>
    %141 = vector.shape_cast %140 : vector<1x128x768xbf16> to vector<128x768xbf16>
    %cst_80 = arith.constant dense<0.000000e+00> : vector<1x768xf32>
    %142 = tpu.matmul %139, %141, %cst_80 {dimension_numbers = #tpu.dot_dimension_numbers<[1], [0], [0], [1], [0, 0, 1, 1], [], []>} : vector<1x128xbf16>, vector<128x768xbf16>, vector<1x768xf32> -> vector<1x768xf32>
    %143 = arith.addf %137, %142 : vector<1x768xf32>
    %144 = vector.extract_strided_slice %16 {offsets = [0, 21, 0], sizes = [1, 1, 128], strides = [1, 1, 1]} : vector<1x25x128xbf16> to vector<1x1x128xbf16>
    %145 = vector.shape_cast %144 : vector<1x1x128xbf16> to vector<1x128xbf16>
    %c21 = arith.constant 21 : index
    %c0_81 = arith.constant 0 : index
    %c0_82 = arith.constant 0 : index
    %146 = vector.load %arg5[%c21, %c0_81, %c0_82] : memref<25x128x768xbf16, #tpu.memory_space<vmem>>, vector<1x128x768xbf16>
    %147 = vector.shape_cast %146 : vector<1x128x768xbf16> to vector<128x768xbf16>
    %cst_83 = arith.constant dense<0.000000e+00> : vector<1x768xf32>
    %148 = tpu.matmul %145, %147, %cst_83 {dimension_numbers = #tpu.dot_dimension_numbers<[1], [0], [0], [1], [0, 0, 1, 1], [], []>} : vector<1x128xbf16>, vector<128x768xbf16>, vector<1x768xf32> -> vector<1x768xf32>
    %149 = arith.addf %143, %148 : vector<1x768xf32>
    %150 = vector.extract_strided_slice %16 {offsets = [0, 22, 0], sizes = [1, 1, 128], strides = [1, 1, 1]} : vector<1x25x128xbf16> to vector<1x1x128xbf16>
    %151 = vector.shape_cast %150 : vector<1x1x128xbf16> to vector<1x128xbf16>
    %c22 = arith.constant 22 : index
    %c0_84 = arith.constant 0 : index
    %c0_85 = arith.constant 0 : index
    %152 = vector.load %arg5[%c22, %c0_84, %c0_85] : memref<25x128x768xbf16, #tpu.memory_space<vmem>>, vector<1x128x768xbf16>
    %153 = vector.shape_cast %152 : vector<1x128x768xbf16> to vector<128x768xbf16>
    %cst_86 = arith.constant dense<0.000000e+00> : vector<1x768xf32>
    %154 = tpu.matmul %151, %153, %cst_86 {dimension_numbers = #tpu.dot_dimension_numbers<[1], [0], [0], [1], [0, 0, 1, 1], [], []>} : vector<1x128xbf16>, vector<128x768xbf16>, vector<1x768xf32> -> vector<1x768xf32>
    %155 = arith.addf %149, %154 : vector<1x768xf32>
    %156 = vector.extract_strided_slice %16 {offsets = [0, 23, 0], sizes = [1, 1, 128], strides = [1, 1, 1]} : vector<1x25x128xbf16> to vector<1x1x128xbf16>
    %157 = vector.shape_cast %156 : vector<1x1x128xbf16> to vector<1x128xbf16>
    %c23 = arith.constant 23 : index
    %c0_87 = arith.constant 0 : index
    %c0_88 = arith.constant 0 : index
    %158 = vector.load %arg5[%c23, %c0_87, %c0_88] : memref<25x128x768xbf16, #tpu.memory_space<vmem>>, vector<1x128x768xbf16>
    %159 = vector.shape_cast %158 : vector<1x128x768xbf16> to vector<128x768xbf16>
    %cst_89 = arith.constant dense<0.000000e+00> : vector<1x768xf32>
    %160 = tpu.matmul %157, %159, %cst_89 {dimension_numbers = #tpu.dot_dimension_numbers<[1], [0], [0], [1], [0, 0, 1, 1], [], []>} : vector<1x128xbf16>, vector<128x768xbf16>, vector<1x768xf32> -> vector<1x768xf32>
    %161 = arith.addf %155, %160 : vector<1x768xf32>
    %162 = vector.extract_strided_slice %16 {offsets = [0, 24, 0], sizes = [1, 1, 128], strides = [1, 1, 1]} : vector<1x25x128xbf16> to vector<1x1x128xbf16>
    %163 = vector.shape_cast %162 : vector<1x1x128xbf16> to vector<1x128xbf16>
    %c24 = arith.constant 24 : index
    %c0_90 = arith.constant 0 : index
    %c0_91 = arith.constant 0 : index
    %164 = vector.load %arg5[%c24, %c0_90, %c0_91] : memref<25x128x768xbf16, #tpu.memory_space<vmem>>, vector<1x128x768xbf16>
    %165 = vector.shape_cast %164 : vector<1x128x768xbf16> to vector<128x768xbf16>
    %cst_92 = arith.constant dense<0.000000e+00> : vector<1x768xf32>
    %166 = tpu.matmul %163, %165, %cst_92 {dimension_numbers = #tpu.dot_dimension_numbers<[1], [0], [0], [1], [0, 0, 1, 1], [], []>} : vector<1x128xbf16>, vector<128x768xbf16>, vector<1x768xf32> -> vector<1x768xf32>
    %167 = arith.addf %161, %166 : vector<1x768xf32>
    %c0_93 = arith.constant 0 : index
    %c0_94 = arith.constant 0 : index
    %168 = vector.load %arg6[%c0_93, %c0_94] : memref<1x768xf32, #tpu.memory_space<vmem>>, vector<1x768xf32>
    %169 = arith.addf %167, %168 : vector<1x768xf32>
    %cst_95 = arith.constant 0.000000e+00 : f32
    %170 = vector.broadcast %cst_95 : f32 to vector<1x768xf32>
    %171 = arith.maximumf %169, %170 : vector<1x768xf32>
    %172 = arith.truncf %171 : vector<1x768xf32> to vector<1x768xbf16>
    %c0_96 = arith.constant 0 : index
    %c0_97 = arith.constant 0 : index
    %173 = vector.load %arg7[%c0_96, %c0_97] : memref<768x128xbf16, #tpu.memory_space<vmem>>, vector<768x128xbf16>
    %cst_98 = arith.constant dense<0.000000e+00> : vector<1x128xf32>
    %174 = tpu.matmul %172, %173, %cst_98 {dimension_numbers = #tpu.dot_dimension_numbers<[1], [0], [0], [1], [0, 0, 1, 1], [], []>} : vector<1x768xbf16>, vector<768x128xbf16>, vector<1x128xf32> -> vector<1x128xf32>
    %c0_99 = arith.constant 0 : index
    %c0_100 = arith.constant 0 : index
    %175 = vector.load %arg8[%c0_99, %c0_100] : memref<1x128xf32, #tpu.memory_space<vmem>>, vector<1x128xf32>
    %176 = arith.addf %174, %175 : vector<1x128xf32>
    %177 = vector.shape_cast %176 : vector<1x128xf32> to vector<1x1x128xf32>
    %c0_101 = arith.constant 0 : index
    %c0_102 = arith.constant 0 : index
    %c0_103 = arith.constant 0 : index
    %178 = vector.load %arg9[%c0_101, %c0_102, %c0_103] : memref<1x1x128xf32, #tpu.memory_space<vmem>>, vector<1x1x128xf32>
    tpu.vector_store %arg9[%c0_101, %c0_102, %c0_103], %177 {strides = array<i32>} : memref<1x1x128xf32, #tpu.memory_space<vmem>>, vector<1x1x128xf32>,
    return
  }
  func.func @transform_0(%arg0: i32) -> (i32, i32, i32) {
    %c0_i32 = arith.constant 0 : i32
    %c0_i32_0 = arith.constant 0 : i32
    %c0_i32_1 = arith.constant 0 : i32
    return %arg0, %c0_i32, %c0_i32_0 : i32, i32, i32
  }
  func.func @transform_1(%arg0: i32) -> (i32, i32) {
    %c0_i32 = arith.constant 0 : i32
    %c0_i32_0 = arith.constant 0 : i32
    %c0_i32_1 = arith.constant 0 : i32
    return %c0_i32, %c0_i32_0 : i32, i32
  }
  func.func @transform_2(%arg0: i32) -> (i32, i32) {
    %c0_i32 = arith.constant 0 : i32
    %c0_i32_0 = arith.constant 0 : i32
    %c0_i32_1 = arith.constant 0 : i32
    return %c0_i32, %c0_i32_0 : i32, i32
  }
  func.func @transform_3(%arg0: i32) -> (i32, i32) {
    %c0_i32 = arith.constant 0 : i32
    %c0_i32_0 = arith.constant 0 : i32
    %c0_i32_1 = arith.constant 0 : i32
    return %c0_i32, %c0_i32_0 : i32, i32
  }
  func.func @transform_4(%arg0: i32) -> (i32, i32, i32) {
    %c0_i32 = arith.constant 0 : i32
    %c0_i32_0 = arith.constant 0 : i32
    %c0_i32_1 = arith.constant 0 : i32
    %c0_i32_2 = arith.constant 0 : i32
    return %c0_i32, %c0_i32_0, %c0_i32_1 : i32, i32, i32
  }
  func.func @transform_5(%arg0: i32) -> (i32, i32) {
    %c0_i32 = arith.constant 0 : i32
    %c0_i32_0 = arith.constant 0 : i32
    %c0_i32_1 = arith.constant 0 : i32
    return %c0_i32, %c0_i32_0 : i32, i32
  }
  func.func @transform_6(%arg0: i32) -> (i32, i32) {
    %c0_i32 = arith.constant 0 : i32
    %c0_i32_0 = arith.constant 0 : i32
    %c0_i32_1 = arith.constant 0 : i32
    return %c0_i32, %c0_i32_0 : i32, i32
  }
  func.func @transform_7(%arg0: i32) -> (i32, i32) {
    %c0_i32 = arith.constant 0 : i32
    %c0_i32_0 = arith.constant 0 : i32
    %c0_i32_1 = arith.constant 0 : i32
    return %c0_i32, %c0_i32_0 : i32, i32
  }
  func.func @transform_8(%arg0: i32) -> (i32, i32, i32) {
    %c0_i32 = arith.constant 0 : i32
    %c0_i32_0 = arith.constant 0 : i32
    %c0_i32_1 = arith.constant 0 : i32
    return %arg0, %c0_i32, %c0_i32_0 : i32, i32, i32
  }
}

</mosaic_0001>

<bundles_post_ra>
// kernel: tpu_custom_call.1
= control target key start
LH: loop header
LB: loop body
LE: loop exit
PB: predicated region body
PF: predicated region fallthrough
CT: control target
= control target key end

     0   :  { %s18781_s0 = inlined_call_operand.vmem [shape: bf16[2,289,768], index: 0, kind: input, shape index: {}]   ;;  %s18782_s1 = inlined_call_operand.hbm [shape: bf16[25,289], index: 1, kind: input, shape index: {}]   ;;  %s18783_s2 = inlined_call_operand.hbm [shape: bf16[768,128], index: 2, kind: input, shape index: {}]   ;;  %s18784_s3 = inlined_call_operand.hbm [shape: f32[1,128], index: 3, kind: input, shape index: {}]   ;;  %s18785_s4 = inlined_call_operand.hbm [shape: bf16[25,128,768], index: 4, kind: input, shape index: {}]   ;;  %s18786_s5 = inlined_call_operand.hbm [shape: f32[1,768], index: 5, kind: input, shape index: {}]   ;;  %s18787_s6 = inlined_call_operand.hbm [shape: bf16[768,128], index: 6, kind: input, shape index: {}]   ;;  %s18788_s7 = inlined_call_operand.hbm [shape: f32[1,128], index: 7, kind: input, shape index: {}]   ;;  %s18789_s8 = inlined_call_operand.hbm [shape: f32[2,1,128], index: 8, kind: output, shape index: {}]  }
   0x1   :  { %18798 = sst [smem:[#allocation24_spill]] %s18783_s2 }
   0x2   :  { %13 = vsyncpa [#allocation4], 0 }
   0x3   :  { %14 = vsyncpa [#allocation7], 0 }
   0x4   :  { %15 = vsyncpa [#allocation10], 0 }
   0x5   :  { %16 = vsyncpa [#allocation13], 0 }
   0x6   :  { %17 = vsyncpa [#allocation5], 0 }
   0x7   :  { %19 = vsyncpa [#allocation5 + $0x1], 0  ;;  %s17653_s27 = smov 0   ;;  %s17655_s28 = smov 0  }
   0x8   :  { %s17657_s29 = smov 0   ;;  %s17659_s30 = smov 0  }
   0x9 LB: > { %18799 = sst [smem:[#allocation21_spill]] %s17587_s29  ;;  %s17674_s9 = sadd.s32 4294967295, %s17591_s30   ;;  %s17591_s30 = sphi %s17659_s30, %s18821_s30   ;;  %s17587_s29 = sphi %s17657_s29, %s18823_s29   ;;  %s17583_s28 = sphi %s17655_s28, %s18825_s28   ;;  %s17579_s27 = sphi %s17653_s27, %s18824_s27  }
   0xa   : > { %s13403_s10 = sadd.s32 4294967294, %s17591_s30   ;;  %s17678_s11 = sadd.s32 1, %s17591_s30  }
   0xb   : > { %18800 = sst [smem:[#allocation22_spill]] %s17678_s11  ;;  %s205_s12 = sadd.s32 1, %s17587_s29 }
   0xc   : > { %s202_s13 = ssub.s32 %s17591_s30, %s17678_s11  ;;  %p215_p0 = scmp.ne.s32.totalorder %s17587_s29, %s17583_s28 }
   0xd   : > { %p203_p1 = scmp.eq.s32.totalorder %s202_s13, 0  ;;  %p216_p2 = scmp.eq.s32.totalorder %s17674_s9, 1 }
   0xe   : > { %p221_p3 = scmp.ne.s32.totalorder %s17583_s28, %s17579_s27  ;;  %p222_p4 = scmp.eq.s32.totalorder %s13403_s10, 1 }
   0xf   : > { %s17689_s14 = scalar_select %p203_p1, %s17587_s29, %s205_s12  }
  0x10   : > { %p17691_p5 = por %p216_p2, %p215_p0  ;;  %p17695_p6 = por %p222_p4, %p221_p3 }
  0x11   : > { %18801 = sst [smem:[#allocation23_spill]] %s17689_s14  ;;  %p13404_p7 = scmp.ge.s32.totalorder %s17591_s30, 1 }
  0x12   : > { %s18802_s15 = scalar_select %p17691_p5, 1, 0 }
  0x13   : > { %s18803_s16 = scalar_select %p17695_p6, 1, 0 }
  0x14   : > { %p229_p8 = scmp.lt.s32.totalorder %s17591_s30, 3  ;;  %p18790_p9 = scmp.eq.s32.totalorder %s17674_s9, 0 }
  0x15   : > { %s17593_s18 = smov [#allocation6]   ;;  %s17594_s21 = smov [#allocation9]  }
  0x16   : > { %p17702_p10 = pnand %p13404_p7, %p229_p8  ;;  %s254_s19 = sshll.u32 %s17593_s18, 4  ;;  %s255_s19 = int_to_ptr.vmem [resolvable:$true] %s254_s19 }
  0x17   : > { %s278_s22 = sshll.u32 %s17594_s21, 4  ;;  %s18806_s2 = sld [smem:[#allocation24_spill]]  ;;  %s17714_s22 = int_to_ptr.vmem [resolvable:$true] %s278_s22 }
  0x18   : > { %s18804_s17 = scalar_select %p17702_p10, 1, 0 }
  0x19   : > { %p15152_p11 = pneg %p17702_p10 }
  0x1b   : > { %p17710_p12 = pnand %p18790_p9, %p15152_p11 }
  0x1d   : > { %s17317_s25 = scalar_lea.hbm %s18806_s2, 6144  ;;  %p17724_p0 = pneg %p17710_p12 }
  0x1e   : > { %p17318_p13 = scmp.ne.s32.totalorder %s18806_s2, %s17317_s25  ;;  %p17324_p3 = scmp.lt.u32.totalorder %s17317_s25, %s18806_s2 }
  0x20   : > { %p17320_p1 = pnand %p17724_p0, %p17318_p13 }
  0x22   : > { %p17321_p2 = pneg %p17320_p1 }
  0x24   : > { %p17326_p4 = pnand %p17324_p3, %p17321_p2 }
  0x26   : > { %17329 = shalt.err (!%p17326_p4)
}
  0x27   : > { %s17330_s21 = scalar_lea.vmem %s255_s19, 6144  ;;  %p17338_p9 = scmp.lt.s32.totalorder %s255_s19, %s255_s19 }
  0x28   : > { %p17331_p7 = scmp.ne.s32.totalorder %s255_s19, %s17330_s21  ;;  %p17339_p6 = scmp.lt.s32.totalorder %s17330_s21, %s17330_s21 }
  0x2a   : > { %p17333_p8 = pnand %p17331_p7, %p17724_p0  ;;  %p17340_p5 = por %p17339_p6, %p17338_p9 }
  0x2c   : > { %p17334_p11 = pneg %p17333_p8 }
  0x2e   : > { %p17341_p10 = pnand %p17340_p5, %p17334_p11 }
  0x30   : > { %17344 = shalt.err (!%p17341_p10)
}
  0x31   : > { %s18796_s23 = smov 64   ;;  %s18797_s24 = smov 4  }
  0x32   : > { %15158 = dma.hbm_to_vmem [thread:$0]  (!%p17710_p12), %s18806_s2, 6144, %s255_s19, [#allocation7], %s18796_s23, %s18796_s23, %s18797_s24  }
  0x33   : > { %s17345_s18 = scalar_lea.hbm %s18785_s4, 153600 }
  0x34   : > { %p17346_p5 = scmp.ne.s32.totalorder %s18785_s4, %s17345_s18  ;;  %p17352_p10 = scmp.lt.u32.totalorder %s17345_s18, %s18785_s4 }
  0x36   : > { %p17348_p6 = pnand %p17346_p5, %p17724_p0 }
  0x38   : > { %p17349_p9 = pneg %p17348_p6 }
  0x3a   : > { %p17354_p13 = pnand %p17352_p10, %p17349_p9 }
  0x3c   : > { %17357 = shalt.err (!%p17354_p13)
}
  0x3d   : > { %s17358_s19 = scalar_lea.vmem %s17714_s22, 153600  ;;  %p17366_p4 = scmp.lt.s32.totalorder %s17714_s22, %s17714_s22 }
  0x3e   : > { %p17359_p1 = scmp.ne.s32.totalorder %s17714_s22, %s17358_s19  ;;  %p17367_p7 = scmp.lt.s32.totalorder %s17358_s19, %s17358_s19 }
  0x40   : > { %p17361_p2 = pnand %p17359_p1, %p17724_p0  ;;  %p17368_p8 = por %p17367_p7, %p17366_p4 }
  0x42   : > { %p17362_p3 = pneg %p17361_p2 }
  0x44   : > { %p17369_p11 = pnand %p17368_p8, %p17362_p3 }
  0x46   : > { %17372 = shalt.err (!%p17369_p11)
}
  0x47   : > { %s17597_s14 = smov 384   ;;  %s17598_s29 = smov 24  }
  0x48   : > { %15164 = dma.hbm_to_vmem [thread:$0]  (!%p17710_p12), %s18785_s4, 153600, %s17714_s22, [#allocation10], %s17597_s14, %s17597_s14, %s17598_s29  }
  0x49   : > { %s17599_s26 = smov [#allocation12]   ;;  %s17600_s13 = smov [#allocation3]  }
  0x4a   : > { %s302_s10 = sshll.u32 %s17599_s26, 4  ;;  %s241_s18 = sshll.u32 %s17600_s13, 4  ;;  %s303_s10 = int_to_ptr.vmem [resolvable:$true] %s302_s10  ;;  %s17766_s18 = int_to_ptr.vmem [resolvable:$true] %s241_s18 }
  0x4b   : > { %s17373_s23 = scalar_lea.hbm %s18787_s6, 6144 }
  0x4c   : > { %p17374_p5 = scmp.ne.s32.totalorder %s18787_s6, %s17373_s23  ;;  %p17380_p10 = scmp.lt.u32.totalorder %s17373_s23, %s18787_s6 }
  0x4e   : > { %p17376_p6 = pnand %p17374_p5, %p17724_p0 }
  0x50   : > { %p17377_p9 = pneg %p17376_p6 }
  0x52   : > { %p17382_p13 = pnand %p17380_p10, %p17377_p9 }
  0x54   : > { %17385 = shalt.err (!%p17382_p13)
}
  0x55   : > { %s17386_s14 = scalar_lea.vmem %s303_s10, 6144  ;;  %p17394_p4 = scmp.lt.s32.totalorder %s303_s10, %s303_s10 }
  0x56   : > { %p17387_p1 = scmp.ne.s32.totalorder %s303_s10, %s17386_s14  ;;  %p17395_p7 = scmp.lt.s32.totalorder %s17386_s14, %s17386_s14 }
  0x58   : > { %p17389_p2 = pnand %p17387_p1, %p17724_p0  ;;  %p17396_p8 = por %p17395_p7, %p17394_p4 }
  0x5a   : > { %p17390_p3 = pneg %p17389_p2 }
  0x5c   : > { %p17397_p11 = pnand %p17396_p8, %p17390_p3 }
  0x5e   : > { %17400 = shalt.err (!%p17397_p11)
}
  0x5f   : > { %s18808_s2 = smov 4   ;;  %s18809_s24 = smov 64  }
  0x60   : > { %15170 = dma.hbm_to_vmem [thread:$0]  (!%p17710_p12), %s18787_s6, 6144, %s303_s10, [#allocation13], %s18809_s24, %s18809_s24, %s18808_s2  }
  0x61   : > { %s17401_s13 = scalar_lea.hbm %s18782_s1, 768 }
  0x62   : > { %p17402_p5 = scmp.ne.s32.totalorder %s18782_s1, %s17401_s13  ;;  %p17408_p10 = scmp.lt.u32.totalorder %s17401_s13, %s18782_s1 }
  0x64   : > { %p17404_p6 = pnand %p17402_p5, %p17724_p0 }
  0x66   : > { %p17405_p9 = pneg %p17404_p6 }
  0x68   : > { %p17410_p13 = pnand %p17408_p10, %p17405_p9 }
  0x6a   : > { %17413 = shalt.err (!%p17410_p13)
}
  0x6b   : > { %s17414_s10 = scalar_lea.vmem %s17766_s18, 768  ;;  %p17422_p4 = scmp.lt.s32.totalorder %s17766_s18, %s17766_s18 }
  0x6c   : > { %p17415_p1 = scmp.ne.s32.totalorder %s17766_s18, %s17414_s10  ;;  %p17423_p7 = scmp.lt.s32.totalorder %s17414_s10, %s17414_s10 }
  0x6e   : > { %p17417_p2 = pnand %p17415_p1, %p17724_p0  ;;  %p17424_p8 = por %p17423_p7, %p17422_p4 }
  0x70   : > { %p17418_p3 = pneg %p17417_p2 }
  0x72   : > { %p17425_p11 = pnand %p17424_p8, %p17418_p3 }
  0x74   : > { %17428 = shalt.err (!%p17425_p11)
}
  0x75   : > { %s17601_s14 = smov 192   ;;  %s17602_s2 = smov 12  }
  0x76   : > { %15155 = dma.hbm_to_vmem [thread:$0]  (!%p17710_p12), %s18782_s1, 768, %s17766_s18, [#allocation4], %s17601_s14, %s17601_s14, %s17602_s2  }
  0x77   : > { %s17603_s23 = smov [#allocation8]   ;;  %s17604_s26 = smov [#allocation11]  }
  0x78   : > { %s268_s25 = sshll.u32 %s17603_s23, 4  ;;  %s292_s13 = sshll.u32 %s17604_s26, 4  ;;  %s269_s25 = int_to_ptr.vmem [resolvable:$true] %s268_s25  ;;  %s17812_s13 = int_to_ptr.vmem [resolvable:$true] %s292_s13 }
  0x79   : > { %s17429_s11 = scalar_lea.hbm %s18784_s3, 16 }
  0x7a   : > { %p17430_p5 = scmp.ne.s32.totalorder %s18784_s3, %s17429_s11  ;;  %p17436_p10 = scmp.lt.u32.totalorder %s17429_s11, %s18784_s3 }
  0x7c   : > { %p17432_p6 = pnand %p17430_p5, %p17724_p0 }
  0x7e   : > { %p17433_p9 = pneg %p17432_p6 }
  0x80   : > { %p17438_p13 = pnand %p17436_p10, %p17433_p9 }
  0x82   : > { %17441 = shalt.err (!%p17438_p13)
}
  0x83   : > { %s17442_s14 = scalar_lea.vmem %s269_s25, 16  ;;  %s17449_s2 = scalar_lea.vmem %s269_s25, 32 }
  0x84   : > { %p17443_p1 = scmp.ne.s32.totalorder %s269_s25, %s17442_s14  ;;  %p17450_p4 = scmp.lt.s32.totalorder %s269_s25, %s269_s25 }
  0x85   : > { %p17451_p7 = scmp.lt.s32.totalorder %s17449_s2, %s17442_s14 }
  0x86   : > { %p17445_p2 = pnand %p17443_p1, %p17724_p0 }
  0x87   : > { %p17452_p8 = por %p17451_p7, %p17450_p4 }
  0x88   : > { %p17446_p3 = pneg %p17445_p2 }
  0x8a   : > { %p17453_p11 = pnand %p17452_p8, %p17446_p3 }
  0x8c   : > { %17456 = shalt.err (!%p17453_p11)
}
  0x8d   : > { %15161 = dma.hbm_to_vmem [thread:$0]  (!%p17710_p12), %s18784_s3, 16, %s269_s25, [#allocation7]  }
  0x8e   : > { %s17457_s19 = scalar_lea.hbm %s18786_s5, 96 }
  0x8f   : > { %p17458_p5 = scmp.ne.s32.totalorder %s18786_s5, %s17457_s19  ;;  %p17464_p10 = scmp.lt.u32.totalorder %s17457_s19, %s18786_s5 }
  0x91   : > { %p17460_p6 = pnand %p17458_p5, %p17724_p0 }
  0x93   : > { %p17461_p9 = pneg %p17460_p6 }
  0x95   : > { %p17466_p13 = pnand %p17464_p10, %p17461_p9 }
  0x97   : > { %17469 = shalt.err (!%p17466_p13)
}
  0x98   : > { %s17470_s25 = scalar_lea.vmem %s17812_s13, 96  ;;  %p17478_p4 = scmp.lt.s32.totalorder %s17812_s13, %s17812_s13 }
  0x99   : > { %p17471_p1 = scmp.ne.s32.totalorder %s17812_s13, %s17470_s25  ;;  %p17479_p7 = scmp.lt.s32.totalorder %s17470_s25, %s17470_s25 }
  0x9b   : > { %p17473_p2 = pnand %p17471_p1, %p17724_p0  ;;  %p17480_p8 = por %p17479_p7, %p17478_p4 }
  0x9d   : > { %p17474_p3 = pneg %p17473_p2 }
  0x9f   : > { %p17481_p11 = pnand %p17480_p8, %p17474_p3 }
  0xa1   : > { %17484 = shalt.err (!%p17481_p11)
}
  0xa2   : > { %15167 = dma.hbm_to_vmem [thread:$0]  (!%p17710_p12), %s18786_s5, 96, %s17812_s13, [#allocation10]  }
  0xa3   : > { %s17605_s2 = smov [#allocation14]   ;;  %s17485_s21 = scalar_lea.hbm %s18788_s7, 16 }
  0xa4   : > { %s316_s29 = sshll.u32 %s17605_s2, 4  ;;  %p17486_p5 = scmp.ne.s32.totalorder %s18788_s7, %s17485_s21  ;;  %s317_s29 = int_to_ptr.vmem [resolvable:$true] %s316_s29 }
  0xa5   : > { %p17492_p10 = scmp.lt.u32.totalorder %s17485_s21, %s18788_s7 }
  0xa6   : > { %p17488_p6 = pnand %p17486_p5, %p17724_p0 }
  0xa8   : > { %p17489_p9 = pneg %p17488_p6 }
  0xaa   : > { %p17494_p13 = pnand %p17492_p10, %p17489_p9 }
  0xac   : > { %17497 = shalt.err (!%p17494_p13)
}
  0xad   : > { %s17498_s13 = scalar_lea.vmem %s317_s29, 16  ;;  %s17505_s24 = scalar_lea.vmem %s317_s29, 32 }
  0xae   : > { %p17499_p1 = scmp.ne.s32.totalorder %s317_s29, %s17498_s13  ;;  %p17506_p4 = scmp.lt.s32.totalorder %s317_s29, %s317_s29 }
  0xaf   : > { %p17507_p7 = scmp.lt.s32.totalorder %s17505_s24, %s17498_s13 }
  0xb0   : > { %p17501_p2 = pnand %p17499_p1, %p17724_p0 }
  0xb1   : > { %p17508_p8 = por %p17507_p7, %p17506_p4 }
  0xb2   : > { %p17502_p3 = pneg %p17501_p2 }
  0xb4   : > { %p17509_p11 = pnand %p17508_p8, %p17502_p3 }
  0xb6   : > { %17512 = shalt.err (!%p17509_p11)
}
  0xb7   : > { %15173 = dma.hbm_to_vmem [thread:$0]  (!%p17710_p12), %s18788_s7, 16, %s317_s29, [#allocation13]  }
  0xb8   : > { %p18810_p5 = scmp.ne.s32.totalorder %s18804_s17, 0 }
  0xb9   : > { %p18811_p6 = scmp.eq.s32.totalorder (!%p18810_p5), %s17674_s9, 0 }
  0xba   : > { %337 = sbr.rel (%p18810_p5) target bundleno = 3001 (0xbb9), region = 52 }
  0xc1   : > { %17558 = dma.done.wait (%p18811_p6), [#allocation4], 768   ;;  %p18812_p0 = pmov %p18811_p6 }
  0xc3   : > { %17560 = vsyncadd (%p18812_p0), [#allocation4], 4294966528  ;;  %p18813_p9 = pmov %p18812_p0 }
  0xc4   : > { %p18814_p10 = pmov %p18812_p0 }
  0xc5   : > { %17562 = dma.done.wait (%p18813_p9), [#allocation7], 6160  }
  0xc6   : > { %17564 = vsyncadd (%p18814_p10), [#allocation7], 4294961136  ;;  %p18815_p13 = pmov %p18812_p0 }
  0xc7   : > { %p18816_p12 = pmov %p18812_p0 }
  0xc8   : > { %17566 = dma.done.wait (%p18815_p13), [#allocation10], 153696  }
  0xc9   : > { %17568 = vsyncadd (%p18816_p12), [#allocation10], 4294813600  ;;  %p18817_p1 = pmov %p18812_p0 }
  0xca   : > { %p18818_p2 = pmov %p18812_p0 }
  0xcb   : > { %17570 = dma.done.wait (%p18817_p1), [#allocation13], 6160  }
  0xcc   : > { %17572 = vsyncadd (%p18818_p2), [#allocation13], 4294961136  ;;  %v17606_v0 = vmov 0   ;;  %v15239_v1 = vld [vmem:[#allocation6] sm:$0xff]   ;;  %v15240_v2 = vld [vmem:[#allocation6 + $0x8] sm:$0xff]   ;;  %p394_p3 = scmp.lt.s32.totalorder %s17674_s9, 1 }
  0xcd   : > { %1465 = vmatprep.subr.bf16.mxu0 %v17606_v0  ;;  %v15241_v3 = vld [vmem:[#allocation6 + $0x10] sm:$0xff]   ;;  %v15242_v4 = vld [vmem:[#allocation6 + $0x18] sm:$0xff]   ;;  %v15243_v5 = vld [vmem:[#allocation6 + $0x20] sm:$0xff]   ;;  %vm2072_vm0 = vcmask 269312   ;;  %vm2079_vm1 = vcmask 1040384   ;;  %s392_s29 = sand.u32 1, %s17583_s28  }
  0xce   : > { %1466 = vmatpush1.bf16.msra.mxu0 %v15239_v1  ;;  %s395_s17 = scalar_select %p394_p3, %s17674_s9, 1  ;;  %v15244_v7 = vld [vmem:[#allocation6 + $0x28] sm:$0xff]   ;;  %v15245_v8 = vld [vmem:[#allocation6 + $0x30] sm:$0xff]   ;;  %v15246_v9 = vld [vmem:[#allocation6 + $0x38] sm:$0xff]   ;;  %vm2207_vm2 = vsmask.f32 256 }
  0xcf   : > { %1467 = vmatprep.subr.bf16.mxu0 %v17606_v0  ;;  %v15247_v10 = vld [vmem:[#allocation6 + $0x40] sm:$0xff]   ;;  %v15248_v11 = vld [vmem:[#allocation6 + $0x48] sm:$0xff]   ;;  %v15249_v12 = vld [vmem:[#allocation6 + $0x50] sm:$0xff]   ;;  %s14848_s23 = sshll.u32 %s17674_s9, 4  ;;  %s393_s26 = scalar_lea.vmem [#allocation15], %s392_s29 }
  0xd0   : > { %s15121_s20 = smul.u32 888, %s395_s17  ;;  %v15250_v13 = vld [vmem:[#allocation6 + $0x58] sm:$0xff]   ;;  %v15251_v14 = vld [vmem:[#allocation6 + $0x60] sm:$0xff]   ;;  %v15252_v15 = vld [vmem:[#allocation6 + $0x68] sm:$0xff]   ;;  %s13279_s21 = sshll.u32 %s393_s26, 4  ;;  %s18741_s21 = int_to_ptr.vmem [resolvable:$true] %s13279_s21 }
  0xd1   : > { %v15253_v16 = vld [vmem:[#allocation6 + $0x70] sm:$0xff]   ;;  %v15254_v17 = vld [vmem:[#allocation6 + $0x78] sm:$0xff]   ;;  %v15258_v19 = vld [vmem:[#allocation6 + $0x80] sm:$0xff]   ;;  %s18739_s22 = scalar_lea.hbm %s18789_s8, %s14848_s23  ;;  %s13267_s10 = scalar_lea.sflag [#allocation5], %s392_s29 }
  0xd2   : > { %1468 = vmatpush1.bf16.msra.mxu0 %v15240_v2  ;;  %s17900_s2 = scalar_lea.vmem %s18781_s0, %s15121_s20  ;;  %v15262_v21 = vld [vmem:[#allocation6 + $0x88] sm:$0xff]   ;;  %v15266_v24 = vld [vmem:[#allocation6 + $0x90] sm:$0xff]   ;;  %v15272_v25 = vld [vmem:[#allocation6 + $0x98] sm:$0xff]   ;;  %s17513_s13 = scalar_lea.vmem %s18741_s21, 16 }
  0xd3   : > { %1469 = vmatprep.subr.bf16.mxu0 %v17606_v0  ;;  %v15257_v6 = vld [vmem:[%s17900_s2 + $0x4] ss:$24 sps:$4 sm:$0xff]   ;;  %v15255_v18 = vld [vmem:[%s17900_s2] ss:$24 sps:$4 sm:$0xff]   ;;  %v15259_v20 = vld [vmem:[%s17900_s2 + $0x34] ss:$24 sps:$4 sm:$0xff]   ;;  %p17514_p4 = scmp.ne.s32.totalorder %s18741_s21, %s17513_s13 }
  0xd4   : > { %1497 = vmatprep.mubr.bf16.mxu0 %v15257_v6  ;;  %v15261_v22 = vld [vmem:[%s17900_s2 + $0x30] ss:$24 sps:$4 sm:$0xff]   ;;  %v15263_v23 = vld [vmem:[%s17900_s2 + $0x64] ss:$24 sps:$4 sm:$0xff]   ;;  %v15265_v26 = vld [vmem:[%s17900_s2 + $0x60] ss:$24 sps:$4 sm:$0xff]  }
  0xd5   : > { %v15267_v27 = vld [vmem:[%s17900_s2 + $0x94] ss:$24 sps:$4 sm:$0xff]   ;;  %v15277_v28 = vld [vmem:[#allocation6 + $0xa0] sm:$0xff]   ;;  %v15269_v30 = vld [vmem:[%s17900_s2 + $0x90] ss:$24 sps:$4 sm:$0xff]   ;;  %p18819_p7 = scmp.ne.s32.totalorder %s18802_s15, 0 }
  0xd6   : > { %1470 = vmatpush1.bf16.msra.mxu0 %v15241_v3  ;;  %v15281_v29 = vld [vmem:[#allocation6 + $0xa8] sm:$0xff]   ;;  %v15270_v31 = vld [vmem:[%s17900_s2 + $0xc4] ss:$24 sps:$4 sm:$0xff]   ;;  %v15285_v32 = vld [vmem:[#allocation6 + $0xb0] sm:$0xff]   ;;  %s17607_s9 = smov [#allocation15]  }
  0xd7   : > { %1471 = vmatprep.subr.bf16.mxu0 %v17606_v0  ;;  %v15289_v33 = vld [vmem:[#allocation6 + $0xb8] sm:$0xff]   ;;  %v15274_v35 = vld [vmem:[%s17900_s2 + $0xf4] ss:$24 sps:$4 sm:$0xff]   ;;  %v15293_v36 = vld [vmem:[#allocation6 + $0xc0] sm:$0xff]   ;;  %p17515_p8 = pnand %p17514_p4, %p18819_p7  ;;  %s17517_s24 = sshll.u32 %s17607_s9, 4  ;;  %s17518_s24 = int_to_ptr.vmem [resolvable:$false] %s17517_s24 }
  0xd8   : > { %v15273_v34 = vld [vmem:[%s17900_s2 + $0xc0] ss:$24 sps:$4 sm:$0xff]   ;;  %v15300_v37 = vld [vmem:[#allocation6 + $0xc8] sm:$0xff]   ;;  %v15278_v39 = vld [vmem:[%s17900_s2 + $0x124] ss:$24 sps:$4 sm:$0xff]   ;;  %s17519_s25 = scalar_lea.vmem %s17518_s24, 32  ;;  %p17520_p5 = scmp.lt.s32.totalorder %s18741_s21, %s17518_s24 }
  0xd9   : > { %v15276_v38 = vld [vmem:[%s17900_s2 + $0xf0] ss:$24 sps:$4 sm:$0xff]   ;;  %v15308_v41 = vld [vmem:[#allocation6 + $0xd8] sm:$0xff]   ;;  %v15282_v43 = vld [vmem:[%s17900_s2 + $0x154] ss:$24 sps:$4 sm:$0xff]   ;;  %p17516_p11 = pneg %p17515_p8  ;;  %p17521_p6 = scmp.lt.s32.totalorder %s17519_s25, %s17513_s13 }
  0xda   : > { %1472 = vmatpush1.bf16.msra.mxu0 %v15242_v4  ;;  %v15304_v40 = vld [vmem:[#allocation6 + $0xd0] sm:$0xff]   ;;  %v15280_v42 = vld [vmem:[%s17900_s2 + $0x120] ss:$24 sps:$4 sm:$0xff]   ;;  %v15316_v45 = vld [vmem:[#allocation6 + $0xe8] sm:$0xff]  }
  0xdb   : > { %1473 = vmatprep.subr.bf16.mxu0 %v17606_v0  ;;  %v15312_v44 = vld [vmem:[#allocation6 + $0xe0] sm:$0xff]   ;;  %v15284_v46 = vld [vmem:[%s17900_s2 + $0x150] ss:$24 sps:$4 sm:$0xff]   ;;  %v15326_v49 = vld [vmem:[#allocation6 + $0xf8] sm:$0xff]   ;;  %p17522_p0 = por %p17521_p6, %p17520_p5 }
  0xdc   : > { %v15286_v47 = vld [vmem:[%s17900_s2 + $0x184] ss:$24 sps:$4 sm:$0xff]   ;;  %v15322_v48 = vld [vmem:[#allocation6 + $0xf0] sm:$0xff]   ;;  %v15288_v50 = vld [vmem:[%s17900_s2 + $0x180] ss:$24 sps:$4 sm:$0xff]  }
  0xdd   : > { %v15290_v51 = vld [vmem:[%s17900_s2 + $0x1b4] ss:$24 sps:$4 sm:$0xff]   ;;  %v15292_v52 = vld [vmem:[%s17900_s2 + $0x1b0] ss:$24 sps:$4 sm:$0xff]   ;;  %v15294_v53 = vld [vmem:[%s17900_s2 + $0x1e4] ss:$24 sps:$4 sm:$0xff]   ;;  %p17523_p9 = pnand %p17522_p0, %p17516_p11 }
  0xde   : > { %1474 = vmatpush1.bf16.msra.mxu0 %v15243_v5  ;;  %v15296_v54 = vld [vmem:[%s17900_s2 + $0x1e0] ss:$24 sps:$4 sm:$0xff]   ;;  %v15297_v55 = vld [vmem:[%s17900_s2 + $0x214] ss:$24 sps:$4 sm:$0xff]   ;;  %v15299_v56 = vld [vmem:[%s17900_s2 + $0x210] ss:$24 sps:$4 sm:$0xff]  }
  0xdf   : > { %1475 = vmatprep.subr.bf16.mxu0 %v17606_v0  ;;  %v15301_v57 = vld [vmem:[%s17900_s2 + $0x244] ss:$24 sps:$4 sm:$0xff]   ;;  %v15303_v58 = vld [vmem:[%s17900_s2 + $0x240] ss:$24 sps:$4 sm:$0xff]   ;;  %v15305_v59 = vld [vmem:[%s17900_s2 + $0x274] ss:$24 sps:$4 sm:$0xff]  }
  0xe0   : > { %v15307_v60 = vld [vmem:[%s17900_s2 + $0x270] ss:$24 sps:$4 sm:$0xff]   ;;  %v15309_v61 = vld [vmem:[%s17900_s2 + $0x2a4] ss:$24 sps:$4 sm:$0xff]   ;;  %v15311_v62 = vld [vmem:[%s17900_s2 + $0x2a0] ss:$24 sps:$4 sm:$0xff]  }
  0xe1   : > { %v15313_v63 = vld [vmem:[%s17900_s2 + $0x2d4] ss:$24 sps:$4 sm:$0xff]   ;;  %v15315_v1 = vld [vmem:[%s17900_s2 + $0x2d0] ss:$24 sps:$4 sm:$0xff]   ;;  %v15317_v2 = vld [vmem:[%s17900_s2 + $0x304] ss:$24 sps:$4 sm:$0xff]  }
  0xe2   : > { %1476 = vmatpush1.bf16.msra.mxu0 %v15244_v7  ;;  %v15319_v3 = vld [vmem:[%s17900_s2 + $0x300] ss:$24 sps:$4 sm:$0xff]   ;;  %v15320_v4 = vld [vmem:[%s17900_s2 + $0x334] ss:$24 sps:$4 sm:$0xff]   ;;  %v15323_v6 = vld [vmem:[%s17900_s2 + $0x330] ss:$24 sps:$4 sm:$0xff]  }
  0xe3   : > { %1477 = vmatprep.subr.bf16.mxu0 %v17606_v0  ;;  %v613_v5 = vld [vmem:[%s17900_s2 + $0x360] sm:$0x11]  ;;  %vm2208_vm3 = vmand %vm2079_vm1, %vm2207_vm2 }
  0xe4   : > { %v13531_v7 = vcombine.high %v613_v5, %v613_v5 }
  0xe6   : > { %1478 = vmatpush1.bf16.msra.mxu0 %v15245_v8  ;;  %v15329_v8 = vld [vmem:[%s17900_s2 + $0xc] ss:$24 sps:$4 sm:$0xff]  }
  0xe7   : > { %1479 = vmatprep.subr.bf16.mxu0 %v17606_v0 }
  0xea   : > { %1480 = vmatpush1.bf16.msra.mxu0 %v15246_v9  ;;  %v13530_v9 = vcombine.low %v613_v5, %v613_v5  ;;  %v15405_v5 = vld [vmem:[%s17900_s2 + $0x74] ss:$24 sps:$4 sm:$0xff]  }
  0xeb   : > { %1481 = vmatprep.subr.bf16.mxu0 %v17606_v0 }
  0xee   : > { %1482 = vmatpush1.bf16.msra.mxu0 %v15247_v10  ;;  %v15327_v10 = vld [vmem:[%s17900_s2 + $0x8] ss:$24 sps:$4 sm:$0xff]  }
  0xef   : > { %1483 = vmatprep.subr.bf16.mxu0 %v17606_v0 }
  0xf2   : > { %1484 = vmatpush1.bf16.msra.mxu0 %v15248_v11  ;;  %v15330_v11 = vld [vmem:[#allocation6 + $0x100] sm:$0xff]  }
  0xf3   : > { %1485 = vmatprep.subr.bf16.mxu0 %v17606_v0 }
  0xf6   : > { %1486 = vmatpush1.bf16.msra.mxu0 %v15249_v12  ;;  %v15331_v12 = vld [vmem:[%s17900_s2 + $0x3c] ss:$24 sps:$4 sm:$0xff]  }
  0xf7   : > { %1487 = vmatprep.subr.bf16.mxu0 %v17606_v0 }
  0xfa   : > { %1488 = vmatpush1.bf16.msra.mxu0 %v15250_v13  ;;  %v15334_v13 = vld [vmem:[#allocation6 + $0x108] sm:$0xff]  }
  0xfb   : > { %1489 = vmatprep.subr.bf16.mxu0 %v17606_v0 }
  0xfe   : > { %1490 = vmatpush1.bf16.msra.mxu0 %v15251_v14  ;;  %v15333_v14 = vld [vmem:[%s17900_s2 + $0x38] ss:$24 sps:$4 sm:$0xff]  }
  0xff   : > { %1491 = vmatprep.subr.bf16.mxu0 %v17606_v0 }
 0x102   : > { %1492 = vmatpush1.bf16.msra.mxu0 %v15252_v15  ;;  %v15335_v15 = vld [vmem:[%s17900_s2 + $0x6c] ss:$24 sps:$4 sm:$0xff]  }
 0x103   : > { %1493 = vmatprep.subr.bf16.mxu0 %v17606_v0 }
 0x106   : > { %1494 = vmatpush1.bf16.msra.mxu0 %v15253_v16  ;;  %v15338_v16 = vld [vmem:[#allocation6 + $0x110] sm:$0xff]  }
 0x107   : > { %1495 = vmatprep.subr.bf16.mxu0 %v17606_v0 }
 0x10a   : > { %1496 = vmatpush1.bf16.msra.mxu0 %v15254_v17  ;;  %v15344_v17 = vld [vmem:[#allocation6 + $0x118] sm:$0xff]  }
 0x10b   : > { %1649 = vmatprep.subr.bf16.mxu0 %v17606_v0 }
 0x10d   : > { %1498 = vmatmul.mubr.bf16.vlgmr.msra.gmra.mrb[0].mxu0 %v15255_v18  ;;  %v15337_v18 = vld [vmem:[%s17900_s2 + $0x68] ss:$24 sps:$4 sm:$0xff]  }
 0x10e   : > { %1650 = vmatpush1.bf16.msra.mxu0 %v15258_v19  ;;  %1505 = vmatprep.mubr.bf16.mxu0 %v15259_v20  ;;  %v15339_v19 = vld [vmem:[%s17900_s2 + $0x9c] ss:$24 sps:$4 sm:$0xff]   ;;  %v15349_v20 = vld [vmem:[#allocation6 + $0x120] sm:$0xff]  }
 0x10f   : > { %1651 = vmatprep.subr.bf16.mxu0 %v17606_v0 }
 0x112   : > { %1652 = vmatpush1.bf16.msra.mxu0 %v15262_v21  ;;  %v15353_v21 = vld [vmem:[#allocation6 + $0x128] sm:$0xff]  }
 0x113   : > { %1653 = vmatprep.subr.bf16.mxu0 %v17606_v0 }
 0x115   : > { %1506 = vmatmul.mubr.bf16.gmra.mrb[4].mxu0 %v15261_v22  ;;  %v15341_v22 = vld [vmem:[%s17900_s2 + $0x98] ss:$24 sps:$4 sm:$0xff]  }
 0x116   : > { %1513 = vmatprep.mubr.bf16.mxu0 %v15263_v23  ;;  %1654 = vmatpush1.bf16.msra.mxu0 %v15266_v24  ;;  %v15342_v23 = vld [vmem:[%s17900_s2 + $0xcc] ss:$24 sps:$4 sm:$0xff]   ;;  %v15357_v24 = vld [vmem:[#allocation6 + $0x130] sm:$0xff]  }
 0x117   : > { %1655 = vmatprep.subr.bf16.mxu0 %v17606_v0 }
 0x11a   : > { %1656 = vmatpush1.bf16.msra.mxu0 %v15272_v25  ;;  %v15361_v25 = vld [vmem:[#allocation6 + $0x138] sm:$0xff]  }
 0x11b   : > { %1657 = vmatprep.subr.bf16.mxu0 %v17606_v0 }
 0x11d   : > { %1514 = vmatmul.mubr.bf16.gmra.mrb[8].mxu0 %v15265_v26  ;;  %v15345_v26 = vld [vmem:[%s17900_s2 + $0xc8] ss:$24 sps:$4 sm:$0xff]  }
 0x11e   : > { %1521 = vmatprep.mubr.bf16.mxu0 %v15267_v27  ;;  %1658 = vmatpush1.bf16.msra.mxu0 %v15277_v28  ;;  %v15346_v27 = vld [vmem:[%s17900_s2 + $0xfc] ss:$24 sps:$4 sm:$0xff]   ;;  %v15365_v28 = vld [vmem:[#allocation6 + $0x140] sm:$0xff]  }
 0x11f   : > { %1659 = vmatprep.subr.bf16.mxu0 %v17606_v0 }
 0x122   : > { %1660 = vmatpush1.bf16.msra.mxu0 %v15281_v29  ;;  %v15372_v29 = vld [vmem:[#allocation6 + $0x148] sm:$0xff]  }
 0x123   : > { %1661 = vmatprep.subr.bf16.mxu0 %v17606_v0 }
 0x125   : > { %1522 = vmatmul.mubr.bf16.gmra.mrb[12].mxu0 %v15269_v30  ;;  %v15348_v30 = vld [vmem:[%s17900_s2 + $0xf8] ss:$24 sps:$4 sm:$0xff]  }
 0x126   : > { %1529 = vmatprep.mubr.bf16.mxu0 %v15270_v31  ;;  %1662 = vmatpush1.bf16.msra.mxu0 %v15285_v32  ;;  %v15350_v31 = vld [vmem:[%s17900_s2 + $0x12c] ss:$24 sps:$4 sm:$0xff]   ;;  %v15376_v32 = vld [vmem:[#allocation6 + $0x150] sm:$0xff]  }
 0x127   : > { %1663 = vmatprep.subr.bf16.mxu0 %v17606_v0 }
 0x12a   : > { %1664 = vmatpush1.bf16.msra.mxu0 %v15289_v33  ;;  %v15380_v33 = vld [vmem:[#allocation6 + $0x158] sm:$0xff]  }
 0x12b   : > { %1665 = vmatprep.subr.bf16.mxu0 %v17606_v0 }
 0x12d   : > { %1530 = vmatmul.mubr.bf16.gmra.mrb[16].mxu0 %v15273_v34  ;;  %v15352_v34 = vld [vmem:[%s17900_s2 + $0x128] ss:$24 sps:$4 sm:$0xff]  }
 0x12e   : > { %1537 = vmatprep.mubr.bf16.mxu0 %v15274_v35  ;;  %1666 = vmatpush1.bf16.msra.mxu0 %v15293_v36  ;;  %v15354_v35 = vld [vmem:[%s17900_s2 + $0x15c] ss:$24 sps:$4 sm:$0xff]   ;;  %v15384_v36 = vld [vmem:[#allocation6 + $0x160] sm:$0xff]  }
 0x12f   : > { %1667 = vmatprep.subr.bf16.mxu0 %v17606_v0 }
 0x132   : > { %1668 = vmatpush1.bf16.msra.mxu0 %v15300_v37  ;;  %v15388_v37 = vld [vmem:[#allocation6 + $0x168] sm:$0xff]  }
 0x133   : > { %1669 = vmatprep.subr.bf16.mxu0 %v17606_v0 }
 0x135   : > { %1538 = vmatmul.mubr.bf16.gmra.mrb[20].mxu0 %v15276_v38  ;;  %v15356_v38 = vld [vmem:[%s17900_s2 + $0x158] ss:$24 sps:$4 sm:$0xff]  }
 0x136   : > { %1545 = vmatprep.mubr.bf16.mxu0 %v15278_v39  ;;  %1670 = vmatpush1.bf16.msra.mxu0 %v15304_v40  ;;  %v15358_v39 = vld [vmem:[%s17900_s2 + $0x18c] ss:$24 sps:$4 sm:$0xff]   ;;  %v15394_v40 = vld [vmem:[#allocation6 + $0x170] sm:$0xff]  }
 0x137   : > { %1671 = vmatprep.subr.bf16.mxu0 %v17606_v0 }
 0x13a   : > { %1672 = vmatpush1.bf16.msra.mxu0 %v15308_v41  ;;  %v15398_v41 = vld [vmem:[#allocation6 + $0x178] sm:$0xff]  }
 0x13b   : > { %1673 = vmatprep.subr.bf16.mxu0 %v17606_v0 }
 0x13d   : > { %1546 = vmatmul.mubr.bf16.gmra.mrb[24].mxu0 %v15280_v42  ;;  %v15360_v42 = vld [vmem:[%s17900_s2 + $0x188] ss:$24 sps:$4 sm:$0xff]  }
 0x13e   : > { %1553 = vmatprep.mubr.bf16.mxu0 %v15282_v43  ;;  %1674 = vmatpush1.bf16.msra.mxu0 %v15312_v44  ;;  %v15362_v43 = vld [vmem:[%s17900_s2 + $0x1bc] ss:$24 sps:$4 sm:$0xff]   ;;  %v15364_v44 = vld [vmem:[%s17900_s2 + $0x1b8] ss:$24 sps:$4 sm:$0xff]  }
 0x13f   : > { %1675 = vmatprep.subr.bf16.mxu0 %v17606_v0 }
 0x142   : > { %1676 = vmatpush1.bf16.msra.mxu0 %v15316_v45  ;;  %v15366_v45 = vld [vmem:[%s17900_s2 + $0x1ec] ss:$24 sps:$4 sm:$0xff]  }
 0x143   : > { %1677 = vmatprep.subr.bf16.mxu0 %v17606_v0 }
 0x145   : > { %1554 = vmatmul.mubr.bf16.gmra.mrb[28].mxu0 %v15284_v46  ;;  %v15368_v46 = vld [vmem:[%s17900_s2 + $0x1e8] ss:$24 sps:$4 sm:$0xff]  }
 0x146   : > { %1561 = vmatprep.mubr.bf16.mxu0 %v15286_v47  ;;  %1678 = vmatpush1.bf16.msra.mxu0 %v15322_v48  ;;  %v15369_v47 = vld [vmem:[%s17900_s2 + $0x21c] ss:$24 sps:$4 sm:$0xff]   ;;  %v15371_v48 = vld [vmem:[%s17900_s2 + $0x218] ss:$24 sps:$4 sm:$0xff]  }
 0x147   : > { %1679 = vmatprep.subr.bf16.mxu0 %v17606_v0 }
 0x14a   : > { %1680 = vmatpush1.bf16.msra.mxu0 %v15326_v49  ;;  %v15373_v49 = vld [vmem:[%s17900_s2 + $0x24c] ss:$24 sps:$4 sm:$0xff]  }
 0x14b   : > { %1833 = vmatprep.subr.bf16.mxu0 %v17606_v0 }
 0x14d   : > { %1562 = vmatmul.mubr.bf16.gmra.mrb[32].mxu0 %v15288_v50  ;;  %v15375_v50 = vld [vmem:[%s17900_s2 + $0x248] ss:$24 sps:$4 sm:$0xff]  }
 0x14e   : > { %1569 = vmatprep.mubr.bf16.mxu0 %v15290_v51  ;;  %v15377_v51 = vld [vmem:[%s17900_s2 + $0x27c] ss:$24 sps:$4 sm:$0xff]  }
 0x155   : > { %1570 = vmatmul.mubr.bf16.gmra.mrb[36].mxu0 %v15292_v52  ;;  %v15379_v52 = vld [vmem:[%s17900_s2 + $0x278] ss:$24 sps:$4 sm:$0xff]  }
 0x156   : > { %1577 = vmatprep.mubr.bf16.mxu0 %v15294_v53  ;;  %v15381_v53 = vld [vmem:[%s17900_s2 + $0x2ac] ss:$24 sps:$4 sm:$0xff]  }
 0x15d   : > { %1578 = vmatmul.mubr.bf16.gmra.mrb[40].mxu0 %v15296_v54  ;;  %v15383_v54 = vld [vmem:[%s17900_s2 + $0x2a8] ss:$24 sps:$4 sm:$0xff]  }
 0x15e   : > { %1585 = vmatprep.mubr.bf16.mxu0 %v15297_v55  ;;  %v15385_v55 = vld [vmem:[%s17900_s2 + $0x2dc] ss:$24 sps:$4 sm:$0xff]  }
 0x165   : > { %1586 = vmatmul.mubr.bf16.gmra.mrb[44].mxu0 %v15299_v56  ;;  %v15387_v56 = vld [vmem:[%s17900_s2 + $0x2d8] ss:$24 sps:$4 sm:$0xff]  }
 0x166   : > { %1593 = vmatprep.mubr.bf16.mxu0 %v15301_v57  ;;  %v15389_v57 = vld [vmem:[%s17900_s2 + $0x30c] ss:$24 sps:$4 sm:$0xff]  }
 0x16d   : > { %1594 = vmatmul.mubr.bf16.gmra.mrb[48].mxu0 %v15303_v58  ;;  %v15391_v58 = vld [vmem:[%s17900_s2 + $0x308] ss:$24 sps:$4 sm:$0xff]  }
 0x16e   : > { %1601 = vmatprep.mubr.bf16.mxu0 %v15305_v59  ;;  %v15392_v59 = vld [vmem:[%s17900_s2 + $0x33c] ss:$24 sps:$4 sm:$0xff]  }
 0x175   : > { %1602 = vmatmul.mubr.bf16.gmra.mrb[52].mxu0 %v15307_v60  ;;  %v614_v60 = vld [vmem:[%s17900_s2 + $0x368] sm:$0x11] }
 0x176   : > { %1609 = vmatprep.mubr.bf16.mxu0 %v15309_v61  ;;  %v15395_v61 = vld [vmem:[%s17900_s2 + $0x338] ss:$24 sps:$4 sm:$0xff]  }
 0x17d   : > { %1610 = vmatmul.mubr.bf16.gmra.mrb[56].mxu0 %v15311_v62  ;;  %v13533_v62 = vcombine.high %v614_v60, %v614_v60 }
 0x17e   : > { %1617 = vmatprep.mubr.bf16.mxu0 %v15313_v63  ;;  %v15401_v63 = vld [vmem:[%s17900_s2 + $0x14] ss:$24 sps:$4 sm:$0xff]  }
 0x185   : > { %1618 = vmatmul.mubr.bf16.gmra.mrb[60].mxu0 %v15315_v1  ;;  %v13532_v1 = vcombine.low %v614_v60, %v614_v60 }
 0x186   : > { %1625 = vmatprep.mubr.bf16.mxu0 %v15317_v2  ;;  %v15399_v2 = vld [vmem:[%s17900_s2 + $0x10] ss:$24 sps:$4 sm:$0xff]  }
 0x18d   : > { %1626 = vmatmul.mubr.bf16.gmra.mrb[64].mxu0 %v15319_v3  ;;  %v15402_v3 = vld [vmem:[%s17900_s2 + $0x44] ss:$24 sps:$4 sm:$0xff]  }
 0x18e   : > { %1633 = vmatprep.mubr.bf16.mxu0 %v15320_v4  ;;  %v15404_v4 = vld [vmem:[%s17900_s2 + $0x40] ss:$24 sps:$4 sm:$0xff]  }
 0x195   : > { %1634 = vmatmul.mubr.bf16.gmra.mrb[68].mxu0 %v15323_v6  ;;  %v15407_v6 = vld [vmem:[%s17900_s2 + $0x70] ss:$24 sps:$4 sm:$0xff]  }
 0x196   : > { %1641 = vmatprep.mubr.bf16.mxu0 %v13531_v7  ;;  %v15408_v7 = vld [vmem:[%s17900_s2 + $0xa4] ss:$24 sps:$4 sm:$0xff]  }
 0x19d   : > { %1642 = vmatmul.mubr.bf16.gmra.mrb[72].mxu0 %v13530_v9  ;;  %v15411_v9 = vld [vmem:[%s17900_s2 + $0xd4] ss:$24 sps:$4 sm:$0xff]  }
 0x19e   : > { %1681 = vmatprep.mubr.bf16.mxu0 %v15329_v8  ;;  %v15410_v8 = vld [vmem:[%s17900_s2 + $0xa0] ss:$24 sps:$4 sm:$0xff]  }
 0x1a5   : > { %1682 = vmatmul.mubr.bf16.vlgmr.msra.gmra.mrb[0].mxu0 %v15327_v10  ;;  %v15413_v10 = vld [vmem:[%s17900_s2 + $0xd0] ss:$24 sps:$4 sm:$0xff]  }
 0x1a6   : > { %1834 = vmatpush1.bf16.msra.mxu0 %v15330_v11  ;;  %1689 = vmatprep.mubr.bf16.mxu0 %v15331_v12  ;;  %v15414_v11 = vld [vmem:[%s17900_s2 + $0x104] ss:$24 sps:$4 sm:$0xff]   ;;  %v15416_v12 = vld [vmem:[%s17900_s2 + $0x100] ss:$24 sps:$4 sm:$0xff]  }
 0x1a7   : > { %1835 = vmatprep.subr.bf16.mxu0 %v17606_v0 }
 0x1aa   : > { %1836 = vmatpush1.bf16.msra.mxu0 %v15334_v13  ;;  %v15417_v13 = vld [vmem:[%s17900_s2 + $0x134] ss:$24 sps:$4 sm:$0xff]  }
 0x1ab   : > { %1837 = vmatprep.subr.bf16.mxu0 %v17606_v0 }
 0x1ad   : > { %1690 = vmatmul.mubr.bf16.gmra.mrb[4].mxu0 %v15333_v14  ;;  %v15419_v14 = vld [vmem:[%s17900_s2 + $0x130] ss:$24 sps:$4 sm:$0xff]  }
 0x1ae   : > { %1697 = vmatprep.mubr.bf16.mxu0 %v15335_v15  ;;  %1838 = vmatpush1.bf16.msra.mxu0 %v15338_v16  ;;  %v15420_v15 = vld [vmem:[%s17900_s2 + $0x164] ss:$24 sps:$4 sm:$0xff]   ;;  %v15422_v16 = vld [vmem:[%s17900_s2 + $0x160] ss:$24 sps:$4 sm:$0xff]  }
 0x1af   : > { %1839 = vmatprep.subr.bf16.mxu0 %v17606_v0 }
 0x1b2   : > { %1840 = vmatpush1.bf16.msra.mxu0 %v15344_v17  ;;  %v15423_v17 = vld [vmem:[%s17900_s2 + $0x194] ss:$24 sps:$4 sm:$0xff]  }
 0x1b3   : > { %1841 = vmatprep.subr.bf16.mxu0 %v17606_v0 }
 0x1b5   : > { %1698 = vmatmul.mubr.bf16.gmra.mrb[8].mxu0 %v15337_v18  ;;  %v15425_v18 = vld [vmem:[%s17900_s2 + $0x190] ss:$24 sps:$4 sm:$0xff]  }
 0x1b6   : > { %1705 = vmatprep.mubr.bf16.mxu0 %v15339_v19  ;;  %1842 = vmatpush1.bf16.msra.mxu0 %v15349_v20  ;;  %v15426_v19 = vld [vmem:[%s17900_s2 + $0x1c4] ss:$24 sps:$4 sm:$0xff]   ;;  %v15428_v20 = vld [vmem:[%s17900_s2 + $0x1c0] ss:$24 sps:$4 sm:$0xff]  }
 0x1b7   : > { %1843 = vmatprep.subr.bf16.mxu0 %v17606_v0 }
 0x1ba   : > { %1844 = vmatpush1.bf16.msra.mxu0 %v15353_v21  ;;  %v15429_v21 = vld [vmem:[%s17900_s2 + $0x1f4] ss:$24 sps:$4 sm:$0xff]  }
 0x1bb   : > { %1845 = vmatprep.subr.bf16.mxu0 %v17606_v0 }
 0x1bd   : > { %1706 = vmatmul.mubr.bf16.gmra.mrb[12].mxu0 %v15341_v22  ;;  %v15431_v22 = vld [vmem:[%s17900_s2 + $0x1f0] ss:$24 sps:$4 sm:$0xff]  }
 0x1be   : > { %1713 = vmatprep.mubr.bf16.mxu0 %v15342_v23  ;;  %1846 = vmatpush1.bf16.msra.mxu0 %v15357_v24  ;;  %v15432_v23 = vld [vmem:[%s17900_s2 + $0x224] ss:$24 sps:$4 sm:$0xff]   ;;  %v15434_v24 = vld [vmem:[%s17900_s2 + $0x220] ss:$24 sps:$4 sm:$0xff]  }
 0x1bf   : > { %1847 = vmatprep.subr.bf16.mxu0 %v17606_v0 }
 0x1c2   : > { %1848 = vmatpush1.bf16.msra.mxu0 %v15361_v25  ;;  %v15435_v25 = vld [vmem:[%s17900_s2 + $0x254] ss:$24 sps:$4 sm:$0xff]  }
 0x1c3   : > { %1849 = vmatprep.subr.bf16.mxu0 %v17606_v0 }
 0x1c5   : > { %1714 = vmatmul.mubr.bf16.gmra.mrb[16].mxu0 %v15345_v26  ;;  %v15437_v26 = vld [vmem:[%s17900_s2 + $0x250] ss:$24 sps:$4 sm:$0xff]  }
 0x1c6   : > { %1721 = vmatprep.mubr.bf16.mxu0 %v15346_v27  ;;  %1850 = vmatpush1.bf16.msra.mxu0 %v15365_v28  ;;  %v15438_v27 = vld [vmem:[%s17900_s2 + $0x284] ss:$24 sps:$4 sm:$0xff]   ;;  %v15440_v28 = vld [vmem:[%s17900_s2 + $0x280] ss:$24 sps:$4 sm:$0xff]  }
 0x1c7   : > { %1851 = vmatprep.subr.bf16.mxu0 %v17606_v0 }
 0x1ca   : > { %1852 = vmatpush1.bf16.msra.mxu0 %v15372_v29  ;;  %v15441_v29 = vld [vmem:[%s17900_s2 + $0x2b4] ss:$24 sps:$4 sm:$0xff]  }
 0x1cb   : > { %1853 = vmatprep.subr.bf16.mxu0 %v17606_v0 }
 0x1cd   : > { %1722 = vmatmul.mubr.bf16.gmra.mrb[20].mxu0 %v15348_v30  ;;  %v15443_v30 = vld [vmem:[%s17900_s2 + $0x2b0] ss:$24 sps:$4 sm:$0xff]  }
 0x1ce   : > { %1729 = vmatprep.mubr.bf16.mxu0 %v15350_v31  ;;  %1854 = vmatpush1.bf16.msra.mxu0 %v15376_v32  ;;  %v15444_v31 = vld [vmem:[%s17900_s2 + $0x2e4] ss:$24 sps:$4 sm:$0xff]   ;;  %v15446_v32 = vld [vmem:[%s17900_s2 + $0x2e0] ss:$24 sps:$4 sm:$0xff]  }
 0x1cf   : > { %1855 = vmatprep.subr.bf16.mxu0 %v17606_v0 }
 0x1d2   : > { %1856 = vmatpush1.bf16.msra.mxu0 %v15380_v33  ;;  %v15447_v33 = vld [vmem:[%s17900_s2 + $0x314] ss:$24 sps:$4 sm:$0xff]  }
 0x1d3   : > { %1857 = vmatprep.subr.bf16.mxu0 %v17606_v0 }
 0x1d5   : > { %1730 = vmatmul.mubr.bf16.gmra.mrb[24].mxu0 %v15352_v34  ;;  %v15449_v34 = vld [vmem:[%s17900_s2 + $0x310] ss:$24 sps:$4 sm:$0xff]  }
 0x1d6   : > { %1737 = vmatprep.mubr.bf16.mxu0 %v15354_v35  ;;  %1858 = vmatpush1.bf16.msra.mxu0 %v15384_v36  ;;  %v15450_v35 = vld [vmem:[%s17900_s2 + $0x344] ss:$24 sps:$4 sm:$0xff]   ;;  %v615_v36 = vld [vmem:[%s17900_s2 + $0x370] sm:$0x11] }
 0x1d7   : > { %1859 = vmatprep.subr.bf16.mxu0 %v17606_v0 }
 0x1da   : > { %1860 = vmatpush1.bf16.msra.mxu0 %v15388_v37  ;;  %v15452_v37 = vld [vmem:[%s17900_s2 + $0x340] ss:$24 sps:$4 sm:$0xff]  }
 0x1db   : > { %1861 = vmatprep.subr.bf16.mxu0 %v17606_v0 }
 0x1dd   : > { %1738 = vmatmul.mubr.bf16.gmra.mrb[28].mxu0 %v15356_v38  ;;  %v13535_v38 = vcombine.high %v615_v36, %v615_v36 }
 0x1de   : > { %1745 = vmatprep.mubr.bf16.mxu0 %v15358_v39  ;;  %1862 = vmatpush1.bf16.msra.mxu0 %v15394_v40  ;;  %v13534_v39 = vcombine.low %v615_v36, %v615_v36 }
 0x1df   : > { %1863 = vmatprep.subr.bf16.mxu0 %v17606_v0 }
 0x1e2   : > { %1864 = vmatpush1.bf16.msra.mxu0 %v15398_v41 }
 0x1e5   : > { %1746 = vmatmul.mubr.bf16.gmra.mrb[32].mxu0 %v15360_v42 }
 0x1e6   : > { %1753 = vmatprep.mubr.bf16.mxu0 %v15362_v43 }
 0x1ed   : > { %1754 = vmatmul.mubr.bf16.gmra.mrb[36].mxu0 %v15364_v44 }
 0x1ee   : > { %1761 = vmatprep.mubr.bf16.mxu0 %v15366_v45  ;;  %v15457_v45 = vld [vmem:[#allocation3 + $0x4] ss:$12 sps:$4 sm:$0xff]  }
 0x1ef   : > { %2117 = vmatprep.mubr.bf16.mxu1 %v15457_v45 }
 0x1f5   : > { %1762 = vmatmul.mubr.bf16.gmra.mrb[40].mxu0 %v15368_v46 }
 0x1f6   : > { %1769 = vmatprep.mubr.bf16.mxu0 %v15369_v47 }
 0x1fd   : > { %1770 = vmatmul.mubr.bf16.gmra.mrb[44].mxu0 %v15371_v48 }
 0x1fe   : > { %1777 = vmatprep.mubr.bf16.mxu0 %v15373_v49 }
 0x205   : > { %1778 = vmatmul.mubr.bf16.gmra.mrb[48].mxu0 %v15375_v50 }
 0x206   : > { %1785 = vmatprep.mubr.bf16.mxu0 %v15377_v51 }
 0x20d   : > { %1786 = vmatmul.mubr.bf16.gmra.mrb[52].mxu0 %v15379_v52 }
 0x20e   : > { %1793 = vmatprep.mubr.bf16.mxu0 %v15381_v53 }
 0x215   : > { %1794 = vmatmul.mubr.bf16.gmra.mrb[56].mxu0 %v15383_v54 }
 0x216   : > { %1801 = vmatprep.mubr.bf16.mxu0 %v15385_v55 }
 0x21d   : > { %1802 = vmatmul.mubr.bf16.gmra.mrb[60].mxu0 %v15387_v56 }
 0x21e   : > { %1809 = vmatprep.mubr.bf16.mxu0 %v15389_v57 }
 0x225   : > { %1810 = vmatmul.mubr.bf16.gmra.mrb[64].mxu0 %v15391_v58 }
 0x226   : > { %1817 = vmatprep.mubr.bf16.mxu0 %v15392_v59 }
 0x22d   : > { %1818 = vmatmul.mubr.bf16.gmra.mrb[68].mxu0 %v15395_v61 }
 0x22e   : > { %1825 = vmatprep.mubr.bf16.mxu0 %v13533_v62 }
 0x235   : > { %1826 = vmatmul.mubr.bf16.gmra.mrb[72].mxu0 %v13532_v1 }
 0x236   : > { %1865 = vmatprep.mubr.bf16.mxu0 %v15401_v63 }
 0x23d   : > { %1866 = vmatmul.mubr.bf16.vlgmr.msra.gmra.mrb[0].mxu0 %v15399_v2 }
 0x23e   : > { %1873 = vmatprep.mubr.bf16.mxu0 %v15402_v3 }
 0x245   : > { %1874 = vmatmul.mubr.bf16.gmra.mrb[4].mxu0 %v15404_v4 }
 0x246   : > { %1881 = vmatprep.mubr.bf16.mxu0 %v15405_v5 }
 0x24d   : > { %1882 = vmatmul.mubr.bf16.gmra.mrb[8].mxu0 %v15407_v6 }
 0x24e   : > { %1889 = vmatprep.mubr.bf16.mxu0 %v15408_v7 }
 0x255   : > { %1890 = vmatmul.mubr.bf16.gmra.mrb[12].mxu0 %v15410_v8 }
 0x256   : > { %1897 = vmatprep.mubr.bf16.mxu0 %v15411_v9 }
 0x25d   : > { %1898 = vmatmul.mubr.bf16.gmra.mrb[16].mxu0 %v15413_v10 }
 0x25e   : > { %1905 = vmatprep.mubr.bf16.mxu0 %v15414_v11 }
 0x265   : > { %1906 = vmatmul.mubr.bf16.gmra.mrb[20].mxu0 %v15416_v12 }
 0x266   : > { %1913 = vmatprep.mubr.bf16.mxu0 %v15417_v13 }
 0x26d   : > { %1914 = vmatmul.mubr.bf16.gmra.mrb[24].mxu0 %v15419_v14 }
 0x26e   : > { %1921 = vmatprep.mubr.bf16.mxu0 %v15420_v15 }
 0x275   : > { %1922 = vmatmul.mubr.bf16.gmra.mrb[28].mxu0 %v15422_v16 }
 0x276   : > { %1929 = vmatprep.mubr.bf16.mxu0 %v15423_v17 }
 0x27d   : > { %1930 = vmatmul.mubr.bf16.gmra.mrb[32].mxu0 %v15425_v18 }
 0x27e   : > { %1937 = vmatprep.mubr.bf16.mxu0 %v15426_v19 }
 0x285   : > { %1938 = vmatmul.mubr.bf16.gmra.mrb[36].mxu0 %v15428_v20 }
 0x286   : > { %1945 = vmatprep.mubr.bf16.mxu0 %v15429_v21 }
 0x28d   : > { %1946 = vmatmul.mubr.bf16.gmra.mrb[40].mxu0 %v15431_v22 }
 0x28e   : > { %1953 = vmatprep.mubr.bf16.mxu0 %v15432_v23 }
 0x295   : > { %1954 = vmatmul.mubr.bf16.gmra.mrb[44].mxu0 %v15434_v24 }
 0x296   : > { %1961 = vmatprep.mubr.bf16.mxu0 %v15435_v25 }
 0x29d   : > { %1962 = vmatmul.mubr.bf16.gmra.mrb[48].mxu0 %v15437_v26 }
 0x29e   : > { %1969 = vmatprep.mubr.bf16.mxu0 %v15438_v27 }
 0x2a5   : > { %1970 = vmatmul.mubr.bf16.gmra.mrb[52].mxu0 %v15440_v28 }
 0x2a6   : > { %1977 = vmatprep.mubr.bf16.mxu0 %v15441_v29 }
 0x2ad   : > { %1978 = vmatmul.mubr.bf16.gmra.mrb[56].mxu0 %v15443_v30 }
 0x2ae   : > { %1985 = vmatprep.mubr.bf16.mxu0 %v15444_v31 }
 0x2b5   : > { %1986 = vmatmul.mubr.bf16.gmra.mrb[60].mxu0 %v15446_v32 }
 0x2b6   : > { %1993 = vmatprep.mubr.bf16.mxu0 %v15447_v33 }
 0x2bd   : > { %1994 = vmatmul.mubr.bf16.gmra.mrb[64].mxu0 %v15449_v34 }
 0x2be   : > { %2001 = vmatprep.mubr.bf16.mxu0 %v15450_v35 }
 0x2c5   : > { %2002 = vmatmul.mubr.bf16.gmra.mrb[68].mxu0 %v15452_v37 }
 0x2c6   : > { %2009 = vmatprep.mubr.bf16.mxu0 %v13535_v38 }
 0x2cd   : > { %2010 = vmatmul.mubr.bf16.gmra.mrb[72].mxu0 %v13534_v39 }
 0x2ce   : > { %4291 = vmatprep.mubr.bf16.mxu0 %v17606_v0 }
 0x310   : > { %v1867_v40 = vpop.f32.mrb[0].mxu0 }
 0x311   : > { %v1869_v41 = vpop.f32.mrb[1].mxu0 }
 0x312   : > { %v1870_v42 = vpop.f32.mrb[2].mxu0 }
 0x313   : > { %v2017_v43 = vpack.c.bf16 %v1870_v42, %v1867_v40  ;;  %v1872_v44 = vpop.f32.mrb[3].mxu0 }
 0x318   : > { %v1875_v46 = vpop.f32.mrb[4].mxu0 }
 0x319   : > { %v1877_v47 = vpop.f32.mrb[5].mxu0 }
 0x31a   : > { %v1878_v48 = vpop.f32.mrb[6].mxu0 }
 0x31b   : > { %v2018_v49 = vpack.c.bf16 %v1878_v48, %v1875_v46  ;;  %v1880_v50 = vpop.f32.mrb[7].mxu0 }
 0x320   : > { %v1883_v51 = vpop.f32.mrb[8].mxu0 }
 0x321   : > { %v1885_v52 = vpop.f32.mrb[9].mxu0 }
 0x322   : > { %v1886_v53 = vpop.f32.mrb[10].mxu0 }
 0x323   : > { %v2019_v54 = vpack.c.bf16 %v1886_v53, %v1883_v51  ;;  %v1888_v55 = vpop.f32.mrb[11].mxu0 }
 0x328   : > { %v1891_v56 = vpop.f32.mrb[12].mxu0 }
 0x329   : > { %v1893_v57 = vpop.f32.mrb[13].mxu0 }
 0x32a   : > { %v1894_v58 = vpop.f32.mrb[14].mxu0 }
 0x32b   : > { %v2020_v59 = vpack.c.bf16 %v1894_v58, %v1891_v56  ;;  %v1896_v60 = vpop.f32.mrb[15].mxu0  ;;  %v15455_v58 = vld [vmem:[#allocation3] ss:$12 sps:$4 sm:$0xff]  }
 0x330   : > { %v1899_v61 = vpop.f32.mrb[16].mxu0 }
 0x331   : > { %v1901_v62 = vpop.f32.mrb[17].mxu0 }
 0x332   : > { %v1902_v63 = vpop.f32.mrb[18].mxu0 }
 0x333   : > { %v2021_v1 = vpack.c.bf16 %v1902_v63, %v1899_v61  ;;  %v1904_v2 = vpop.f32.mrb[19].mxu0 }
 0x334   : > { %v15460_v2 = vld [vmem:[#allocation3 + $0x18] ss:$12 sps:$4 sm:$0x1f]  }
 0x338   : > { %v1907_v3 = vpop.f32.mrb[20].mxu0 }
 0x339   : > { %v1909_v4 = vpop.f32.mrb[21].mxu0 }
 0x33a   : > { %v1910_v5 = vpop.f32.mrb[22].mxu0 }
 0x33b   : > { %v2022_v6 = vpack.c.bf16 %v1910_v5, %v1907_v3  ;;  %v1912_v7 = vpop.f32.mrb[23].mxu0  ;;  %v15461_v3 = vld [vmem:[#allocation3 + $0x8] ss:$12 sps:$4 sm:$0xff]  }
 0x340   : > { %v1915_v8 = vpop.f32.mrb[24].mxu0 }
 0x341   : > { %v1917_v9 = vpop.f32.mrb[25].mxu0 }
 0x342   : > { %v1918_v10 = vpop.f32.mrb[26].mxu0 }
 0x343   : > { %v2023_v11 = vpack.c.bf16 %v1918_v10, %v1915_v8  ;;  %v1920_v12 = vpop.f32.mrb[27].mxu0  ;;  %v2081_v10 = vsel %vm2079_vm1, 65535, %v17606_v0 }
 0x348   : > { %v1923_v13 = vpop.f32.mrb[28].mxu0 }
 0x349   : > { %v1925_v14 = vpop.f32.mrb[29].mxu0 }
 0x34a   : > { %v1926_v15 = vpop.f32.mrb[30].mxu0 }
 0x34b   : > { %v2024_v16 = vpack.c.bf16 %v1926_v15, %v1923_v13  ;;  %v1928_v17 = vpop.f32.mrb[31].mxu0 }
 0x34c   : > { %v15463_v17 = vld [vmem:[#allocation9 + $0x180] ss:$24 sps:$4 sm:$0xff]  }
 0x350   : > { %v1931_v18 = vpop.f32.mrb[32].mxu0 }
 0x351   : > { %v1933_v19 = vpop.f32.mrb[33].mxu0 }
 0x352   : > { %v1934_v20 = vpop.f32.mrb[34].mxu0  ;;  %v15466_v19 = vld [vmem:[#allocation9 + $0x610] ss:$24 sps:$4 sm:$0xff]  }
 0x353   : > { %v1936_v21 = vpop.f32.mrb[35].mxu0  ;;  %v2025_v22 = vpack.c.bf16 %v1934_v20, %v1931_v18  ;;  %v15465_v18 = vld [vmem:[#allocation9 + $0x184] ss:$24 sps:$4 sm:$0xff]   ;;  %v15468_v20 = vld [vmem:[#allocation9 + $0x614] ss:$24 sps:$4 sm:$0xff]  }
 0x354   : > { %4259 = vmatprep.subr.bf16.mxu0 %v15468_v20  ;;  %v15469_v21 = vld [vmem:[#allocation9 + $0x1b0] ss:$24 sps:$4 sm:$0xff]  }
 0x355   : > { %14860 = vmatprep.subr.bf16.mxu1 %v2025_v22  ;;  %4260 = vmatpush1.bf16.msra.mxu0 %v15466_v19  ;;  %v15471_v22 = vld [vmem:[#allocation9 + $0x1b4] ss:$24 sps:$4 sm:$0xff]  }
 0x356   : > { %14861 = vmatpush3.bf16.msra.mxu1 %v2017_v43 }
 0x358   : > { %v1939_v23 = vpop.f32.mrb[36].mxu0 }
 0x359   : > { %v1941_v24 = vpop.f32.mrb[37].mxu0 }
 0x35a   : > { %v1942_v25 = vpop.f32.mrb[38].mxu0  ;;  %v15474_v24 = vld [vmem:[#allocation9 + $0x644] ss:$24 sps:$4 sm:$0xff]  }
 0x35b   : > { %v2026_v26 = vpack.c.bf16 %v1942_v25, %v1939_v23  ;;  %v1944_v27 = vpop.f32.mrb[39].mxu0  ;;  %v15472_v23 = vld [vmem:[#allocation9 + $0x640] ss:$24 sps:$4 sm:$0xff]   ;;  %v15477_v25 = vld [vmem:[#allocation9 + $0x1e4] ss:$24 sps:$4 sm:$0xff]   ;;  %4261 = vmatprep.subr.bf16.mxu0 %v15474_v24 }
 0x35c   : > { %v15480_v27 = vld [vmem:[#allocation9 + $0x674] ss:$24 sps:$4 sm:$0xff]   ;;  %4262 = vmatpush1.bf16.msra.mxu0 %v15472_v23  ;;  %v15511_v24 = vld [vmem:[#allocation9 + $0x188] ss:$24 sps:$4 sm:$0xff]  }
 0x35d   : > { %14862 = vmatprep.subr.bf16.mxu1 %v2026_v26  ;;  %v15475_v26 = vld [vmem:[#allocation9 + $0x1e0] ss:$24 sps:$4 sm:$0xff]   ;;  %4263 = vmatprep.subr.bf16.mxu0 %v15480_v27 }
 0x35e   : > { %14863 = vmatpush3.bf16.msra.mxu1 %v2018_v49 }
 0x360   : > { %v1947_v28 = vpop.f32.mrb[40].mxu0 }
 0x361   : > { %v1949_v29 = vpop.f32.mrb[41].mxu0 }
 0x362   : > { %v1950_v30 = vpop.f32.mrb[42].mxu0  ;;  %v15483_v29 = vld [vmem:[#allocation9 + $0x214] ss:$24 sps:$4 sm:$0xff]  }
 0x363   : > { %v2027_v31 = vpack.c.bf16 %v1950_v30, %v1947_v28  ;;  %v1952_v32 = vpop.f32.mrb[43].mxu0  ;;  %v15478_v28 = vld [vmem:[#allocation9 + $0x670] ss:$24 sps:$4 sm:$0xff]   ;;  %v15486_v30 = vld [vmem:[#allocation9 + $0x6a4] ss:$24 sps:$4 sm:$0xff]  }
 0x364   : > { %4264 = vmatpush1.bf16.msra.mxu0 %v15478_v28  ;;  %v15484_v32 = vld [vmem:[#allocation9 + $0x6a0] ss:$24 sps:$4 sm:$0xff]   ;;  %v15520_v28 = vld [vmem:[#allocation9 + $0x1bc] ss:$24 sps:$4 sm:$0xff]  }
 0x365   : > { %14864 = vmatprep.subr.bf16.mxu1 %v2027_v31  ;;  %v15481_v31 = vld [vmem:[#allocation9 + $0x210] ss:$24 sps:$4 sm:$0xff]   ;;  %4265 = vmatprep.subr.bf16.mxu0 %v15486_v30 }
 0x366   : > { %14865 = vmatpush3.bf16.msra.mxu1 %v2019_v54  ;;  %v15518_v30 = vld [vmem:[#allocation9 + $0x1b8] ss:$24 sps:$4 sm:$0xff]  }
 0x368   : > { %v1955_v33 = vpop.f32.mrb[44].mxu0  ;;  %4266 = vmatpush1.bf16.msra.mxu0 %v15484_v32  ;;  %v15526_v32 = vld [vmem:[#allocation9 + $0x1ec] ss:$24 sps:$4 sm:$0xff]  }
 0x369   : > { %v1957_v34 = vpop.f32.mrb[45].mxu0 }
 0x36a   : > { %v1958_v35 = vpop.f32.mrb[46].mxu0  ;;  %v15492_v34 = vld [vmem:[#allocation9 + $0x6d4] ss:$24 sps:$4 sm:$0xff]  }
 0x36b   : > { %v2028_v36 = vpack.c.bf16 %v1958_v35, %v1955_v33  ;;  %v1960_v37 = vpop.f32.mrb[47].mxu0  ;;  %v15489_v33 = vld [vmem:[#allocation9 + $0x244] ss:$24 sps:$4 sm:$0xff]   ;;  %v15487_v35 = vld [vmem:[#allocation9 + $0x240] ss:$24 sps:$4 sm:$0xff]   ;;  %4267 = vmatprep.subr.bf16.mxu0 %v15492_v34 }
 0x36c   : > { %v15495_v37 = vld [vmem:[#allocation9 + $0x274] ss:$24 sps:$4 sm:$0xff]   ;;  %v15524_v34 = vld [vmem:[#allocation9 + $0x1e8] ss:$24 sps:$4 sm:$0xff]  }
 0x36d   : > { %14866 = vmatprep.subr.bf16.mxu1 %v2028_v36  ;;  %v15490_v36 = vld [vmem:[#allocation9 + $0x6d0] ss:$24 sps:$4 sm:$0xff]  }
 0x36e   : > { %14867 = vmatpush3.bf16.msra.mxu1 %v2020_v59  ;;  %v15458_v59 = vld [vmem:[#allocation3 + $0x1c] ss:$12 sps:$4 sm:$0x1f]   ;;  %4268 = vmatpush1.bf16.msra.mxu0 %v15490_v36 }
 0x36f   : > { %v15532_v36 = vld [vmem:[#allocation9 + $0x21c] ss:$24 sps:$4 sm:$0xff]  }
 0x370   : > { %v1963_v38 = vpop.f32.mrb[48].mxu0 }
 0x371   : > { %v1965_v39 = vpop.f32.mrb[49].mxu0 }
 0x372   : > { %v1966_v40 = vpop.f32.mrb[50].mxu0  ;;  %v15493_v39 = vld [vmem:[#allocation9 + $0x270] ss:$24 sps:$4 sm:$0xff]  }
 0x373   : > { %v2029_v41 = vpack.c.bf16 %v1966_v40, %v1963_v38  ;;  %v1968_v42 = vpop.f32.mrb[51].mxu0  ;;  %v15498_v38 = vld [vmem:[#allocation9 + $0x704] ss:$24 sps:$4 sm:$0xff]   ;;  %v15496_v40 = vld [vmem:[#allocation9 + $0x700] ss:$24 sps:$4 sm:$0xff]  }
 0x374   : > { %4269 = vmatprep.subr.bf16.mxu0 %v15498_v38  ;;  %v15501_v42 = vld [vmem:[#allocation9 + $0x2a4] ss:$24 sps:$4 sm:$0xff]   ;;  %v15530_v38 = vld [vmem:[#allocation9 + $0x218] ss:$24 sps:$4 sm:$0xff]  }
 0x375   : > { %14868 = vmatprep.subr.bf16.mxu1 %v2029_v41  ;;  %4270 = vmatpush1.bf16.msra.mxu0 %v15496_v40  ;;  %v15499_v41 = vld [vmem:[#allocation9 + $0x2a0] ss:$24 sps:$4 sm:$0xff]   ;;  %v15538_v40 = vld [vmem:[#allocation9 + $0x24c] ss:$24 sps:$4 sm:$0xff]  }
 0x376   : > { %14869 = vmatpush3.bf16.msra.mxu1 %v2021_v1 }
 0x378   : > { %v1971_v43 = vpop.f32.mrb[52].mxu0 }
 0x379   : > { %v1973_v44 = vpop.f32.mrb[53].mxu0 }
 0x37a   : > { %v1974_v45 = vpop.f32.mrb[54].mxu0  ;;  %v15504_v44 = vld [vmem:[#allocation9 + $0x734] ss:$24 sps:$4 sm:$0xff]  }
 0x37b   : > { %v2030_v46 = vpack.c.bf16 %v1974_v45, %v1971_v43  ;;  %v1976_v47 = vpop.f32.mrb[55].mxu0  ;;  %v15502_v43 = vld [vmem:[#allocation9 + $0x730] ss:$24 sps:$4 sm:$0xff]   ;;  %v15507_v45 = vld [vmem:[#allocation9 + $0x2d4] ss:$24 sps:$4 sm:$0xff]   ;;  %4271 = vmatprep.subr.bf16.mxu0 %v15504_v44 }
 0x37c   : > { %4272 = vmatpush1.bf16.msra.mxu0 %v15502_v43  ;;  %v15505_v47 = vld [vmem:[#allocation9 + $0x2d0] ss:$24 sps:$4 sm:$0xff]   ;;  %v15544_v44 = vld [vmem:[#allocation9 + $0x27c] ss:$24 sps:$4 sm:$0xff]  }
 0x37d   : > { %14870 = vmatprep.subr.bf16.mxu1 %v2030_v46  ;;  %v15510_v46 = vld [vmem:[#allocation9 + $0x764] ss:$24 sps:$4 sm:$0xff]   ;;  %v15539_v43 = vld [vmem:[#allocation9 + $0x848] ss:$24 sps:$4 sm:$0xff]  }
 0x37e   : > { %14871 = vmatpush3.bf16.msra.mxu1 %v2022_v6  ;;  %4273 = vmatprep.subr.bf16.mxu0 %v15510_v46  ;;  %v15542_v46 = vld [vmem:[#allocation9 + $0x278] ss:$24 sps:$4 sm:$0xff]  }
 0x380   : > { %v1979_v48 = vpop.f32.mrb[56].mxu0 }
 0x381   : > { %v1981_v49 = vpop.f32.mrb[57].mxu0 }
 0x382   : > { %v1982_v50 = vpop.f32.mrb[58].mxu0  ;;  %v15513_v49 = vld [vmem:[#allocation9 + $0x18c] ss:$24 sps:$4 sm:$0xff]  }
 0x383   : > { %v2031_v51 = vpack.c.bf16 %v1982_v50, %v1979_v48  ;;  %v1984_v52 = vpop.f32.mrb[59].mxu0  ;;  %v15508_v48 = vld [vmem:[#allocation9 + $0x760] ss:$24 sps:$4 sm:$0xff]   ;;  %v15516_v50 = vld [vmem:[#allocation9 + $0x78c] ss:$24 sps:$4 sm:$0xff]  }
 0x384   : > { %4274 = vmatpush1.bf16.msra.mxu0 %v15508_v48  ;;  %v15550_v48 = vld [vmem:[#allocation9 + $0x2ac] ss:$24 sps:$4 sm:$0xff]  }
 0x385   : > { %14872 = vmatprep.subr.bf16.mxu1 %v2031_v51  ;;  %4638 = vmatprep.subr.bf16.mxu0 %v15516_v50  ;;  %v15548_v50 = vld [vmem:[#allocation9 + $0x2a8] ss:$24 sps:$4 sm:$0xff]  }
 0x386   : > { %14873 = vmatpush3.bf16.msra.mxu1 %v2023_v11 }
 0x388   : > { %v1987_v53 = vpop.f32.mrb[60].mxu0 }
 0x389   : > { %v1989_v54 = vpop.f32.mrb[61].mxu0 }
 0x38a   : > { %v1990_v55 = vpop.f32.mrb[62].mxu0 }
 0x38b   : > { %v2032_v56 = vpack.c.bf16 %v1990_v55, %v1987_v53  ;;  %v1992_v57 = vpop.f32.mrb[63].mxu0 }
 0x38d   : > { %14874 = vmatprep.subr.bf16.mxu1 %v2032_v56 }
 0x38e   : > { %14875 = vmatpush3.bf16.msra.mxu1 %v2024_v16  ;;  %v15462_v16 = vld [vmem:[#allocation3 + $0x20] ss:$12 sps:$4 sm:$0x1f]  }
 0x390   : > { %v1995_v60 = vpop.f32.mrb[64].mxu0 }
 0x391   : > { %v1997_v61 = vpop.f32.mrb[65].mxu0  ;;  %2118 = vmatmul.mubr.bf16.vlgmr.msra.gmra.mrb[0].mxu1 %v15455_v58 }
 0x392   : > { %v1998_v62 = vpop.f32.mrb[66].mxu0  ;;  %2125 = vmatprep.mubr.bf16.mxu1 %v15458_v59 }
 0x393   : > { %v2033_v63 = vpack.c.bf16 %v1998_v62, %v1995_v60  ;;  %v2000_v1 = vpop.f32.mrb[67].mxu0 }
 0x395   : > { %14959 = vmatprep.subr.bf16.mxu1 %v2033_v63 }
 0x396   : > { %14960 = vmatpush3.bf16.msra.mxu1 %v2033_v63  ;;  %v13584_v63 = vld [vmem:[#allocation8] ss:$0 sm:$0xff] }
 0x398   : > { %v2003_v4 = vpop.f32.mrb[68].mxu0 }
 0x399   : > { %v2005_v5 = vpop.f32.mrb[69].mxu0  ;;  %2126 = vmatmul.mubr.bf16.gmra.mrb[4].mxu1 %v15460_v2 }
 0x39a   : > { %v2006_v6 = vpop.f32.mrb[70].mxu0  ;;  %14965 = vmatprep.mubr.msk.bf16.mxu1 %vm2072_vm0, %v15461_v3 }
 0x39b   : > { %v2034_v7 = vpack.c.bf16 %v2006_v6, %v2003_v4  ;;  %v2008_v8 = vpop.f32.mrb[71].mxu0 }
 0x39d   : > { %14961 = vmatprep.subr.bf16.mxu1 %v2034_v7 }
 0x39e   : > { %14962 = vmatpush3.bf16.msra.mxu1 %v2034_v7 }
 0x3a0   : > { %v2011_v9 = vpop.f32.mrb[72].mxu0 }
 0x3a1   : > { %v2035_v11 = vpack.c.bf16 %v2011_v9, %v2011_v9  ;;  %v2013_v12 = vpop.f32.mrb[73].mxu0 }
 0x3a2   : > { %v2014_v13 = vpop.f32.mrb[74].mxu0 }
 0x3a3   : > { %v2083_v14 = vand.u32 %v2081_v10, %v2035_v11  ;;  %v2015_v15 = vpop.f32.mrb[75].mxu0 }
 0x3a5   : > { %14963 = vmatprep.subr.bf16.mxu1 %v2083_v14 }
 0x3a6   : > { %14964 = vmatpush3.bf16.msra.mxu1 %v2083_v14 }
 0x3a7   : > { %2560 = vmatprep.subr.bf16.mxu1 %v15465_v18 }
 0x3a9   : > { %14966 = vmatmul.mubr.msk.bf16.vlgmr.msra.gmra.mrb[8].mxu1 %vm2072_vm0, %v15462_v16 }
 0x3aa   : > { %2592 = vmatprep.mubr.bf16.mxu1 %v17606_v0  ;;  %2561 = vmatpush1.bf16.msra.mxu1 %v15463_v17  ;;  %v2209_v17 = vld [vmem:[#allocation2 + $0xc] sm:$0x1] }
 0x3ab   : > { %2562 = vmatprep.subr.bf16.mxu1 %v15471_v22 }
 0x3ae   : > { %2563 = vmatpush1.bf16.msra.mxu1 %v15469_v21 }
 0x3af   : > { %2564 = vmatprep.subr.bf16.mxu1 %v15477_v25  ;;  %v15514_v25 = vld [vmem:[#allocation9 + $0x788] ss:$24 sps:$4 sm:$0xff]  }
 0x3b2   : > { %2565 = vmatpush1.bf16.msra.mxu1 %v15475_v26 }
 0x3b3   : > { %2566 = vmatprep.subr.bf16.mxu1 %v15483_v29  ;;  %v15523_v29 = vld [vmem:[#allocation9 + $0x7bc] ss:$24 sps:$4 sm:$0xff]  }
 0x3b6   : > { %2567 = vmatpush1.bf16.msra.mxu1 %v15481_v31  ;;  %v15521_v31 = vld [vmem:[#allocation9 + $0x7b8] ss:$24 sps:$4 sm:$0xff]  }
 0x3b7   : > { %2568 = vmatprep.subr.bf16.mxu1 %v15489_v33  ;;  %v15529_v33 = vld [vmem:[#allocation9 + $0x7ec] ss:$24 sps:$4 sm:$0xff]  }
 0x3ba   : > { %2569 = vmatpush1.bf16.msra.mxu1 %v15487_v35  ;;  %v15527_v35 = vld [vmem:[#allocation9 + $0x7e8] ss:$24 sps:$4 sm:$0xff]  }
 0x3bb   : > { %2570 = vmatprep.subr.bf16.mxu1 %v15495_v37  ;;  %v15535_v37 = vld [vmem:[#allocation9 + $0x81c] ss:$24 sps:$4 sm:$0xff]  }
 0x3be   : > { %2571 = vmatpush1.bf16.msra.mxu1 %v15493_v39  ;;  %v15533_v39 = vld [vmem:[#allocation9 + $0x818] ss:$24 sps:$4 sm:$0xff]  }
 0x3bf   : > { %2572 = vmatprep.subr.bf16.mxu1 %v15501_v42  ;;  %v15536_v42 = vld [vmem:[#allocation9 + $0x248] ss:$24 sps:$4 sm:$0xff]  }
 0x3c2   : > { %2573 = vmatpush1.bf16.msra.mxu1 %v15499_v41  ;;  %v15541_v41 = vld [vmem:[#allocation9 + $0x84c] ss:$24 sps:$4 sm:$0xff]  }
 0x3c3   : > { %2574 = vmatprep.subr.bf16.mxu1 %v15507_v45  ;;  %v15547_v45 = vld [vmem:[#allocation9 + $0x87c] ss:$24 sps:$4 sm:$0xff]  }
 0x3c6   : > { %2575 = vmatpush1.bf16.msra.mxu1 %v15505_v47  ;;  %v15545_v47 = vld [vmem:[#allocation9 + $0x878] ss:$24 sps:$4 sm:$0xff]  }
 0x3c7   : > { %2601 = vmatprep.subr.bf16.mxu1 %v15513_v49  ;;  %v15553_v49 = vld [vmem:[#allocation9 + $0x8ac] ss:$24 sps:$4 sm:$0xff]  }
 0x464   : > { %v14876_v51 = vpop.f32.mrb[0].mxu1 }
 0x465   : > { %v14877_v52 = vpop.f32.mrb[1].mxu1 }
 0x466   : > { %v14878_v53 = vadd.f32 %v14877_v52, %v14876_v51  ;;  %v14879_v54 = vpop.f32.mrb[2].mxu1  ;;  %v15551_v51 = vld [vmem:[#allocation9 + $0x8a8] ss:$24 sps:$4 sm:$0xff]   ;;  %v15556_v52 = vld [vmem:[#allocation9 + $0x2dc] ss:$24 sps:$4 sm:$0xff]  }
 0x467   : > { %v14880_v55 = vpop.f32.mrb[3].mxu1 }
 0x468   : > { %v14881_v56 = vadd.f32 %v14880_v55, %v14879_v54  ;;  %v2120_v3 = vadd.f32 %v14878_v53, %v13584_v63  ;;  %v15559_v53 = vld [vmem:[#allocation9 + $0x8dc] ss:$24 sps:$4 sm:$0xff]   ;;  %v15554_v54 = vld [vmem:[#allocation9 + $0x2d8] ss:$24 sps:$4 sm:$0xff]  }
 0x469   : > { %v15557_v55 = vld [vmem:[#allocation9 + $0x8d8] ss:$24 sps:$4 sm:$0xff]  }
 0x46a   : > { %v2123_v9 = vadd.f32 %v14881_v56, %v13584_v63  ;;  %v15562_v56 = vld [vmem:[#allocation9 + $0x194] ss:$24 sps:$4 sm:$0xff]  }
 0x46c   : > { %v14882_v57 = vpop.f32.mrb[4].mxu1 }
 0x46d   : > { %v14883_v58 = vpop.f32.mrb[5].mxu1 }
 0x46e   : > { %v14884_v59 = vadd.f32 %v14883_v58, %v14882_v57  ;;  %v14885_v60 = vpop.f32.mrb[6].mxu1  ;;  %v15565_v57 = vld [vmem:[#allocation9 + $0x904] ss:$24 sps:$4 sm:$0xff]   ;;  %v15560_v58 = vld [vmem:[#allocation9 + $0x190] ss:$24 sps:$4 sm:$0xff]  }
 0x46f   : > { %v14886_v61 = vpop.f32.mrb[7].mxu1 }
 0x470   : > { %v14887_v62 = vadd.f32 %v14886_v61, %v14885_v60  ;;  %v2128_v1 = vadd.f32 %v14884_v59, %v13584_v63  ;;  %v15563_v59 = vld [vmem:[#allocation9 + $0x900] ss:$24 sps:$4 sm:$0xff]   ;;  %v15568_v61 = vld [vmem:[#allocation9 + $0x1c4] ss:$24 sps:$4 sm:$0xff]  }
 0x472   : > { %v2131_v6 = vadd.f32 %v14887_v62, %v13584_v63  ;;  %v15571_v62 = vld [vmem:[#allocation9 + $0x934] ss:$24 sps:$4 sm:$0xff]   ;;  %v15566_v63 = vld [vmem:[#allocation9 + $0x1c0] ss:$24 sps:$4 sm:$0xff]  }
 0x47c   : > { %v14967_v2 = vpop.f32.mrb[8].mxu1 }
 0x47d   : > { %v2177_v4 = vadd.f32 %v14967_v2, %v2128_v1  ;;  %v2168_v5 = vpop.f32.mrb[9].mxu1  ;;  %v15569_v1 = vld [vmem:[#allocation9 + $0x930] ss:$24 sps:$4 sm:$0xff]   ;;  %v15574_v2 = vld [vmem:[#allocation9 + $0x1f4] ss:$24 sps:$4 sm:$0xff]  }
 0x47e   : > { %v2169_v7 = vadd.f32 %v2168_v5, %v2120_v3  ;;  %v14968_v8 = vpop.f32.mrb[10].mxu1  ;;  %v15577_v3 = vld [vmem:[#allocation9 + $0x964] ss:$24 sps:$4 sm:$0xff]   ;;  %v15575_v5 = vld [vmem:[#allocation9 + $0x960] ss:$24 sps:$4 sm:$0xff]  }
 0x47f   : > { %v2185_v10 = vmax.f32 %v2177_v4, 0.0  ;;  %v2180_v11 = vadd.f32 %v14968_v8, %v2131_v6  ;;  %v2171_v12 = vpop.f32.mrb[11].mxu1  ;;  %v15572_v4 = vld [vmem:[#allocation9 + $0x1f0] ss:$24 sps:$4 sm:$0xff]   ;;  %v15580_v6 = vld [vmem:[#allocation9 + $0x224] ss:$24 sps:$4 sm:$0xff]  }
 0x480   : > { %v2172_v13 = vadd.f32 %v2171_v12, %v2123_v9  ;;  %v2183_v16 = vmax.f32 %v2169_v7, 0.0  ;;  %v15583_v7 = vld [vmem:[#allocation9 + $0x994] ss:$24 sps:$4 sm:$0xff]   ;;  %v15578_v8 = vld [vmem:[#allocation9 + $0x220] ss:$24 sps:$4 sm:$0xff]  }
 0x481   : > { %v14853_v14 = vpack.c.bf16 %v2185_v10, %v2185_v10  ;;  %v2186_v15 = vmax.f32 %v2180_v11, 0.0  ;;  %v15581_v9 = vld [vmem:[#allocation9 + $0x990] ss:$24 sps:$4 sm:$0xff]   ;;  %v15586_v10 = vld [vmem:[#allocation9 + $0x254] ss:$24 sps:$4 sm:$0xff]  }
 0x482   : > { %v2184_v18 = vmax.f32 %v2172_v13, 0.0  ;;  %v15589_v11 = vld [vmem:[#allocation9 + $0x9c4] ss:$24 sps:$4 sm:$0xff]   ;;  %v15584_v12 = vld [vmem:[#allocation9 + $0x250] ss:$24 sps:$4 sm:$0xff]  }
 0x483   : > { %2205 = vst [vmem:[#allocation2 + $0x8] sm:$0xf] %v14853_v14  ;;  %v14854_v19 = vpack.c.bf16 %v2186_v15, %v2186_v15  ;;  %v15587_v13 = vld [vmem:[#allocation9 + $0x9c0] ss:$24 sps:$4 sm:$0xff]   ;;  %v15592_v14 = vld [vmem:[#allocation9 + $0x284] ss:$24 sps:$4 sm:$0xff]  }
 0x484   : > { %v14858_v20 = vpack.c.bf16 %v2184_v18, %v2183_v16  ;;  %v15595_v15 = vld [vmem:[#allocation9 + $0x9f4] ss:$24 sps:$4 sm:$0xff]   ;;  %v15590_v16 = vld [vmem:[#allocation9 + $0x280] ss:$24 sps:$4 sm:$0xff]  }
 0x485   : > { %v2210_v21 = vsel %vm2208_vm3, %v14854_v19, %v2209_v17  ;;  %v15593_v17 = vld [vmem:[#allocation9 + $0x9f0] ss:$24 sps:$4 sm:$0xff]   ;;  %v15598_v18 = vld [vmem:[#allocation9 + $0x2b4] ss:$24 sps:$4 sm:$0xff]   ;;  %v15601_v19 = vld [vmem:[#allocation9 + $0xa24] ss:$24 sps:$4 sm:$0xff]  }
 0x486   : > { %2211 = vst [vmem:[#allocation2 + $0xc] sm:$0x1] %v2210_v21  ;;  %14859 = vst [vmem:[#allocation2] sm:$0xff] %v14858_v20   ;;  %v15596_v20 = vld [vmem:[#allocation9 + $0x2b0] ss:$24 sps:$4 sm:$0xff]  }
 0x487   : > { %v15599_v21 = vld [vmem:[#allocation9 + $0xa20] ss:$24 sps:$4 sm:$0xff]  }
 0x48d   : > { %v18064_v22 = vld [vmem:[#allocation2] sm:$0xf] }
 0x48e   : > { %v18068_v23 = vcombine.low %v18064_v22, %v18064_v22 }
 0x490   : > { %v18071_v26 = vshrl.u32 %v18068_v23, 16  ;;  %v18074_v27 = vrot.slane %v18068_v23, 2 }
 0x492   : > { %2593 = vmatmul.mubr.bf16.vlgmr.msra.gmra.mrb[12].mxu1 %v18071_v26  ;;  %4292 = vmatmul.mubr.bf16.vlgmr.msra.gmra.mrb[76].mxu0 %v18074_v27  ;;  %v18081_v60 = vrot.slane %v18071_v26, 2 }
 0x493   : > { %2602 = vmatpush1.bf16.msra.mxu1 %v15511_v24  ;;  %4639 = vmatpush1.bf16.msra.mxu0 %v15514_v25  ;;  %v15604_v24 = vld [vmem:[#allocation9 + $0x2e4] ss:$24 sps:$4 sm:$0xff]   ;;  %v15607_v25 = vld [vmem:[#allocation9 + $0xa54] ss:$24 sps:$4 sm:$0xff]  }
 0x494   : > { %2603 = vmatprep.subr.bf16.mxu1 %v15520_v28  ;;  %4640 = vmatprep.subr.bf16.mxu0 %v15523_v29  ;;  %v15602_v28 = vld [vmem:[#allocation9 + $0x2e0] ss:$24 sps:$4 sm:$0xff]   ;;  %v15605_v29 = vld [vmem:[#allocation9 + $0xa50] ss:$24 sps:$4 sm:$0xff]  }
 0x495   : > { %2633 = vmatprep.mubr.bf16.mxu1 %v17606_v0  ;;  %4670 = vmatprep.mubr.bf16.mxu0 %v17606_v0 }
 0x497   : > { %2604 = vmatpush1.bf16.msra.mxu1 %v15518_v30  ;;  %4641 = vmatpush1.bf16.msra.mxu0 %v15521_v31  ;;  %v15610_v30 = vld [vmem:[#allocation9 + $0x4] ss:$24 sps:$4 sm:$0xff]   ;;  %v15613_v31 = vld [vmem:[#allocation9 + $0x914] ss:$24 sps:$4 sm:$0xff]  }
 0x498   : > { %2605 = vmatprep.subr.bf16.mxu1 %v15526_v32  ;;  %4642 = vmatprep.subr.bf16.mxu0 %v15529_v33  ;;  %v15608_v32 = vld [vmem:[#allocation9] ss:$24 sps:$4 sm:$0xff]   ;;  %v15611_v33 = vld [vmem:[#allocation9 + $0x910] ss:$24 sps:$4 sm:$0xff]  }
 0x49b   : > { %2606 = vmatpush1.bf16.msra.mxu1 %v15524_v34  ;;  %4643 = vmatpush1.bf16.msra.mxu0 %v15527_v35  ;;  %v18088_v34 = vrot.slane %v18068_v23, 3  ;;  %v15616_v35 = vld [vmem:[#allocation9 + $0x34] ss:$24 sps:$4 sm:$0xff]  }
 0x49c   : > { %2607 = vmatprep.subr.bf16.mxu1 %v15532_v36  ;;  %4644 = vmatprep.subr.bf16.mxu0 %v15535_v37  ;;  %v15619_v36 = vld [vmem:[#allocation9 + $0x944] ss:$24 sps:$4 sm:$0xff]   ;;  %v15614_v37 = vld [vmem:[#allocation9 + $0x30] ss:$24 sps:$4 sm:$0xff]  }
 0x49f   : > { %2608 = vmatpush1.bf16.msra.mxu1 %v15530_v38  ;;  %4645 = vmatpush1.bf16.msra.mxu0 %v15533_v39  ;;  %v15617_v38 = vld [vmem:[#allocation9 + $0x940] ss:$24 sps:$4 sm:$0xff]   ;;  %v15622_v39 = vld [vmem:[#allocation9 + $0x64] ss:$24 sps:$4 sm:$0xff]  }
 0x4a0   : > { %2609 = vmatprep.subr.bf16.mxu1 %v15538_v40  ;;  %4646 = vmatprep.subr.bf16.mxu0 %v15541_v41  ;;  %v15625_v40 = vld [vmem:[#allocation9 + $0x974] ss:$24 sps:$4 sm:$0xff]   ;;  %v15620_v41 = vld [vmem:[#allocation9 + $0x60] ss:$24 sps:$4 sm:$0xff]  }
 0x4a3   : > { %2610 = vmatpush1.bf16.msra.mxu1 %v15536_v42  ;;  %4647 = vmatpush1.bf16.msra.mxu0 %v15539_v43  ;;  %v15623_v42 = vld [vmem:[#allocation9 + $0x970] ss:$24 sps:$4 sm:$0xff]   ;;  %v15628_v43 = vld [vmem:[#allocation9 + $0x94] ss:$24 sps:$4 sm:$0xff]  }
 0x4a4   : > { %2611 = vmatprep.subr.bf16.mxu1 %v15544_v44  ;;  %4648 = vmatprep.subr.bf16.mxu0 %v15547_v45  ;;  %v15631_v44 = vld [vmem:[#allocation9 + $0x9a4] ss:$24 sps:$4 sm:$0xff]   ;;  %v15626_v45 = vld [vmem:[#allocation9 + $0x90] ss:$24 sps:$4 sm:$0xff]  }
 0x4a7   : > { %2612 = vmatpush1.bf16.msra.mxu1 %v15542_v46  ;;  %4649 = vmatpush1.bf16.msra.mxu0 %v15545_v47  ;;  %v15629_v46 = vld [vmem:[#allocation9 + $0x9a0] ss:$24 sps:$4 sm:$0xff]   ;;  %v15634_v47 = vld [vmem:[#allocation9 + $0xc4] ss:$24 sps:$4 sm:$0xff]  }
 0x4a8   : > { %2613 = vmatprep.subr.bf16.mxu1 %v15550_v48  ;;  %4650 = vmatprep.subr.bf16.mxu0 %v15553_v49  ;;  %v15637_v48 = vld [vmem:[#allocation9 + $0x9d4] ss:$24 sps:$4 sm:$0xff]   ;;  %v15632_v49 = vld [vmem:[#allocation9 + $0xc0] ss:$24 sps:$4 sm:$0xff]  }
 0x4ab   : > { %2614 = vmatpush1.bf16.msra.mxu1 %v15548_v50  ;;  %4651 = vmatpush1.bf16.msra.mxu0 %v15551_v51  ;;  %v15635_v50 = vld [vmem:[#allocation9 + $0x9d0] ss:$24 sps:$4 sm:$0xff]   ;;  %v15640_v51 = vld [vmem:[#allocation9 + $0xf4] ss:$24 sps:$4 sm:$0xff]  }
 0x4ac   : > { %2615 = vmatprep.subr.bf16.mxu1 %v15556_v52  ;;  %4652 = vmatprep.subr.bf16.mxu0 %v15559_v53  ;;  %v15643_v52 = vld [vmem:[#allocation9 + $0xa04] ss:$24 sps:$4 sm:$0xff]   ;;  %v15638_v53 = vld [vmem:[#allocation9 + $0xf0] ss:$24 sps:$4 sm:$0xff]  }
 0x4af   : > { %2616 = vmatpush1.bf16.msra.mxu1 %v15554_v54  ;;  %4653 = vmatpush1.bf16.msra.mxu0 %v15557_v55  ;;  %v15641_v54 = vld [vmem:[#allocation9 + $0xa00] ss:$24 sps:$4 sm:$0xff]   ;;  %v15646_v55 = vld [vmem:[#allocation9 + $0x124] ss:$24 sps:$4 sm:$0xff]  }
 0x4b0   : > { %2642 = vmatprep.subr.bf16.mxu1 %v15562_v56  ;;  %5017 = vmatprep.subr.bf16.mxu0 %v15565_v57  ;;  %v15649_v56 = vld [vmem:[#allocation9 + $0xa34] ss:$24 sps:$4 sm:$0xff]   ;;  %v15644_v57 = vld [vmem:[#allocation9 + $0x120] ss:$24 sps:$4 sm:$0xff]  }
 0x4b2   : > { %2634 = vmatmul.mubr.bf16.vlgmr.msra.gmra.mrb[16].mxu1 %v18071_v26  ;;  %4671 = vmatmul.mubr.bf16.vlgmr.msra.gmra.mrb[80].mxu0 %v18081_v60 }
 0x4b3   : > { %2643 = vmatpush1.bf16.msra.mxu1 %v15560_v58  ;;  %5018 = vmatpush1.bf16.msra.mxu0 %v15563_v59  ;;  %v15647_v58 = vld [vmem:[#allocation9 + $0xa30] ss:$24 sps:$4 sm:$0xff]   ;;  %v15652_v59 = vld [vmem:[#allocation9 + $0x154] ss:$24 sps:$4 sm:$0xff]  }
 0x4b4   : > { %2644 = vmatprep.subr.bf16.mxu1 %v15568_v61  ;;  %5019 = vmatprep.subr.bf16.mxu0 %v15571_v62  ;;  %v15655_v61 = vld [vmem:[#allocation9 + $0xa64] ss:$24 sps:$4 sm:$0xff]   ;;  %v15650_v62 = vld [vmem:[#allocation9 + $0x150] ss:$24 sps:$4 sm:$0xff]  }
 0x4b5   : > { %2674 = vmatprep.mubr.bf16.mxu1 %v17606_v0  ;;  %5049 = vmatprep.mubr.bf16.mxu0 %v17606_v0 }
 0x4b7   : > { %2645 = vmatpush1.bf16.msra.mxu1 %v15566_v63  ;;  %5020 = vmatpush1.bf16.msra.mxu0 %v15569_v1  ;;  %v15653_v63 = vld [vmem:[#allocation9 + $0xa60] ss:$24 sps:$4 sm:$0xff]   ;;  %v15658_v1 = vld [vmem:[#allocation9 + $0xc] ss:$24 sps:$4 sm:$0xff]  }
 0x4b8   : > { %2646 = vmatprep.subr.bf16.mxu1 %v15574_v2  ;;  %5021 = vmatprep.subr.bf16.mxu0 %v15577_v3  ;;  %v15661_v2 = vld [vmem:[#allocation9 + $0xa8c] ss:$24 sps:$4 sm:$0xff]   ;;  %v15656_v3 = vld [vmem:[#allocation9 + $0x8] ss:$24 sps:$4 sm:$0xff]  }
 0x4bb   : > { %2647 = vmatpush1.bf16.msra.mxu1 %v15572_v4  ;;  %5022 = vmatpush1.bf16.msra.mxu0 %v15575_v5  ;;  %v15659_v4 = vld [vmem:[#allocation9 + $0xa88] ss:$24 sps:$4 sm:$0xff]   ;;  %v15664_v5 = vld [vmem:[#allocation9 + $0x3c] ss:$24 sps:$4 sm:$0xff]  }
 0x4bc   : > { %2648 = vmatprep.subr.bf16.mxu1 %v15580_v6  ;;  %5023 = vmatprep.subr.bf16.mxu0 %v15583_v7  ;;  %v15667_v6 = vld [vmem:[#allocation9 + $0xabc] ss:$24 sps:$4 sm:$0xff]   ;;  %v15662_v7 = vld [vmem:[#allocation9 + $0x38] ss:$24 sps:$4 sm:$0xff]  }
 0x4bf   : > { %2649 = vmatpush1.bf16.msra.mxu1 %v15578_v8  ;;  %5024 = vmatpush1.bf16.msra.mxu0 %v15581_v9  ;;  %v15665_v8 = vld [vmem:[#allocation9 + $0xab8] ss:$24 sps:$4 sm:$0xff]   ;;  %v15670_v9 = vld [vmem:[#allocation9 + $0x6c] ss:$24 sps:$4 sm:$0xff]  }
 0x4c0   : > { %2650 = vmatprep.subr.bf16.mxu1 %v15586_v10  ;;  %5025 = vmatprep.subr.bf16.mxu0 %v15589_v11  ;;  %v15673_v10 = vld [vmem:[#allocation9 + $0xaec] ss:$24 sps:$4 sm:$0xff]   ;;  %v15668_v11 = vld [vmem:[#allocation9 + $0x68] ss:$24 sps:$4 sm:$0xff]  }
 0x4c3   : > { %2651 = vmatpush1.bf16.msra.mxu1 %v15584_v12  ;;  %5026 = vmatpush1.bf16.msra.mxu0 %v15587_v13  ;;  %v15671_v12 = vld [vmem:[#allocation9 + $0xae8] ss:$24 sps:$4 sm:$0xff]   ;;  %v15676_v13 = vld [vmem:[#allocation9 + $0x9c] ss:$24 sps:$4 sm:$0xff]  }
 0x4c4   : > { %2652 = vmatprep.subr.bf16.mxu1 %v15592_v14  ;;  %5027 = vmatprep.subr.bf16.mxu0 %v15595_v15  ;;  %v15679_v14 = vld [vmem:[#allocation9 + $0xb1c] ss:$24 sps:$4 sm:$0xff]   ;;  %v15674_v15 = vld [vmem:[#allocation9 + $0x98] ss:$24 sps:$4 sm:$0xff]  }
 0x4c7   : > { %2653 = vmatpush1.bf16.msra.mxu1 %v15590_v16  ;;  %5028 = vmatpush1.bf16.msra.mxu0 %v15593_v17  ;;  %v15677_v16 = vld [vmem:[#allocation9 + $0xb18] ss:$24 sps:$4 sm:$0xff]   ;;  %v15682_v17 = vld [vmem:[#allocation9 + $0xcc] ss:$24 sps:$4 sm:$0xff]  }
 0x4c8   : > { %2654 = vmatprep.subr.bf16.mxu1 %v15598_v18  ;;  %5029 = vmatprep.subr.bf16.mxu0 %v15601_v19  ;;  %v15685_v18 = vld [vmem:[#allocation9 + $0xb4c] ss:$24 sps:$4 sm:$0xff]   ;;  %v15680_v19 = vld [vmem:[#allocation9 + $0xc8] ss:$24 sps:$4 sm:$0xff]  }
 0x4cb   : > { %2655 = vmatpush1.bf16.msra.mxu1 %v15596_v20  ;;  %5030 = vmatpush1.bf16.msra.mxu0 %v15599_v21  ;;  %v15683_v20 = vld [vmem:[#allocation9 + $0xb48] ss:$24 sps:$4 sm:$0xff]   ;;  %v15688_v21 = vld [vmem:[#allocation9 + $0xfc] ss:$24 sps:$4 sm:$0xff]  }
 0x4cc   : > { %2656 = vmatprep.subr.bf16.mxu1 %v15604_v24  ;;  %5031 = vmatprep.subr.bf16.mxu0 %v15607_v25  ;;  %v15691_v24 = vld [vmem:[#allocation9 + $0xb7c] ss:$24 sps:$4 sm:$0xff]   ;;  %v15686_v25 = vld [vmem:[#allocation9 + $0xf8] ss:$24 sps:$4 sm:$0xff]  }
 0x4cf   : > { %2657 = vmatpush1.bf16.msra.mxu1 %v15602_v28  ;;  %5032 = vmatpush1.bf16.msra.mxu0 %v15605_v29  ;;  %v15689_v28 = vld [vmem:[#allocation9 + $0xb78] ss:$24 sps:$4 sm:$0xff]   ;;  %v15694_v29 = vld [vmem:[#allocation9 + $0x12c] ss:$24 sps:$4 sm:$0xff]  }
 0x4d0   : > { %2923 = vmatprep.subr.bf16.mxu1 %v15610_v30  ;;  %5099 = vmatprep.subr.bf16.mxu0 %v15613_v31  ;;  %v15697_v30 = vld [vmem:[#allocation9 + $0xbac] ss:$24 sps:$4 sm:$0xff]   ;;  %v15692_v31 = vld [vmem:[#allocation9 + $0x128] ss:$24 sps:$4 sm:$0xff]  }
 0x4d2   : > { %2675 = vmatmul.mubr.bf16.vlgmr.msra.gmra.mrb[20].mxu1 %v18071_v26  ;;  %5050 = vmatmul.mubr.bf16.vlgmr.msra.gmra.mrb[84].mxu0 %v18088_v34 }
 0x4d3   : > { %2924 = vmatpush1.bf16.msra.mxu1 %v15608_v32  ;;  %5100 = vmatpush1.bf16.msra.mxu0 %v15611_v33  ;;  %v15695_v32 = vld [vmem:[#allocation9 + $0xba8] ss:$24 sps:$4 sm:$0xff]   ;;  %v15700_v33 = vld [vmem:[#allocation9 + $0x15c] ss:$24 sps:$4 sm:$0xff]  }
 0x4d4   : > { %2925 = vmatprep.subr.bf16.mxu1 %v15616_v35  ;;  %5101 = vmatprep.subr.bf16.mxu0 %v15619_v36  ;;  %v15703_v35 = vld [vmem:[#allocation9 + $0xbdc] ss:$24 sps:$4 sm:$0xff]   ;;  %v15698_v36 = vld [vmem:[#allocation9 + $0x158] ss:$24 sps:$4 sm:$0xff]  }
 0x4d5   : > { %2955 = vmatprep.mubr.bf16.mxu1 %v17606_v0  ;;  %5131 = vmatprep.mubr.bf16.mxu0 %v17606_v0 }
 0x4d7   : > { %2926 = vmatpush1.bf16.msra.mxu1 %v15614_v37  ;;  %5102 = vmatpush1.bf16.msra.mxu0 %v15617_v38  ;;  %v15701_v37 = vld [vmem:[#allocation9 + $0xbd8] ss:$24 sps:$4 sm:$0xff]   ;;  %v15706_v38 = vld [vmem:[#allocation9 + $0x14] ss:$24 sps:$4 sm:$0xff]  }
 0x4d8   : > { %2927 = vmatprep.subr.bf16.mxu1 %v15622_v39  ;;  %5103 = vmatprep.subr.bf16.mxu0 %v15625_v40  ;;  %v15709_v39 = vld [vmem:[#allocation9 + $0xc04] ss:$24 sps:$4 sm:$0xff]   ;;  %v15704_v40 = vld [vmem:[#allocation9 + $0x10] ss:$24 sps:$4 sm:$0xff]  }
 0x4db   : > { %2928 = vmatpush1.bf16.msra.mxu1 %v15620_v41  ;;  %5104 = vmatpush1.bf16.msra.mxu0 %v15623_v42  ;;  %v15707_v41 = vld [vmem:[#allocation9 + $0xc00] ss:$24 sps:$4 sm:$0xff]   ;;  %v18099_v42 = vrot.slane %v18071_v26, 3 }
 0x4dc   : > { %2929 = vmatprep.subr.bf16.mxu1 %v15628_v43  ;;  %5105 = vmatprep.subr.bf16.mxu0 %v15631_v44  ;;  %v15712_v43 = vld [vmem:[#allocation9 + $0x44] ss:$24 sps:$4 sm:$0xff]   ;;  %v15715_v44 = vld [vmem:[#allocation9 + $0xc34] ss:$24 sps:$4 sm:$0xff]  }
 0x4df   : > { %2930 = vmatpush1.bf16.msra.mxu1 %v15626_v45  ;;  %5106 = vmatpush1.bf16.msra.mxu0 %v15629_v46  ;;  %v15710_v45 = vld [vmem:[#allocation9 + $0x40] ss:$24 sps:$4 sm:$0xff]   ;;  %v15713_v46 = vld [vmem:[#allocation9 + $0xc30] ss:$24 sps:$4 sm:$0xff]  }
 0x4e0   : > { %2931 = vmatprep.subr.bf16.mxu1 %v15634_v47  ;;  %5107 = vmatprep.subr.bf16.mxu0 %v15637_v48  ;;  %v15718_v47 = vld [vmem:[#allocation9 + $0x74] ss:$24 sps:$4 sm:$0xff]   ;;  %v15721_v48 = vld [vmem:[#allocation9 + $0xc64] ss:$24 sps:$4 sm:$0xff]  }
 0x4e3   : > { %2932 = vmatpush1.bf16.msra.mxu1 %v15632_v49  ;;  %5108 = vmatpush1.bf16.msra.mxu0 %v15635_v50  ;;  %v15716_v49 = vld [vmem:[#allocation9 + $0x70] ss:$24 sps:$4 sm:$0xff]   ;;  %v15719_v50 = vld [vmem:[#allocation9 + $0xc60] ss:$24 sps:$4 sm:$0xff]  }
 0x4e4   : > { %2933 = vmatprep.subr.bf16.mxu1 %v15640_v51  ;;  %5109 = vmatprep.subr.bf16.mxu0 %v15643_v52  ;;  %v15724_v51 = vld [vmem:[#allocation9 + $0xa4] ss:$24 sps:$4 sm:$0xff]   ;;  %v15727_v52 = vld [vmem:[#allocation9 + $0xc94] ss:$24 sps:$4 sm:$0xff]  }
 0x4e7   : > { %2934 = vmatpush1.bf16.msra.mxu1 %v15638_v53  ;;  %5110 = vmatpush1.bf16.msra.mxu0 %v15641_v54  ;;  %v15722_v53 = vld [vmem:[#allocation9 + $0xa0] ss:$24 sps:$4 sm:$0xff]   ;;  %v15725_v54 = vld [vmem:[#allocation9 + $0xc90] ss:$24 sps:$4 sm:$0xff]  }
 0x4e8   : > { %2935 = vmatprep.subr.bf16.mxu1 %v15646_v55  ;;  %5111 = vmatprep.subr.bf16.mxu0 %v15649_v56  ;;  %v15730_v55 = vld [vmem:[#allocation9 + $0xd4] ss:$24 sps:$4 sm:$0xff]   ;;  %v15733_v56 = vld [vmem:[#allocation9 + $0xcc4] ss:$24 sps:$4 sm:$0xff]  }
 0x4eb   : > { %2936 = vmatpush1.bf16.msra.mxu1 %v15644_v57  ;;  %5112 = vmatpush1.bf16.msra.mxu0 %v15647_v58  ;;  %v15728_v57 = vld [vmem:[#allocation9 + $0xd0] ss:$24 sps:$4 sm:$0xff]   ;;  %v15731_v58 = vld [vmem:[#allocation9 + $0xcc0] ss:$24 sps:$4 sm:$0xff]  }
 0x4ec   : > { %2937 = vmatprep.subr.bf16.mxu1 %v15652_v59  ;;  %5113 = vmatprep.subr.bf16.mxu0 %v15655_v61  ;;  %v15736_v59 = vld [vmem:[#allocation9 + $0x104] ss:$24 sps:$4 sm:$0xff]   ;;  %v15739_v61 = vld [vmem:[#allocation9 + $0xcf4] ss:$24 sps:$4 sm:$0xff]  }
 0x4ef   : > { %2938 = vmatpush1.bf16.msra.mxu1 %v15650_v62  ;;  %5114 = vmatpush1.bf16.msra.mxu0 %v15653_v63  ;;  %v15734_v62 = vld [vmem:[#allocation9 + $0x100] ss:$24 sps:$4 sm:$0xff]   ;;  %v15737_v63 = vld [vmem:[#allocation9 + $0xcf0] ss:$24 sps:$4 sm:$0xff]  }
 0x4f0   : > { %2964 = vmatprep.subr.bf16.mxu1 %v15658_v1  ;;  %5478 = vmatprep.subr.bf16.mxu0 %v15661_v2  ;;  %v15742_v1 = vld [vmem:[#allocation9 + $0x134] ss:$24 sps:$4 sm:$0xff]   ;;  %v15745_v2 = vld [vmem:[#allocation9 + $0xd24] ss:$24 sps:$4 sm:$0xff]  }
 0x4f2   : > { %2956 = vmatmul.mubr.bf16.vlgmr.msra.gmra.mrb[24].mxu1 %v18064_v22  ;;  %5132 = vmatmul.mubr.bf16.vlgmr.msra.gmra.mrb[88].mxu0 %v18088_v34 }
 0x4f3   : > { %2965 = vmatpush1.bf16.msra.mxu1 %v15656_v3  ;;  %5479 = vmatpush1.bf16.msra.mxu0 %v15659_v4  ;;  %v15740_v3 = vld [vmem:[#allocation9 + $0x130] ss:$24 sps:$4 sm:$0xff]   ;;  %v15743_v4 = vld [vmem:[#allocation9 + $0xd20] ss:$24 sps:$4 sm:$0xff]  }
 0x4f4   : > { %2966 = vmatprep.subr.bf16.mxu1 %v15664_v5  ;;  %5480 = vmatprep.subr.bf16.mxu0 %v15667_v6  ;;  %v15748_v5 = vld [vmem:[#allocation9 + $0x164] ss:$24 sps:$4 sm:$0xff]   ;;  %v15751_v6 = vld [vmem:[#allocation9 + $0xd54] ss:$24 sps:$4 sm:$0xff]  }
 0x4f5   : > { %2996 = vmatprep.mubr.bf16.mxu1 %v17606_v0  ;;  %5510 = vmatprep.mubr.bf16.mxu0 %v17606_v0 }
 0x4f7   : > { %2967 = vmatpush1.bf16.msra.mxu1 %v15662_v7  ;;  %5481 = vmatpush1.bf16.msra.mxu0 %v15665_v8  ;;  %v15746_v7 = vld [vmem:[#allocation9 + $0x160] ss:$24 sps:$4 sm:$0xff]   ;;  %v15749_v8 = vld [vmem:[#allocation9 + $0xd50] ss:$24 sps:$4 sm:$0xff]  }
 0x4f8   : > { %2968 = vmatprep.subr.bf16.mxu1 %v15670_v9  ;;  %5482 = vmatprep.subr.bf16.mxu0 %v15673_v10  ;;  %v15754_v9 = vld [vmem:[#allocation9 + $0x304] ss:$24 sps:$4 sm:$0xff]   ;;  %v15758_v10 = vld [vmem:[#allocation9 + $0xc14] ss:$24 sps:$4 sm:$0xff]  }
 0x4fb   : > { %2969 = vmatpush1.bf16.msra.mxu1 %v15668_v11  ;;  %5483 = vmatpush1.bf16.msra.mxu0 %v15671_v12  ;;  %v15752_v11 = vld [vmem:[#allocation9 + $0x300] ss:$24 sps:$4 sm:$0xff]   ;;  %v15756_v12 = vld [vmem:[#allocation9 + $0xc10] ss:$24 sps:$4 sm:$0xff]  }
 0x4fc   : > { %2970 = vmatprep.subr.bf16.mxu1 %v15676_v13  ;;  %5484 = vmatprep.subr.bf16.mxu0 %v15679_v14  ;;  %v15761_v13 = vld [vmem:[#allocation9 + $0x334] ss:$24 sps:$4 sm:$0xff]   ;;  %v15764_v14 = vld [vmem:[#allocation9 + $0xc44] ss:$24 sps:$4 sm:$0xff]  }
 0x4ff   : > { %2971 = vmatpush1.bf16.msra.mxu1 %v15674_v15  ;;  %5485 = vmatpush1.bf16.msra.mxu0 %v15677_v16  ;;  %v18105_v15 = vld [vmem:[#allocation2 + $0x4] sm:$0xf]  ;;  %v15759_v16 = vld [vmem:[#allocation9 + $0x330] ss:$24 sps:$4 sm:$0xff]  }
 0x500   : > { %2972 = vmatprep.subr.bf16.mxu1 %v15682_v17  ;;  %5486 = vmatprep.subr.bf16.mxu0 %v15685_v18  ;;  %v15762_v17 = vld [vmem:[#allocation9 + $0xc40] ss:$24 sps:$4 sm:$0xff]   ;;  %v15767_v18 = vld [vmem:[#allocation9 + $0x364] ss:$24 sps:$4 sm:$0xff]  }
 0x503   : > { %2973 = vmatpush1.bf16.msra.mxu1 %v15680_v19  ;;  %5487 = vmatpush1.bf16.msra.mxu0 %v15683_v20  ;;  %v15770_v19 = vld [vmem:[#allocation9 + $0xc74] ss:$24 sps:$4 sm:$0xff]   ;;  %v15765_v20 = vld [vmem:[#allocation9 + $0x360] ss:$24 sps:$4 sm:$0xff]  }
 0x504   : > { %2974 = vmatprep.subr.bf16.mxu1 %v15688_v21  ;;  %5488 = vmatprep.subr.bf16.mxu0 %v15691_v24  ;;  %v15768_v21 = vld [vmem:[#allocation9 + $0xc70] ss:$24 sps:$4 sm:$0xff]   ;;  %v15776_v24 = vld [vmem:[#allocation9 + $0xca4] ss:$24 sps:$4 sm:$0xff]  }
 0x507   : > { %2975 = vmatpush1.bf16.msra.mxu1 %v15686_v25  ;;  %5489 = vmatpush1.bf16.msra.mxu0 %v15689_v28  ;;  %v15771_v25 = vld [vmem:[#allocation9 + $0x390] ss:$24 sps:$4 sm:$0xff]   ;;  %v15774_v28 = vld [vmem:[#allocation9 + $0xca0] ss:$24 sps:$4 sm:$0xff]  }
 0x508   : > { %2976 = vmatprep.subr.bf16.mxu1 %v15694_v29  ;;  %5490 = vmatprep.subr.bf16.mxu0 %v15697_v30  ;;  %v15779_v29 = vld [vmem:[#allocation9 + $0x3c4] ss:$24 sps:$4 sm:$0xff]   ;;  %v15782_v30 = vld [vmem:[#allocation9 + $0xcd4] ss:$24 sps:$4 sm:$0xff]  }
 0x50b   : > { %2977 = vmatpush1.bf16.msra.mxu1 %v15692_v31  ;;  %5491 = vmatpush1.bf16.msra.mxu0 %v15695_v32  ;;  %v15777_v31 = vld [vmem:[#allocation9 + $0x3c0] ss:$24 sps:$4 sm:$0xff]   ;;  %v15780_v32 = vld [vmem:[#allocation9 + $0xcd0] ss:$24 sps:$4 sm:$0xff]  }
 0x50c   : > { %2978 = vmatprep.subr.bf16.mxu1 %v15700_v33  ;;  %5492 = vmatprep.subr.bf16.mxu0 %v15703_v35  ;;  %v15785_v33 = vld [vmem:[#allocation9 + $0x3f4] ss:$24 sps:$4 sm:$0xff]   ;;  %v15788_v35 = vld [vmem:[#allocation9 + $0xd04] ss:$24 sps:$4 sm:$0xff]  }
 0x50f   : > { %2979 = vmatpush1.bf16.msra.mxu1 %v15698_v36  ;;  %5493 = vmatpush1.bf16.msra.mxu0 %v15701_v37  ;;  %v15783_v36 = vld [vmem:[#allocation9 + $0x3f0] ss:$24 sps:$4 sm:$0xff]   ;;  %v15786_v37 = vld [vmem:[#allocation9 + $0xd00] ss:$24 sps:$4 sm:$0xff]  }
 0x510   : > { %3005 = vmatprep.subr.bf16.mxu1 %v15706_v38  ;;  %5855 = vmatprep.subr.bf16.mxu0 %v15709_v39  ;;  %v15791_v38 = vld [vmem:[#allocation9 + $0x424] ss:$24 sps:$4 sm:$0xff]   ;;  %v15794_v39 = vld [vmem:[#allocation9 + $0xd34] ss:$24 sps:$4 sm:$0xff]  }
 0x512   : > { %2997 = vmatmul.mubr.bf16.vlgmr.msra.gmra.mrb[28].mxu1 %v18064_v22  ;;  %5511 = vmatmul.mubr.bf16.vlgmr.msra.gmra.mrb[92].mxu0 %v18099_v42 }
 0x513   : > { %3006 = vmatpush1.bf16.msra.mxu1 %v15704_v40  ;;  %5856 = vmatpush1.bf16.msra.mxu0 %v15707_v41  ;;  %v15789_v40 = vld [vmem:[#allocation9 + $0x420] ss:$24 sps:$4 sm:$0xff]   ;;  %v15792_v41 = vld [vmem:[#allocation9 + $0xd30] ss:$24 sps:$4 sm:$0xff]  }
 0x514   : > { %3007 = vmatprep.subr.bf16.mxu1 %v15712_v43  ;;  %5857 = vmatprep.subr.bf16.mxu0 %v15715_v44  ;;  %v15797_v43 = vld [vmem:[#allocation9 + $0x454] ss:$24 sps:$4 sm:$0xff]   ;;  %v15800_v44 = vld [vmem:[#allocation9 + $0xd64] ss:$24 sps:$4 sm:$0xff]  }
 0x515   : > { %3037 = vmatprep.mubr.bf16.mxu1 %v17606_v0  ;;  %5887 = vmatprep.mubr.bf16.mxu0 %v17606_v0 }
 0x517   : > { %3008 = vmatpush1.bf16.msra.mxu1 %v15710_v45  ;;  %5858 = vmatpush1.bf16.msra.mxu0 %v15713_v46  ;;  %v15795_v45 = vld [vmem:[#allocation9 + $0x450] ss:$24 sps:$4 sm:$0xff]   ;;  %v15798_v46 = vld [vmem:[#allocation9 + $0xd60] ss:$24 sps:$4 sm:$0xff]  }
 0x518   : > { %3009 = vmatprep.subr.bf16.mxu1 %v15718_v47  ;;  %5859 = vmatprep.subr.bf16.mxu0 %v15721_v48  ;;  %v15803_v47 = vld [vmem:[#allocation9 + $0x30c] ss:$24 sps:$4 sm:$0xff]  }
 0x519   : > { %v15806_v48 = vld [vmem:[#allocation9 + $0xd8c] ss:$24 sps:$4 sm:$0xff]  }
 0x51b   : > { %3010 = vmatpush1.bf16.msra.mxu1 %v15716_v49  ;;  %5860 = vmatpush1.bf16.msra.mxu0 %v15719_v50  ;;  %v15801_v49 = vld [vmem:[#allocation9 + $0x308] ss:$24 sps:$4 sm:$0xff]  }
 0x51c   : > { %3011 = vmatprep.subr.bf16.mxu1 %v15724_v51  ;;  %5861 = vmatprep.subr.bf16.mxu0 %v15727_v52  ;;  %v15804_v50 = vld [vmem:[#allocation9 + $0xd88] ss:$24 sps:$4 sm:$0xff]   ;;  %v18112_v51 = vrot.slane %v18068_v23, 1  ;;  %v15809_v52 = vld [vmem:[#allocation9 + $0x33c] ss:$24 sps:$4 sm:$0xff]  }
 0x51d   : > { %v15813_v23 = vld [vmem:[#allocation9 + $0x368] ss:$24 sps:$4 sm:$0xff]  }
 0x51f   : > { %3012 = vmatpush1.bf16.msra.mxu1 %v15722_v53  ;;  %5862 = vmatpush1.bf16.msra.mxu0 %v15725_v54  ;;  %v15812_v53 = vld [vmem:[#allocation9 + $0xdbc] ss:$24 sps:$4 sm:$0xff]   ;;  %v15807_v54 = vld [vmem:[#allocation9 + $0x338] ss:$24 sps:$4 sm:$0xff]  }
 0x520   : > { %3013 = vmatprep.subr.bf16.mxu1 %v15730_v55  ;;  %5863 = vmatprep.subr.bf16.mxu0 %v15733_v56  ;;  %v15810_v55 = vld [vmem:[#allocation9 + $0xdb8] ss:$24 sps:$4 sm:$0xff]   ;;  %v15815_v56 = vld [vmem:[#allocation9 + $0x36c] ss:$24 sps:$4 sm:$0xff]  }
 0x523   : > { %3014 = vmatpush1.bf16.msra.mxu1 %v15728_v57  ;;  %5864 = vmatpush1.bf16.msra.mxu0 %v15731_v58  ;;  %v15818_v57 = vld [vmem:[#allocation9 + $0xdec] ss:$24 sps:$4 sm:$0xff]   ;;  %v15816_v58 = vld [vmem:[#allocation9 + $0xde8] ss:$24 sps:$4 sm:$0xff]  }
 0x524   : > { %3015 = vmatprep.subr.bf16.mxu1 %v15736_v59  ;;  %5865 = vmatprep.subr.bf16.mxu0 %v15739_v61  ;;  %v15821_v59 = vld [vmem:[#allocation9 + $0x39c] ss:$24 sps:$4 sm:$0xff]  }
 0x525   : > { %v15824_v61 = vld [vmem:[#allocation9 + $0xe1c] ss:$24 sps:$4 sm:$0xff]  }
 0x527   : > { %3016 = vmatpush1.bf16.msra.mxu1 %v15734_v62  ;;  %5866 = vmatpush1.bf16.msra.mxu0 %v15737_v63  ;;  %v15819_v62 = vld [vmem:[#allocation9 + $0x398] ss:$24 sps:$4 sm:$0xff]  }
 0x528   : > { %3017 = vmatprep.subr.bf16.mxu1 %v15742_v1  ;;  %5867 = vmatprep.subr.bf16.mxu0 %v15745_v2  ;;  %v15822_v63 = vld [vmem:[#allocation9 + $0xe18] ss:$24 sps:$4 sm:$0xff]   ;;  %v15827_v1 = vld [vmem:[#allocation9 + $0x3cc] ss:$24 sps:$4 sm:$0xff]  }
 0x529   : > { %v15830_v2 = vld [vmem:[#allocation9 + $0xe4c] ss:$24 sps:$4 sm:$0xff]  }
 0x52b   : > { %3018 = vmatpush1.bf16.msra.mxu1 %v15740_v3  ;;  %5868 = vmatpush1.bf16.msra.mxu0 %v15743_v4  ;;  %v15825_v3 = vld [vmem:[#allocation9 + $0x3c8] ss:$24 sps:$4 sm:$0xff]  }
 0x52c   : > { %3019 = vmatprep.subr.bf16.mxu1 %v15748_v5  ;;  %5869 = vmatprep.subr.bf16.mxu0 %v15751_v6  ;;  %v15828_v4 = vld [vmem:[#allocation9 + $0xe48] ss:$24 sps:$4 sm:$0xff]   ;;  %v15833_v5 = vld [vmem:[#allocation9 + $0x3fc] ss:$24 sps:$4 sm:$0xff]  }
 0x52d   : > { %v15836_v6 = vld [vmem:[#allocation9 + $0xe7c] ss:$24 sps:$4 sm:$0xff]  }
 0x52f   : > { %3020 = vmatpush1.bf16.msra.mxu1 %v15746_v7  ;;  %5870 = vmatpush1.bf16.msra.mxu0 %v15749_v8  ;;  %v15831_v7 = vld [vmem:[#allocation9 + $0x3f8] ss:$24 sps:$4 sm:$0xff]  }
 0x530   : > { %3337 = vmatprep.subr.bf16.mxu1 %v15754_v9  ;;  %5937 = vmatprep.subr.bf16.mxu0 %v15758_v10  ;;  %v15834_v8 = vld [vmem:[#allocation9 + $0xe78] ss:$24 sps:$4 sm:$0xff]   ;;  %v15839_v9 = vld [vmem:[#allocation9 + $0x42c] ss:$24 sps:$4 sm:$0xff]  }
 0x531   : > { %v15842_v10 = vld [vmem:[#allocation9 + $0xeac] ss:$24 sps:$4 sm:$0xff]  }
 0x532   : > { %3038 = vmatmul.mubr.bf16.vlgmr.msra.gmra.mrb[32].mxu1 %v18064_v22  ;;  %5888 = vmatmul.mubr.bf16.vlgmr.msra.gmra.mrb[96].mxu0 %v18105_v15  ;;  %v15773_v22 = vld [vmem:[#allocation9 + $0x394] ss:$24 sps:$4 sm:$0xff]  }
 0x533   : > { %3338 = vmatpush1.bf16.msra.mxu1 %v15752_v11  ;;  %5938 = vmatpush1.bf16.msra.mxu0 %v15756_v12 }
 0x534   : > { %3339 = vmatprep.subr.bf16.mxu1 %v15761_v13  ;;  %5939 = vmatprep.subr.bf16.mxu0 %v15764_v14 }
 0x535   : > { %3369 = vmatprep.mubr.bf16.mxu1 %v17606_v0  ;;  %5969 = vmatprep.mubr.bf16.mxu0 %v17606_v0 }
 0x537   : > { %3340 = vmatpush1.bf16.msra.mxu1 %v15759_v16  ;;  %5940 = vmatpush1.bf16.msra.mxu0 %v15762_v17 }
 0x538   : > { %3341 = vmatprep.subr.bf16.mxu1 %v15767_v18  ;;  %5941 = vmatprep.subr.bf16.mxu0 %v15770_v19  ;;  %v15837_v18 = vld [vmem:[#allocation9 + $0x428] ss:$24 sps:$4 sm:$0xff]  }
 0x539   : > { %v15840_v19 = vld [vmem:[#allocation9 + $0xea8] ss:$24 sps:$4 sm:$0xff]  }
 0x53b   : > { %3342 = vmatpush1.bf16.msra.mxu1 %v15765_v20  ;;  %5942 = vmatpush1.bf16.msra.mxu0 %v15768_v21 }
 0x53c   : > { %3343 = vmatprep.subr.bf16.mxu1 %v15773_v22  ;;  %5943 = vmatprep.subr.bf16.mxu0 %v15776_v24  ;;  %v15845_v22 = vld [vmem:[#allocation9 + $0x45c] ss:$24 sps:$4 sm:$0xff]  }
 0x53d   : > { %v15848_v24 = vld [vmem:[#allocation9 + $0xedc] ss:$24 sps:$4 sm:$0xff]  }
 0x53f   : > { %3344 = vmatpush1.bf16.msra.mxu1 %v15771_v25  ;;  %5944 = vmatpush1.bf16.msra.mxu0 %v15774_v28  ;;  %v15843_v25 = vld [vmem:[#allocation9 + $0x458] ss:$24 sps:$4 sm:$0xff]  }
 0x540   : > { %3345 = vmatprep.subr.bf16.mxu1 %v15779_v29  ;;  %5945 = vmatprep.subr.bf16.mxu0 %v15782_v30  ;;  %v15846_v28 = vld [vmem:[#allocation9 + $0xed8] ss:$24 sps:$4 sm:$0xff]   ;;  %v18128_v29 = vcombine.low %v18105_v15, %v18105_v15  ;;  %v15851_v30 = vld [vmem:[#allocation9 + $0x314] ss:$24 sps:$4 sm:$0xff]  }
 0x543   : > { %3346 = vmatpush1.bf16.msra.mxu1 %v15777_v31  ;;  %5946 = vmatpush1.bf16.msra.mxu0 %v15780_v32  ;;  %v15854_v31 = vld [vmem:[#allocation9 + $0xf04] ss:$24 sps:$4 sm:$0xff]   ;;  %v15849_v32 = vld [vmem:[#allocation9 + $0x310] ss:$24 sps:$4 sm:$0xff]  }
 0x544   : > { %3347 = vmatprep.subr.bf16.mxu1 %v15785_v33  ;;  %5947 = vmatprep.subr.bf16.mxu0 %v15788_v35  ;;  %v15852_v33 = vld [vmem:[#allocation9 + $0xf00] ss:$24 sps:$4 sm:$0xff]   ;;  %v18131_v35 = vshrl.u32 %v18128_v29, 16 }
 0x547   : > { %3348 = vmatpush1.bf16.msra.mxu1 %v15783_v36  ;;  %5948 = vmatpush1.bf16.msra.mxu0 %v15786_v37  ;;  %v15857_v36 = vld [vmem:[#allocation9 + $0x344] ss:$24 sps:$4 sm:$0xff]   ;;  %v15860_v37 = vld [vmem:[#allocation9 + $0xf34] ss:$24 sps:$4 sm:$0xff]  }
 0x548   : > { %3349 = vmatprep.subr.bf16.mxu1 %v15791_v38  ;;  %5949 = vmatprep.subr.bf16.mxu0 %v15794_v39  ;;  %v15858_v38 = vld [vmem:[#allocation9 + $0xf30] ss:$24 sps:$4 sm:$0xff]   ;;  %v15863_v39 = vld [vmem:[#allocation9 + $0x374] ss:$24 sps:$4 sm:$0xff]  }
 0x54b   : > { %3350 = vmatpush1.bf16.msra.mxu1 %v15789_v40  ;;  %5950 = vmatpush1.bf16.msra.mxu0 %v15792_v41  ;;  %v15866_v40 = vld [vmem:[#allocation9 + $0xf64] ss:$24 sps:$4 sm:$0xff]   ;;  %v15861_v41 = vld [vmem:[#allocation9 + $0x370] ss:$24 sps:$4 sm:$0xff]  }
 0x54c   : > { %3351 = vmatprep.subr.bf16.mxu1 %v15797_v43  ;;  %5951 = vmatprep.subr.bf16.mxu0 %v15800_v44  ;;  %v15864_v43 = vld [vmem:[#allocation9 + $0xf60] ss:$24 sps:$4 sm:$0xff]   ;;  %v15869_v44 = vld [vmem:[#allocation9 + $0x3a4] ss:$24 sps:$4 sm:$0xff]  }
 0x54f   : > { %3352 = vmatpush1.bf16.msra.mxu1 %v15795_v45  ;;  %5952 = vmatpush1.bf16.msra.mxu0 %v15798_v46  ;;  %v15872_v45 = vld [vmem:[#allocation9 + $0xf94] ss:$24 sps:$4 sm:$0xff]   ;;  %v15867_v46 = vld [vmem:[#allocation9 + $0x3a0] ss:$24 sps:$4 sm:$0xff]  }
 0x550   : > { %3378 = vmatprep.subr.bf16.mxu1 %v15803_v47  ;;  %6321 = vmatprep.subr.bf16.mxu0 %v15806_v48  ;;  %v15870_v47 = vld [vmem:[#allocation9 + $0xf90] ss:$24 sps:$4 sm:$0xff]   ;;  %v15875_v48 = vld [vmem:[#allocation9 + $0x3d4] ss:$24 sps:$4 sm:$0xff]  }
 0x552   : > { %3370 = vmatmul.mubr.bf16.vlgmr.msra.gmra.mrb[36].mxu1 %v18112_v51  ;;  %5970 = vmatmul.mubr.bf16.vlgmr.msra.gmra.mrb[100].mxu0 %v18105_v15  ;;  %v15855_v15 = vld [vmem:[#allocation9 + $0x340] ss:$24 sps:$4 sm:$0xff]  }
 0x553   : > { %3379 = vmatpush1.bf16.msra.mxu1 %v15801_v49  ;;  %6322 = vmatpush1.bf16.msra.mxu0 %v15804_v50  ;;  %v15878_v49 = vld [vmem:[#allocation9 + $0xfc4] ss:$24 sps:$4 sm:$0xff]   ;;  %v15873_v50 = vld [vmem:[#allocation9 + $0x3d0] ss:$24 sps:$4 sm:$0xff]  }
 0x554   : > { %3380 = vmatprep.subr.bf16.mxu1 %v15809_v52  ;;  %6323 = vmatprep.subr.bf16.mxu0 %v15812_v53  ;;  %v15876_v52 = vld [vmem:[#allocation9 + $0xfc0] ss:$24 sps:$4 sm:$0xff]   ;;  %v15881_v53 = vld [vmem:[#allocation9 + $0x404] ss:$24 sps:$4 sm:$0xff]  }
 0x555   : > { %3410 = vmatprep.mubr.bf16.mxu1 %v17606_v0  ;;  %6353 = vmatprep.mubr.bf16.mxu0 %v17606_v0 }
 0x557   : > { %3381 = vmatpush1.bf16.msra.mxu1 %v15807_v54  ;;  %6324 = vmatpush1.bf16.msra.mxu0 %v15810_v55  ;;  %v15884_v54 = vld [vmem:[#allocation9 + $0xff4] ss:$24 sps:$4 sm:$0xff]   ;;  %v15879_v55 = vld [vmem:[#allocation9 + $0x400] ss:$24 sps:$4 sm:$0xff]  }
 0x558   : > { %3382 = vmatprep.subr.bf16.mxu1 %v15815_v56  ;;  %6325 = vmatprep.subr.bf16.mxu0 %v15818_v57  ;;  %v15882_v56 = vld [vmem:[#allocation9 + $0xff0] ss:$24 sps:$4 sm:$0xff]   ;;  %v15887_v57 = vld [vmem:[#allocation9 + $0x434] ss:$24 sps:$4 sm:$0xff]  }
 0x55b   : > { %3383 = vmatpush1.bf16.msra.mxu1 %v15813_v23  ;;  %6326 = vmatpush1.bf16.msra.mxu0 %v15816_v58  ;;  %v15890_v23 = vld [vmem:[#allocation9 + $0x1024] ss:$24 sps:$4 sm:$0xff]  }
 0x55c   : > { %3384 = vmatprep.subr.bf16.mxu1 %v15821_v59  ;;  %6327 = vmatprep.subr.bf16.mxu0 %v15824_v61 }
 0x55f   : > { %3385 = vmatpush1.bf16.msra.mxu1 %v15819_v62  ;;  %6328 = vmatpush1.bf16.msra.mxu0 %v15822_v63 }
 0x560   : > { %3386 = vmatprep.subr.bf16.mxu1 %v15827_v1  ;;  %6329 = vmatprep.subr.bf16.mxu0 %v15830_v2  ;;  %v15885_v2 = vld [vmem:[#allocation9 + $0x430] ss:$24 sps:$4 sm:$0xff]  }
 0x563   : > { %3387 = vmatpush1.bf16.msra.mxu1 %v15825_v3  ;;  %6330 = vmatpush1.bf16.msra.mxu0 %v15828_v4  ;;  %v15888_v3 = vld [vmem:[#allocation9 + $0x1020] ss:$24 sps:$4 sm:$0xff]  }
 0x564   : > { %3388 = vmatprep.subr.bf16.mxu1 %v15833_v5  ;;  %6331 = vmatprep.subr.bf16.mxu0 %v15836_v6  ;;  %v15893_v6 = vld [vmem:[#allocation9 + $0x464] ss:$24 sps:$4 sm:$0xff]  }
 0x565   : > { %v18118_v11 = vpop.f32.mrb[12].mxu1  ;;  %v18120_v12 = vpop.f32.mrb[76].mxu0 }
 0x566   : > { %v18122_v13 = vpop.f32.mrb[13].mxu1  ;;  %v18124_v14 = vpop.f32.mrb[77].mxu0 }
 0x567   : > { %3389 = vmatpush1.bf16.msra.mxu1 %v15831_v7  ;;  %6332 = vmatpush1.bf16.msra.mxu0 %v15834_v8  ;;  %v2598_v16 = vpop.f32.mrb[14].mxu1  ;;  %v4297_v17 = vpop.f32.mrb[78].mxu0  ;;  %v15896_v7 = vld [vmem:[#allocation9 + $0x1054] ss:$24 sps:$4 sm:$0xff]   ;;  %v15891_v8 = vld [vmem:[#allocation9 + $0x460] ss:$24 sps:$4 sm:$0xff]  }
 0x568   : > { %v2599_v20 = vpop.f32.mrb[15].mxu1  ;;  %v4298_v21 = vpop.f32.mrb[79].mxu0  ;;  %3390 = vmatprep.subr.bf16.mxu1 %v15839_v9  ;;  %6333 = vmatprep.subr.bf16.mxu0 %v15842_v10  ;;  %v15894_v9 = vld [vmem:[#allocation9 + $0x1050] ss:$24 sps:$4 sm:$0xff]   ;;  %v15899_v10 = vld [vmem:[#allocation9 + $0x484] ss:$24 sps:$4 sm:$0xff]  }
 0x569   : > { %v15902_v16 = vld [vmem:[#allocation9 + $0xf14] ss:$24 sps:$4 sm:$0xff]   ;;  %v15897_v17 = vld [vmem:[#allocation9 + $0x480] ss:$24 sps:$4 sm:$0xff]   ;;  %v15908_v21 = vld [vmem:[#allocation9 + $0xf44] ss:$24 sps:$4 sm:$0xff]  }
 0x56a   : > { %v15905_v20 = vld [vmem:[#allocation9 + $0x4b4] ss:$24 sps:$4 sm:$0xff]  }
 0x56b   : > { %3391 = vmatpush1.bf16.msra.mxu1 %v15837_v18  ;;  %6334 = vmatpush1.bf16.msra.mxu0 %v15840_v19  ;;  %v15900_v18 = vld [vmem:[#allocation9 + $0xf10] ss:$24 sps:$4 sm:$0xff]   ;;  %v18146_v19 = vrot.slane %v18128_v29, 1 }
 0x56c   : > { %3392 = vmatprep.subr.bf16.mxu1 %v15845_v22  ;;  %6335 = vmatprep.subr.bf16.mxu0 %v15848_v24  ;;  %v15903_v22 = vld [vmem:[#allocation9 + $0x4b0] ss:$24 sps:$4 sm:$0xff]   ;;  %v15906_v24 = vld [vmem:[#allocation9 + $0xf40] ss:$24 sps:$4 sm:$0xff]  }
 0x56f   : > { %3393 = vmatpush1.bf16.msra.mxu1 %v15843_v25  ;;  %6336 = vmatpush1.bf16.msra.mxu0 %v15846_v28  ;;  %v15911_v25 = vld [vmem:[#allocation9 + $0x4e4] ss:$24 sps:$4 sm:$0xff]   ;;  %v15914_v28 = vld [vmem:[#allocation9 + $0xf74] ss:$24 sps:$4 sm:$0xff]  }
 0x570   : > { %3419 = vmatprep.subr.bf16.mxu1 %v15851_v30  ;;  %6700 = vmatprep.subr.bf16.mxu0 %v15854_v31  ;;  %v15909_v30 = vld [vmem:[#allocation9 + $0x4e0] ss:$24 sps:$4 sm:$0xff]   ;;  %v15912_v31 = vld [vmem:[#allocation9 + $0xf70] ss:$24 sps:$4 sm:$0xff]  }
 0x572   : > { %3411 = vmatmul.mubr.bf16.vlgmr.msra.gmra.mrb[40].mxu1 %v18112_v51  ;;  %6354 = vmatmul.mubr.bf16.vlgmr.msra.gmra.mrb[104].mxu0 %v18131_v35 }
 0x573   : > { %3420 = vmatpush1.bf16.msra.mxu1 %v15849_v32  ;;  %6701 = vmatpush1.bf16.msra.mxu0 %v15852_v33  ;;  %v15920_v32 = vld [vmem:[#allocation9 + $0xfa4] ss:$24 sps:$4 sm:$0xff]   ;;  %v15915_v33 = vld [vmem:[#allocation9 + $0x510] ss:$24 sps:$4 sm:$0xff]  }
 0x574   : > { %3421 = vmatprep.subr.bf16.mxu1 %v15857_v36  ;;  %6702 = vmatprep.subr.bf16.mxu0 %v15860_v37  ;;  %v15918_v36 = vld [vmem:[#allocation9 + $0xfa0] ss:$24 sps:$4 sm:$0xff]   ;;  %v15923_v37 = vld [vmem:[#allocation9 + $0x544] ss:$24 sps:$4 sm:$0xff]  }
 0x575   : > { %3451 = vmatprep.mubr.bf16.mxu1 %v17606_v0  ;;  %6732 = vmatprep.mubr.bf16.mxu0 %v17606_v0 }
 0x577   : > { %3422 = vmatpush1.bf16.msra.mxu1 %v15855_v15  ;;  %6703 = vmatpush1.bf16.msra.mxu0 %v15858_v38  ;;  %v15926_v15 = vld [vmem:[#allocation9 + $0xfd4] ss:$24 sps:$4 sm:$0xff]   ;;  %v15921_v38 = vld [vmem:[#allocation9 + $0x540] ss:$24 sps:$4 sm:$0xff]  }
 0x578   : > { %3423 = vmatprep.subr.bf16.mxu1 %v15863_v39  ;;  %6704 = vmatprep.subr.bf16.mxu0 %v15866_v40  ;;  %v15924_v39 = vld [vmem:[#allocation9 + $0xfd0] ss:$24 sps:$4 sm:$0xff]   ;;  %v15929_v40 = vld [vmem:[#allocation9 + $0x574] ss:$24 sps:$4 sm:$0xff]  }
 0x57b   : > { %3424 = vmatpush1.bf16.msra.mxu1 %v15861_v41  ;;  %6705 = vmatpush1.bf16.msra.mxu0 %v15864_v43  ;;  %v15932_v41 = vld [vmem:[#allocation9 + $0x1004] ss:$24 sps:$4 sm:$0xff]   ;;  %v15927_v43 = vld [vmem:[#allocation9 + $0x570] ss:$24 sps:$4 sm:$0xff]  }
 0x57c   : > { %3425 = vmatprep.subr.bf16.mxu1 %v15869_v44  ;;  %6706 = vmatprep.subr.bf16.mxu0 %v15872_v45  ;;  %v15930_v44 = vld [vmem:[#allocation9 + $0x1000] ss:$24 sps:$4 sm:$0xff]   ;;  %v15935_v45 = vld [vmem:[#allocation9 + $0x5a4] ss:$24 sps:$4 sm:$0xff]  }
 0x57f   : > { %3426 = vmatpush1.bf16.msra.mxu1 %v15867_v46  ;;  %6707 = vmatpush1.bf16.msra.mxu0 %v15870_v47  ;;  %v15938_v46 = vld [vmem:[#allocation9 + $0x1034] ss:$24 sps:$4 sm:$0xff]  }
 0x580   : > { %3427 = vmatprep.subr.bf16.mxu1 %v15875_v48  ;;  %6708 = vmatprep.subr.bf16.mxu0 %v15878_v49 }
 0x583   : > { %3428 = vmatpush1.bf16.msra.mxu1 %v15873_v50  ;;  %6709 = vmatpush1.bf16.msra.mxu0 %v15876_v52 }
 0x584   : > { %3429 = vmatprep.subr.bf16.mxu1 %v15881_v53  ;;  %6710 = vmatprep.subr.bf16.mxu0 %v15884_v54  ;;  %v15933_v54 = vld [vmem:[#allocation9 + $0x5a0] ss:$24 sps:$4 sm:$0xff]  }
 0x585   : > { %v18137_v58 = vpop.f32.mrb[16].mxu1  ;;  %v18139_v59 = vpop.f32.mrb[80].mxu0 }
 0x586   : > { %v18141_v61 = vpop.f32.mrb[17].mxu1  ;;  %v18143_v62 = vpop.f32.mrb[81].mxu0 }
 0x587   : > { %v2639_v63 = vpop.f32.mrb[18].mxu1  ;;  %3430 = vmatpush1.bf16.msra.mxu1 %v15879_v55  ;;  %v4676_v1 = vpop.f32.mrb[82].mxu0  ;;  %6711 = vmatpush1.bf16.msra.mxu0 %v15882_v56  ;;  %v15936_v55 = vld [vmem:[#allocation9 + $0x1030] ss:$24 sps:$4 sm:$0xff]  }
 0x588   : > { %v2640_v4 = vpop.f32.mrb[19].mxu1  ;;  %v4677_v5 = vpop.f32.mrb[83].mxu0  ;;  %3431 = vmatprep.subr.bf16.mxu1 %v15887_v57  ;;  %6712 = vmatprep.subr.bf16.mxu0 %v15890_v23  ;;  %v15941_v23 = vld [vmem:[#allocation9 + $0x5d4] ss:$24 sps:$4 sm:$0xff]   ;;  %v15944_v63 = vld [vmem:[#allocation9 + $0x1064] ss:$24 sps:$4 sm:$0xff]  }
 0x589   : > { %v15939_v1 = vld [vmem:[#allocation9 + $0x5d0] ss:$24 sps:$4 sm:$0xff]   ;;  %v15950_v4 = vld [vmem:[#allocation9 + $0x108c] ss:$24 sps:$4 sm:$0xff]  }
 0x58a   : > { %v15945_v5 = vld [vmem:[#allocation9 + $0x488] ss:$24 sps:$4 sm:$0xff]  }
 0x58b   : > { %3432 = vmatpush1.bf16.msra.mxu1 %v15885_v2  ;;  %6713 = vmatpush1.bf16.msra.mxu0 %v15888_v3  ;;  %v15942_v2 = vld [vmem:[#allocation9 + $0x1060] ss:$24 sps:$4 sm:$0xff]   ;;  %v15947_v3 = vld [vmem:[#allocation9 + $0x48c] ss:$24 sps:$4 sm:$0xff]  }
 0x58c   : > { %3433 = vmatprep.subr.bf16.mxu1 %v15893_v6  ;;  %6714 = vmatprep.subr.bf16.mxu0 %v15896_v7  ;;  %v15948_v6 = vld [vmem:[#allocation9 + $0x1088] ss:$24 sps:$4 sm:$0xff]   ;;  %v18161_v7 = vrot.slane %v18071_v26, 1 }
 0x58d   : > { %v15957_v26 = vld [vmem:[#allocation9 + $0x4e8] ss:$24 sps:$4 sm:$0xff]  }
 0x58f   : > { %3434 = vmatpush1.bf16.msra.mxu1 %v15891_v8  ;;  %6715 = vmatpush1.bf16.msra.mxu0 %v15894_v9  ;;  %v15953_v8 = vld [vmem:[#allocation9 + $0x4bc] ss:$24 sps:$4 sm:$0xff]  }
 0x590   : > { %3757 = vmatprep.subr.bf16.mxu1 %v15899_v10  ;;  %6782 = vmatprep.subr.bf16.mxu0 %v15902_v16  ;;  %v15956_v9 = vld [vmem:[#allocation9 + $0x10bc] ss:$24 sps:$4 sm:$0xff]   ;;  %v15951_v10 = vld [vmem:[#allocation9 + $0x4b8] ss:$24 sps:$4 sm:$0xff]  }
 0x591   : > { %v15954_v16 = vld [vmem:[#allocation9 + $0x10b8] ss:$24 sps:$4 sm:$0xff]  }
 0x592   : > { %3452 = vmatmul.mubr.bf16.vlgmr.msra.gmra.mrb[44].mxu1 %v18112_v51  ;;  %6733 = vmatmul.mubr.bf16.vlgmr.msra.gmra.mrb[108].mxu0 %v18146_v19  ;;  %v15917_v51 = vld [vmem:[#allocation9 + $0x514] ss:$24 sps:$4 sm:$0xff]  }
 0x593   : > { %3758 = vmatpush1.bf16.msra.mxu1 %v15897_v17  ;;  %6783 = vmatpush1.bf16.msra.mxu0 %v15900_v18  ;;  %v15959_v17 = vld [vmem:[#allocation9 + $0x4ec] ss:$24 sps:$4 sm:$0xff]  }
 0x594   : > { %3759 = vmatprep.subr.bf16.mxu1 %v15905_v20  ;;  %6784 = vmatprep.subr.bf16.mxu0 %v15908_v21  ;;  %v15962_v18 = vld [vmem:[#allocation9 + $0x10ec] ss:$24 sps:$4 sm:$0xff]   ;;  %v15960_v20 = vld [vmem:[#allocation9 + $0x10e8] ss:$24 sps:$4 sm:$0xff]   ;;  %v15965_v21 = vld [vmem:[#allocation9 + $0x51c] ss:$24 sps:$4 sm:$0xff]  }
 0x595   : > { %3789 = vmatprep.mubr.bf16.mxu1 %v17606_v0  ;;  %6814 = vmatprep.mubr.bf16.mxu0 %v17606_v0 }
 0x597   : > { %3760 = vmatpush1.bf16.msra.mxu1 %v15903_v22  ;;  %6785 = vmatpush1.bf16.msra.mxu0 %v15906_v24  ;;  %v15968_v22 = vld [vmem:[#allocation9 + $0x111c] ss:$24 sps:$4 sm:$0xff]   ;;  %v15963_v24 = vld [vmem:[#allocation9 + $0x518] ss:$24 sps:$4 sm:$0xff]  }
 0x598   : > { %3761 = vmatprep.subr.bf16.mxu1 %v15911_v25  ;;  %6786 = vmatprep.subr.bf16.mxu0 %v15914_v28  ;;  %v15966_v25 = vld [vmem:[#allocation9 + $0x1118] ss:$24 sps:$4 sm:$0xff]   ;;  %v15971_v28 = vld [vmem:[#allocation9 + $0x54c] ss:$24 sps:$4 sm:$0xff]  }
 0x59b   : > { %3762 = vmatpush1.bf16.msra.mxu1 %v15909_v30  ;;  %6787 = vmatpush1.bf16.msra.mxu0 %v15912_v31  ;;  %v15974_v30 = vld [vmem:[#allocation9 + $0x114c] ss:$24 sps:$4 sm:$0xff]   ;;  %v15969_v31 = vld [vmem:[#allocation9 + $0x548] ss:$24 sps:$4 sm:$0xff]  }
 0x59c   : > { %3763 = vmatprep.subr.bf16.mxu1 %v15917_v51  ;;  %6788 = vmatprep.subr.bf16.mxu0 %v15920_v32  ;;  %v15972_v51 = vld [vmem:[#allocation9 + $0x1148] ss:$24 sps:$4 sm:$0xff]   ;;  %v15977_v32 = vld [vmem:[#allocation9 + $0x57c] ss:$24 sps:$4 sm:$0xff]  }
 0x59f   : > { %3764 = vmatpush1.bf16.msra.mxu1 %v15915_v33  ;;  %6789 = vmatpush1.bf16.msra.mxu0 %v15918_v36  ;;  %v15980_v33 = vld [vmem:[#allocation9 + $0x117c] ss:$24 sps:$4 sm:$0xff]   ;;  %v15975_v36 = vld [vmem:[#allocation9 + $0x578] ss:$24 sps:$4 sm:$0xff]  }
 0x5a0   : > { %3765 = vmatprep.subr.bf16.mxu1 %v15923_v37  ;;  %6790 = vmatprep.subr.bf16.mxu0 %v15926_v15  ;;  %v15978_v37 = vld [vmem:[#allocation9 + $0x1178] ss:$24 sps:$4 sm:$0xff]   ;;  %v15983_v15 = vld [vmem:[#allocation9 + $0x5ac] ss:$24 sps:$4 sm:$0xff]  }
 0x5a3   : > { %3766 = vmatpush1.bf16.msra.mxu1 %v15921_v38  ;;  %6791 = vmatpush1.bf16.msra.mxu0 %v15924_v39  ;;  %v15986_v38 = vld [vmem:[#allocation9 + $0x11ac] ss:$24 sps:$4 sm:$0xff]  }
 0x5a4   : > { %3767 = vmatprep.subr.bf16.mxu1 %v15929_v40  ;;  %6792 = vmatprep.subr.bf16.mxu0 %v15932_v41 }
 0x5a5   : > { %v18152_v47 = vpop.f32.mrb[20].mxu1  ;;  %v18154_v48 = vpop.f32.mrb[84].mxu0 }
 0x5a6   : > { %v18156_v49 = vpop.f32.mrb[21].mxu1  ;;  %v18158_v50 = vpop.f32.mrb[85].mxu0 }
 0x5a7   : > { %v2680_v52 = vpop.f32.mrb[22].mxu1  ;;  %3768 = vmatpush1.bf16.msra.mxu1 %v15927_v43  ;;  %v5055_v53 = vpop.f32.mrb[86].mxu0  ;;  %6793 = vmatpush1.bf16.msra.mxu0 %v15930_v44 }
 0x5a8   : > { %v2681_v56 = vpop.f32.mrb[23].mxu1  ;;  %v5056_v57 = vpop.f32.mrb[87].mxu0  ;;  %3769 = vmatprep.subr.bf16.mxu1 %v15935_v45  ;;  %6794 = vmatprep.subr.bf16.mxu0 %v15938_v46  ;;  %v15981_v53 = vld [vmem:[#allocation9 + $0x5a8] ss:$24 sps:$4 sm:$0xff]  }
 0x5a9   : > { %v15989_v57 = vld [vmem:[#allocation9 + $0x5dc] ss:$24 sps:$4 sm:$0xff]  }
 0x5ab   : > { %3770 = vmatpush1.bf16.msra.mxu1 %v15933_v54  ;;  %6795 = vmatpush1.bf16.msra.mxu0 %v15936_v55  ;;  %v15984_v54 = vld [vmem:[#allocation9 + $0x11a8] ss:$24 sps:$4 sm:$0xff]  }
 0x5ac   : > { %3771 = vmatprep.subr.bf16.mxu1 %v15941_v23  ;;  %6796 = vmatprep.subr.bf16.mxu0 %v15944_v63  ;;  %v15992_v23 = vld [vmem:[#allocation9 + $0x11dc] ss:$24 sps:$4 sm:$0xff]   ;;  %v15990_v63 = vld [vmem:[#allocation9 + $0x11d8] ss:$24 sps:$4 sm:$0xff]  }
 0x5af   : > { %3772 = vmatpush1.bf16.msra.mxu1 %v15939_v1  ;;  %6797 = vmatpush1.bf16.msra.mxu0 %v15942_v2  ;;  %v15998_v1 = vld [vmem:[#allocation9 + $0x1204] ss:$24 sps:$4 sm:$0xff]   ;;  %v15993_v2 = vld [vmem:[#allocation9 + $0x490] ss:$24 sps:$4 sm:$0xff]  }
 0x5b0   : > { %3798 = vmatprep.subr.bf16.mxu1 %v15947_v3  ;;  %7161 = vmatprep.subr.bf16.mxu0 %v15950_v4  ;;  %v15996_v3 = vld [vmem:[#allocation9 + $0x1200] ss:$24 sps:$4 sm:$0xff]   ;;  %v18178_v4 = vrot.slane %v18131_v35, 1 }
 0x5b2   : > { %3790 = vmatmul.mubr.bf16.vlgmr.msra.gmra.mrb[48].mxu1 %v18161_v7  ;;  %6815 = vmatmul.mubr.bf16.vlgmr.msra.gmra.mrb[112].mxu0 %v18146_v19 }
 0x5b3   : > { %3799 = vmatpush1.bf16.msra.mxu1 %v15945_v5  ;;  %7162 = vmatpush1.bf16.msra.mxu0 %v15948_v6  ;;  %v16001_v5 = vld [vmem:[#allocation9 + $0x4c4] ss:$24 sps:$4 sm:$0xff]   ;;  %v16004_v6 = vld [vmem:[#allocation9 + $0x1234] ss:$24 sps:$4 sm:$0xff]  }
 0x5b4   : > { %3800 = vmatprep.subr.bf16.mxu1 %v15953_v8  ;;  %7163 = vmatprep.subr.bf16.mxu0 %v15956_v9  ;;  %v15999_v8 = vld [vmem:[#allocation9 + $0x4c0] ss:$24 sps:$4 sm:$0xff]   ;;  %v16002_v9 = vld [vmem:[#allocation9 + $0x1230] ss:$24 sps:$4 sm:$0xff]  }
 0x5b5   : > { %3830 = vmatprep.mubr.bf16.mxu1 %v17606_v0  ;;  %7193 = vmatprep.mubr.bf16.mxu0 %v17606_v0 }
 0x5b7   : > { %3801 = vmatpush1.bf16.msra.mxu1 %v15951_v10  ;;  %7164 = vmatpush1.bf16.msra.mxu0 %v15954_v16  ;;  %v16007_v10 = vld [vmem:[#allocation9 + $0x4f4] ss:$24 sps:$4 sm:$0xff]   ;;  %v16010_v16 = vld [vmem:[#allocation9 + $0x1264] ss:$24 sps:$4 sm:$0xff]  }
 0x5b8   : > { %3802 = vmatprep.subr.bf16.mxu1 %v15959_v17  ;;  %7165 = vmatprep.subr.bf16.mxu0 %v15962_v18  ;;  %v16005_v17 = vld [vmem:[#allocation9 + $0x4f0] ss:$24 sps:$4 sm:$0xff]   ;;  %v16008_v18 = vld [vmem:[#allocation9 + $0x1260] ss:$24 sps:$4 sm:$0xff]  }
 0x5bb   : > { %3803 = vmatpush1.bf16.msra.mxu1 %v15957_v26  ;;  %7166 = vmatpush1.bf16.msra.mxu0 %v15960_v20  ;;  %v16013_v26 = vld [vmem:[#allocation9 + $0x524] ss:$24 sps:$4 sm:$0xff]   ;;  %v16016_v20 = vld [vmem:[#allocation9 + $0x1294] ss:$24 sps:$4 sm:$0xff]  }
 0x5bc   : > { %3804 = vmatprep.subr.bf16.mxu1 %v15965_v21  ;;  %7167 = vmatprep.subr.bf16.mxu0 %v15968_v22  ;;  %v16011_v21 = vld [vmem:[#allocation9 + $0x520] ss:$24 sps:$4 sm:$0xff]   ;;  %v16014_v22 = vld [vmem:[#allocation9 + $0x1290] ss:$24 sps:$4 sm:$0xff]  }
 0x5bf   : > { %3805 = vmatpush1.bf16.msra.mxu1 %v15963_v24  ;;  %7168 = vmatpush1.bf16.msra.mxu0 %v15966_v25  ;;  %v16019_v24 = vld [vmem:[#allocation9 + $0x554] ss:$24 sps:$4 sm:$0xff]   ;;  %v16022_v25 = vld [vmem:[#allocation9 + $0x12c4] ss:$24 sps:$4 sm:$0xff]  }
 0x5c0   : > { %3806 = vmatprep.subr.bf16.mxu1 %v15971_v28  ;;  %7169 = vmatprep.subr.bf16.mxu0 %v15974_v30  ;;  %v16017_v28 = vld [vmem:[#allocation9 + $0x550] ss:$24 sps:$4 sm:$0xff]   ;;  %v16020_v30 = vld [vmem:[#allocation9 + $0x12c0] ss:$24 sps:$4 sm:$0xff]  }
 0x5c3   : > { %3807 = vmatpush1.bf16.msra.mxu1 %v15969_v31  ;;  %7170 = vmatpush1.bf16.msra.mxu0 %v15972_v51  ;;  %v16025_v31 = vld [vmem:[#allocation9 + $0x584] ss:$24 sps:$4 sm:$0xff]   ;;  %v16028_v51 = vld [vmem:[#allocation9 + $0x12f4] ss:$24 sps:$4 sm:$0xff]  }
 0x5c4   : > { %3808 = vmatprep.subr.bf16.mxu1 %v15977_v32  ;;  %7171 = vmatprep.subr.bf16.mxu0 %v15980_v33  ;;  %v16023_v32 = vld [vmem:[#allocation9 + $0x580] ss:$24 sps:$4 sm:$0xff]   ;;  %v16026_v33 = vld [vmem:[#allocation9 + $0x12f0] ss:$24 sps:$4 sm:$0xff]  }
 0x5c5   : > { %v2957_v39 = vpop.f32.mrb[24].mxu1  ;;  %v18167_v40 = vpop.f32.mrb[88].mxu0 }
 0x5c6   : > { %v18170_v41 = vadd.f32 %v2957_v39, %v18118_v11  ;;  %v2959_v43 = vpop.f32.mrb[25].mxu1  ;;  %v18172_v44 = vpop.f32.mrb[89].mxu0  ;;  %v15987_v11 = vld [vmem:[#allocation9 + $0x5d8] ss:$24 sps:$4 sm:$0xff]  }
 0x5c7   : > { %v18175_v45 = vadd.f32 %v2959_v43, %v18122_v13  ;;  %v2961_v46 = vpop.f32.mrb[26].mxu1  ;;  %3809 = vmatpush1.bf16.msra.mxu1 %v15975_v36  ;;  %v5137_v52 = vpop.f32.mrb[90].mxu0  ;;  %7172 = vmatpush1.bf16.msra.mxu0 %v15978_v37  ;;  %v15995_v13 = vld [vmem:[#allocation9 + $0x494] ss:$24 sps:$4 sm:$0xff]   ;;  %v16034_v37 = vld [vmem:[#allocation9 + $0x1324] ss:$24 sps:$4 sm:$0xff]  }
 0x5c8   : > { %v2962_v55 = vpop.f32.mrb[27].mxu1  ;;  %v5138_v56 = vpop.f32.mrb[91].mxu0  ;;  %3810 = vmatprep.subr.bf16.mxu1 %v15983_v15  ;;  %7173 = vmatprep.subr.bf16.mxu0 %v15986_v38  ;;  %v16031_v36 = vld [vmem:[#allocation9 + $0x5b4] ss:$24 sps:$4 sm:$0xff]  }
 0x5c9   : > { %v16029_v55 = vld [vmem:[#allocation9 + $0x5b0] ss:$24 sps:$4 sm:$0xff]   ;;  %v16032_v56 = vld [vmem:[#allocation9 + $0x1320] ss:$24 sps:$4 sm:$0xff]  }
 0x5cb   : > { %3811 = vmatpush1.bf16.msra.mxu1 %v15981_v53  ;;  %7174 = vmatpush1.bf16.msra.mxu0 %v15984_v54 }
 0x5cc   : > { %3812 = vmatprep.subr.bf16.mxu1 %v15989_v57  ;;  %7175 = vmatprep.subr.bf16.mxu0 %v15992_v23 }
 0x5cf   : > { %3813 = vmatpush1.bf16.msra.mxu1 %v15987_v11  ;;  %7176 = vmatpush1.bf16.msra.mxu0 %v15990_v63  ;;  %v16037_v11 = vld [vmem:[#allocation9 + $0x5e4] ss:$24 sps:$4 sm:$0xff]   ;;  %v16040_v63 = vld [vmem:[#allocation9 + $0x1354] ss:$24 sps:$4 sm:$0xff]  }
 0x5d0   : > { %3839 = vmatprep.subr.bf16.mxu1 %v15995_v13  ;;  %7540 = vmatprep.subr.bf16.mxu0 %v15998_v1  ;;  %v16038_v13 = vld [vmem:[#allocation9 + $0x1350] ss:$24 sps:$4 sm:$0xff]   ;;  %v16046_v1 = vld [vmem:[#allocation9 + $0x1214] ss:$24 sps:$4 sm:$0xff]  }
 0x5d2   : > { %3831 = vmatmul.mubr.bf16.vlgmr.msra.gmra.mrb[52].mxu1 %v18161_v7  ;;  %7194 = vmatmul.mubr.bf16.vlgmr.msra.gmra.mrb[116].mxu0 %v18178_v4 }
 0x5d3   : > { %3840 = vmatpush1.bf16.msra.mxu1 %v15993_v2  ;;  %7541 = vmatpush1.bf16.msra.mxu0 %v15996_v3  ;;  %v16041_v2 = vld [vmem:[#allocation9 + $0x600] ss:$24 sps:$4 sm:$0xff]   ;;  %v16044_v3 = vld [vmem:[#allocation9 + $0x1210] ss:$24 sps:$4 sm:$0xff]  }
 0x5d4   : > { %3841 = vmatprep.subr.bf16.mxu1 %v16001_v5  ;;  %7542 = vmatprep.subr.bf16.mxu0 %v16004_v6  ;;  %v18195_v5 = vrot.slane %v18128_v29, 2  ;;  %v16049_v6 = vld [vmem:[#allocation9 + $0x634] ss:$24 sps:$4 sm:$0xff]  }
 0x5d5   : > { %3871 = vmatprep.mubr.bf16.mxu1 %v17606_v0  ;;  %7572 = vmatprep.mubr.bf16.mxu0 %v17606_v0 }
 0x5d7   : > { %3842 = vmatpush1.bf16.msra.mxu1 %v15999_v8  ;;  %7543 = vmatpush1.bf16.msra.mxu0 %v16002_v9  ;;  %v16052_v8 = vld [vmem:[#allocation9 + $0x1244] ss:$24 sps:$4 sm:$0xff]   ;;  %v16047_v9 = vld [vmem:[#allocation9 + $0x630] ss:$24 sps:$4 sm:$0xff]  }
 0x5d8   : > { %3843 = vmatprep.subr.bf16.mxu1 %v16007_v10  ;;  %7544 = vmatprep.subr.bf16.mxu0 %v16010_v16  ;;  %v16050_v10 = vld [vmem:[#allocation9 + $0x1240] ss:$24 sps:$4 sm:$0xff]   ;;  %v16055_v16 = vld [vmem:[#allocation9 + $0x664] ss:$24 sps:$4 sm:$0xff]  }
 0x5db   : > { %3844 = vmatpush1.bf16.msra.mxu1 %v16005_v17  ;;  %7545 = vmatpush1.bf16.msra.mxu0 %v16008_v18  ;;  %v16058_v17 = vld [vmem:[#allocation9 + $0x1274] ss:$24 sps:$4 sm:$0xff]   ;;  %v16053_v18 = vld [vmem:[#allocation9 + $0x660] ss:$24 sps:$4 sm:$0xff]  }
 0x5dc   : > { %3845 = vmatprep.subr.bf16.mxu1 %v16013_v26  ;;  %7546 = vmatprep.subr.bf16.mxu0 %v16016_v20  ;;  %v16056_v26 = vld [vmem:[#allocation9 + $0x1270] ss:$24 sps:$4 sm:$0xff]   ;;  %v16064_v20 = vld [vmem:[#allocation9 + $0x12a4] ss:$24 sps:$4 sm:$0xff]  }
 0x5df   : > { %3846 = vmatpush1.bf16.msra.mxu1 %v16011_v21  ;;  %7547 = vmatpush1.bf16.msra.mxu0 %v16014_v22  ;;  %v16059_v21 = vld [vmem:[#allocation9 + $0x690] ss:$24 sps:$4 sm:$0xff]   ;;  %v16062_v22 = vld [vmem:[#allocation9 + $0x12a0] ss:$24 sps:$4 sm:$0xff]  }
 0x5e0   : > { %3847 = vmatprep.subr.bf16.mxu1 %v16019_v24  ;;  %7548 = vmatprep.subr.bf16.mxu0 %v16022_v25  ;;  %v16067_v24 = vld [vmem:[#allocation9 + $0x6c4] ss:$24 sps:$4 sm:$0xff]   ;;  %v16070_v25 = vld [vmem:[#allocation9 + $0x12d4] ss:$24 sps:$4 sm:$0xff]  }
 0x5e3   : > { %3848 = vmatpush1.bf16.msra.mxu1 %v16017_v28  ;;  %7549 = vmatpush1.bf16.msra.mxu0 %v16020_v30  ;;  %v16065_v28 = vld [vmem:[#allocation9 + $0x6c0] ss:$24 sps:$4 sm:$0xff]   ;;  %v16068_v30 = vld [vmem:[#allocation9 + $0x12d0] ss:$24 sps:$4 sm:$0xff]  }
 0x5e4   : > { %3849 = vmatprep.subr.bf16.mxu1 %v16025_v31  ;;  %7550 = vmatprep.subr.bf16.mxu0 %v16028_v51  ;;  %v16073_v31 = vld [vmem:[#allocation9 + $0x6f4] ss:$24 sps:$4 sm:$0xff]   ;;  %v16076_v51 = vld [vmem:[#allocation9 + $0x1304] ss:$24 sps:$4 sm:$0xff]  }
 0x5e5   : > { %v2998_v15 = vpop.f32.mrb[28].mxu1  ;;  %v18184_v38 = vpop.f32.mrb[92].mxu0 }
 0x5e6   : > { %v18187_v39 = vadd.f32 %v2998_v15, %v18137_v58  ;;  %v3000_v43 = vpop.f32.mrb[29].mxu1  ;;  %v18189_v46 = vpop.f32.mrb[93].mxu0  ;;  %v16035_v58 = vld [vmem:[#allocation9 + $0x5e0] ss:$24 sps:$4 sm:$0xff]  }
 0x5e7   : > { %v18192_v52 = vadd.f32 %v3000_v43, %v18141_v61  ;;  %v3002_v53 = vpop.f32.mrb[30].mxu1  ;;  %3850 = vmatpush1.bf16.msra.mxu1 %v16023_v32  ;;  %v5516_v54 = vpop.f32.mrb[94].mxu0  ;;  %7551 = vmatpush1.bf16.msra.mxu0 %v16026_v33  ;;  %v16043_v61 = vld [vmem:[#allocation9 + $0x604] ss:$24 sps:$4 sm:$0xff]   ;;  %v16071_v32 = vld [vmem:[#allocation9 + $0x6f0] ss:$24 sps:$4 sm:$0xff]  }
 0x5e8   : > { %v3003_v57 = vpop.f32.mrb[31].mxu1  ;;  %v5517_v23 = vpop.f32.mrb[95].mxu0  ;;  %3851 = vmatprep.subr.bf16.mxu1 %v16031_v36  ;;  %7552 = vmatprep.subr.bf16.mxu0 %v16034_v37  ;;  %v16074_v33 = vld [vmem:[#allocation9 + $0x1300] ss:$24 sps:$4 sm:$0xff]   ;;  %v16079_v36 = vld [vmem:[#allocation9 + $0x724] ss:$24 sps:$4 sm:$0xff]  }
 0x5e9   : > { %v16082_v37 = vld [vmem:[#allocation9 + $0x1334] ss:$24 sps:$4 sm:$0xff]  }
 0x5eb   : > { %3852 = vmatpush1.bf16.msra.mxu1 %v16029_v55  ;;  %7553 = vmatpush1.bf16.msra.mxu0 %v16032_v56 }
 0x5ec   : > { %3853 = vmatprep.subr.bf16.mxu1 %v16037_v11  ;;  %7554 = vmatprep.subr.bf16.mxu0 %v16040_v63  ;;  %v16077_v11 = vld [vmem:[#allocation9 + $0x720] ss:$24 sps:$4 sm:$0xff]   ;;  %v16080_v63 = vld [vmem:[#allocation9 + $0x1330] ss:$24 sps:$4 sm:$0xff]  }
 0x5ef   : > { %3854 = vmatpush1.bf16.msra.mxu1 %v16035_v58  ;;  %7555 = vmatpush1.bf16.msra.mxu0 %v16038_v13 }
 0x5f0   : > { %4177 = vmatprep.subr.bf16.mxu1 %v16043_v61  ;;  %7622 = vmatprep.subr.bf16.mxu0 %v16046_v1  ;;  %v16085_v61 = vld [vmem:[#allocation9 + $0x754] ss:$24 sps:$4 sm:$0xff]   ;;  %v16088_v1 = vld [vmem:[#allocation9 + $0x1364] ss:$24 sps:$4 sm:$0xff]  }
 0x5f2   : > { %3872 = vmatmul.mubr.bf16.vlgmr.msra.gmra.mrb[56].mxu1 %v18161_v7  ;;  %7573 = vmatmul.mubr.bf16.vlgmr.msra.gmra.mrb[120].mxu0 %v18195_v5  ;;  %v16061_v7 = vld [vmem:[#allocation9 + $0x694] ss:$24 sps:$4 sm:$0xff]  }
 0x5f3   : > { %4178 = vmatpush1.bf16.msra.mxu1 %v16041_v2  ;;  %7623 = vmatpush1.bf16.msra.mxu0 %v16044_v3  ;;  %v16086_v2 = vld [vmem:[#allocation9 + $0x1360] ss:$24 sps:$4 sm:$0xff]   ;;  %v16094_v3 = vld [vmem:[#allocation9 + $0x138c] ss:$24 sps:$4 sm:$0xff]  }
 0x5f4   : > { %4179 = vmatprep.subr.bf16.mxu1 %v16049_v6  ;;  %7624 = vmatprep.subr.bf16.mxu0 %v16052_v8  ;;  %v16089_v6 = vld [vmem:[#allocation9 + $0x608] ss:$24 sps:$4 sm:$0xff]  }
 0x5f5   : > { %4209 = vmatprep.mubr.bf16.mxu1 %v17606_v0  ;;  %7654 = vmatprep.mubr.bf16.mxu0 %v17606_v0  ;;  %v16092_v8 = vld [vmem:[#allocation9 + $0x1388] ss:$24 sps:$4 sm:$0xff]  }
 0x5f7   : > { %4180 = vmatpush1.bf16.msra.mxu1 %v16047_v9  ;;  %7625 = vmatpush1.bf16.msra.mxu0 %v16050_v10  ;;  %v16097_v9 = vld [vmem:[#allocation9 + $0x63c] ss:$24 sps:$4 sm:$0xff]  }
 0x5f8   : > { %4181 = vmatprep.subr.bf16.mxu1 %v16055_v16  ;;  %7626 = vmatprep.subr.bf16.mxu0 %v16058_v17  ;;  %v16100_v10 = vld [vmem:[#allocation9 + $0x13bc] ss:$24 sps:$4 sm:$0xff]   ;;  %v16095_v16 = vld [vmem:[#allocation9 + $0x638] ss:$24 sps:$4 sm:$0xff]  }
 0x5f9   : > { %v16098_v17 = vld [vmem:[#allocation9 + $0x13b8] ss:$24 sps:$4 sm:$0xff]  }
 0x5fb   : > { %4182 = vmatpush1.bf16.msra.mxu1 %v16053_v18  ;;  %7627 = vmatpush1.bf16.msra.mxu0 %v16056_v26  ;;  %v16103_v18 = vld [vmem:[#allocation9 + $0x66c] ss:$24 sps:$4 sm:$0xff]  }
 0x5fc   : > { %4183 = vmatprep.subr.bf16.mxu1 %v16061_v7  ;;  %7628 = vmatprep.subr.bf16.mxu0 %v16064_v20  ;;  %v16106_v26 = vld [vmem:[#allocation9 + $0x13ec] ss:$24 sps:$4 sm:$0xff]   ;;  %v16101_v7 = vld [vmem:[#allocation9 + $0x668] ss:$24 sps:$4 sm:$0xff]  }
 0x5fd   : > { %v16104_v20 = vld [vmem:[#allocation9 + $0x13e8] ss:$24 sps:$4 sm:$0xff]  }
 0x5ff   : > { %4184 = vmatpush1.bf16.msra.mxu1 %v16059_v21  ;;  %7629 = vmatpush1.bf16.msra.mxu0 %v16062_v22  ;;  %v16109_v21 = vld [vmem:[#allocation9 + $0x69c] ss:$24 sps:$4 sm:$0xff]  }
 0x600   : > { %4185 = vmatprep.subr.bf16.mxu1 %v16067_v24  ;;  %7630 = vmatprep.subr.bf16.mxu0 %v16070_v25  ;;  %v16112_v22 = vld [vmem:[#allocation9 + $0x141c] ss:$24 sps:$4 sm:$0xff]   ;;  %v16107_v24 = vld [vmem:[#allocation9 + $0x698] ss:$24 sps:$4 sm:$0xff]  }
 0x601   : > { %v16110_v25 = vld [vmem:[#allocation9 + $0x1418] ss:$24 sps:$4 sm:$0xff]  }
 0x603   : > { %4186 = vmatpush1.bf16.msra.mxu1 %v16065_v28  ;;  %7631 = vmatpush1.bf16.msra.mxu0 %v16068_v30  ;;  %v16115_v28 = vld [vmem:[#allocation9 + $0x6cc] ss:$24 sps:$4 sm:$0xff]  }
 0x604   : > { %4187 = vmatprep.subr.bf16.mxu1 %v16073_v31  ;;  %7632 = vmatprep.subr.bf16.mxu0 %v16076_v51  ;;  %v16118_v30 = vld [vmem:[#allocation9 + $0x144c] ss:$24 sps:$4 sm:$0xff]   ;;  %v16113_v31 = vld [vmem:[#allocation9 + $0x6c8] ss:$24 sps:$4 sm:$0xff]  }
 0x605   : > { %v3039_v15 = vpop.f32.mrb[32].mxu1  ;;  %v18201_v43 = vpop.f32.mrb[96].mxu0  ;;  %v16116_v51 = vld [vmem:[#allocation9 + $0x1448] ss:$24 sps:$4 sm:$0xff]  }
 0x606   : > { %v18204_v53 = vadd.f32 %v3039_v15, %v18152_v47  ;;  %v3041_v54 = vpop.f32.mrb[33].mxu1  ;;  %v18206_v55 = vpop.f32.mrb[97].mxu0  ;;  %v16083_v47 = vld [vmem:[#allocation9 + $0x750] ss:$24 sps:$4 sm:$0xff]   ;;  %v16127_v15 = vld [vmem:[#allocation9 + $0x72c] ss:$24 sps:$4 sm:$0xff]  }
 0x607   : > { %v18209_v56 = vadd.f32 %v3041_v54, %v18156_v49  ;;  %v3043_v57 = vpop.f32.mrb[34].mxu1  ;;  %4188 = vmatpush1.bf16.msra.mxu1 %v16071_v32  ;;  %v5893_v23 = vpop.f32.mrb[98].mxu0  ;;  %7633 = vmatpush1.bf16.msra.mxu0 %v16074_v33  ;;  %v16091_v49 = vld [vmem:[#allocation9 + $0x60c] ss:$24 sps:$4 sm:$0xff]   ;;  %v16121_v32 = vld [vmem:[#allocation9 + $0x6fc] ss:$24 sps:$4 sm:$0xff]  }
 0x608   : > { %v3044_v58 = vpop.f32.mrb[35].mxu1  ;;  %v5894_v13 = vpop.f32.mrb[99].mxu0  ;;  %4189 = vmatprep.subr.bf16.mxu1 %v16079_v36  ;;  %7634 = vmatprep.subr.bf16.mxu0 %v16082_v37  ;;  %v16124_v33 = vld [vmem:[#allocation9 + $0x147c] ss:$24 sps:$4 sm:$0xff]   ;;  %v16119_v36 = vld [vmem:[#allocation9 + $0x6f8] ss:$24 sps:$4 sm:$0xff]  }
 0x609   : > { %v16122_v37 = vld [vmem:[#allocation9 + $0x1478] ss:$24 sps:$4 sm:$0xff]   ;;  %v16130_v54 = vld [vmem:[#allocation9 + $0x14ac] ss:$24 sps:$4 sm:$0xff]  }
 0x60b   : > { %4190 = vmatpush1.bf16.msra.mxu1 %v16077_v11  ;;  %7635 = vmatpush1.bf16.msra.mxu0 %v16080_v63 }
 0x60c   : > { %4191 = vmatprep.subr.bf16.mxu1 %v16085_v61  ;;  %7636 = vmatprep.subr.bf16.mxu0 %v16088_v1 }
 0x60f   : > { %4192 = vmatpush1.bf16.msra.mxu1 %v16083_v47  ;;  %7637 = vmatpush1.bf16.msra.mxu0 %v16086_v2  ;;  %v16125_v47 = vld [vmem:[#allocation9 + $0x728] ss:$24 sps:$4 sm:$0xff]  }
 0x610   : > { %4218 = vmatprep.subr.bf16.mxu1 %v16091_v49  ;;  %8001 = vmatprep.subr.bf16.mxu0 %v16094_v3  ;;  %v16128_v2 = vld [vmem:[#allocation9 + $0x14a8] ss:$24 sps:$4 sm:$0xff]  }
 0x612   : > { %4210 = vmatmul.mubr.bf16.vlgmr.msra.gmra.mrb[60].mxu1 %v18074_v27  ;;  %7655 = vmatmul.mubr.bf16.vlgmr.msra.gmra.mrb[124].mxu0 %v18195_v5 }
 0x613   : > { %4219 = vmatpush1.bf16.msra.mxu1 %v16089_v6  ;;  %8002 = vmatpush1.bf16.msra.mxu0 %v16092_v8  ;;  %v16133_v6 = vld [vmem:[#allocation9 + $0x75c] ss:$24 sps:$4 sm:$0xff]  }
 0x614   : > { %4220 = vmatprep.subr.bf16.mxu1 %v16097_v9  ;;  %8003 = vmatprep.subr.bf16.mxu0 %v16100_v10  ;;  %v16136_v8 = vld [vmem:[#allocation9 + $0x14dc] ss:$24 sps:$4 sm:$0xff]   ;;  %v16134_v9 = vld [vmem:[#allocation9 + $0x14d8] ss:$24 sps:$4 sm:$0xff]  }
 0x615   : > { %4250 = vmatprep.mubr.bf16.mxu1 %v17606_v0  ;;  %8033 = vmatprep.mubr.bf16.mxu0 %v17606_v0  ;;  %v16142_v10 = vld [vmem:[#allocation9 + $0x1504] ss:$24 sps:$4 sm:$0xff]  }
 0x617   : > { %4221 = vmatpush1.bf16.msra.mxu1 %v16095_v16  ;;  %8004 = vmatpush1.bf16.msra.mxu0 %v16098_v17  ;;  %v16137_v16 = vld [vmem:[#allocation9 + $0x780] ss:$24 sps:$4 sm:$0xff]  }
 0x618   : > { %4222 = vmatprep.subr.bf16.mxu1 %v16103_v18  ;;  %8005 = vmatprep.subr.bf16.mxu0 %v16106_v26  ;;  %v16140_v17 = vld [vmem:[#allocation9 + $0x1500] ss:$24 sps:$4 sm:$0xff]   ;;  %v18226_v18 = vrot.slane %v18131_v35, 2  ;;  %v16145_v26 = vld [vmem:[#allocation9 + $0x7b4] ss:$24 sps:$4 sm:$0xff]  }
 0x61b   : > { %4223 = vmatpush1.bf16.msra.mxu1 %v16101_v7  ;;  %8006 = vmatpush1.bf16.msra.mxu0 %v16104_v20  ;;  %v16148_v7 = vld [vmem:[#allocation9 + $0x1534] ss:$24 sps:$4 sm:$0xff]   ;;  %v16143_v20 = vld [vmem:[#allocation9 + $0x7b0] ss:$24 sps:$4 sm:$0xff]  }
 0x61c   : > { %4224 = vmatprep.subr.bf16.mxu1 %v16109_v21  ;;  %8007 = vmatprep.subr.bf16.mxu0 %v16112_v22  ;;  %v16146_v21 = vld [vmem:[#allocation9 + $0x1530] ss:$24 sps:$4 sm:$0xff]   ;;  %v16151_v22 = vld [vmem:[#allocation9 + $0x7e4] ss:$24 sps:$4 sm:$0xff]  }
 0x61f   : > { %4225 = vmatpush1.bf16.msra.mxu1 %v16107_v24  ;;  %8008 = vmatpush1.bf16.msra.mxu0 %v16110_v25  ;;  %v16154_v24 = vld [vmem:[#allocation9 + $0x1564] ss:$24 sps:$4 sm:$0xff]   ;;  %v16149_v25 = vld [vmem:[#allocation9 + $0x7e0] ss:$24 sps:$4 sm:$0xff]  }
 0x620   : > { %4226 = vmatprep.subr.bf16.mxu1 %v16115_v28  ;;  %8009 = vmatprep.subr.bf16.mxu0 %v16118_v30  ;;  %v16152_v28 = vld [vmem:[#allocation9 + $0x1560] ss:$24 sps:$4 sm:$0xff]   ;;  %v16160_v30 = vld [vmem:[#allocation9 + $0x1594] ss:$24 sps:$4 sm:$0xff]  }
 0x623   : > { %4227 = vmatpush1.bf16.msra.mxu1 %v16113_v31  ;;  %8010 = vmatpush1.bf16.msra.mxu0 %v16116_v51  ;;  %v16155_v31 = vld [vmem:[#allocation9 + $0x810] ss:$24 sps:$4 sm:$0xff]  }
 0x624   : > { %4228 = vmatprep.subr.bf16.mxu1 %v16121_v32  ;;  %8011 = vmatprep.subr.bf16.mxu0 %v16124_v33  ;;  %v16158_v51 = vld [vmem:[#allocation9 + $0x1590] ss:$24 sps:$4 sm:$0xff]   ;;  %v16163_v32 = vld [vmem:[#allocation9 + $0x844] ss:$24 sps:$4 sm:$0xff]  }
 0x625   : > { %v3371_v57 = vpop.f32.mrb[36].mxu1  ;;  %v18215_v23 = vpop.f32.mrb[100].mxu0  ;;  %v16166_v33 = vld [vmem:[#allocation9 + $0x15c4] ss:$24 sps:$4 sm:$0xff]  }
 0x626   : > { %v18218_v11 = vadd.f32 %v3371_v57, %v18170_v41  ;;  %v3373_v63 = vpop.f32.mrb[37].mxu1  ;;  %v18220_v58 = vpop.f32.mrb[101].mxu0  ;;  %v16131_v41 = vld [vmem:[#allocation9 + $0x758] ss:$24 sps:$4 sm:$0xff]  }
 0x627   : > { %v18223_v13 = vadd.f32 %v3373_v63, %v18175_v45  ;;  %v3375_v61 = vpop.f32.mrb[38].mxu1  ;;  %4229 = vmatpush1.bf16.msra.mxu1 %v16119_v36  ;;  %v5975_v1 = vpop.f32.mrb[102].mxu0  ;;  %8012 = vmatpush1.bf16.msra.mxu0 %v16122_v37  ;;  %v16139_v45 = vld [vmem:[#allocation9 + $0x784] ss:$24 sps:$4 sm:$0xff]   ;;  %v16161_v36 = vld [vmem:[#allocation9 + $0x840] ss:$24 sps:$4 sm:$0xff]  }
 0x628   : > { %v3376_v49 = vpop.f32.mrb[39].mxu1  ;;  %v5976_v3 = vpop.f32.mrb[103].mxu0  ;;  %4230 = vmatprep.subr.bf16.mxu1 %v16127_v15  ;;  %8013 = vmatprep.subr.bf16.mxu0 %v16130_v54  ;;  %v16164_v37 = vld [vmem:[#allocation9 + $0x15c0] ss:$24 sps:$4 sm:$0xff]   ;;  %v16169_v15 = vld [vmem:[#allocation9 + $0x874] ss:$24 sps:$4 sm:$0xff]  }
 0x629   : > { %v16172_v54 = vld [vmem:[#allocation9 + $0x15f4] ss:$24 sps:$4 sm:$0xff]   ;;  %v16167_v57 = vld [vmem:[#allocation9 + $0x870] ss:$24 sps:$4 sm:$0xff]   ;;  %v16175_v61 = vld [vmem:[#allocation9 + $0x8a4] ss:$24 sps:$4 sm:$0xff]  }
 0x62a   : > { %v16170_v63 = vld [vmem:[#allocation9 + $0x15f0] ss:$24 sps:$4 sm:$0xff]   ;;  %v16178_v1 = vld [vmem:[#allocation9 + $0x1624] ss:$24 sps:$4 sm:$0xff]  }
 0x62b   : > { %4231 = vmatpush1.bf16.msra.mxu1 %v16125_v47  ;;  %8014 = vmatpush1.bf16.msra.mxu0 %v16128_v2 }
 0x62c   : > { %4232 = vmatprep.subr.bf16.mxu1 %v16133_v6  ;;  %8015 = vmatprep.subr.bf16.mxu0 %v16136_v8 }
 0x62f   : > { %4233 = vmatpush1.bf16.msra.mxu1 %v16131_v41  ;;  %8016 = vmatpush1.bf16.msra.mxu0 %v16134_v9 }
 0x630   : > { %4597 = vmatprep.subr.bf16.mxu1 %v16139_v45  ;;  %8380 = vmatprep.subr.bf16.mxu0 %v16142_v10  ;;  %v16173_v45 = vld [vmem:[#allocation9 + $0x8a0] ss:$24 sps:$4 sm:$0xff]  }
 0x631   : > { %v16176_v10 = vld [vmem:[#allocation9 + $0x1620] ss:$24 sps:$4 sm:$0xff]  }
 0x632   : > { %4251 = vmatmul.mubr.bf16.vlgmr.msra.gmra.mrb[64].mxu1 %v18074_v27  ;;  %8034 = vmatmul.mubr.bf16.vlgmr.msra.gmra.mrb[128].mxu0 %v18226_v18  ;;  %v16157_v27 = vld [vmem:[#allocation9 + $0x814] ss:$24 sps:$4 sm:$0xff]  }
 0x633   : > { %4598 = vmatpush1.bf16.msra.mxu1 %v16137_v16  ;;  %8381 = vmatpush1.bf16.msra.mxu0 %v16140_v17 }
 0x634   : > { %4599 = vmatprep.subr.bf16.mxu1 %v16145_v26  ;;  %8382 = vmatprep.subr.bf16.mxu0 %v16148_v7  ;;  %v16181_v26 = vld [vmem:[#allocation9 + $0x8d4] ss:$24 sps:$4 sm:$0xff]  }
 0x635   : > { %4629 = vmatprep.mubr.bf16.mxu1 %v17606_v0  ;;  %8412 = vmatprep.mubr.bf16.mxu0 %v17606_v0  ;;  %v16184_v7 = vld [vmem:[#allocation9 + $0x1654] ss:$24 sps:$4 sm:$0xff]  }
 0x637   : > { %4600 = vmatpush1.bf16.msra.mxu1 %v16143_v20  ;;  %8383 = vmatpush1.bf16.msra.mxu0 %v16146_v21  ;;  %v16182_v20 = vld [vmem:[#allocation9 + $0x1650] ss:$24 sps:$4 sm:$0xff]   ;;  %v16190_v21 = vld [vmem:[#allocation9 + $0x1514] ss:$24 sps:$4 sm:$0xff]  }
 0x638   : > { %4601 = vmatprep.subr.bf16.mxu1 %v16151_v22  ;;  %8384 = vmatprep.subr.bf16.mxu0 %v16154_v24  ;;  %v16185_v22 = vld [vmem:[#allocation9 + $0x790] ss:$24 sps:$4 sm:$0xff]  }
 0x639   : > { %v16188_v24 = vld [vmem:[#allocation9 + $0x1510] ss:$24 sps:$4 sm:$0xff]  }
 0x63b   : > { %4602 = vmatpush1.bf16.msra.mxu1 %v16149_v25  ;;  %8385 = vmatpush1.bf16.msra.mxu0 %v16152_v28  ;;  %v18243_v25 = vrot.slane %v18128_v29, 3  ;;  %v16193_v28 = vld [vmem:[#allocation9 + $0x7c4] ss:$24 sps:$4 sm:$0xff]   ;;  %v16197_v29 = vld [vmem:[#allocation9 + $0x7f0] ss:$24 sps:$4 sm:$0xff]  }
 0x63c   : > { %4603 = vmatprep.subr.bf16.mxu1 %v16157_v27  ;;  %8386 = vmatprep.subr.bf16.mxu0 %v16160_v30  ;;  %v16196_v27 = vld [vmem:[#allocation9 + $0x1544] ss:$24 sps:$4 sm:$0xff]   ;;  %v16191_v30 = vld [vmem:[#allocation9 + $0x7c0] ss:$24 sps:$4 sm:$0xff]  }
 0x63f   : > { %4604 = vmatpush1.bf16.msra.mxu1 %v16155_v31  ;;  %8387 = vmatpush1.bf16.msra.mxu0 %v16158_v51  ;;  %v16194_v31 = vld [vmem:[#allocation9 + $0x1540] ss:$24 sps:$4 sm:$0xff]   ;;  %v16199_v51 = vld [vmem:[#allocation9 + $0x7f4] ss:$24 sps:$4 sm:$0xff]  }
 0x640   : > { %4605 = vmatprep.subr.bf16.mxu1 %v16163_v32  ;;  %8388 = vmatprep.subr.bf16.mxu0 %v16166_v33  ;;  %v16202_v32 = vld [vmem:[#allocation9 + $0x1574] ss:$24 sps:$4 sm:$0xff]   ;;  %v16200_v33 = vld [vmem:[#allocation9 + $0x1570] ss:$24 sps:$4 sm:$0xff]  }
 0x643   : > { %4606 = vmatpush1.bf16.msra.mxu1 %v16161_v36  ;;  %8389 = vmatpush1.bf16.msra.mxu0 %v16164_v37  ;;  %v16205_v36 = vld [vmem:[#allocation9 + $0x824] ss:$24 sps:$4 sm:$0xff]  }
 0x644   : > { %4607 = vmatprep.subr.bf16.mxu1 %v16169_v15  ;;  %8390 = vmatprep.subr.bf16.mxu0 %v16172_v54  ;;  %v16208_v37 = vld [vmem:[#allocation9 + $0x15a4] ss:$24 sps:$4 sm:$0xff]   ;;  %v16203_v15 = vld [vmem:[#allocation9 + $0x820] ss:$24 sps:$4 sm:$0xff]  }
 0x645   : > { %v3412_v47 = vpop.f32.mrb[40].mxu1  ;;  %v18232_v2 = vpop.f32.mrb[104].mxu0  ;;  %v16206_v54 = vld [vmem:[#allocation9 + $0x15a0] ss:$24 sps:$4 sm:$0xff]  }
 0x646   : > { %v18235_v49 = vadd.f32 %v3412_v47, %v18187_v39  ;;  %v3414_v3 = vpop.f32.mrb[41].mxu1  ;;  %v18237_v6 = vpop.f32.mrb[105].mxu0  ;;  %v16179_v39 = vld [vmem:[#allocation9 + $0x8d0] ss:$24 sps:$4 sm:$0xff]   ;;  %v16217_v47 = vld [vmem:[#allocation9 + $0x884] ss:$24 sps:$4 sm:$0xff]  }
 0x647   : > { %v18240_v8 = vadd.f32 %v3414_v3, %v18192_v52  ;;  %v3416_v41 = vpop.f32.mrb[42].mxu1  ;;  %4608 = vmatpush1.bf16.msra.mxu1 %v16167_v57  ;;  %v6359_v9 = vpop.f32.mrb[106].mxu0  ;;  %8391 = vmatpush1.bf16.msra.mxu0 %v16170_v63  ;;  %v16187_v52 = vld [vmem:[#allocation9 + $0x794] ss:$24 sps:$4 sm:$0xff]   ;;  %v16220_v3 = vld [vmem:[#allocation9 + $0x1604] ss:$24 sps:$4 sm:$0xff]  }
 0x648   : > { %v3417_v16 = vpop.f32.mrb[43].mxu1  ;;  %v6360_v17 = vpop.f32.mrb[107].mxu0  ;;  %4609 = vmatprep.subr.bf16.mxu1 %v16175_v61  ;;  %8392 = vmatprep.subr.bf16.mxu0 %v16178_v1  ;;  %v16211_v57 = vld [vmem:[#allocation9 + $0x854] ss:$24 sps:$4 sm:$0xff]   ;;  %v16209_v61 = vld [vmem:[#allocation9 + $0x850] ss:$24 sps:$4 sm:$0xff]  }
 0x649   : > { %v16214_v63 = vld [vmem:[#allocation9 + $0x15d4] ss:$24 sps:$4 sm:$0xff]   ;;  %v16212_v1 = vld [vmem:[#allocation9 + $0x15d0] ss:$24 sps:$4 sm:$0xff]   ;;  %v16215_v41 = vld [vmem:[#allocation9 + $0x880] ss:$24 sps:$4 sm:$0xff]  }
 0x64a   : > { %v16218_v9 = vld [vmem:[#allocation9 + $0x1600] ss:$24 sps:$4 sm:$0xff]  }
 0x64b   : > { %4610 = vmatpush1.bf16.msra.mxu1 %v16173_v45  ;;  %8393 = vmatpush1.bf16.msra.mxu0 %v16176_v10  ;;  %v16223_v45 = vld [vmem:[#allocation9 + $0x8b4] ss:$24 sps:$4 sm:$0xff]  }
 0x64c   : > { %4611 = vmatprep.subr.bf16.mxu1 %v16181_v26  ;;  %8394 = vmatprep.subr.bf16.mxu0 %v16184_v7  ;;  %v16226_v10 = vld [vmem:[#allocation9 + $0x1634] ss:$24 sps:$4 sm:$0xff]  }
 0x64f   : > { %4612 = vmatpush1.bf16.msra.mxu1 %v16179_v39  ;;  %8395 = vmatpush1.bf16.msra.mxu0 %v16182_v20 }
 0x650   : > { %4679 = vmatprep.subr.bf16.mxu1 %v16187_v52  ;;  %8462 = vmatprep.subr.bf16.mxu0 %v16190_v21 }
 0x652   : > { %4630 = vmatmul.mubr.bf16.vlgmr.msra.gmra.mrb[68].mxu1 %v18081_v60  ;;  %8413 = vmatmul.mubr.bf16.vlgmr.msra.gmra.mrb[132].mxu0 %v18243_v25 }
 0x653   : > { %4680 = vmatpush1.bf16.msra.mxu1 %v16185_v22  ;;  %8463 = vmatpush1.bf16.msra.mxu0 %v16188_v24  ;;  %v16221_v22 = vld [vmem:[#allocation9 + $0x8b0] ss:$24 sps:$4 sm:$0xff]  }
 0x654   : > { %4681 = vmatprep.subr.bf16.mxu1 %v16193_v28  ;;  %8464 = vmatprep.subr.bf16.mxu0 %v16196_v27  ;;  %v16224_v24 = vld [vmem:[#allocation9 + $0x1630] ss:$24 sps:$4 sm:$0xff]  }
 0x655   : > { %4711 = vmatprep.mubr.bf16.mxu1 %v17606_v0  ;;  %8494 = vmatprep.mubr.bf16.mxu0 %v17606_v0 }
 0x657   : > { %4682 = vmatpush1.bf16.msra.mxu1 %v16191_v30  ;;  %8465 = vmatpush1.bf16.msra.mxu0 %v16194_v31  ;;  %v16229_v30 = vld [vmem:[#allocation9 + $0x8e4] ss:$24 sps:$4 sm:$0xff]  }
 0x658   : > { %4683 = vmatprep.subr.bf16.mxu1 %v16199_v51  ;;  %8466 = vmatprep.subr.bf16.mxu0 %v16202_v32  ;;  %v16232_v31 = vld [vmem:[#allocation9 + $0x1664] ss:$24 sps:$4 sm:$0xff]   ;;  %v16230_v51 = vld [vmem:[#allocation9 + $0x1660] ss:$24 sps:$4 sm:$0xff]  }
 0x659   : > { %v16238_v32 = vld [vmem:[#allocation9 + $0x168c] ss:$24 sps:$4 sm:$0xff]  }
 0x65b   : > { %4684 = vmatpush1.bf16.msra.mxu1 %v16197_v29  ;;  %8467 = vmatpush1.bf16.msra.mxu0 %v16200_v33  ;;  %v16233_v29 = vld [vmem:[#allocation9 + $0x908] ss:$24 sps:$4 sm:$0xff]  }
 0x65c   : > { %4685 = vmatprep.subr.bf16.mxu1 %v16205_v36  ;;  %8468 = vmatprep.subr.bf16.mxu0 %v16208_v37  ;;  %v16236_v33 = vld [vmem:[#allocation9 + $0x1688] ss:$24 sps:$4 sm:$0xff]   ;;  %v16241_v36 = vld [vmem:[#allocation9 + $0x93c] ss:$24 sps:$4 sm:$0xff]  }
 0x65d   : > { %v16244_v37 = vld [vmem:[#allocation9 + $0x16bc] ss:$24 sps:$4 sm:$0xff]  }
 0x65f   : > { %4686 = vmatpush1.bf16.msra.mxu1 %v16203_v15  ;;  %8469 = vmatpush1.bf16.msra.mxu0 %v16206_v54  ;;  %v16239_v15 = vld [vmem:[#allocation9 + $0x938] ss:$24 sps:$4 sm:$0xff]  }
 0x660   : > { %4687 = vmatprep.subr.bf16.mxu1 %v16211_v57  ;;  %8470 = vmatprep.subr.bf16.mxu0 %v16214_v63  ;;  %v16242_v54 = vld [vmem:[#allocation9 + $0x16b8] ss:$24 sps:$4 sm:$0xff]   ;;  %v16247_v57 = vld [vmem:[#allocation9 + $0x96c] ss:$24 sps:$4 sm:$0xff]  }
 0x661   : > { %v16250_v63 = vld [vmem:[#allocation9 + $0x16ec] ss:$24 sps:$4 sm:$0xff]  }
 0x663   : > { %4688 = vmatpush1.bf16.msra.mxu1 %v16209_v61  ;;  %8471 = vmatpush1.bf16.msra.mxu0 %v16212_v1  ;;  %v16245_v61 = vld [vmem:[#allocation9 + $0x968] ss:$24 sps:$4 sm:$0xff]  }
 0x664   : > { %4689 = vmatprep.subr.bf16.mxu1 %v16217_v47  ;;  %8472 = vmatprep.subr.bf16.mxu0 %v16220_v3  ;;  %v16248_v1 = vld [vmem:[#allocation9 + $0x16e8] ss:$24 sps:$4 sm:$0xff]   ;;  %v16256_v47 = vld [vmem:[#allocation9 + $0x171c] ss:$24 sps:$4 sm:$0xff]   ;;  %v16251_v3 = vld [vmem:[#allocation9 + $0x998] ss:$24 sps:$4 sm:$0xff]  }
 0x665   : > { %v3453_v16 = vpop.f32.mrb[44].mxu1  ;;  %v18249_v17 = vpop.f32.mrb[108].mxu0 }
 0x666   : > { %v18252_v26 = vadd.f32 %v3453_v16, %v18204_v53  ;;  %v3455_v7 = vpop.f32.mrb[45].mxu1  ;;  %v18254_v39 = vpop.f32.mrb[109].mxu0  ;;  %v16227_v53 = vld [vmem:[#allocation9 + $0x8e0] ss:$24 sps:$4 sm:$0xff]  }
 0x667   : > { %v18257_v20 = vadd.f32 %v3455_v7, %v18209_v56  ;;  %v3457_v52 = vpop.f32.mrb[46].mxu1  ;;  %4690 = vmatpush1.bf16.msra.mxu1 %v16215_v41  ;;  %v6738_v21 = vpop.f32.mrb[110].mxu0  ;;  %8473 = vmatpush1.bf16.msra.mxu0 %v16218_v9  ;;  %v16235_v56 = vld [vmem:[#allocation9 + $0x90c] ss:$24 sps:$4 sm:$0xff]   ;;  %v16254_v41 = vld [vmem:[#allocation9 + $0x1718] ss:$24 sps:$4 sm:$0xff]  }
 0x668   : > { %v3458_v28 = vpop.f32.mrb[47].mxu1  ;;  %v6739_v27 = vpop.f32.mrb[111].mxu0  ;;  %4691 = vmatprep.subr.bf16.mxu1 %v16223_v45  ;;  %8474 = vmatprep.subr.bf16.mxu0 %v16226_v10  ;;  %v16259_v9 = vld [vmem:[#allocation9 + $0x9cc] ss:$24 sps:$4 sm:$0xff]   ;;  %v16257_v10 = vld [vmem:[#allocation9 + $0x9c8] ss:$24 sps:$4 sm:$0xff]  }
 0x669   : > { %v16262_v45 = vld [vmem:[#allocation9 + $0x174c] ss:$24 sps:$4 sm:$0xff]   ;;  %v16260_v16 = vld [vmem:[#allocation9 + $0x1748] ss:$24 sps:$4 sm:$0xff]   ;;  %v16265_v7 = vld [vmem:[#allocation9 + $0x9fc] ss:$24 sps:$4 sm:$0xff]  }
 0x66a   : > { %v16268_v52 = vld [vmem:[#allocation9 + $0x177c] ss:$24 sps:$4 sm:$0xff]   ;;  %v16263_v21 = vld [vmem:[#allocation9 + $0x9f8] ss:$24 sps:$4 sm:$0xff]   ;;  %v16274_v28 = vld [vmem:[#allocation9 + $0x17ac] ss:$24 sps:$4 sm:$0xff]  }
 0x66b   : > { %4692 = vmatpush1.bf16.msra.mxu1 %v16221_v22  ;;  %8475 = vmatpush1.bf16.msra.mxu0 %v16224_v24  ;;  %v16266_v22 = vld [vmem:[#allocation9 + $0x1778] ss:$24 sps:$4 sm:$0xff]   ;;  %v16271_v24 = vld [vmem:[#allocation9 + $0xa2c] ss:$24 sps:$4 sm:$0xff]  }
 0x66c   : > { %4693 = vmatprep.subr.bf16.mxu1 %v16229_v30  ;;  %8476 = vmatprep.subr.bf16.mxu0 %v16232_v31 }
 0x66f   : > { %4694 = vmatpush1.bf16.msra.mxu1 %v16227_v53  ;;  %8477 = vmatpush1.bf16.msra.mxu0 %v16230_v51 }
 0x670   : > { %5058 = vmatprep.subr.bf16.mxu1 %v16235_v56  ;;  %8841 = vmatprep.subr.bf16.mxu0 %v16238_v32 }
 0x672   : > { %4712 = vmatmul.mubr.bf16.vlgmr.msra.gmra.mrb[72].mxu1 %v18081_v60  ;;  %8495 = vmatmul.mubr.bf16.vlgmr.msra.gmra.mrb[136].mxu0 %v18243_v25  ;;  %v16253_v60 = vld [vmem:[#allocation9 + $0x99c] ss:$24 sps:$4 sm:$0xff]  }
 0x673   : > { %5059 = vmatpush1.bf16.msra.mxu1 %v16233_v29  ;;  %8842 = vmatpush1.bf16.msra.mxu0 %v16236_v33  ;;  %v16269_v33 = vld [vmem:[#allocation9 + $0xa28] ss:$24 sps:$4 sm:$0xff]  }
 0x674   : > { %5060 = vmatprep.subr.bf16.mxu1 %v16241_v36  ;;  %8843 = vmatprep.subr.bf16.mxu0 %v16244_v37  ;;  %v16272_v36 = vld [vmem:[#allocation9 + $0x17a8] ss:$24 sps:$4 sm:$0xff]  }
 0x675   : > { %5090 = vmatprep.mubr.bf16.mxu1 %v17606_v0  ;;  %8873 = vmatprep.mubr.bf16.mxu0 %v17606_v0 }
 0x677   : > { %5061 = vmatpush1.bf16.msra.mxu1 %v16239_v15  ;;  %8844 = vmatpush1.bf16.msra.mxu0 %v16242_v54  ;;  %v16277_v54 = vld [vmem:[#allocation9 + $0xa5c] ss:$24 sps:$4 sm:$0xff]  }
 0x678   : > { %5062 = vmatprep.subr.bf16.mxu1 %v16247_v57  ;;  %8845 = vmatprep.subr.bf16.mxu0 %v16250_v63  ;;  %v16280_v57 = vld [vmem:[#allocation9 + $0x17dc] ss:$24 sps:$4 sm:$0xff]   ;;  %v16278_v63 = vld [vmem:[#allocation9 + $0x17d8] ss:$24 sps:$4 sm:$0xff]  }
 0x67b   : > { %5063 = vmatpush1.bf16.msra.mxu1 %v16245_v61  ;;  %8846 = vmatpush1.bf16.msra.mxu0 %v16248_v1  ;;  %v16286_v61 = vld [vmem:[#allocation9 + $0x1804] ss:$24 sps:$4 sm:$0xff]   ;;  %v16281_v1 = vld [vmem:[#allocation9 + $0xa80] ss:$24 sps:$4 sm:$0xff]  }
 0x67c   : > { %5064 = vmatprep.subr.bf16.mxu1 %v16253_v60  ;;  %8847 = vmatprep.subr.bf16.mxu0 %v16256_v47  ;;  %v16284_v60 = vld [vmem:[#allocation9 + $0x1800] ss:$24 sps:$4 sm:$0xff]   ;;  %v18274_v47 = vrot.slane %v18131_v35, 3 }
 0x67f   : > { %5065 = vmatpush1.bf16.msra.mxu1 %v16251_v3  ;;  %8848 = vmatpush1.bf16.msra.mxu0 %v16254_v41  ;;  %v16289_v3 = vld [vmem:[#allocation9 + $0xab4] ss:$24 sps:$4 sm:$0xff]  }
 0x680   : > { %5066 = vmatprep.subr.bf16.mxu1 %v16259_v9  ;;  %8849 = vmatprep.subr.bf16.mxu0 %v16262_v45  ;;  %v16292_v41 = vld [vmem:[#allocation9 + $0x1834] ss:$24 sps:$4 sm:$0xff]   ;;  %v16287_v9 = vld [vmem:[#allocation9 + $0xab0] ss:$24 sps:$4 sm:$0xff]  }
 0x681   : > { %v16290_v45 = vld [vmem:[#allocation9 + $0x1830] ss:$24 sps:$4 sm:$0xff]  }
 0x683   : > { %5067 = vmatpush1.bf16.msra.mxu1 %v16257_v10  ;;  %8850 = vmatpush1.bf16.msra.mxu0 %v16260_v16  ;;  %v16295_v10 = vld [vmem:[#allocation9 + $0xae4] ss:$24 sps:$4 sm:$0xff]  }
 0x684   : > { %5068 = vmatprep.subr.bf16.mxu1 %v16265_v7  ;;  %8851 = vmatprep.subr.bf16.mxu0 %v16268_v52  ;;  %v16298_v16 = vld [vmem:[#allocation9 + $0x1864] ss:$24 sps:$4 sm:$0xff]   ;;  %v16293_v7 = vld [vmem:[#allocation9 + $0xae0] ss:$24 sps:$4 sm:$0xff]  }
 0x685   : > { %v3791_v27 = vpop.f32.mrb[48].mxu1  ;;  %v18263_v30 = vpop.f32.mrb[112].mxu0  ;;  %v16296_v52 = vld [vmem:[#allocation9 + $0x1860] ss:$24 sps:$4 sm:$0xff]  }
 0x686   : > { %v18266_v31 = vadd.f32 %v3791_v27, %v18218_v11  ;;  %v3793_v53 = vpop.f32.mrb[49].mxu1  ;;  %v18268_v51 = vpop.f32.mrb[113].mxu0  ;;  %v16275_v11 = vld [vmem:[#allocation9 + $0xa58] ss:$24 sps:$4 sm:$0xff]   ;;  %v16310_v27 = vld [vmem:[#allocation9 + $0x18c4] ss:$24 sps:$4 sm:$0xff]  }
 0x687   : > { %v18271_v56 = vadd.f32 %v3793_v53, %v18223_v13  ;;  %v3795_v32 = vpop.f32.mrb[50].mxu1  ;;  %5069 = vmatpush1.bf16.msra.mxu1 %v16263_v21  ;;  %v6820_v29 = vpop.f32.mrb[114].mxu0  ;;  %8852 = vmatpush1.bf16.msra.mxu0 %v16266_v22  ;;  %v16283_v13 = vld [vmem:[#allocation9 + $0xa84] ss:$24 sps:$4 sm:$0xff]   ;;  %v16304_v21 = vld [vmem:[#allocation9 + $0x1894] ss:$24 sps:$4 sm:$0xff]  }
 0x688   : > { %v3796_v37 = vpop.f32.mrb[51].mxu1  ;;  %v6821_v15 = vpop.f32.mrb[115].mxu0  ;;  %5070 = vmatprep.subr.bf16.mxu1 %v16271_v24  ;;  %8853 = vmatprep.subr.bf16.mxu0 %v16274_v28  ;;  %v16299_v22 = vld [vmem:[#allocation9 + $0xb10] ss:$24 sps:$4 sm:$0xff]   ;;  %v16307_v28 = vld [vmem:[#allocation9 + $0xb44] ss:$24 sps:$4 sm:$0xff]  }
 0x689   : > { %v16302_v24 = vld [vmem:[#allocation9 + $0x1890] ss:$24 sps:$4 sm:$0xff]   ;;  %v16305_v53 = vld [vmem:[#allocation9 + $0xb40] ss:$24 sps:$4 sm:$0xff]   ;;  %v16313_v29 = vld [vmem:[#allocation9 + $0xb74] ss:$24 sps:$4 sm:$0xff]  }
 0x68a   : > { %v16308_v32 = vld [vmem:[#allocation9 + $0x18c0] ss:$24 sps:$4 sm:$0xff]   ;;  %v16314_v37 = vld [vmem:[#allocation9 + $0x18f0] ss:$24 sps:$4 sm:$0xff]   ;;  %v16319_v15 = vld [vmem:[#allocation9 + $0xba4] ss:$24 sps:$4 sm:$0xff]  }
 0x68b   : > { %5071 = vmatpush1.bf16.msra.mxu1 %v16269_v33  ;;  %8854 = vmatpush1.bf16.msra.mxu0 %v16272_v36  ;;  %v16316_v33 = vld [vmem:[#allocation9 + $0x18f4] ss:$24 sps:$4 sm:$0xff]   ;;  %v16311_v36 = vld [vmem:[#allocation9 + $0xb70] ss:$24 sps:$4 sm:$0xff]  }
 0x68c   : > { %5072 = vmatprep.subr.bf16.mxu1 %v16277_v54  ;;  %8855 = vmatprep.subr.bf16.mxu0 %v16280_v57  ;;  %v16322_v54 = vld [vmem:[#allocation9 + $0x1924] ss:$24 sps:$4 sm:$0xff]  }
 0x68f   : > { %5073 = vmatpush1.bf16.msra.mxu1 %v16275_v11  ;;  %8856 = vmatpush1.bf16.msra.mxu0 %v16278_v63 }
 0x690   : > { %5437 = vmatprep.subr.bf16.mxu1 %v16283_v13  ;;  %9218 = vmatprep.subr.bf16.mxu0 %v16286_v61 }
 0x692   : > { %5091 = vmatmul.mubr.bf16.vlgmr.msra.gmra.mrb[76].mxu1 %v18088_v34  ;;  %8874 = vmatmul.mubr.bf16.vlgmr.msra.gmra.mrb[140].mxu0 %v18274_v47  ;;  %v16301_v34 = vld [vmem:[#allocation9 + $0xb14] ss:$24 sps:$4 sm:$0xff]  }
 0x693   : > { %5438 = vmatpush1.bf16.msra.mxu1 %v16281_v1  ;;  %9219 = vmatpush1.bf16.msra.mxu0 %v16284_v60 }
 0x694   : > { %5439 = vmatprep.subr.bf16.mxu1 %v16289_v3  ;;  %9220 = vmatprep.subr.bf16.mxu0 %v16292_v41  ;;  %v16317_v41 = vld [vmem:[#allocation9 + $0xba0] ss:$24 sps:$4 sm:$0xff]  }
 0x695   : > { %5469 = vmatprep.mubr.bf16.mxu1 %v17606_v0  ;;  %9250 = vmatprep.mubr.bf16.mxu0 %v17606_v0 }
 0x697   : > { %5440 = vmatpush1.bf16.msra.mxu1 %v16287_v9  ;;  %9221 = vmatpush1.bf16.msra.mxu0 %v16290_v45  ;;  %v16320_v9 = vld [vmem:[#allocation9 + $0x1920] ss:$24 sps:$4 sm:$0xff]  }
 0x698   : > { %5441 = vmatprep.subr.bf16.mxu1 %v16295_v10  ;;  %9222 = vmatprep.subr.bf16.mxu0 %v16298_v16  ;;  %v16325_v16 = vld [vmem:[#allocation9 + $0xbd4] ss:$24 sps:$4 sm:$0xff]  }
 0x69b   : > { %5442 = vmatpush1.bf16.msra.mxu1 %v16293_v7  ;;  %9223 = vmatpush1.bf16.msra.mxu0 %v16296_v52  ;;  %v16328_v7 = vld [vmem:[#allocation9 + $0x1954] ss:$24 sps:$4 sm:$0xff]   ;;  %v16326_v52 = vld [vmem:[#allocation9 + $0x1950] ss:$24 sps:$4 sm:$0xff]  }
 0x69c   : > { %5443 = vmatprep.subr.bf16.mxu1 %v16301_v34  ;;  %9224 = vmatprep.subr.bf16.mxu0 %v16304_v21  ;;  %v16335_v34 = vld [vmem:[#allocation9 + $0x1814] ss:$24 sps:$4 sm:$0xff]   ;;  %v16329_v21 = vld [vmem:[#allocation9 + $0xa90] ss:$24 sps:$4 sm:$0xff]  }
 0x69f   : > { %5444 = vmatpush1.bf16.msra.mxu1 %v16299_v22  ;;  %9225 = vmatpush1.bf16.msra.mxu0 %v16302_v24  ;;  %v16333_v22 = vld [vmem:[#allocation9 + $0x1810] ss:$24 sps:$4 sm:$0xff]   ;;  %v16338_v24 = vld [vmem:[#allocation9 + $0xac4] ss:$24 sps:$4 sm:$0xff]  }
 0x6a0   : > { %5445 = vmatprep.subr.bf16.mxu1 %v16307_v28  ;;  %9226 = vmatprep.subr.bf16.mxu0 %v16310_v27  ;;  %v16341_v28 = vld [vmem:[#allocation9 + $0x1844] ss:$24 sps:$4 sm:$0xff]  }
 0x6a1   : > { %v18290_v27 = vld [vmem:[#allocation2 + $0x8] sm:$0xf] }
 0x6a3   : > { %5446 = vmatpush1.bf16.msra.mxu1 %v16305_v53  ;;  %9227 = vmatpush1.bf16.msra.mxu0 %v16308_v32  ;;  %v16336_v53 = vld [vmem:[#allocation9 + $0xac0] ss:$24 sps:$4 sm:$0xff]  }
 0x6a4   : > { %5447 = vmatprep.subr.bf16.mxu1 %v16313_v29  ;;  %9228 = vmatprep.subr.bf16.mxu0 %v16316_v33  ;;  %v16339_v32 = vld [vmem:[#allocation9 + $0x1840] ss:$24 sps:$4 sm:$0xff]   ;;  %v16344_v29 = vld [vmem:[#allocation9 + $0xaf4] ss:$24 sps:$4 sm:$0xff]  }
 0x6a5   : > { %v3832_v57 = vpop.f32.mrb[52].mxu1  ;;  %v18280_v11 = vpop.f32.mrb[116].mxu0  ;;  %v16347_v33 = vld [vmem:[#allocation9 + $0x1874] ss:$24 sps:$4 sm:$0xff]  }
 0x6a6   : > { %v18283_v63 = vadd.f32 %v3832_v57, %v18235_v49  ;;  %v3834_v13 = vpop.f32.mrb[53].mxu1  ;;  %v18285_v61 = vpop.f32.mrb[117].mxu0  ;;  %v16323_v49 = vld [vmem:[#allocation9 + $0xbd0] ss:$24 sps:$4 sm:$0xff]   ;;  %v16348_v57 = vld [vmem:[#allocation9 + $0xb20] ss:$24 sps:$4 sm:$0xff]  }
 0x6a7   : > { %v18288_v1 = vadd.f32 %v3834_v13, %v18240_v8  ;;  %v3836_v60 = vpop.f32.mrb[54].mxu1  ;;  %5448 = vmatpush1.bf16.msra.mxu1 %v16311_v36  ;;  %v7199_v3 = vpop.f32.mrb[118].mxu0  ;;  %9229 = vmatpush1.bf16.msra.mxu0 %v16314_v37  ;;  %v16331_v8 = vld [vmem:[#allocation9 + $0xa94] ss:$24 sps:$4 sm:$0xff]   ;;  %v16342_v36 = vld [vmem:[#allocation9 + $0xaf0] ss:$24 sps:$4 sm:$0xff]  }
 0x6a8   : > { %v3837_v45 = vpop.f32.mrb[55].mxu1  ;;  %v7200_v10 = vpop.f32.mrb[119].mxu0  ;;  %5449 = vmatprep.subr.bf16.mxu1 %v16319_v15  ;;  %9230 = vmatprep.subr.bf16.mxu0 %v16322_v54  ;;  %v16345_v37 = vld [vmem:[#allocation9 + $0x1870] ss:$24 sps:$4 sm:$0xff]   ;;  %v16350_v15 = vld [vmem:[#allocation9 + $0xb24] ss:$24 sps:$4 sm:$0xff]  }
 0x6a9   : > { %v16353_v54 = vld [vmem:[#allocation9 + $0x18a4] ss:$24 sps:$4 sm:$0xff]   ;;  %v16351_v13 = vld [vmem:[#allocation9 + $0x18a0] ss:$24 sps:$4 sm:$0xff]   ;;  %v16356_v60 = vld [vmem:[#allocation9 + $0xb54] ss:$24 sps:$4 sm:$0xff]  }
 0x6aa   : > { %v16359_v3 = vld [vmem:[#allocation9 + $0x18d4] ss:$24 sps:$4 sm:$0xff]   ;;  %v16362_v45 = vld [vmem:[#allocation9 + $0xb84] ss:$24 sps:$4 sm:$0xff]  }
 0x6ab   : > { %5450 = vmatpush1.bf16.msra.mxu1 %v16317_v41  ;;  %9231 = vmatpush1.bf16.msra.mxu0 %v16320_v9  ;;  %v16354_v41 = vld [vmem:[#allocation9 + $0xb50] ss:$24 sps:$4 sm:$0xff]   ;;  %v16365_v10 = vld [vmem:[#allocation9 + $0x1904] ss:$24 sps:$4 sm:$0xff]  }
 0x6ac   : > { %5451 = vmatprep.subr.bf16.mxu1 %v16325_v16  ;;  %9232 = vmatprep.subr.bf16.mxu0 %v16328_v7  ;;  %v16357_v9 = vld [vmem:[#allocation9 + $0x18d0] ss:$24 sps:$4 sm:$0xff]   ;;  %v16360_v16 = vld [vmem:[#allocation9 + $0xb80] ss:$24 sps:$4 sm:$0xff]  }
 0x6ad   : > { %v16363_v7 = vld [vmem:[#allocation9 + $0x1900] ss:$24 sps:$4 sm:$0xff]  }
 0x6af   : > { %5452 = vmatpush1.bf16.msra.mxu1 %v16323_v49  ;;  %9233 = vmatpush1.bf16.msra.mxu0 %v16326_v52  ;;  %v16368_v49 = vld [vmem:[#allocation9 + $0xbb4] ss:$24 sps:$4 sm:$0xff]  }
 0x6b0   : > { %5519 = vmatprep.subr.bf16.mxu1 %v16331_v8  ;;  %9300 = vmatprep.subr.bf16.mxu0 %v16335_v34  ;;  %v16371_v52 = vld [vmem:[#allocation9 + $0x1934] ss:$24 sps:$4 sm:$0xff]  }
 0x6b2   : > { %5470 = vmatmul.mubr.bf16.vlgmr.msra.gmra.mrb[80].mxu1 %v18099_v42  ;;  %9251 = vmatmul.mubr.bf16.vlgmr.msra.gmra.mrb[144].mxu0 %v18290_v27 }
 0x6b3   : > { %5520 = vmatpush1.bf16.msra.mxu1 %v16329_v21  ;;  %9301 = vmatpush1.bf16.msra.mxu0 %v16333_v22 }
 0x6b4   : > { %5521 = vmatprep.subr.bf16.mxu1 %v16338_v24  ;;  %9302 = vmatprep.subr.bf16.mxu0 %v16341_v28 }
 0x6b5   : > { %5551 = vmatprep.mubr.bf16.mxu1 %v17606_v0  ;;  %9332 = vmatprep.mubr.bf16.mxu0 %v17606_v0 }
 0x6b7   : > { %5522 = vmatpush1.bf16.msra.mxu1 %v16336_v53  ;;  %9303 = vmatpush1.bf16.msra.mxu0 %v16339_v32 }
 0x6b8   : > { %5523 = vmatprep.subr.bf16.mxu1 %v16344_v29  ;;  %9304 = vmatprep.subr.bf16.mxu0 %v16347_v33  ;;  %v16366_v29 = vld [vmem:[#allocation9 + $0xbb0] ss:$24 sps:$4 sm:$0xff]  }
 0x6b9   : > { %v16369_v33 = vld [vmem:[#allocation9 + $0x1930] ss:$24 sps:$4 sm:$0xff]  }
 0x6bb   : > { %5524 = vmatpush1.bf16.msra.mxu1 %v16342_v36  ;;  %9305 = vmatpush1.bf16.msra.mxu0 %v16345_v37 }
 0x6bc   : > { %5525 = vmatprep.subr.bf16.mxu1 %v16350_v15  ;;  %9306 = vmatprep.subr.bf16.mxu0 %v16353_v54  ;;  %v16374_v15 = vld [vmem:[#allocation9 + $0xbe4] ss:$24 sps:$4 sm:$0xff]  }
 0x6bd   : > { %v16377_v54 = vld [vmem:[#allocation9 + $0x1964] ss:$24 sps:$4 sm:$0xff]  }
 0x6bf   : > { %5526 = vmatpush1.bf16.msra.mxu1 %v16348_v57  ;;  %9307 = vmatpush1.bf16.msra.mxu0 %v16351_v13  ;;  %v16375_v13 = vld [vmem:[#allocation9 + $0x1960] ss:$24 sps:$4 sm:$0xff]  }
 0x6c0   : > { %5527 = vmatprep.subr.bf16.mxu1 %v16356_v60  ;;  %9308 = vmatprep.subr.bf16.mxu0 %v16359_v3  ;;  %v16380_v60 = vld [vmem:[#allocation9 + $0xc0c] ss:$24 sps:$4 sm:$0xff]  }
 0x6c1   : > { %v16383_v3 = vld [vmem:[#allocation9 + $0x198c] ss:$24 sps:$4 sm:$0xff]  }
 0x6c3   : > { %5528 = vmatpush1.bf16.msra.mxu1 %v16354_v41  ;;  %9309 = vmatpush1.bf16.msra.mxu0 %v16357_v9  ;;  %v16378_v41 = vld [vmem:[#allocation9 + $0xc08] ss:$24 sps:$4 sm:$0xff]  }
 0x6c4   : > { %5529 = vmatprep.subr.bf16.mxu1 %v16362_v45  ;;  %9310 = vmatprep.subr.bf16.mxu0 %v16365_v10  ;;  %v16381_v9 = vld [vmem:[#allocation9 + $0x1988] ss:$24 sps:$4 sm:$0xff]   ;;  %v16386_v45 = vld [vmem:[#allocation9 + $0xc3c] ss:$24 sps:$4 sm:$0xff]   ;;  %v16387_v10 = vld [vmem:[#allocation9 + $0x19b8] ss:$24 sps:$4 sm:$0xff]  }
 0x6c5   : > { %v3873_v8 = vpop.f32.mrb[56].mxu1  ;;  %v18296_v34 = vpop.f32.mrb[120].mxu0 }
 0x6c6   : > { %v3884_v21 = vadd.f32 %v3873_v8, %v18252_v26  ;;  %v3875_v22 = vpop.f32.mrb[57].mxu1  ;;  %v18299_v24 = vpop.f32.mrb[121].mxu0  ;;  %v16401_v8 = vld [vmem:[#allocation9 + $0x1a1c] ss:$24 sps:$4 sm:$0xff]  }
 0x6c7   : > { %v3885_v28 = vadd.f32 %v3875_v22, %v18257_v20  ;;  %v3877_v53 = vpop.f32.mrb[58].mxu1  ;;  %5530 = vmatpush1.bf16.msra.mxu1 %v16360_v16  ;;  %v7578_v32 = vpop.f32.mrb[122].mxu0  ;;  %9311 = vmatpush1.bf16.msra.mxu0 %v16363_v7  ;;  %v16372_v20 = vld [vmem:[#allocation9 + $0xbe0] ss:$24 sps:$4 sm:$0xff]   ;;  %v16392_v16 = vld [vmem:[#allocation9 + $0xc6c] ss:$24 sps:$4 sm:$0xff]  }
 0x6c8   : > { %v3878_v36 = vpop.f32.mrb[59].mxu1  ;;  %v7579_v37 = vpop.f32.mrb[123].mxu0  ;;  %5531 = vmatprep.subr.bf16.mxu1 %v16368_v49  ;;  %9312 = vmatprep.subr.bf16.mxu0 %v16371_v52  ;;  %v18303_v57 = vadd.f32 %v18120_v12, %v3884_v21  ;;  %v16389_v12 = vld [vmem:[#allocation9 + $0x19bc] ss:$24 sps:$4 sm:$0xff]   ;;  %v16395_v7 = vld [vmem:[#allocation9 + $0x19ec] ss:$24 sps:$4 sm:$0xff]  }
 0x6c9   : > { %v18306_v26 = vadd.f32 %v18124_v14, %v3885_v28  ;;  %v16384_v14 = vld [vmem:[#allocation9 + $0xc38] ss:$24 sps:$4 sm:$0xff]   ;;  %v16390_v49 = vld [vmem:[#allocation9 + $0xc68] ss:$24 sps:$4 sm:$0xff]   ;;  %v16404_v28 = vld [vmem:[#allocation9 + $0xccc] ss:$24 sps:$4 sm:$0xff]  }
 0x6ca   : > { %v16393_v52 = vld [vmem:[#allocation9 + $0x19e8] ss:$24 sps:$4 sm:$0xff]   ;;  %v16396_v21 = vld [vmem:[#allocation9 + $0xc98] ss:$24 sps:$4 sm:$0xff]   ;;  %v16407_v53 = vld [vmem:[#allocation9 + $0x1a4c] ss:$24 sps:$4 sm:$0xff]  }
 0x6cb   : > { %5532 = vmatpush1.bf16.msra.mxu1 %v16366_v29  ;;  %9313 = vmatpush1.bf16.msra.mxu0 %v16369_v33  ;;  %v16399_v22 = vld [vmem:[#allocation9 + $0x1a18] ss:$24 sps:$4 sm:$0xff]   ;;  %v16402_v32 = vld [vmem:[#allocation9 + $0xcc8] ss:$24 sps:$4 sm:$0xff]   ;;  %v16410_v33 = vld [vmem:[#allocation9 + $0xcfc] ss:$24 sps:$4 sm:$0xff]  }
 0x6cc   : > { %5533 = vmatprep.subr.bf16.mxu1 %v16374_v15  ;;  %9314 = vmatprep.subr.bf16.mxu0 %v16377_v54  ;;  %v16405_v29 = vld [vmem:[#allocation9 + $0x1a48] ss:$24 sps:$4 sm:$0xff]   ;;  %v16413_v36 = vld [vmem:[#allocation9 + $0x1a7c] ss:$24 sps:$4 sm:$0xff]   ;;  %v16408_v37 = vld [vmem:[#allocation9 + $0xcf8] ss:$24 sps:$4 sm:$0xff]  }
 0x6cd   : > { %v16411_v15 = vld [vmem:[#allocation9 + $0x1a78] ss:$24 sps:$4 sm:$0xff]   ;;  %v16416_v54 = vld [vmem:[#allocation9 + $0xd2c] ss:$24 sps:$4 sm:$0xff]  }
 0x6cf   : > { %5534 = vmatpush1.bf16.msra.mxu1 %v16372_v20  ;;  %9315 = vmatpush1.bf16.msra.mxu0 %v16375_v13  ;;  %v16419_v20 = vld [vmem:[#allocation9 + $0x1aac] ss:$24 sps:$4 sm:$0xff]  }
 0x6d0   : > { %5896 = vmatprep.subr.bf16.mxu1 %v16380_v60  ;;  %9684 = vmatprep.subr.bf16.mxu0 %v16383_v3 }
 0x6d2   : > { %5552 = vmatmul.mubr.bf16.vlgmr.msra.gmra.mrb[84].mxu1 %v18099_v42  ;;  %9333 = vmatmul.mubr.bf16.vlgmr.msra.gmra.mrb[148].mxu0 %v18290_v27  ;;  %v16398_v42 = vld [vmem:[#allocation9 + $0xc9c] ss:$24 sps:$4 sm:$0xff]  }
 0x6d3   : > { %5897 = vmatpush1.bf16.msra.mxu1 %v16378_v41  ;;  %9685 = vmatpush1.bf16.msra.mxu0 %v16381_v9 }
 0x6d4   : > { %5898 = vmatprep.subr.bf16.mxu1 %v16386_v45  ;;  %9686 = vmatprep.subr.bf16.mxu0 %v16389_v12 }
 0x6d5   : > { %5928 = vmatprep.mubr.bf16.mxu1 %v17606_v0  ;;  %9716 = vmatprep.mubr.bf16.mxu0 %v17606_v0 }
 0x6d7   : > { %5899 = vmatpush1.bf16.msra.mxu1 %v16384_v14  ;;  %9687 = vmatpush1.bf16.msra.mxu0 %v16387_v10  ;;  %v16414_v10 = vld [vmem:[#allocation9 + $0xd28] ss:$24 sps:$4 sm:$0xff]  }
 0x6d8   : > { %5900 = vmatprep.subr.bf16.mxu1 %v16392_v16  ;;  %9688 = vmatprep.subr.bf16.mxu0 %v16395_v7  ;;  %v16417_v16 = vld [vmem:[#allocation9 + $0x1aa8] ss:$24 sps:$4 sm:$0xff]  }
 0x6db   : > { %5901 = vmatpush1.bf16.msra.mxu1 %v16390_v49  ;;  %9689 = vmatpush1.bf16.msra.mxu0 %v16393_v52  ;;  %v16422_v52 = vld [vmem:[#allocation9 + $0xd5c] ss:$24 sps:$4 sm:$0xff]  }
 0x6dc   : > { %5902 = vmatprep.subr.bf16.mxu1 %v16398_v42  ;;  %9690 = vmatprep.subr.bf16.mxu0 %v16401_v8  ;;  %v16425_v42 = vld [vmem:[#allocation9 + $0x1adc] ss:$24 sps:$4 sm:$0xff]   ;;  %v16423_v8 = vld [vmem:[#allocation9 + $0x1ad8] ss:$24 sps:$4 sm:$0xff]  }
 0x6df   : > { %5903 = vmatpush1.bf16.msra.mxu1 %v16396_v21  ;;  %9691 = vmatpush1.bf16.msra.mxu0 %v16399_v22  ;;  %v16428_v21 = vld [vmem:[#allocation9 + $0xd84] ss:$24 sps:$4 sm:$0xff]  }
 0x6e0   : > { %5904 = vmatprep.subr.bf16.mxu1 %v16404_v28  ;;  %9692 = vmatprep.subr.bf16.mxu0 %v16407_v53  ;;  %v16431_v22 = vld [vmem:[#allocation9 + $0x1b04] ss:$24 sps:$4 sm:$0xff]   ;;  %v16426_v28 = vld [vmem:[#allocation9 + $0xd80] ss:$24 sps:$4 sm:$0xff]  }
 0x6e1   : > { %v16429_v53 = vld [vmem:[#allocation9 + $0x1b00] ss:$24 sps:$4 sm:$0xff]  }
 0x6e3   : > { %5905 = vmatpush1.bf16.msra.mxu1 %v16402_v32  ;;  %9693 = vmatpush1.bf16.msra.mxu0 %v16405_v29  ;;  %v16434_v29 = vld [vmem:[#allocation9 + $0xdb4] ss:$24 sps:$4 sm:$0xff]  }
 0x6e4   : > { %5906 = vmatprep.subr.bf16.mxu1 %v16410_v33  ;;  %9694 = vmatprep.subr.bf16.mxu0 %v16413_v36  ;;  %v16437_v33 = vld [vmem:[#allocation9 + $0x1b34] ss:$24 sps:$4 sm:$0xff]   ;;  %v17314_v36 = vld [vmem:[#allocation2 + $0x4] sm:$0xf] }
 0x6e5   : > { %v4211_v13 = vpop.f32.mrb[60].mxu1  ;;  %v18312_v60 = vpop.f32.mrb[124].mxu0 }
 0x6e6   : > { %v18315_v3 = vadd.f32 %v4211_v13, %v18266_v31  ;;  %v4213_v41 = vpop.f32.mrb[61].mxu1  ;;  %v18317_v9 = vpop.f32.mrb[125].mxu0  ;;  %v16420_v31 = vld [vmem:[#allocation9 + $0xd58] ss:$24 sps:$4 sm:$0xff]  }
 0x6e7   : > { %v18320_v45 = vadd.f32 %v4213_v41, %v18271_v56  ;;  %v4215_v12 = vpop.f32.mrb[62].mxu1  ;;  %5907 = vmatpush1.bf16.msra.mxu1 %v16408_v37  ;;  %v7660_v14 = vpop.f32.mrb[126].mxu0  ;;  %9695 = vmatpush1.bf16.msra.mxu0 %v16411_v15  ;;  %v18324_v56 = vcombine.low %v18290_v27, %v18290_v27  ;;  %v16432_v27 = vld [vmem:[#allocation9 + $0xdb0] ss:$24 sps:$4 sm:$0xff]   ;;  %v16440_v15 = vld [vmem:[#allocation9 + $0xde4] ss:$24 sps:$4 sm:$0xff]  }
 0x6e8   : > { %v4216_v7 = vpop.f32.mrb[63].mxu1  ;;  %v7661_v49 = vpop.f32.mrb[127].mxu0  ;;  %5908 = vmatprep.subr.bf16.mxu1 %v16416_v54  ;;  %9696 = vmatprep.subr.bf16.mxu0 %v16419_v20  ;;  %v16435_v37 = vld [vmem:[#allocation9 + $0x1b30] ss:$24 sps:$4 sm:$0xff]   ;;  %v16443_v54 = vld [vmem:[#allocation9 + $0x1b64] ss:$24 sps:$4 sm:$0xff]  }
 0x6e9   : > { %v18327_v32 = vshrl.u32 %v18324_v56, 16  ;;  %v16438_v20 = vld [vmem:[#allocation9 + $0xde0] ss:$24 sps:$4 sm:$0xff]   ;;  %v16446_v41 = vld [vmem:[#allocation9 + $0xe14] ss:$24 sps:$4 sm:$0xff]  }
 0x6ea   : > { %v16441_v13 = vld [vmem:[#allocation9 + $0x1b60] ss:$24 sps:$4 sm:$0xff]   ;;  %v16449_v12 = vld [vmem:[#allocation9 + $0x1b94] ss:$24 sps:$4 sm:$0xff]   ;;  %v16444_v14 = vld [vmem:[#allocation9 + $0xe10] ss:$24 sps:$4 sm:$0xff]  }
 0x6eb   : > { %5909 = vmatpush1.bf16.msra.mxu1 %v16414_v10  ;;  %9697 = vmatpush1.bf16.msra.mxu0 %v16417_v16  ;;  %v16447_v10 = vld [vmem:[#allocation9 + $0x1b90] ss:$24 sps:$4 sm:$0xff]   ;;  %v16452_v16 = vld [vmem:[#allocation9 + $0xe44] ss:$24 sps:$4 sm:$0xff]   ;;  %v16450_v49 = vld [vmem:[#allocation9 + $0xe40] ss:$24 sps:$4 sm:$0xff]  }
 0x6ec   : > { %5910 = vmatprep.subr.bf16.mxu1 %v16422_v52  ;;  %9698 = vmatprep.subr.bf16.mxu0 %v16425_v42  ;;  %v16455_v7 = vld [vmem:[#allocation9 + $0x1bc4] ss:$24 sps:$4 sm:$0xff]   ;;  %v16453_v52 = vld [vmem:[#allocation9 + $0x1bc0] ss:$24 sps:$4 sm:$0xff]   ;;  %v16458_v42 = vld [vmem:[#allocation9 + $0xe74] ss:$24 sps:$4 sm:$0xff]  }
 0x6ef   : > { %5911 = vmatpush1.bf16.msra.mxu1 %v16420_v31  ;;  %9699 = vmatpush1.bf16.msra.mxu0 %v16423_v8  ;;  %v16461_v31 = vld [vmem:[#allocation9 + $0x1bf4] ss:$24 sps:$4 sm:$0xff]   ;;  %v16456_v8 = vld [vmem:[#allocation9 + $0xe70] ss:$24 sps:$4 sm:$0xff]  }
 0x6f0   : > { %6280 = vmatprep.subr.bf16.mxu1 %v16428_v21  ;;  %10063 = vmatprep.subr.bf16.mxu0 %v16431_v22  ;;  %v16459_v21 = vld [vmem:[#allocation9 + $0x1bf0] ss:$24 sps:$4 sm:$0xff]   ;;  %v16464_v22 = vld [vmem:[#allocation9 + $0xea4] ss:$24 sps:$4 sm:$0xff]  }
 0x6f2   : > { %5929 = vmatmul.mubr.bf16.vlgmr.msra.gmra.mrb[88].mxu1 %v17314_v36  ;;  %9717 = vmatmul.mubr.bf16.vlgmr.msra.gmra.mrb[152].mxu0 %v18327_v32 }
 0x6f3   : > { %6281 = vmatpush1.bf16.msra.mxu1 %v16426_v28  ;;  %10064 = vmatpush1.bf16.msra.mxu0 %v16429_v53  ;;  %v16467_v28 = vld [vmem:[#allocation9 + $0x1c24] ss:$24 sps:$4 sm:$0xff]  }
 0x6f4   : > { %6282 = vmatprep.subr.bf16.mxu1 %v16434_v29  ;;  %10065 = vmatprep.subr.bf16.mxu0 %v16437_v33 }
 0x6f5   : > { %6312 = vmatprep.mubr.bf16.mxu1 %v17606_v0  ;;  %10095 = vmatprep.mubr.bf16.mxu0 %v17606_v0 }
 0x6f7   : > { %6283 = vmatpush1.bf16.msra.mxu1 %v16432_v27  ;;  %10066 = vmatpush1.bf16.msra.mxu0 %v16435_v37 }
 0x6f8   : > { %6284 = vmatprep.subr.bf16.mxu1 %v16440_v15  ;;  %10067 = vmatprep.subr.bf16.mxu0 %v16443_v54 }
 0x6fb   : > { %6285 = vmatpush1.bf16.msra.mxu1 %v16438_v20  ;;  %10068 = vmatpush1.bf16.msra.mxu0 %v16441_v13  ;;  %v16462_v20 = vld [vmem:[#allocation9 + $0xea0] ss:$24 sps:$4 sm:$0xff]  }
 0x6fc   : > { %6286 = vmatprep.subr.bf16.mxu1 %v16446_v41  ;;  %10069 = vmatprep.subr.bf16.mxu0 %v16449_v12  ;;  %v16465_v13 = vld [vmem:[#allocation9 + $0x1c20] ss:$24 sps:$4 sm:$0xff]  }
 0x6ff   : > { %6287 = vmatpush1.bf16.msra.mxu1 %v16444_v14  ;;  %10070 = vmatpush1.bf16.msra.mxu0 %v16447_v10  ;;  %v16470_v14 = vld [vmem:[#allocation9 + $0xed4] ss:$24 sps:$4 sm:$0xff]  }
 0x700   : > { %6288 = vmatprep.subr.bf16.mxu1 %v16452_v16  ;;  %10071 = vmatprep.subr.bf16.mxu0 %v16455_v7  ;;  %v16473_v10 = vld [vmem:[#allocation9 + $0x1c54] ss:$24 sps:$4 sm:$0xff]   ;;  %v16471_v7 = vld [vmem:[#allocation9 + $0x1c50] ss:$24 sps:$4 sm:$0xff]  }
 0x703   : > { %6289 = vmatpush1.bf16.msra.mxu1 %v16450_v49  ;;  %10072 = vmatpush1.bf16.msra.mxu0 %v16453_v52  ;;  %v16476_v49 = vld [vmem:[#allocation9 + $0xd94] ss:$24 sps:$4 sm:$0xff]  }
 0x704   : > { %6290 = vmatprep.subr.bf16.mxu1 %v16458_v42  ;;  %10073 = vmatprep.subr.bf16.mxu0 %v16461_v31  ;;  %v16479_v52 = vld [vmem:[#allocation9 + $0x1b14] ss:$24 sps:$4 sm:$0xff]   ;;  %v16474_v42 = vld [vmem:[#allocation9 + $0xd90] ss:$24 sps:$4 sm:$0xff]  }
 0x705   : > { %v4252_v53 = vpop.f32.mrb[64].mxu1  ;;  %v18332_v29 = vpop.f32.mrb[128].mxu0  ;;  %v16477_v31 = vld [vmem:[#allocation9 + $0x1b10] ss:$24 sps:$4 sm:$0xff]  }
 0x706   : > { %v4302_v33 = vadd.f32 %v4252_v53, %v18283_v63  ;;  %v4254_v36 = vpop.f32.mrb[65].mxu1  ;;  %v18335_v27 = vpop.f32.mrb[129].mxu0  ;;  %v16491_v53 = vld [vmem:[#allocation9 + $0x1b74] ss:$24 sps:$4 sm:$0xff]  }
 0x707   : > { %v4303_v37 = vadd.f32 %v4254_v36, %v18288_v1  ;;  %v4256_v15 = vpop.f32.mrb[66].mxu1  ;;  %6291 = vmatpush1.bf16.msra.mxu1 %v16456_v8  ;;  %v8039_v54 = vpop.f32.mrb[130].mxu0  ;;  %10074 = vmatpush1.bf16.msra.mxu0 %v16459_v21  ;;  %v16468_v1 = vld [vmem:[#allocation9 + $0xed0] ss:$24 sps:$4 sm:$0xff]   ;;  %v18345_v8 = vrot.slane %v18324_v56, 1 }
 0x708   : > { %v4257_v41 = vpop.f32.mrb[67].mxu1  ;;  %v8040_v12 = vpop.f32.mrb[131].mxu0  ;;  %6292 = vmatprep.subr.bf16.mxu1 %v16464_v22  ;;  %10075 = vmatprep.subr.bf16.mxu0 %v16467_v28  ;;  %v18339_v16 = vadd.f32 %v18139_v59, %v4302_v33  ;;  %v16482_v59 = vld [vmem:[#allocation9 + $0xdc4] ss:$24 sps:$4 sm:$0xff]   ;;  %v16480_v21 = vld [vmem:[#allocation9 + $0xdc0] ss:$24 sps:$4 sm:$0xff]  }
 0x709   : > { %v18342_v63 = vadd.f32 %v18143_v62, %v4303_v37  ;;  %v16485_v62 = vld [vmem:[#allocation9 + $0x1b44] ss:$24 sps:$4 sm:$0xff]   ;;  %v16483_v22 = vld [vmem:[#allocation9 + $0x1b40] ss:$24 sps:$4 sm:$0xff]   ;;  %v16488_v28 = vld [vmem:[#allocation9 + $0xdf4] ss:$24 sps:$4 sm:$0xff]  }
 0x70a   : > { %v16486_v33 = vld [vmem:[#allocation9 + $0xdf0] ss:$24 sps:$4 sm:$0xff]   ;;  %v16494_v37 = vld [vmem:[#allocation9 + $0xe24] ss:$24 sps:$4 sm:$0xff]   ;;  %v16492_v54 = vld [vmem:[#allocation9 + $0xe20] ss:$24 sps:$4 sm:$0xff]  }
 0x70b   : > { %6293 = vmatpush1.bf16.msra.mxu1 %v16462_v20  ;;  %10076 = vmatpush1.bf16.msra.mxu0 %v16465_v13  ;;  %v16489_v36 = vld [vmem:[#allocation9 + $0x1b70] ss:$24 sps:$4 sm:$0xff]   ;;  %v16497_v15 = vld [vmem:[#allocation9 + $0x1ba4] ss:$24 sps:$4 sm:$0xff]   ;;  %v16495_v20 = vld [vmem:[#allocation9 + $0x1ba0] ss:$24 sps:$4 sm:$0xff]  }
 0x70c   : > { %6294 = vmatprep.subr.bf16.mxu1 %v16470_v14  ;;  %10077 = vmatprep.subr.bf16.mxu0 %v16473_v10  ;;  %v16500_v13 = vld [vmem:[#allocation9 + $0xe54] ss:$24 sps:$4 sm:$0xff]   ;;  %v16498_v12 = vld [vmem:[#allocation9 + $0xe50] ss:$24 sps:$4 sm:$0xff]   ;;  %v16506_v10 = vld [vmem:[#allocation9 + $0xe84] ss:$24 sps:$4 sm:$0xff]  }
 0x70d   : > { %v16503_v41 = vld [vmem:[#allocation9 + $0x1bd4] ss:$24 sps:$4 sm:$0xff]   ;;  %v16501_v14 = vld [vmem:[#allocation9 + $0x1bd0] ss:$24 sps:$4 sm:$0xff]  }
 0x70f   : > { %6295 = vmatpush1.bf16.msra.mxu1 %v16468_v1  ;;  %10078 = vmatpush1.bf16.msra.mxu0 %v16471_v7  ;;  %v16509_v1 = vld [vmem:[#allocation9 + $0x1c04] ss:$24 sps:$4 sm:$0xff]   ;;  %v16504_v7 = vld [vmem:[#allocation9 + $0xe80] ss:$24 sps:$4 sm:$0xff]  }
 0x710   : > { %6362 = vmatprep.subr.bf16.mxu1 %v16476_v49  ;;  %10145 = vmatprep.subr.bf16.mxu0 %v16479_v52  ;;  %v16507_v49 = vld [vmem:[#allocation9 + $0x1c00] ss:$24 sps:$4 sm:$0xff]   ;;  %v16512_v52 = vld [vmem:[#allocation9 + $0xeb4] ss:$24 sps:$4 sm:$0xff]  }
 0x712   : > { %6313 = vmatmul.mubr.bf16.vlgmr.msra.gmra.mrb[92].mxu1 %v18131_v35  ;;  %10096 = vmatmul.mubr.bf16.vlgmr.msra.gmra.mrb[156].mxu0 %v18345_v8 }
 0x713   : > { %6363 = vmatpush1.bf16.msra.mxu1 %v16474_v42  ;;  %10146 = vmatpush1.bf16.msra.mxu0 %v16477_v31  ;;  %v16515_v42 = vld [vmem:[#allocation9 + $0x1c34] ss:$24 sps:$4 sm:$0xff]  }
 0x714   : > { %6364 = vmatprep.subr.bf16.mxu1 %v16482_v59  ;;  %10147 = vmatprep.subr.bf16.mxu0 %v16485_v62 }
 0x715   : > { %6394 = vmatprep.mubr.bf16.mxu1 %v17606_v0  ;;  %10177 = vmatprep.mubr.bf16.mxu0 %v17606_v0 }
 0x717   : > { %6365 = vmatpush1.bf16.msra.mxu1 %v16480_v21  ;;  %10148 = vmatpush1.bf16.msra.mxu0 %v16483_v22 }
 0x718   : > { %6366 = vmatprep.subr.bf16.mxu1 %v16488_v28  ;;  %10149 = vmatprep.subr.bf16.mxu0 %v16491_v53 }
 0x71b   : > { %6367 = vmatpush1.bf16.msra.mxu1 %v16486_v33  ;;  %10150 = vmatpush1.bf16.msra.mxu0 %v16489_v36  ;;  %v16510_v36 = vld [vmem:[#allocation9 + $0xeb0] ss:$24 sps:$4 sm:$0xff]  }
 0x71c   : > { %6368 = vmatprep.subr.bf16.mxu1 %v16494_v37  ;;  %10151 = vmatprep.subr.bf16.mxu0 %v16497_v15  ;;  %v16513_v37 = vld [vmem:[#allocation9 + $0x1c30] ss:$24 sps:$4 sm:$0xff]  }
 0x71f   : > { %6369 = vmatpush1.bf16.msra.mxu1 %v16492_v54  ;;  %10152 = vmatpush1.bf16.msra.mxu0 %v16495_v20  ;;  %v16518_v20 = vld [vmem:[#allocation9 + $0xee4] ss:$24 sps:$4 sm:$0xff]  }
 0x720   : > { %6370 = vmatprep.subr.bf16.mxu1 %v16500_v13  ;;  %10153 = vmatprep.subr.bf16.mxu0 %v16503_v41  ;;  %v16521_v13 = vld [vmem:[#allocation9 + $0x1c64] ss:$24 sps:$4 sm:$0xff]  }
 0x723   : > { %6371 = vmatpush1.bf16.msra.mxu1 %v16498_v12  ;;  %10154 = vmatpush1.bf16.msra.mxu0 %v16501_v14  ;;  %v16519_v12 = vld [vmem:[#allocation9 + $0x1c60] ss:$24 sps:$4 sm:$0xff]   ;;  %v16524_v14 = vld [vmem:[#allocation9 + $0xf0c] ss:$24 sps:$4 sm:$0xff]  }
 0x724   : > { %6372 = vmatprep.subr.bf16.mxu1 %v16506_v10  ;;  %10155 = vmatprep.subr.bf16.mxu0 %v16509_v1  ;;  %v16527_v10 = vld [vmem:[#allocation9 + $0x1c8c] ss:$24 sps:$4 sm:$0xff]   ;;  %v16522_v1 = vld [vmem:[#allocation9 + $0xf08] ss:$24 sps:$4 sm:$0xff]  }
 0x725   : > { %v4631_v31 = vpop.f32.mrb[68].mxu1  ;;  %v18351_v59 = vpop.f32.mrb[132].mxu0 }
 0x726   : > { %v4720_v62 = vadd.f32 %v4631_v31, %v18315_v3  ;;  %v4633_v21 = vpop.f32.mrb[69].mxu1  ;;  %v18354_v22 = vpop.f32.mrb[133].mxu0  ;;  %v16539_v31 = vld [vmem:[#allocation9 + $0x1cec] ss:$24 sps:$4 sm:$0xff]  }
 0x727   : > { %v4721_v28 = vadd.f32 %v4633_v21, %v18320_v45  ;;  %v4635_v53 = vpop.f32.mrb[70].mxu1  ;;  %6373 = vmatpush1.bf16.msra.mxu1 %v16504_v7  ;;  %v8418_v33 = vpop.f32.mrb[134].mxu0  ;;  %10156 = vmatpush1.bf16.msra.mxu0 %v16507_v49  ;;  %v16516_v45 = vld [vmem:[#allocation9 + $0xee0] ss:$24 sps:$4 sm:$0xff]   ;;  %v16530_v49 = vld [vmem:[#allocation9 + $0xf3c] ss:$24 sps:$4 sm:$0xff]  }
 0x728   : > { %v4636_v15 = vpop.f32.mrb[71].mxu1  ;;  %v8419_v54 = vpop.f32.mrb[135].mxu0  ;;  %6374 = vmatprep.subr.bf16.mxu1 %v16512_v52  ;;  %10157 = vmatprep.subr.bf16.mxu0 %v16515_v42  ;;  %v18358_v41 = vadd.f32 %v18154_v48, %v4720_v62  ;;  %v16525_v7 = vld [vmem:[#allocation9 + $0x1c88] ss:$24 sps:$4 sm:$0xff]   ;;  %v16533_v48 = vld [vmem:[#allocation9 + $0x1cbc] ss:$24 sps:$4 sm:$0xff]  }
 0x729   : > { %v18361_v3 = vadd.f32 %v18158_v50, %v4721_v28  ;;  %v16528_v50 = vld [vmem:[#allocation9 + $0xf38] ss:$24 sps:$4 sm:$0xff]   ;;  %v16536_v42 = vld [vmem:[#allocation9 + $0xf6c] ss:$24 sps:$4 sm:$0xff]   ;;  %v16534_v62 = vld [vmem:[#allocation9 + $0xf68] ss:$24 sps:$4 sm:$0xff]  }
 0x72a   : > { %v16531_v52 = vld [vmem:[#allocation9 + $0x1cb8] ss:$24 sps:$4 sm:$0xff]   ;;  %v16537_v21 = vld [vmem:[#allocation9 + $0x1ce8] ss:$24 sps:$4 sm:$0xff]   ;;  %v16545_v28 = vld [vmem:[#allocation9 + $0x1d1c] ss:$24 sps:$4 sm:$0xff]  }
 0x72b   : > { %6375 = vmatpush1.bf16.msra.mxu1 %v16510_v36  ;;  %10158 = vmatpush1.bf16.msra.mxu0 %v16513_v37  ;;  %v16540_v53 = vld [vmem:[#allocation9 + $0xf98] ss:$24 sps:$4 sm:$0xff]   ;;  %v16548_v36 = vld [vmem:[#allocation9 + $0xfcc] ss:$24 sps:$4 sm:$0xff]   ;;  %v16546_v15 = vld [vmem:[#allocation9 + $0xfc8] ss:$24 sps:$4 sm:$0xff]  }
 0x72c   : > { %6376 = vmatprep.subr.bf16.mxu1 %v16518_v20  ;;  %10159 = vmatprep.subr.bf16.mxu0 %v16521_v13  ;;  %v16543_v33 = vld [vmem:[#allocation9 + $0x1d18] ss:$24 sps:$4 sm:$0xff]   ;;  %v16551_v37 = vld [vmem:[#allocation9 + $0x1d4c] ss:$24 sps:$4 sm:$0xff]   ;;  %v16549_v54 = vld [vmem:[#allocation9 + $0x1d48] ss:$24 sps:$4 sm:$0xff]  }
 0x72d   : > { %v16554_v20 = vld [vmem:[#allocation9 + $0xffc] ss:$24 sps:$4 sm:$0xff]  }
 0x72e   : > { %v16557_v13 = vld [vmem:[#allocation9 + $0x1d7c] ss:$24 sps:$4 sm:$0xff]  }
 0x72f   : > { %6377 = vmatpush1.bf16.msra.mxu1 %v16516_v45  ;;  %10160 = vmatpush1.bf16.msra.mxu0 %v16519_v12  ;;  %v16552_v45 = vld [vmem:[#allocation9 + $0xff8] ss:$24 sps:$4 sm:$0xff]  }
 0x730   : > { %6741 = vmatprep.subr.bf16.mxu1 %v16524_v14  ;;  %10524 = vmatprep.subr.bf16.mxu0 %v16527_v10  ;;  %v16555_v12 = vld [vmem:[#allocation9 + $0x1d78] ss:$24 sps:$4 sm:$0xff]   ;;  %v16560_v14 = vld [vmem:[#allocation9 + $0x102c] ss:$24 sps:$4 sm:$0xff]  }
 0x731   : > { %v16563_v10 = vld [vmem:[#allocation9 + $0x1dac] ss:$24 sps:$4 sm:$0xff]  }
 0x732   : > { %6395 = vmatmul.mubr.bf16.vlgmr.msra.gmra.mrb[96].mxu1 %v18131_v35  ;;  %10178 = vmatmul.mubr.bf16.vlgmr.msra.gmra.mrb[160].mxu0 %v18345_v8  ;;  %v16542_v35 = vld [vmem:[#allocation9 + $0xf9c] ss:$24 sps:$4 sm:$0xff]  }
 0x733   : > { %6742 = vmatpush1.bf16.msra.mxu1 %v16522_v1  ;;  %10525 = vmatpush1.bf16.msra.mxu0 %v16525_v7 }
 0x734   : > { %6743 = vmatprep.subr.bf16.mxu1 %v16530_v49  ;;  %10526 = vmatprep.subr.bf16.mxu0 %v16533_v48 }
 0x735   : > { %6773 = vmatprep.mubr.bf16.mxu1 %v17606_v0  ;;  %10556 = vmatprep.mubr.bf16.mxu0 %v17606_v0 }
 0x737   : > { %6744 = vmatpush1.bf16.msra.mxu1 %v16528_v50  ;;  %10527 = vmatpush1.bf16.msra.mxu0 %v16531_v52 }
 0x738   : > { %6745 = vmatprep.subr.bf16.mxu1 %v16536_v42  ;;  %10528 = vmatprep.subr.bf16.mxu0 %v16539_v31 }
 0x73b   : > { %6746 = vmatpush1.bf16.msra.mxu1 %v16534_v62  ;;  %10529 = vmatpush1.bf16.msra.mxu0 %v16537_v21  ;;  %v16558_v62 = vld [vmem:[#allocation9 + $0x1028] ss:$24 sps:$4 sm:$0xff]  }
 0x73c   : > { %6747 = vmatprep.subr.bf16.mxu1 %v16542_v35  ;;  %10530 = vmatprep.subr.bf16.mxu0 %v16545_v28  ;;  %v16561_v21 = vld [vmem:[#allocation9 + $0x1da8] ss:$24 sps:$4 sm:$0xff]  }
 0x73f   : > { %6748 = vmatpush1.bf16.msra.mxu1 %v16540_v53  ;;  %10531 = vmatpush1.bf16.msra.mxu0 %v16543_v33  ;;  %v16566_v53 = vld [vmem:[#allocation9 + $0x105c] ss:$24 sps:$4 sm:$0xff]  }
 0x740   : > { %6749 = vmatprep.subr.bf16.mxu1 %v16548_v36  ;;  %10532 = vmatprep.subr.bf16.mxu0 %v16551_v37  ;;  %v16569_v33 = vld [vmem:[#allocation9 + $0x1ddc] ss:$24 sps:$4 sm:$0xff]   ;;  %v16567_v37 = vld [vmem:[#allocation9 + $0x1dd8] ss:$24 sps:$4 sm:$0xff]  }
 0x743   : > { %6750 = vmatpush1.bf16.msra.mxu1 %v16546_v15  ;;  %10533 = vmatpush1.bf16.msra.mxu0 %v16549_v54  ;;  %v16572_v15 = vld [vmem:[#allocation9 + $0x1084] ss:$24 sps:$4 sm:$0xff]  }
 0x744   : > { %6751 = vmatprep.subr.bf16.mxu1 %v16554_v20  ;;  %10534 = vmatprep.subr.bf16.mxu0 %v16557_v13  ;;  %v16575_v54 = vld [vmem:[#allocation9 + $0x1e04] ss:$24 sps:$4 sm:$0xff]   ;;  %v16570_v20 = vld [vmem:[#allocation9 + $0x1080] ss:$24 sps:$4 sm:$0xff]  }
 0x745   : > { %v4713_v1 = vpop.f32.mrb[72].mxu1  ;;  %v18367_v7 = vpop.f32.mrb[136].mxu0  ;;  %v16573_v13 = vld [vmem:[#allocation9 + $0x1e00] ss:$24 sps:$4 sm:$0xff]  }
 0x746   : > { %v4724_v49 = vadd.f32 %v4713_v1, %v18303_v57  ;;  %v4715_v48 = vpop.f32.mrb[73].mxu1  ;;  %v18370_v50 = vpop.f32.mrb[137].mxu0  ;;  %v16587_v1 = vld [vmem:[#allocation9 + $0x1e64] ss:$24 sps:$4 sm:$0xff]  }
 0x747   : > { %v4725_v52 = vadd.f32 %v4715_v48, %v18306_v26  ;;  %v4717_v42 = vpop.f32.mrb[74].mxu1  ;;  %6752 = vmatpush1.bf16.msra.mxu1 %v16552_v45  ;;  %v8500_v31 = vpop.f32.mrb[138].mxu0  ;;  %10535 = vmatpush1.bf16.msra.mxu0 %v16555_v12  ;;  %v16564_v26 = vld [vmem:[#allocation9 + $0x1058] ss:$24 sps:$4 sm:$0xff]   ;;  %v18380_v45 = vrot.slane %v18327_v32, 1 }
 0x748   : > { %v4718_v35 = vpop.f32.mrb[75].mxu1  ;;  %v8501_v28 = vpop.f32.mrb[139].mxu0  ;;  %6753 = vmatprep.subr.bf16.mxu1 %v16560_v14  ;;  %10536 = vmatprep.subr.bf16.mxu0 %v16563_v10  ;;  %v18374_v36 = vadd.f32 %v18167_v40, %v4724_v49  ;;  %v16578_v40 = vld [vmem:[#allocation9 + $0x10b4] ss:$24 sps:$4 sm:$0xff]   ;;  %v16576_v12 = vld [vmem:[#allocation9 + $0x10b0] ss:$24 sps:$4 sm:$0xff]  }
 0x749   : > { %v18377_v57 = vadd.f32 %v18172_v44, %v4725_v52  ;;  %v16581_v44 = vld [vmem:[#allocation9 + $0x1e34] ss:$24 sps:$4 sm:$0xff]   ;;  %v16579_v14 = vld [vmem:[#allocation9 + $0x1e30] ss:$24 sps:$4 sm:$0xff]   ;;  %v16584_v10 = vld [vmem:[#allocation9 + $0x10e4] ss:$24 sps:$4 sm:$0xff]  }
 0x74a   : > { %v16582_v49 = vld [vmem:[#allocation9 + $0x10e0] ss:$24 sps:$4 sm:$0xff]   ;;  %v16593_v52 = vld [vmem:[#allocation9 + $0x1e94] ss:$24 sps:$4 sm:$0xff]   ;;  %v16588_v42 = vld [vmem:[#allocation9 + $0x1110] ss:$24 sps:$4 sm:$0xff]  }
 0x74b   : > { %6754 = vmatpush1.bf16.msra.mxu1 %v16558_v62  ;;  %10537 = vmatpush1.bf16.msra.mxu0 %v16561_v21  ;;  %v16585_v48 = vld [vmem:[#allocation9 + $0x1e60] ss:$24 sps:$4 sm:$0xff]   ;;  %v16591_v31 = vld [vmem:[#allocation9 + $0x1e90] ss:$24 sps:$4 sm:$0xff]   ;;  %v16596_v62 = vld [vmem:[#allocation9 + $0x1144] ss:$24 sps:$4 sm:$0xff]  }
 0x74c   : > { %6755 = vmatprep.subr.bf16.mxu1 %v16566_v53  ;;  %10538 = vmatprep.subr.bf16.mxu0 %v16569_v33  ;;  %v16599_v21 = vld [vmem:[#allocation9 + $0x1ec4] ss:$24 sps:$4 sm:$0xff]   ;;  %v16594_v35 = vld [vmem:[#allocation9 + $0x1140] ss:$24 sps:$4 sm:$0xff]   ;;  %v16602_v53 = vld [vmem:[#allocation9 + $0x1174] ss:$24 sps:$4 sm:$0xff]  }
 0x74d   : > { %v16597_v28 = vld [vmem:[#allocation9 + $0x1ec0] ss:$24 sps:$4 sm:$0xff]   ;;  %v16605_v33 = vld [vmem:[#allocation9 + $0x1ef4] ss:$24 sps:$4 sm:$0xff]  }
 0x74f   : > { %6756 = vmatpush1.bf16.msra.mxu1 %v16564_v26  ;;  %10539 = vmatpush1.bf16.msra.mxu0 %v16567_v37  ;;  %v16600_v26 = vld [vmem:[#allocation9 + $0x1170] ss:$24 sps:$4 sm:$0xff]  }
 0x750   : > { %7120 = vmatprep.subr.bf16.mxu1 %v16572_v15  ;;  %10903 = vmatprep.subr.bf16.mxu0 %v16575_v54  ;;  %v16603_v37 = vld [vmem:[#allocation9 + $0x1ef0] ss:$24 sps:$4 sm:$0xff]   ;;  %v16608_v15 = vld [vmem:[#allocation9 + $0x11a4] ss:$24 sps:$4 sm:$0xff]  }
 0x751   : > { %v16611_v54 = vld [vmem:[#allocation9 + $0x1f24] ss:$24 sps:$4 sm:$0xff]  }
 0x752   : > { %6774 = vmatmul.mubr.bf16.vlgmr.msra.gmra.mrb[100].mxu1 %v18146_v19  ;;  %10557 = vmatmul.mubr.bf16.vlgmr.msra.gmra.mrb[164].mxu0 %v18380_v45  ;;  %v16590_v19 = vld [vmem:[#allocation9 + $0x1114] ss:$24 sps:$4 sm:$0xff]  }
 0x753   : > { %7121 = vmatpush1.bf16.msra.mxu1 %v16570_v20  ;;  %10904 = vmatpush1.bf16.msra.mxu0 %v16573_v13 }
 0x754   : > { %7122 = vmatprep.subr.bf16.mxu1 %v16578_v40  ;;  %10905 = vmatprep.subr.bf16.mxu0 %v16581_v44 }
 0x755   : > { %7152 = vmatprep.mubr.bf16.mxu1 %v17606_v0  ;;  %10935 = vmatprep.mubr.bf16.mxu0 %v17606_v0 }
 0x757   : > { %7123 = vmatpush1.bf16.msra.mxu1 %v16576_v12  ;;  %10906 = vmatpush1.bf16.msra.mxu0 %v16579_v14 }
 0x758   : > { %7124 = vmatprep.subr.bf16.mxu1 %v16584_v10  ;;  %10907 = vmatprep.subr.bf16.mxu0 %v16587_v1 }
 0x75b   : > { %7125 = vmatpush1.bf16.msra.mxu1 %v16582_v49  ;;  %10908 = vmatpush1.bf16.msra.mxu0 %v16585_v48  ;;  %v16606_v49 = vld [vmem:[#allocation9 + $0x11a0] ss:$24 sps:$4 sm:$0xff]  }
 0x75c   : > { %7126 = vmatprep.subr.bf16.mxu1 %v16590_v19  ;;  %10909 = vmatprep.subr.bf16.mxu0 %v16593_v52  ;;  %v16609_v48 = vld [vmem:[#allocation9 + $0x1f20] ss:$24 sps:$4 sm:$0xff]  }
 0x75f   : > { %7127 = vmatpush1.bf16.msra.mxu1 %v16588_v42  ;;  %10910 = vmatpush1.bf16.msra.mxu0 %v16591_v31  ;;  %v16614_v42 = vld [vmem:[#allocation9 + $0x11d4] ss:$24 sps:$4 sm:$0xff]  }
 0x760   : > { %7128 = vmatprep.subr.bf16.mxu1 %v16596_v62  ;;  %10911 = vmatprep.subr.bf16.mxu0 %v16599_v21  ;;  %v16617_v31 = vld [vmem:[#allocation9 + $0x1f54] ss:$24 sps:$4 sm:$0xff]   ;;  %v16615_v21 = vld [vmem:[#allocation9 + $0x1f50] ss:$24 sps:$4 sm:$0xff]  }
 0x763   : > { %7129 = vmatpush1.bf16.msra.mxu1 %v16594_v35  ;;  %10912 = vmatpush1.bf16.msra.mxu0 %v16597_v28  ;;  %v16620_v35 = vld [vmem:[#allocation9 + $0x1094] ss:$24 sps:$4 sm:$0xff]  }
 0x764   : > { %7130 = vmatprep.subr.bf16.mxu1 %v16602_v53  ;;  %10913 = vmatprep.subr.bf16.mxu0 %v16605_v33  ;;  %v16623_v28 = vld [vmem:[#allocation9 + $0x1e14] ss:$24 sps:$4 sm:$0xff]   ;;  %v16618_v53 = vld [vmem:[#allocation9 + $0x1090] ss:$24 sps:$4 sm:$0xff]  }
 0x765   : > { %v5092_v20 = vpop.f32.mrb[76].mxu1  ;;  %v18386_v13 = vpop.f32.mrb[140].mxu0  ;;  %v16621_v33 = vld [vmem:[#allocation9 + $0x1e10] ss:$24 sps:$4 sm:$0xff]  }
 0x766   : > { %v5142_v40 = vadd.f32 %v5092_v20, %v18339_v16  ;;  %v5094_v44 = vpop.f32.mrb[77].mxu1  ;;  %v18389_v12 = vpop.f32.mrb[141].mxu0  ;;  %v16635_v20 = vld [vmem:[#allocation9 + $0x1e74] ss:$24 sps:$4 sm:$0xff]  }
 0x767   : > { %v5143_v14 = vadd.f32 %v5094_v44, %v18342_v63  ;;  %v5096_v10 = vpop.f32.mrb[78].mxu1  ;;  %7131 = vmatpush1.bf16.msra.mxu1 %v16600_v26  ;;  %v8879_v1 = vpop.f32.mrb[142].mxu0  ;;  %10914 = vmatpush1.bf16.msra.mxu0 %v16603_v37  ;;  %v16612_v63 = vld [vmem:[#allocation9 + $0x11d0] ss:$24 sps:$4 sm:$0xff]   ;;  %v18399_v26 = vrot.slane %v18324_v56, 2 }
 0x768   : > { %v5097_v19 = vpop.f32.mrb[79].mxu1  ;;  %v8880_v52 = vpop.f32.mrb[143].mxu0  ;;  %7132 = vmatprep.subr.bf16.mxu1 %v16608_v15  ;;  %10915 = vmatprep.subr.bf16.mxu0 %v16611_v54  ;;  %v18393_v62 = vadd.f32 %v18184_v38, %v5142_v40  ;;  %v16626_v38 = vld [vmem:[#allocation9 + $0x10c4] ss:$24 sps:$4 sm:$0xff]   ;;  %v16624_v37 = vld [vmem:[#allocation9 + $0x10c0] ss:$24 sps:$4 sm:$0xff]  }
 0x769   : > { %v18396_v16 = vadd.f32 %v18189_v46, %v5143_v14  ;;  %v16629_v46 = vld [vmem:[#allocation9 + $0x1e44] ss:$24 sps:$4 sm:$0xff]   ;;  %v16627_v15 = vld [vmem:[#allocation9 + $0x1e40] ss:$24 sps:$4 sm:$0xff]   ;;  %v16632_v54 = vld [vmem:[#allocation9 + $0x10f4] ss:$24 sps:$4 sm:$0xff]  }
 0x76a   : > { %v16630_v40 = vld [vmem:[#allocation9 + $0x10f0] ss:$24 sps:$4 sm:$0xff]   ;;  %v16638_v14 = vld [vmem:[#allocation9 + $0x1124] ss:$24 sps:$4 sm:$0xff]   ;;  %v16636_v1 = vld [vmem:[#allocation9 + $0x1120] ss:$24 sps:$4 sm:$0xff]  }
 0x76b   : > { %7133 = vmatpush1.bf16.msra.mxu1 %v16606_v49  ;;  %10916 = vmatpush1.bf16.msra.mxu0 %v16609_v48  ;;  %v16633_v44 = vld [vmem:[#allocation9 + $0x1e70] ss:$24 sps:$4 sm:$0xff]   ;;  %v16641_v10 = vld [vmem:[#allocation9 + $0x1ea4] ss:$24 sps:$4 sm:$0xff]   ;;  %v16639_v49 = vld [vmem:[#allocation9 + $0x1ea0] ss:$24 sps:$4 sm:$0xff]  }
 0x76c   : > { %7134 = vmatprep.subr.bf16.mxu1 %v16614_v42  ;;  %10917 = vmatprep.subr.bf16.mxu0 %v16617_v31  ;;  %v16644_v48 = vld [vmem:[#allocation9 + $0x1154] ss:$24 sps:$4 sm:$0xff]   ;;  %v16642_v52 = vld [vmem:[#allocation9 + $0x1150] ss:$24 sps:$4 sm:$0xff]   ;;  %v16650_v31 = vld [vmem:[#allocation9 + $0x1184] ss:$24 sps:$4 sm:$0xff]  }
 0x76d   : > { %v16647_v19 = vld [vmem:[#allocation9 + $0x1ed4] ss:$24 sps:$4 sm:$0xff]   ;;  %v16645_v42 = vld [vmem:[#allocation9 + $0x1ed0] ss:$24 sps:$4 sm:$0xff]  }
 0x76f   : > { %7135 = vmatpush1.bf16.msra.mxu1 %v16612_v63  ;;  %10918 = vmatpush1.bf16.msra.mxu0 %v16615_v21  ;;  %v16653_v63 = vld [vmem:[#allocation9 + $0x1f04] ss:$24 sps:$4 sm:$0xff]   ;;  %v16648_v21 = vld [vmem:[#allocation9 + $0x1180] ss:$24 sps:$4 sm:$0xff]  }
 0x770   : > { %7202 = vmatprep.subr.bf16.mxu1 %v16620_v35  ;;  %10985 = vmatprep.subr.bf16.mxu0 %v16623_v28  ;;  %v16651_v35 = vld [vmem:[#allocation9 + $0x1f00] ss:$24 sps:$4 sm:$0xff]   ;;  %v16656_v28 = vld [vmem:[#allocation9 + $0x11b4] ss:$24 sps:$4 sm:$0xff]  }
 0x772   : > { %7153 = vmatmul.mubr.bf16.vlgmr.msra.gmra.mrb[104].mxu1 %v18178_v4  ;;  %10936 = vmatmul.mubr.bf16.vlgmr.msra.gmra.mrb[168].mxu0 %v18399_v26 }
 0x773   : > { %7203 = vmatpush1.bf16.msra.mxu1 %v16618_v53  ;;  %10986 = vmatpush1.bf16.msra.mxu0 %v16621_v33  ;;  %v16659_v53 = vld [vmem:[#allocation9 + $0x1f34] ss:$24 sps:$4 sm:$0xff]  }
 0x774   : > { %7204 = vmatprep.subr.bf16.mxu1 %v16626_v38  ;;  %10987 = vmatprep.subr.bf16.mxu0 %v16629_v46 }
 0x775   : > { %7234 = vmatprep.mubr.bf16.mxu1 %v17606_v0  ;;  %11017 = vmatprep.mubr.bf16.mxu0 %v17606_v0 }
 0x777   : > { %7205 = vmatpush1.bf16.msra.mxu1 %v16624_v37  ;;  %10988 = vmatpush1.bf16.msra.mxu0 %v16627_v15 }
 0x778   : > { %7206 = vmatprep.subr.bf16.mxu1 %v16632_v54  ;;  %10989 = vmatprep.subr.bf16.mxu0 %v16635_v20 }
 0x77b   : > { %7207 = vmatpush1.bf16.msra.mxu1 %v16630_v40  ;;  %10990 = vmatpush1.bf16.msra.mxu0 %v16633_v44  ;;  %v16654_v44 = vld [vmem:[#allocation9 + $0x11b0] ss:$24 sps:$4 sm:$0xff]  }
 0x77c   : > { %7208 = vmatprep.subr.bf16.mxu1 %v16638_v14  ;;  %10991 = vmatprep.subr.bf16.mxu0 %v16641_v10  ;;  %v16657_v14 = vld [vmem:[#allocation9 + $0x1f30] ss:$24 sps:$4 sm:$0xff]  }
 0x77f   : > { %7209 = vmatpush1.bf16.msra.mxu1 %v16636_v1  ;;  %10992 = vmatpush1.bf16.msra.mxu0 %v16639_v49  ;;  %v16662_v49 = vld [vmem:[#allocation9 + $0x11e4] ss:$24 sps:$4 sm:$0xff]  }
 0x780   : > { %7210 = vmatprep.subr.bf16.mxu1 %v16644_v48  ;;  %10993 = vmatprep.subr.bf16.mxu0 %v16647_v19  ;;  %v16665_v48 = vld [vmem:[#allocation9 + $0x1f64] ss:$24 sps:$4 sm:$0xff]  }
 0x783   : > { %7211 = vmatpush1.bf16.msra.mxu1 %v16642_v52  ;;  %10994 = vmatpush1.bf16.msra.mxu0 %v16645_v42  ;;  %v16663_v52 = vld [vmem:[#allocation9 + $0x1f60] ss:$24 sps:$4 sm:$0xff]   ;;  %v16668_v42 = vld [vmem:[#allocation9 + $0x120c] ss:$24 sps:$4 sm:$0xff]  }
 0x784   : > { %7212 = vmatprep.subr.bf16.mxu1 %v16650_v31  ;;  %10995 = vmatprep.subr.bf16.mxu0 %v16653_v63  ;;  %v16671_v31 = vld [vmem:[#allocation9 + $0x1f8c] ss:$24 sps:$4 sm:$0xff]   ;;  %v16666_v63 = vld [vmem:[#allocation9 + $0x1208] ss:$24 sps:$4 sm:$0xff]  }
 0x785   : > { %v5471_v33 = vpop.f32.mrb[80].mxu1  ;;  %v18405_v38 = vpop.f32.mrb[144].mxu0 }
 0x786   : > { %v5560_v46 = vadd.f32 %v5471_v33, %v18358_v41  ;;  %v5473_v37 = vpop.f32.mrb[81].mxu1  ;;  %v18408_v15 = vpop.f32.mrb[145].mxu0  ;;  %v16683_v33 = vld [vmem:[#allocation9 + $0x1fec] ss:$24 sps:$4 sm:$0xff]  }
 0x787   : > { %v5561_v54 = vadd.f32 %v5473_v37, %v18361_v3  ;;  %v5475_v20 = vpop.f32.mrb[82].mxu1  ;;  %7213 = vmatpush1.bf16.msra.mxu1 %v16648_v21  ;;  %v9256_v40 = vpop.f32.mrb[146].mxu0  ;;  %10996 = vmatpush1.bf16.msra.mxu0 %v16651_v35  ;;  %v16660_v3 = vld [vmem:[#allocation9 + $0x11e0] ss:$24 sps:$4 sm:$0xff]   ;;  %v16674_v35 = vld [vmem:[#allocation9 + $0x123c] ss:$24 sps:$4 sm:$0xff]  }
 0x788   : > { %v5476_v10 = vpop.f32.mrb[83].mxu1  ;;  %v9257_v1 = vpop.f32.mrb[147].mxu0  ;;  %7214 = vmatprep.subr.bf16.mxu1 %v16656_v28  ;;  %10997 = vmatprep.subr.bf16.mxu0 %v16659_v53  ;;  %v18412_v19 = vadd.f32 %v18201_v43, %v5560_v46  ;;  %v16669_v21 = vld [vmem:[#allocation9 + $0x1f88] ss:$24 sps:$4 sm:$0xff]   ;;  %v16677_v43 = vld [vmem:[#allocation9 + $0x1fbc] ss:$24 sps:$4 sm:$0xff]  }
 0x789   : > { %v18415_v41 = vadd.f32 %v18206_v55, %v5561_v54  ;;  %v16672_v55 = vld [vmem:[#allocation9 + $0x1238] ss:$24 sps:$4 sm:$0xff]   ;;  %v16680_v53 = vld [vmem:[#allocation9 + $0x126c] ss:$24 sps:$4 sm:$0xff]   ;;  %v16678_v46 = vld [vmem:[#allocation9 + $0x1268] ss:$24 sps:$4 sm:$0xff]  }
 0x78a   : > { %v16675_v28 = vld [vmem:[#allocation9 + $0x1fb8] ss:$24 sps:$4 sm:$0xff]   ;;  %v16681_v37 = vld [vmem:[#allocation9 + $0x1fe8] ss:$24 sps:$4 sm:$0xff]   ;;  %v16689_v54 = vld [vmem:[#allocation9 + $0x201c] ss:$24 sps:$4 sm:$0xff]  }
 0x78b   : > { %7215 = vmatpush1.bf16.msra.mxu1 %v16654_v44  ;;  %10998 = vmatpush1.bf16.msra.mxu0 %v16657_v14  ;;  %v16684_v20 = vld [vmem:[#allocation9 + $0x1298] ss:$24 sps:$4 sm:$0xff]   ;;  %v16692_v44 = vld [vmem:[#allocation9 + $0x12cc] ss:$24 sps:$4 sm:$0xff]   ;;  %v16690_v10 = vld [vmem:[#allocation9 + $0x12c8] ss:$24 sps:$4 sm:$0xff]  }
 0x78c   : > { %7216 = vmatprep.subr.bf16.mxu1 %v16662_v49  ;;  %10999 = vmatprep.subr.bf16.mxu0 %v16665_v48  ;;  %v16687_v40 = vld [vmem:[#allocation9 + $0x2018] ss:$24 sps:$4 sm:$0xff]   ;;  %v16695_v14 = vld [vmem:[#allocation9 + $0x204c] ss:$24 sps:$4 sm:$0xff]   ;;  %v16693_v1 = vld [vmem:[#allocation9 + $0x2048] ss:$24 sps:$4 sm:$0xff]  }
 0x78d   : > { %v16698_v49 = vld [vmem:[#allocation9 + $0x12fc] ss:$24 sps:$4 sm:$0xff]  }
 0x78e   : > { %v16701_v48 = vld [vmem:[#allocation9 + $0x207c] ss:$24 sps:$4 sm:$0xff]  }
 0x78f   : > { %7217 = vmatpush1.bf16.msra.mxu1 %v16660_v3  ;;  %11000 = vmatpush1.bf16.msra.mxu0 %v16663_v52  ;;  %v16696_v3 = vld [vmem:[#allocation9 + $0x12f8] ss:$24 sps:$4 sm:$0xff]  }
 0x790   : > { %7581 = vmatprep.subr.bf16.mxu1 %v16668_v42  ;;  %11364 = vmatprep.subr.bf16.mxu0 %v16671_v31  ;;  %v16699_v52 = vld [vmem:[#allocation9 + $0x2078] ss:$24 sps:$4 sm:$0xff]   ;;  %v16704_v42 = vld [vmem:[#allocation9 + $0x132c] ss:$24 sps:$4 sm:$0xff]  }
 0x791   : > { %v16707_v31 = vld [vmem:[#allocation9 + $0x20ac] ss:$24 sps:$4 sm:$0xff]  }
 0x792   : > { %7235 = vmatmul.mubr.bf16.vlgmr.msra.gmra.mrb[108].mxu1 %v18178_v4  ;;  %11018 = vmatmul.mubr.bf16.vlgmr.msra.gmra.mrb[172].mxu0 %v18399_v26  ;;  %v16686_v4 = vld [vmem:[#allocation9 + $0x129c] ss:$24 sps:$4 sm:$0xff]  }
 0x793   : > { %7582 = vmatpush1.bf16.msra.mxu1 %v16666_v63  ;;  %11365 = vmatpush1.bf16.msra.mxu0 %v16669_v21 }
 0x794   : > { %7583 = vmatprep.subr.bf16.mxu1 %v16674_v35  ;;  %11366 = vmatprep.subr.bf16.mxu0 %v16677_v43 }
 0x795   : > { %7613 = vmatprep.mubr.bf16.mxu1 %v17606_v0  ;;  %11396 = vmatprep.mubr.bf16.mxu0 %v17606_v0 }
 0x797   : > { %7584 = vmatpush1.bf16.msra.mxu1 %v16672_v55  ;;  %11367 = vmatpush1.bf16.msra.mxu0 %v16675_v28 }
 0x798   : > { %7585 = vmatprep.subr.bf16.mxu1 %v16680_v53  ;;  %11368 = vmatprep.subr.bf16.mxu0 %v16683_v33 }
 0x79b   : > { %7586 = vmatpush1.bf16.msra.mxu1 %v16678_v46  ;;  %11369 = vmatpush1.bf16.msra.mxu0 %v16681_v37  ;;  %v16702_v46 = vld [vmem:[#allocation9 + $0x1328] ss:$24 sps:$4 sm:$0xff]  }
 0x79c   : > { %7587 = vmatprep.subr.bf16.mxu1 %v16686_v4  ;;  %11370 = vmatprep.subr.bf16.mxu0 %v16689_v54  ;;  %v16705_v37 = vld [vmem:[#allocation9 + $0x20a8] ss:$24 sps:$4 sm:$0xff]  }
 0x79f   : > { %7588 = vmatpush1.bf16.msra.mxu1 %v16684_v20  ;;  %11371 = vmatpush1.bf16.msra.mxu0 %v16687_v40  ;;  %v16710_v20 = vld [vmem:[#allocation9 + $0x135c] ss:$24 sps:$4 sm:$0xff]  }
 0x7a0   : > { %7589 = vmatprep.subr.bf16.mxu1 %v16692_v44  ;;  %11372 = vmatprep.subr.bf16.mxu0 %v16695_v14  ;;  %v16713_v40 = vld [vmem:[#allocation9 + $0x20dc] ss:$24 sps:$4 sm:$0xff]   ;;  %v16711_v14 = vld [vmem:[#allocation9 + $0x20d8] ss:$24 sps:$4 sm:$0xff]  }
 0x7a3   : > { %7590 = vmatpush1.bf16.msra.mxu1 %v16690_v10  ;;  %11373 = vmatpush1.bf16.msra.mxu0 %v16693_v1  ;;  %v16716_v10 = vld [vmem:[#allocation9 + $0x1384] ss:$24 sps:$4 sm:$0xff]  }
 0x7a4   : > { %7591 = vmatprep.subr.bf16.mxu1 %v16698_v49  ;;  %11374 = vmatprep.subr.bf16.mxu0 %v16701_v48  ;;  %v16719_v1 = vld [vmem:[#allocation9 + $0x2104] ss:$24 sps:$4 sm:$0xff]   ;;  %v16714_v49 = vld [vmem:[#allocation9 + $0x1380] ss:$24 sps:$4 sm:$0xff]  }
 0x7a5   : > { %v5553_v63 = vpop.f32.mrb[84].mxu1  ;;  %v18421_v21 = vpop.f32.mrb[148].mxu0  ;;  %v16717_v48 = vld [vmem:[#allocation9 + $0x2100] ss:$24 sps:$4 sm:$0xff]  }
 0x7a6   : > { %v5564_v35 = vadd.f32 %v5553_v63, %v18374_v36  ;;  %v5555_v43 = vpop.f32.mrb[85].mxu1  ;;  %v18424_v55 = vpop.f32.mrb[149].mxu0  ;;  %v16731_v63 = vld [vmem:[#allocation9 + $0x2164] ss:$24 sps:$4 sm:$0xff]  }
 0x7a7   : > { %v5565_v28 = vadd.f32 %v5555_v43, %v18377_v57  ;;  %v5557_v53 = vpop.f32.mrb[86].mxu1  ;;  %7592 = vmatpush1.bf16.msra.mxu1 %v16696_v3  ;;  %v9338_v33 = vpop.f32.mrb[150].mxu0  ;;  %11375 = vmatpush1.bf16.msra.mxu0 %v16699_v52  ;;  %v16708_v57 = vld [vmem:[#allocation9 + $0x1358] ss:$24 sps:$4 sm:$0xff]   ;;  %v18434_v3 = vrot.slane %v18327_v32, 2 }
 0x7a8   : > { %v5558_v4 = vpop.f32.mrb[87].mxu1  ;;  %v9339_v54 = vpop.f32.mrb[151].mxu0  ;;  %7593 = vmatprep.subr.bf16.mxu1 %v16704_v42  ;;  %11376 = vmatprep.subr.bf16.mxu0 %v16707_v31  ;;  %v18428_v44 = vadd.f32 %v18215_v23, %v5564_v35  ;;  %v16722_v23 = vld [vmem:[#allocation9 + $0x13b4] ss:$24 sps:$4 sm:$0xff]   ;;  %v16720_v52 = vld [vmem:[#allocation9 + $0x13b0] ss:$24 sps:$4 sm:$0xff]  }
 0x7a9   : > { %v18431_v36 = vadd.f32 %v18220_v58, %v5565_v28  ;;  %v16725_v58 = vld [vmem:[#allocation9 + $0x2134] ss:$24 sps:$4 sm:$0xff]   ;;  %v16723_v42 = vld [vmem:[#allocation9 + $0x2130] ss:$24 sps:$4 sm:$0xff]   ;;  %v16728_v31 = vld [vmem:[#allocation9 + $0x13e4] ss:$24 sps:$4 sm:$0xff]  }
 0x7aa   : > { %v16726_v35 = vld [vmem:[#allocation9 + $0x13e0] ss:$24 sps:$4 sm:$0xff]   ;;  %v16737_v28 = vld [vmem:[#allocation9 + $0x2194] ss:$24 sps:$4 sm:$0xff]   ;;  %v16732_v53 = vld [vmem:[#allocation9 + $0x1410] ss:$24 sps:$4 sm:$0xff]  }
 0x7ab   : > { %7594 = vmatpush1.bf16.msra.mxu1 %v16702_v46  ;;  %11377 = vmatpush1.bf16.msra.mxu0 %v16705_v37  ;;  %v16729_v43 = vld [vmem:[#allocation9 + $0x2160] ss:$24 sps:$4 sm:$0xff]   ;;  %v16735_v33 = vld [vmem:[#allocation9 + $0x2190] ss:$24 sps:$4 sm:$0xff]   ;;  %v16740_v46 = vld [vmem:[#allocation9 + $0x1444] ss:$24 sps:$4 sm:$0xff]  }
 0x7ac   : > { %7595 = vmatprep.subr.bf16.mxu1 %v16710_v20  ;;  %11378 = vmatprep.subr.bf16.mxu0 %v16713_v40  ;;  %v16743_v37 = vld [vmem:[#allocation9 + $0x21c4] ss:$24 sps:$4 sm:$0xff]   ;;  %v16738_v4 = vld [vmem:[#allocation9 + $0x1440] ss:$24 sps:$4 sm:$0xff]   ;;  %v16746_v20 = vld [vmem:[#allocation9 + $0x1474] ss:$24 sps:$4 sm:$0xff]  }
 0x7ad   : > { %v16741_v54 = vld [vmem:[#allocation9 + $0x21c0] ss:$24 sps:$4 sm:$0xff]   ;;  %v16749_v40 = vld [vmem:[#allocation9 + $0x21f4] ss:$24 sps:$4 sm:$0xff]  }
 0x7af   : > { %7596 = vmatpush1.bf16.msra.mxu1 %v16708_v57  ;;  %11379 = vmatpush1.bf16.msra.mxu0 %v16711_v14  ;;  %v16744_v57 = vld [vmem:[#allocation9 + $0x1470] ss:$24 sps:$4 sm:$0xff]  }
 0x7b0   : > { %7960 = vmatprep.subr.bf16.mxu1 %v16716_v10  ;;  %11743 = vmatprep.subr.bf16.mxu0 %v16719_v1  ;;  %v16747_v14 = vld [vmem:[#allocation9 + $0x21f0] ss:$24 sps:$4 sm:$0xff]   ;;  %v16752_v10 = vld [vmem:[#allocation9 + $0x14a4] ss:$24 sps:$4 sm:$0xff]  }
 0x7b1   : > { %v16755_v1 = vld [vmem:[#allocation9 + $0x2224] ss:$24 sps:$4 sm:$0xff]  }
 0x7b2   : > { %7614 = vmatmul.mubr.bf16.vlgmr.msra.gmra.mrb[112].mxu1 %v18195_v5  ;;  %11397 = vmatmul.mubr.bf16.vlgmr.msra.gmra.mrb[176].mxu0 %v18434_v3  ;;  %v16734_v5 = vld [vmem:[#allocation9 + $0x1414] ss:$24 sps:$4 sm:$0xff]  }
 0x7b3   : > { %7961 = vmatpush1.bf16.msra.mxu1 %v16714_v49  ;;  %11744 = vmatpush1.bf16.msra.mxu0 %v16717_v48 }
 0x7b4   : > { %7962 = vmatprep.subr.bf16.mxu1 %v16722_v23  ;;  %11745 = vmatprep.subr.bf16.mxu0 %v16725_v58 }
 0x7b5   : > { %7992 = vmatprep.mubr.bf16.mxu1 %v17606_v0  ;;  %11775 = vmatprep.mubr.bf16.mxu0 %v17606_v0 }
 0x7b7   : > { %7963 = vmatpush1.bf16.msra.mxu1 %v16720_v52  ;;  %11746 = vmatpush1.bf16.msra.mxu0 %v16723_v42 }
 0x7b8   : > { %7964 = vmatprep.subr.bf16.mxu1 %v16728_v31  ;;  %11747 = vmatprep.subr.bf16.mxu0 %v16731_v63 }
 0x7bb   : > { %7965 = vmatpush1.bf16.msra.mxu1 %v16726_v35  ;;  %11748 = vmatpush1.bf16.msra.mxu0 %v16729_v43  ;;  %v16750_v35 = vld [vmem:[#allocation9 + $0x14a0] ss:$24 sps:$4 sm:$0xff]  }
 0x7bc   : > { %7966 = vmatprep.subr.bf16.mxu1 %v16734_v5  ;;  %11749 = vmatprep.subr.bf16.mxu0 %v16737_v28  ;;  %v16753_v43 = vld [vmem:[#allocation9 + $0x2220] ss:$24 sps:$4 sm:$0xff]  }
 0x7bf   : > { %7967 = vmatpush1.bf16.msra.mxu1 %v16732_v53  ;;  %11750 = vmatpush1.bf16.msra.mxu0 %v16735_v33  ;;  %v16758_v53 = vld [vmem:[#allocation9 + $0x14d4] ss:$24 sps:$4 sm:$0xff]  }
 0x7c0   : > { %7968 = vmatprep.subr.bf16.mxu1 %v16740_v46  ;;  %11751 = vmatprep.subr.bf16.mxu0 %v16743_v37  ;;  %v16761_v33 = vld [vmem:[#allocation9 + $0x2254] ss:$24 sps:$4 sm:$0xff]   ;;  %v16759_v37 = vld [vmem:[#allocation9 + $0x2250] ss:$24 sps:$4 sm:$0xff]  }
 0x7c3   : > { %7969 = vmatpush1.bf16.msra.mxu1 %v16738_v4  ;;  %11752 = vmatpush1.bf16.msra.mxu0 %v16741_v54  ;;  %v16764_v4 = vld [vmem:[#allocation9 + $0x1394] ss:$24 sps:$4 sm:$0xff]  }
 0x7c4   : > { %7970 = vmatprep.subr.bf16.mxu1 %v16746_v20  ;;  %11753 = vmatprep.subr.bf16.mxu0 %v16749_v40  ;;  %v16767_v54 = vld [vmem:[#allocation9 + $0x2114] ss:$24 sps:$4 sm:$0xff]   ;;  %v16762_v20 = vld [vmem:[#allocation9 + $0x1390] ss:$24 sps:$4 sm:$0xff]  }
 0x7c5   : > { %v5930_v49 = vpop.f32.mrb[88].mxu1  ;;  %v18440_v48 = vpop.f32.mrb[152].mxu0  ;;  %v16765_v40 = vld [vmem:[#allocation9 + $0x2110] ss:$24 sps:$4 sm:$0xff]  }
 0x7c6   : > { %v5980_v23 = vadd.f32 %v5930_v49, %v18393_v62  ;;  %v5932_v58 = vpop.f32.mrb[89].mxu1  ;;  %v18443_v52 = vpop.f32.mrb[153].mxu0  ;;  %v16779_v49 = vld [vmem:[#allocation9 + $0x2174] ss:$24 sps:$4 sm:$0xff]  }
 0x7c7   : > { %v5981_v42 = vadd.f32 %v5932_v58, %v18396_v16  ;;  %v5934_v31 = vpop.f32.mrb[90].mxu1  ;;  %7971 = vmatpush1.bf16.msra.mxu1 %v16744_v57  ;;  %v9722_v63 = vpop.f32.mrb[154].mxu0  ;;  %11754 = vmatpush1.bf16.msra.mxu0 %v16747_v14  ;;  %v16756_v16 = vld [vmem:[#allocation9 + $0x14d0] ss:$24 sps:$4 sm:$0xff]   ;;  %v18453_v57 = vrot.slane %v18324_v56, 3 }
 0x7c8   : > { %v5935_v5 = vpop.f32.mrb[91].mxu1  ;;  %v9723_v28 = vpop.f32.mrb[155].mxu0  ;;  %7972 = vmatprep.subr.bf16.mxu1 %v16752_v10  ;;  %11755 = vmatprep.subr.bf16.mxu0 %v16755_v1  ;;  %v18447_v46 = vadd.f32 %v18232_v2, %v5980_v23  ;;  %v16770_v2 = vld [vmem:[#allocation9 + $0x13c4] ss:$24 sps:$4 sm:$0xff]   ;;  %v16768_v14 = vld [vmem:[#allocation9 + $0x13c0] ss:$24 sps:$4 sm:$0xff]  }
 0x7c9   : > { %v18450_v62 = vadd.f32 %v18237_v6, %v5981_v42  ;;  %v16773_v6 = vld [vmem:[#allocation9 + $0x2144] ss:$24 sps:$4 sm:$0xff]   ;;  %v16771_v10 = vld [vmem:[#allocation9 + $0x2140] ss:$24 sps:$4 sm:$0xff]   ;;  %v16776_v1 = vld [vmem:[#allocation9 + $0x13f4] ss:$24 sps:$4 sm:$0xff]  }
 0x7ca   : > { %v16774_v56 = vld [vmem:[#allocation9 + $0x13f0] ss:$24 sps:$4 sm:$0xff]   ;;  %v16782_v58 = vld [vmem:[#allocation9 + $0x1424] ss:$24 sps:$4 sm:$0xff]   ;;  %v16780_v31 = vld [vmem:[#allocation9 + $0x1420] ss:$24 sps:$4 sm:$0xff]  }
 0x7cb   : > { %7973 = vmatpush1.bf16.msra.mxu1 %v16750_v35  ;;  %11756 = vmatpush1.bf16.msra.mxu0 %v16753_v43  ;;  %v16777_v23 = vld [vmem:[#allocation9 + $0x2170] ss:$24 sps:$4 sm:$0xff]   ;;  %v16785_v42 = vld [vmem:[#allocation9 + $0x21a4] ss:$24 sps:$4 sm:$0xff]   ;;  %v16783_v63 = vld [vmem:[#allocation9 + $0x21a0] ss:$24 sps:$4 sm:$0xff]  }
 0x7cc   : > { %7974 = vmatprep.subr.bf16.mxu1 %v16758_v53  ;;  %11757 = vmatprep.subr.bf16.mxu0 %v16761_v33  ;;  %v16788_v35 = vld [vmem:[#allocation9 + $0x1454] ss:$24 sps:$4 sm:$0xff]   ;;  %v16786_v5 = vld [vmem:[#allocation9 + $0x1450] ss:$24 sps:$4 sm:$0xff]   ;;  %v16794_v53 = vld [vmem:[#allocation9 + $0x1484] ss:$24 sps:$4 sm:$0xff]  }
 0x7cd   : > { %v16791_v43 = vld [vmem:[#allocation9 + $0x21d4] ss:$24 sps:$4 sm:$0xff]   ;;  %v16789_v28 = vld [vmem:[#allocation9 + $0x21d0] ss:$24 sps:$4 sm:$0xff]   ;;  %v16797_v33 = vld [vmem:[#allocation9 + $0x2204] ss:$24 sps:$4 sm:$0xff]  }
 0x7cf   : > { %7975 = vmatpush1.bf16.msra.mxu1 %v16756_v16  ;;  %11758 = vmatpush1.bf16.msra.mxu0 %v16759_v37  ;;  %v16792_v16 = vld [vmem:[#allocation9 + $0x1480] ss:$24 sps:$4 sm:$0xff]  }
 0x7d0   : > { %8042 = vmatprep.subr.bf16.mxu1 %v16764_v4  ;;  %11825 = vmatprep.subr.bf16.mxu0 %v16767_v54  ;;  %v16795_v37 = vld [vmem:[#allocation9 + $0x2200] ss:$24 sps:$4 sm:$0xff]   ;;  %v16800_v4 = vld [vmem:[#allocation9 + $0x14b4] ss:$24 sps:$4 sm:$0xff]  }
 0x7d1   : > { %v16803_v54 = vld [vmem:[#allocation9 + $0x2234] ss:$24 sps:$4 sm:$0xff]  }
 0x7d2   : > { %7993 = vmatmul.mubr.bf16.vlgmr.msra.gmra.mrb[116].mxu1 %v18226_v18  ;;  %11776 = vmatmul.mubr.bf16.vlgmr.msra.gmra.mrb[180].mxu0 %v18453_v57 }
 0x7d3   : > { %8043 = vmatpush1.bf16.msra.mxu1 %v16762_v20  ;;  %11826 = vmatpush1.bf16.msra.mxu0 %v16765_v40 }
 0x7d4   : > { %8044 = vmatprep.subr.bf16.mxu1 %v16770_v2  ;;  %11827 = vmatprep.subr.bf16.mxu0 %v16773_v6 }
 0x7d5   : > { %8074 = vmatprep.mubr.bf16.mxu1 %v17606_v0  ;;  %11857 = vmatprep.mubr.bf16.mxu0 %v17606_v0 }
 0x7d7   : > { %8045 = vmatpush1.bf16.msra.mxu1 %v16768_v14  ;;  %11828 = vmatpush1.bf16.msra.mxu0 %v16771_v10 }
 0x7d8   : > { %8046 = vmatprep.subr.bf16.mxu1 %v16776_v1  ;;  %11829 = vmatprep.subr.bf16.mxu0 %v16779_v49 }
 0x7db   : > { %8047 = vmatpush1.bf16.msra.mxu1 %v16774_v56  ;;  %11830 = vmatpush1.bf16.msra.mxu0 %v16777_v23  ;;  %v16798_v56 = vld [vmem:[#allocation9 + $0x14b0] ss:$24 sps:$4 sm:$0xff]  }
 0x7dc   : > { %8048 = vmatprep.subr.bf16.mxu1 %v16782_v58  ;;  %11831 = vmatprep.subr.bf16.mxu0 %v16785_v42  ;;  %v16801_v23 = vld [vmem:[#allocation9 + $0x2230] ss:$24 sps:$4 sm:$0xff]  }
 0x7df   : > { %8049 = vmatpush1.bf16.msra.mxu1 %v16780_v31  ;;  %11832 = vmatpush1.bf16.msra.mxu0 %v16783_v63  ;;  %v16806_v31 = vld [vmem:[#allocation9 + $0x14e4] ss:$24 sps:$4 sm:$0xff]  }
 0x7e0   : > { %8050 = vmatprep.subr.bf16.mxu1 %v16788_v35  ;;  %11833 = vmatprep.subr.bf16.mxu0 %v16791_v43  ;;  %v16809_v63 = vld [vmem:[#allocation9 + $0x2264] ss:$24 sps:$4 sm:$0xff]   ;;  %v16807_v43 = vld [vmem:[#allocation9 + $0x2260] ss:$24 sps:$4 sm:$0xff]  }
 0x7e3   : > { %8051 = vmatpush1.bf16.msra.mxu1 %v16786_v5  ;;  %11834 = vmatpush1.bf16.msra.mxu0 %v16789_v28  ;;  %v16812_v5 = vld [vmem:[#allocation9 + $0x150c] ss:$24 sps:$4 sm:$0xff]  }
 0x7e4   : > { %8052 = vmatprep.subr.bf16.mxu1 %v16794_v53  ;;  %11835 = vmatprep.subr.bf16.mxu0 %v16797_v33  ;;  %v16815_v28 = vld [vmem:[#allocation9 + $0x228c] ss:$24 sps:$4 sm:$0xff]   ;;  %v16810_v53 = vld [vmem:[#allocation9 + $0x1508] ss:$24 sps:$4 sm:$0xff]  }
 0x7e5   : > { %v6314_v20 = vpop.f32.mrb[92].mxu1  ;;  %v18459_v40 = vpop.f32.mrb[156].mxu0  ;;  %v16813_v33 = vld [vmem:[#allocation9 + $0x2288] ss:$24 sps:$4 sm:$0xff]  }
 0x7e6   : > { %v6403_v2 = vadd.f32 %v6314_v20, %v18412_v19  ;;  %v6316_v6 = vpop.f32.mrb[93].mxu1  ;;  %v18462_v14 = vpop.f32.mrb[157].mxu0  ;;  %v16822_v20 = vld [vmem:[#allocation9 + $0x1568] ss:$24 sps:$4 sm:$0xff]  }
 0x7e7   : > { %v6404_v10 = vadd.f32 %v6316_v6, %v18415_v41  ;;  %v6318_v1 = vpop.f32.mrb[94].mxu1  ;;  %8053 = vmatpush1.bf16.msra.mxu1 %v16792_v16  ;;  %v10101_v49 = vpop.f32.mrb[158].mxu0  ;;  %11836 = vmatpush1.bf16.msra.mxu0 %v16795_v37  ;;  %v16804_v41 = vld [vmem:[#allocation9 + $0x14e0] ss:$24 sps:$4 sm:$0xff]   ;;  %v16818_v16 = vld [vmem:[#allocation9 + $0x153c] ss:$24 sps:$4 sm:$0xff]  }
 0x7e8   : > { %v6319_v58 = vpop.f32.mrb[95].mxu1  ;;  %v10102_v42 = vpop.f32.mrb[159].mxu0  ;;  %8054 = vmatprep.subr.bf16.mxu1 %v16800_v4  ;;  %11837 = vmatprep.subr.bf16.mxu0 %v16803_v54  ;;  %v18466_v35 = vadd.f32 %v18249_v17, %v6403_v2  ;;  %v16821_v17 = vld [vmem:[#allocation9 + $0x22bc] ss:$24 sps:$4 sm:$0xff]   ;;  %v16819_v37 = vld [vmem:[#allocation9 + $0x22b8] ss:$24 sps:$4 sm:$0xff]  }
 0x7e9   : > { %v18469_v19 = vadd.f32 %v18254_v39, %v6404_v10  ;;  %v16816_v39 = vld [vmem:[#allocation9 + $0x1538] ss:$24 sps:$4 sm:$0xff]   ;;  %v16824_v4 = vld [vmem:[#allocation9 + $0x156c] ss:$24 sps:$4 sm:$0xff]   ;;  %v16825_v2 = vld [vmem:[#allocation9 + $0x22e8] ss:$24 sps:$4 sm:$0xff]  }
 0x7ea   : > { %v16827_v54 = vld [vmem:[#allocation9 + $0x22ec] ss:$24 sps:$4 sm:$0xff]   ;;  %v16833_v6 = vld [vmem:[#allocation9 + $0x231c] ss:$24 sps:$4 sm:$0xff]   ;;  %v16828_v10 = vld [vmem:[#allocation9 + $0x1598] ss:$24 sps:$4 sm:$0xff]  }
 0x7eb   : > { %8055 = vmatpush1.bf16.msra.mxu1 %v16798_v56  ;;  %11838 = vmatpush1.bf16.msra.mxu0 %v16801_v23  ;;  %v16831_v1 = vld [vmem:[#allocation9 + $0x2318] ss:$24 sps:$4 sm:$0xff]   ;;  %v16836_v49 = vld [vmem:[#allocation9 + $0x15cc] ss:$24 sps:$4 sm:$0xff]   ;;  %v16834_v23 = vld [vmem:[#allocation9 + $0x15c8] ss:$24 sps:$4 sm:$0xff]  }
 0x7ec   : > { %8056 = vmatprep.subr.bf16.mxu1 %v16806_v31  ;;  %11839 = vmatprep.subr.bf16.mxu0 %v16809_v63  ;;  %v16839_v56 = vld [vmem:[#allocation9 + $0x234c] ss:$24 sps:$4 sm:$0xff]   ;;  %v16837_v58 = vld [vmem:[#allocation9 + $0x2348] ss:$24 sps:$4 sm:$0xff]   ;;  %v16842_v42 = vld [vmem:[#allocation9 + $0x15fc] ss:$24 sps:$4 sm:$0xff]  }
 0x7ed   : > { %v16845_v31 = vld [vmem:[#allocation9 + $0x237c] ss:$24 sps:$4 sm:$0xff]   ;;  %v16840_v63 = vld [vmem:[#allocation9 + $0x15f8] ss:$24 sps:$4 sm:$0xff]  }
 0x7ef   : > { %8057 = vmatpush1.bf16.msra.mxu1 %v16804_v41  ;;  %11840 = vmatpush1.bf16.msra.mxu0 %v16807_v43  ;;  %v16843_v41 = vld [vmem:[#allocation9 + $0x2378] ss:$24 sps:$4 sm:$0xff]   ;;  %v16848_v43 = vld [vmem:[#allocation9 + $0x162c] ss:$24 sps:$4 sm:$0xff]  }
 0x7f0   : > { %8421 = vmatprep.subr.bf16.mxu1 %v16812_v5  ;;  %12204 = vmatprep.subr.bf16.mxu0 %v16815_v28  ;;  %v16851_v5 = vld [vmem:[#allocation9 + $0x23ac] ss:$24 sps:$4 sm:$0xff]  }
 0x7f2   : > { %8075 = vmatmul.mubr.bf16.vlgmr.msra.gmra.mrb[120].mxu1 %v18226_v18  ;;  %11858 = vmatmul.mubr.bf16.vlgmr.msra.gmra.mrb[184].mxu0 %v18453_v57  ;;  %v16830_v18 = vld [vmem:[#allocation9 + $0x159c] ss:$24 sps:$4 sm:$0xff]  }
 0x7f3   : > { %8422 = vmatpush1.bf16.msra.mxu1 %v16810_v53  ;;  %12205 = vmatpush1.bf16.msra.mxu0 %v16813_v33 }
 0x7f4   : > { %8423 = vmatprep.subr.bf16.mxu1 %v16818_v16  ;;  %12206 = vmatprep.subr.bf16.mxu0 %v16821_v17 }
 0x7f5   : > { %8453 = vmatprep.mubr.bf16.mxu1 %v17606_v0  ;;  %12236 = vmatprep.mubr.bf16.mxu0 %v17606_v0 }
 0x7f7   : > { %8424 = vmatpush1.bf16.msra.mxu1 %v16816_v39  ;;  %12207 = vmatpush1.bf16.msra.mxu0 %v16819_v37 }
 0x7f8   : > { %8425 = vmatprep.subr.bf16.mxu1 %v16824_v4  ;;  %12208 = vmatprep.subr.bf16.mxu0 %v16827_v54  ;;  %v16846_v54 = vld [vmem:[#allocation9 + $0x1628] ss:$24 sps:$4 sm:$0xff]  }
 0x7fb   : > { %8426 = vmatpush1.bf16.msra.mxu1 %v16822_v20  ;;  %12209 = vmatpush1.bf16.msra.mxu0 %v16825_v2  ;;  %v16849_v20 = vld [vmem:[#allocation9 + $0x23a8] ss:$24 sps:$4 sm:$0xff]  }
 0x7fc   : > { %8427 = vmatprep.subr.bf16.mxu1 %v16830_v18  ;;  %12210 = vmatprep.subr.bf16.mxu0 %v16833_v6  ;;  %v16854_v6 = vld [vmem:[#allocation9 + $0x165c] ss:$24 sps:$4 sm:$0xff]  }
 0x7ff   : > { %8428 = vmatpush1.bf16.msra.mxu1 %v16828_v10  ;;  %12211 = vmatpush1.bf16.msra.mxu0 %v16831_v1  ;;  %v16857_v10 = vld [vmem:[#allocation9 + $0x23dc] ss:$24 sps:$4 sm:$0xff]  }
 0x800   : > { %8429 = vmatprep.subr.bf16.mxu1 %v16836_v49  ;;  %12212 = vmatprep.subr.bf16.mxu0 %v16839_v56  ;;  %v16855_v49 = vld [vmem:[#allocation9 + $0x23d8] ss:$24 sps:$4 sm:$0xff]   ;;  %v16860_v56 = vld [vmem:[#allocation9 + $0x1684] ss:$24 sps:$4 sm:$0xff]  }
 0x803   : > { %8430 = vmatpush1.bf16.msra.mxu1 %v16834_v23  ;;  %12213 = vmatpush1.bf16.msra.mxu0 %v16837_v58  ;;  %v16863_v23 = vld [vmem:[#allocation9 + $0x2404] ss:$24 sps:$4 sm:$0xff]   ;;  %v16858_v58 = vld [vmem:[#allocation9 + $0x1680] ss:$24 sps:$4 sm:$0xff]  }
 0x804   : > { %8431 = vmatprep.subr.bf16.mxu1 %v16842_v42  ;;  %12214 = vmatprep.subr.bf16.mxu0 %v16845_v31  ;;  %v16861_v42 = vld [vmem:[#allocation9 + $0x2400] ss:$24 sps:$4 sm:$0xff]   ;;  %v18488_v31 = vrot.slane %v18327_v32, 3 }
 0x805   : > { %v6396_v28 = vpop.f32.mrb[96].mxu1  ;;  %v18475_v53 = vpop.f32.mrb[160].mxu0 }
 0x806   : > { %v6407_v33 = vadd.f32 %v6396_v28, %v18428_v44  ;;  %v6398_v16 = vpop.f32.mrb[97].mxu1  ;;  %v18478_v17 = vpop.f32.mrb[161].mxu0  ;;  %v16870_v28 = vld [vmem:[#allocation9 + $0x16e0] ss:$24 sps:$4 sm:$0xff]  }
 0x807   : > { %v6408_v39 = vadd.f32 %v6398_v16, %v18431_v36  ;;  %v6400_v37 = vpop.f32.mrb[98].mxu1  ;;  %8432 = vmatpush1.bf16.msra.mxu1 %v16840_v63  ;;  %v10183_v4 = vpop.f32.mrb[162].mxu0  ;;  %12215 = vmatpush1.bf16.msra.mxu0 %v16843_v41  ;;  %v16852_v36 = vld [vmem:[#allocation9 + $0x1658] ss:$24 sps:$4 sm:$0xff]   ;;  %v16881_v16 = vld [vmem:[#allocation9 + $0x2494] ss:$24 sps:$4 sm:$0xff]  }
 0x808   : > { %v6401_v2 = vpop.f32.mrb[99].mxu1  ;;  %v10184_v18 = vpop.f32.mrb[163].mxu0  ;;  %8433 = vmatprep.subr.bf16.mxu1 %v16848_v43  ;;  %12216 = vmatprep.subr.bf16.mxu0 %v16851_v5  ;;  %v18482_v1 = vadd.f32 %v18263_v30, %v6407_v33  ;;  %v16866_v30 = vld [vmem:[#allocation9 + $0x16b4] ss:$24 sps:$4 sm:$0xff]   ;;  %v16864_v63 = vld [vmem:[#allocation9 + $0x16b0] ss:$24 sps:$4 sm:$0xff]  }
 0x809   : > { %v18485_v44 = vadd.f32 %v18268_v51, %v6408_v39  ;;  %v16869_v51 = vld [vmem:[#allocation9 + $0x2434] ss:$24 sps:$4 sm:$0xff]   ;;  %v16867_v41 = vld [vmem:[#allocation9 + $0x2430] ss:$24 sps:$4 sm:$0xff]   ;;  %v16872_v43 = vld [vmem:[#allocation9 + $0x16e4] ss:$24 sps:$4 sm:$0xff]  }
 0x80a   : > { %v16875_v5 = vld [vmem:[#allocation9 + $0x2464] ss:$24 sps:$4 sm:$0xff]   ;;  %v16873_v33 = vld [vmem:[#allocation9 + $0x2460] ss:$24 sps:$4 sm:$0xff]   ;;  %v16876_v39 = vld [vmem:[#allocation9 + $0x1710] ss:$24 sps:$4 sm:$0xff]  }
 0x80b   : > { %8434 = vmatpush1.bf16.msra.mxu1 %v16846_v54  ;;  %12217 = vmatpush1.bf16.msra.mxu0 %v16849_v20  ;;  %v16879_v37 = vld [vmem:[#allocation9 + $0x2490] ss:$24 sps:$4 sm:$0xff]   ;;  %v16884_v4 = vld [vmem:[#allocation9 + $0x1744] ss:$24 sps:$4 sm:$0xff]   ;;  %v16882_v20 = vld [vmem:[#allocation9 + $0x1740] ss:$24 sps:$4 sm:$0xff]  }
 0x80c   : > { %8435 = vmatprep.subr.bf16.mxu1 %v16854_v6  ;;  %12218 = vmatprep.subr.bf16.mxu0 %v16857_v10  ;;  %v16887_v54 = vld [vmem:[#allocation9 + $0x24c4] ss:$24 sps:$4 sm:$0xff]   ;;  %v16885_v2 = vld [vmem:[#allocation9 + $0x24c0] ss:$24 sps:$4 sm:$0xff]   ;;  %v16890_v18 = vld [vmem:[#allocation9 + $0x1774] ss:$24 sps:$4 sm:$0xff]  }
 0x80d   : > { %v16893_v6 = vld [vmem:[#allocation9 + $0x24f4] ss:$24 sps:$4 sm:$0xff]   ;;  %v16888_v10 = vld [vmem:[#allocation9 + $0x1770] ss:$24 sps:$4 sm:$0xff]  }
 0x80f   : > { %8436 = vmatpush1.bf16.msra.mxu1 %v16852_v36  ;;  %12219 = vmatpush1.bf16.msra.mxu0 %v16855_v49  ;;  %v16891_v36 = vld [vmem:[#allocation9 + $0x24f0] ss:$24 sps:$4 sm:$0xff]   ;;  %v16896_v49 = vld [vmem:[#allocation9 + $0x17a4] ss:$24 sps:$4 sm:$0xff]  }
 0x810   : > { %8800 = vmatprep.subr.bf16.mxu1 %v16860_v56  ;;  %12581 = vmatprep.subr.bf16.mxu0 %v16863_v23  ;;  %v16899_v56 = vld [vmem:[#allocation9 + $0x2524] ss:$24 sps:$4 sm:$0xff]  }
 0x812   : > { %8454 = vmatmul.mubr.bf16.vlgmr.msra.gmra.mrb[124].mxu1 %v18243_v25  ;;  %12237 = vmatmul.mubr.bf16.vlgmr.msra.gmra.mrb[188].mxu0 %v18488_v31  ;;  %v16878_v25 = vld [vmem:[#allocation9 + $0x1714] ss:$24 sps:$4 sm:$0xff]  }
 0x813   : > { %8801 = vmatpush1.bf16.msra.mxu1 %v16858_v58  ;;  %12582 = vmatpush1.bf16.msra.mxu0 %v16861_v42 }
 0x814   : > { %8802 = vmatprep.subr.bf16.mxu1 %v16866_v30  ;;  %12583 = vmatprep.subr.bf16.mxu0 %v16869_v51 }
 0x815   : > { %8832 = vmatprep.mubr.bf16.mxu1 %v17606_v0  ;;  %12613 = vmatprep.mubr.bf16.mxu0 %v17606_v0 }
 0x817   : > { %8803 = vmatpush1.bf16.msra.mxu1 %v16864_v63  ;;  %12584 = vmatpush1.bf16.msra.mxu0 %v16867_v41 }
 0x818   : > { %8804 = vmatprep.subr.bf16.mxu1 %v16872_v43  ;;  %12585 = vmatprep.subr.bf16.mxu0 %v16875_v5  ;;  %v16894_v5 = vld [vmem:[#allocation9 + $0x17a0] ss:$24 sps:$4 sm:$0xff]  }
 0x81b   : > { %8805 = vmatpush1.bf16.msra.mxu1 %v16870_v28  ;;  %12586 = vmatpush1.bf16.msra.mxu0 %v16873_v33  ;;  %v16897_v28 = vld [vmem:[#allocation9 + $0x2520] ss:$24 sps:$4 sm:$0xff]  }
 0x81c   : > { %8806 = vmatprep.subr.bf16.mxu1 %v16878_v25  ;;  %12587 = vmatprep.subr.bf16.mxu0 %v16881_v16  ;;  %v16902_v16 = vld [vmem:[#allocation9 + $0x17d4] ss:$24 sps:$4 sm:$0xff]  }
 0x81f   : > { %8807 = vmatpush1.bf16.msra.mxu1 %v16876_v39  ;;  %12588 = vmatpush1.bf16.msra.mxu0 %v16879_v37  ;;  %v16905_v39 = vld [vmem:[#allocation9 + $0x2554] ss:$24 sps:$4 sm:$0xff]  }
 0x820   : > { %8808 = vmatprep.subr.bf16.mxu1 %v16884_v4  ;;  %12589 = vmatprep.subr.bf16.mxu0 %v16887_v54  ;;  %v16903_v4 = vld [vmem:[#allocation9 + $0x2550] ss:$24 sps:$4 sm:$0xff]   ;;  %v16908_v54 = vld [vmem:[#allocation9 + $0x1694] ss:$24 sps:$4 sm:$0xff]  }
 0x823   : > { %8809 = vmatpush1.bf16.msra.mxu1 %v16882_v20  ;;  %12590 = vmatpush1.bf16.msra.mxu0 %v16885_v2  ;;  %v16911_v20 = vld [vmem:[#allocation9 + $0x2414] ss:$24 sps:$4 sm:$0xff]   ;;  %v16906_v2 = vld [vmem:[#allocation9 + $0x1690] ss:$24 sps:$4 sm:$0xff]  }
 0x824   : > { %8810 = vmatprep.subr.bf16.mxu1 %v16890_v18  ;;  %12591 = vmatprep.subr.bf16.mxu0 %v16893_v6  ;;  %v16909_v18 = vld [vmem:[#allocation9 + $0x2410] ss:$24 sps:$4 sm:$0xff]   ;;  %v16914_v6 = vld [vmem:[#allocation9 + $0x16c4] ss:$24 sps:$4 sm:$0xff]  }
 0x825   : > { %v6775_v23 = vpop.f32.mrb[100].mxu1  ;;  %v18494_v58 = vpop.f32.mrb[164].mxu0 }
 0x826   : > { %v6825_v42 = vadd.f32 %v6775_v23, %v18447_v46  ;;  %v6777_v30 = vpop.f32.mrb[101].mxu1  ;;  %v18497_v51 = vpop.f32.mrb[165].mxu0  ;;  %v16918_v23 = vld [vmem:[#allocation9 + $0x16f0] ss:$24 sps:$4 sm:$0xff]  }
 0x827   : > { %v6826_v63 = vadd.f32 %v6777_v30, %v18450_v62  ;;  %v6779_v41 = vpop.f32.mrb[102].mxu1  ;;  %8811 = vmatpush1.bf16.msra.mxu1 %v16888_v10  ;;  %v10562_v43 = vpop.f32.mrb[166].mxu0  ;;  %12592 = vmatpush1.bf16.msra.mxu0 %v16891_v36  ;;  %v16900_v62 = vld [vmem:[#allocation9 + $0x17d0] ss:$24 sps:$4 sm:$0xff]   ;;  %v16915_v36 = vld [vmem:[#allocation9 + $0x2440] ss:$24 sps:$4 sm:$0xff]  }
 0x828   : > { %v6780_v33 = vpop.f32.mrb[103].mxu1  ;;  %v10563_v25 = vpop.f32.mrb[167].mxu0  ;;  %8812 = vmatprep.subr.bf16.mxu1 %v16896_v49  ;;  %12593 = vmatprep.subr.bf16.mxu0 %v16899_v56  ;;  %v18501_v37 = vadd.f32 %v18280_v11, %v6825_v42  ;;  %v16917_v11 = vld [vmem:[#allocation9 + $0x2444] ss:$24 sps:$4 sm:$0xff]   ;;  %v18506_v10 = vld [vmem:[#allocation2 + $0xc] sm:$0x1] }
 0x829   : > { %v18504_v46 = vadd.f32 %v18285_v61, %v6826_v63  ;;  %v16912_v61 = vld [vmem:[#allocation9 + $0x16c0] ss:$24 sps:$4 sm:$0xff]   ;;  %v16920_v49 = vld [vmem:[#allocation9 + $0x16f4] ss:$24 sps:$4 sm:$0xff]   ;;  %v16921_v42 = vld [vmem:[#allocation9 + $0x2470] ss:$24 sps:$4 sm:$0xff]  }
 0x82a   : > { %v16923_v56 = vld [vmem:[#allocation9 + $0x2474] ss:$24 sps:$4 sm:$0xff]   ;;  %v16926_v30 = vld [vmem:[#allocation9 + $0x1724] ss:$24 sps:$4 sm:$0xff]   ;;  %v16924_v41 = vld [vmem:[#allocation9 + $0x1720] ss:$24 sps:$4 sm:$0xff]  }
 0x82b   : > { %8813 = vmatpush1.bf16.msra.mxu1 %v16894_v5  ;;  %12594 = vmatpush1.bf16.msra.mxu0 %v16897_v28  ;;  %v16929_v63 = vld [vmem:[#allocation9 + $0x24a4] ss:$24 sps:$4 sm:$0xff]   ;;  %v16927_v43 = vld [vmem:[#allocation9 + $0x24a0] ss:$24 sps:$4 sm:$0xff]   ;;  %v16932_v5 = vld [vmem:[#allocation9 + $0x1754] ss:$24 sps:$4 sm:$0xff]  }
 0x82c   : > { %8814 = vmatprep.subr.bf16.mxu1 %v16902_v16  ;;  %12595 = vmatprep.subr.bf16.mxu0 %v16905_v39  ;;  %v16935_v28 = vld [vmem:[#allocation9 + $0x24d4] ss:$24 sps:$4 sm:$0xff]   ;;  %v16930_v33 = vld [vmem:[#allocation9 + $0x1750] ss:$24 sps:$4 sm:$0xff]   ;;  %v16938_v16 = vld [vmem:[#allocation9 + $0x1784] ss:$24 sps:$4 sm:$0xff]  }
 0x82d   : > { %v16933_v25 = vld [vmem:[#allocation9 + $0x24d0] ss:$24 sps:$4 sm:$0xff]   ;;  %v16941_v39 = vld [vmem:[#allocation9 + $0x2504] ss:$24 sps:$4 sm:$0xff]  }
 0x82f   : > { %8815 = vmatpush1.bf16.msra.mxu1 %v16900_v62  ;;  %12596 = vmatpush1.bf16.msra.mxu0 %v16903_v4  ;;  %v16936_v62 = vld [vmem:[#allocation9 + $0x1780] ss:$24 sps:$4 sm:$0xff]  }
 0x830   : > { %8882 = vmatprep.subr.bf16.mxu1 %v16908_v54  ;;  %12663 = vmatprep.subr.bf16.mxu0 %v16911_v20  ;;  %v16939_v4 = vld [vmem:[#allocation9 + $0x2500] ss:$24 sps:$4 sm:$0xff]   ;;  %v16944_v54 = vld [vmem:[#allocation9 + $0x17b4] ss:$24 sps:$4 sm:$0xff]  }
 0x831   : > { %v16947_v20 = vld [vmem:[#allocation9 + $0x2534] ss:$24 sps:$4 sm:$0xff]  }
 0x832   : > { %8833 = vmatmul.mubr.bf16.vlgmr.msra.gmra.mrb[128].mxu1 %v18274_v47  ;;  %12614 = vmatmul.mubr.bf16.vlgmr.msra.gmra.mrb[192].mxu0 %v18506_v10 }
 0x833   : > { %8883 = vmatpush1.bf16.msra.mxu1 %v16906_v2  ;;  %12664 = vmatpush1.bf16.msra.mxu0 %v16909_v18 }
 0x834   : > { %8884 = vmatprep.subr.bf16.mxu1 %v16914_v6  ;;  %12665 = vmatprep.subr.bf16.mxu0 %v16917_v11 }
 0x835   : > { %8914 = vmatprep.mubr.bf16.mxu1 %v17606_v0  ;;  %12695 = vmatprep.mubr.bf16.mxu0 %v17606_v0 }
 0x837   : > { %8885 = vmatpush1.bf16.msra.mxu1 %v16912_v61  ;;  %12666 = vmatpush1.bf16.msra.mxu0 %v16915_v36 }
 0x838   : > { %8886 = vmatprep.subr.bf16.mxu1 %v16920_v49  ;;  %12667 = vmatprep.subr.bf16.mxu0 %v16923_v56 }
 0x83b   : > { %8887 = vmatpush1.bf16.msra.mxu1 %v16918_v23  ;;  %12668 = vmatpush1.bf16.msra.mxu0 %v16921_v42  ;;  %v16942_v23 = vld [vmem:[#allocation9 + $0x17b0] ss:$24 sps:$4 sm:$0xff]  }
 0x83c   : > { %8888 = vmatprep.subr.bf16.mxu1 %v16926_v30  ;;  %12669 = vmatprep.subr.bf16.mxu0 %v16929_v63  ;;  %v16945_v42 = vld [vmem:[#allocation9 + $0x2530] ss:$24 sps:$4 sm:$0xff]  }
 0x83f   : > { %8889 = vmatpush1.bf16.msra.mxu1 %v16924_v41  ;;  %12670 = vmatpush1.bf16.msra.mxu0 %v16927_v43  ;;  %v16950_v41 = vld [vmem:[#allocation9 + $0x17e4] ss:$24 sps:$4 sm:$0xff]  }
 0x840   : > { %8890 = vmatprep.subr.bf16.mxu1 %v16932_v5  ;;  %12671 = vmatprep.subr.bf16.mxu0 %v16935_v28  ;;  %v16953_v43 = vld [vmem:[#allocation9 + $0x2564] ss:$24 sps:$4 sm:$0xff]   ;;  %v16951_v28 = vld [vmem:[#allocation9 + $0x2560] ss:$24 sps:$4 sm:$0xff]  }
 0x843   : > { %8891 = vmatpush1.bf16.msra.mxu1 %v16930_v33  ;;  %12672 = vmatpush1.bf16.msra.mxu0 %v16933_v25  ;;  %v16956_v33 = vld [vmem:[#allocation9 + $0x180c] ss:$24 sps:$4 sm:$0xff]   ;;  %v16954_v25 = vld [vmem:[#allocation9 + $0x1808] ss:$24 sps:$4 sm:$0xff]  }
 0x844   : > { %8892 = vmatprep.subr.bf16.mxu1 %v16938_v16  ;;  %12673 = vmatprep.subr.bf16.mxu0 %v16941_v39  ;;  %v16959_v16 = vld [vmem:[#allocation9 + $0x183c] ss:$24 sps:$4 sm:$0xff]   ;;  %v16960_v39 = vld [vmem:[#allocation9 + $0x1868] ss:$24 sps:$4 sm:$0xff]  }
 0x845   : > { %v7154_v2 = vpop.f32.mrb[104].mxu1  ;;  %v18512_v18 = vpop.f32.mrb[168].mxu0 }
 0x846   : > { %v7243_v6 = vadd.f32 %v7154_v2, %v18466_v35  ;;  %v7156_v11 = vpop.f32.mrb[105].mxu1  ;;  %v18515_v61 = vpop.f32.mrb[169].mxu0  ;;  %v16974_v2 = vld [vmem:[#allocation9 + $0x192c] ss:$24 sps:$4 sm:$0xff]  }
 0x847   : > { %v7244_v36 = vadd.f32 %v7156_v11, %v18469_v19  ;;  %v7158_v49 = vpop.f32.mrb[106].mxu1  ;;  %8893 = vmatpush1.bf16.msra.mxu1 %v16936_v62  ;;  %v10941_v56 = vpop.f32.mrb[170].mxu0  ;;  %12674 = vmatpush1.bf16.msra.mxu0 %v16939_v4  ;;  %v16948_v19 = vld [vmem:[#allocation9 + $0x17e0] ss:$24 sps:$4 sm:$0xff]   ;;  %v16965_v62 = vld [vmem:[#allocation9 + $0x189c] ss:$24 sps:$4 sm:$0xff]  }
 0x848   : > { %v7159_v30 = vpop.f32.mrb[107].mxu1  ;;  %v10942_v63 = vpop.f32.mrb[171].mxu0  ;;  %8894 = vmatprep.subr.bf16.mxu1 %v16944_v54  ;;  %12675 = vmatprep.subr.bf16.mxu0 %v16947_v20  ;;  %v18519_v5 = vadd.f32 %v18296_v34, %v7243_v6  ;;  %v16957_v34 = vld [vmem:[#allocation9 + $0x1838] ss:$24 sps:$4 sm:$0xff]   ;;  %v16968_v54 = vld [vmem:[#allocation9 + $0x18cc] ss:$24 sps:$4 sm:$0xff]  }
 0x849   : > { %v18522_v35 = vadd.f32 %v18299_v24, %v7244_v36  ;;  %v16962_v24 = vld [vmem:[#allocation9 + $0x186c] ss:$24 sps:$4 sm:$0xff]   ;;  %v16963_v4 = vld [vmem:[#allocation9 + $0x1898] ss:$24 sps:$4 sm:$0xff]   ;;  %v16966_v20 = vld [vmem:[#allocation9 + $0x18c8] ss:$24 sps:$4 sm:$0xff]  }
 0x84a   : > { %v16972_v63 = vld [vmem:[#allocation9 + $0x1928] ss:$24 sps:$4 sm:$0xff]  }
 0x84b   : > { %8895 = vmatpush1.bf16.msra.mxu1 %v16942_v23  ;;  %12676 = vmatpush1.bf16.msra.mxu0 %v16945_v42 }
 0x84c   : > { %8896 = vmatprep.subr.bf16.mxu1 %v16950_v41  ;;  %12677 = vmatprep.subr.bf16.mxu0 %v16953_v43 }
 0x84f   : > { %8897 = vmatpush1.bf16.msra.mxu1 %v16948_v19  ;;  %12678 = vmatpush1.bf16.msra.mxu0 %v16951_v28  ;;  %v16977_v19 = vld [vmem:[#allocation9 + $0x195c] ss:$24 sps:$4 sm:$0xff]  }
 0x850   : > { %9259 = vmatprep.subr.bf16.mxu1 %v16956_v33 }
 0x852   : > { %8915 = vmatmul.mubr.bf16.vlgmr.msra.gmra.mrb[132].mxu1 %v18274_v47  ;;  %12696 = vmatmul.mubr.bf16.vlgmr.msra.gmra.mrb[196].mxu0 %v18506_v10  ;;  %v16971_v47 = vld [vmem:[#allocation9 + $0x18fc] ss:$24 sps:$4 sm:$0xff]   ;;  %v16969_v10 = vld [vmem:[#allocation9 + $0x18f8] ss:$24 sps:$4 sm:$0xff]  }
 0x853   : > { %9260 = vmatpush1.bf16.msra.mxu1 %v16954_v25  ;;  %9291 = vmatprep.mubr.bf16.mxu1 %v17606_v0  ;;  %v16980_v25 = vld [vmem:[#allocation9 + $0x1984] ss:$24 sps:$4 sm:$0xff]  }
 0x854   : > { %9261 = vmatprep.subr.bf16.mxu1 %v16959_v16  ;;  %v16983_v16 = vld [vmem:[#allocation9 + $0x19b4] ss:$24 sps:$4 sm:$0xff]  }
 0x857   : > { %9262 = vmatpush1.bf16.msra.mxu1 %v16957_v34  ;;  %v17315_v34 = vld [vmem:[#allocation2 + $0x8] sm:$0xf] }
 0x858   : > { %9263 = vmatprep.subr.bf16.mxu1 %v16962_v24  ;;  %v16981_v24 = vld [vmem:[#allocation9 + $0x19b0] ss:$24 sps:$4 sm:$0xff]  }
 0x85b   : > { %9264 = vmatpush1.bf16.msra.mxu1 %v16960_v39  ;;  %v16984_v39 = vld [vmem:[#allocation9 + $0x19e0] ss:$24 sps:$4 sm:$0xff]  }
 0x85c   : > { %9265 = vmatprep.subr.bf16.mxu1 %v16965_v62  ;;  %v16987_v62 = vld [vmem:[#allocation9 + $0x1a10] ss:$24 sps:$4 sm:$0xff]  }
 0x85f   : > { %9266 = vmatpush1.bf16.msra.mxu1 %v16963_v4  ;;  %v16992_v4 = vld [vmem:[#allocation9 + $0x1a44] ss:$24 sps:$4 sm:$0xff]  }
 0x860   : > { %9267 = vmatprep.subr.bf16.mxu1 %v16968_v54  ;;  %v16990_v54 = vld [vmem:[#allocation9 + $0x1a40] ss:$24 sps:$4 sm:$0xff]  }
 0x863   : > { %9268 = vmatpush1.bf16.msra.mxu1 %v16966_v20  ;;  %v16995_v20 = vld [vmem:[#allocation9 + $0x1a74] ss:$24 sps:$4 sm:$0xff]  }
 0x864   : > { %9269 = vmatprep.subr.bf16.mxu1 %v16971_v47  ;;  %v16993_v47 = vld [vmem:[#allocation9 + $0x1a70] ss:$24 sps:$4 sm:$0xff]  }
 0x865   : > { %v7236_v6 = vpop.f32.mrb[108].mxu1  ;;  %v18527_v11 = vpop.f32.mrb[172].mxu0 }
 0x866   : > { %v7247_v36 = vadd.f32 %v7236_v6, %v18482_v1  ;;  %v7238_v49 = vpop.f32.mrb[109].mxu1  ;;  %v18530_v56 = vpop.f32.mrb[173].mxu0  ;;  %v16975_v1 = vld [vmem:[#allocation9 + $0x1958] ss:$24 sps:$4 sm:$0xff]  }
 0x867   : > { %v7248_v23 = vadd.f32 %v7238_v49, %v18485_v44  ;;  %v7240_v42 = vpop.f32.mrb[110].mxu1  ;;  %9270 = vmatpush1.bf16.msra.mxu1 %v16969_v10  ;;  %v11023_v30 = vpop.f32.mrb[174].mxu0  ;;  %v16978_v44 = vld [vmem:[#allocation9 + $0x1980] ss:$24 sps:$4 sm:$0xff]   ;;  %v16998_v10 = vld [vmem:[#allocation9 + $0x1aa4] ss:$24 sps:$4 sm:$0xff]  }
 0x868   : > { %v7241_v41 = vpop.f32.mrb[111].mxu1  ;;  %v11024_v43 = vpop.f32.mrb[175].mxu0  ;;  %9271 = vmatprep.subr.bf16.mxu1 %v16974_v2  ;;  %v18534_v28 = vadd.f32 %v18312_v60, %v7247_v36  ;;  %v16986_v60 = vld [vmem:[#allocation9 + $0x19e4] ss:$24 sps:$4 sm:$0xff]  }
 0x869   : > { %v18537_v33 = vadd.f32 %v18317_v9, %v7248_v23  ;;  %v16989_v9 = vld [vmem:[#allocation9 + $0x1a14] ss:$24 sps:$4 sm:$0xff]   ;;  %v16996_v41 = vld [vmem:[#allocation9 + $0x1aa0] ss:$24 sps:$4 sm:$0xff]  }
 0x86b   : > { %9272 = vmatpush1.bf16.msra.mxu1 %v16972_v63 }
 0x86c   : > { %9273 = vmatprep.subr.bf16.mxu1 %v16977_v19 }
 0x86f   : > { %9274 = vmatpush1.bf16.msra.mxu1 %v16975_v1  ;;  %v17001_v1 = vld [vmem:[#allocation9 + $0x1ad4] ss:$24 sps:$4 sm:$0xff]  }
 0x870   : > { %9643 = vmatprep.subr.bf16.mxu1 %v16980_v25 }
 0x872   : > { %9292 = vmatmul.mubr.bf16.vlgmr.msra.gmra.mrb[136].mxu1 %v17315_v34  ;;  %v17007_v34 = vld [vmem:[#allocation9 + $0x19c4] ss:$24 sps:$4 sm:$0xff]  }
 0x873   : > { %9644 = vmatpush1.bf16.msra.mxu1 %v16978_v44  ;;  %9675 = vmatprep.mubr.bf16.mxu1 %v17606_v0 }
 0x874   : > { %9645 = vmatprep.subr.bf16.mxu1 %v16983_v16  ;;  %v17004_v16 = vld [vmem:[#allocation9 + $0x1994] ss:$24 sps:$4 sm:$0xff]  }
 0x877   : > { %9646 = vmatpush1.bf16.msra.mxu1 %v16981_v24  ;;  %v17005_v24 = vld [vmem:[#allocation9 + $0x19c0] ss:$24 sps:$4 sm:$0xff]  }
 0x878   : > { %9647 = vmatprep.subr.bf16.mxu1 %v16986_v60  ;;  %v17008_v60 = vld [vmem:[#allocation9 + $0x19f0] ss:$24 sps:$4 sm:$0xff]  }
 0x87b   : > { %9648 = vmatpush1.bf16.msra.mxu1 %v16984_v39  ;;  %v17011_v39 = vld [vmem:[#allocation9 + $0x1a20] ss:$24 sps:$4 sm:$0xff]  }
 0x87c   : > { %9649 = vmatprep.subr.bf16.mxu1 %v16989_v9  ;;  %v17016_v9 = vld [vmem:[#allocation9 + $0x1a54] ss:$24 sps:$4 sm:$0xff]  }
 0x87f   : > { %9650 = vmatpush1.bf16.msra.mxu1 %v16987_v62  ;;  %v17014_v62 = vld [vmem:[#allocation9 + $0x1a50] ss:$24 sps:$4 sm:$0xff]  }
 0x880   : > { %9651 = vmatprep.subr.bf16.mxu1 %v16992_v4  ;;  %v17019_v4 = vld [vmem:[#allocation9 + $0x1a84] ss:$24 sps:$4 sm:$0xff]  }
 0x883   : > { %9652 = vmatpush1.bf16.msra.mxu1 %v16990_v54  ;;  %v17017_v54 = vld [vmem:[#allocation9 + $0x1a80] ss:$24 sps:$4 sm:$0xff]  }
 0x884   : > { %9653 = vmatprep.subr.bf16.mxu1 %v16995_v20  ;;  %v17022_v20 = vld [vmem:[#allocation9 + $0x1ab4] ss:$24 sps:$4 sm:$0xff]  }
 0x885   : > { %v7615_v2 = vpop.f32.mrb[112].mxu1  ;;  %v18540_v6 = vpop.f32.mrb[176].mxu0 }
 0x886   : > { %v7665_v36 = vadd.f32 %v7615_v2, %v18501_v37  ;;  %v7617_v49 = vpop.f32.mrb[113].mxu1  ;;  %v18543_v23 = vpop.f32.mrb[177].mxu0  ;;  %v16999_v37 = vld [vmem:[#allocation9 + $0x1ad0] ss:$24 sps:$4 sm:$0xff]  }
 0x887   : > { %v7666_v42 = vadd.f32 %v7617_v49, %v18504_v46  ;;  %v7619_v30 = vpop.f32.mrb[114].mxu1  ;;  %9654 = vmatpush1.bf16.msra.mxu1 %v16993_v47  ;;  %v11402_v63 = vpop.f32.mrb[178].mxu0  ;;  %v17002_v46 = vld [vmem:[#allocation9 + $0x1990] ss:$24 sps:$4 sm:$0xff]  }
 0x888   : > { %v7620_v43 = vpop.f32.mrb[115].mxu1  ;;  %v11403_v19 = vpop.f32.mrb[179].mxu0  ;;  %9655 = vmatprep.subr.bf16.mxu1 %v16998_v10  ;;  %v18547_v25 = vadd.f32 %v18332_v29, %v7665_v36  ;;  %v17010_v29 = vld [vmem:[#allocation9 + $0x19f4] ss:$24 sps:$4 sm:$0xff]  }
 0x889   : > { %v18550_v44 = vadd.f32 %v18335_v27, %v7666_v42  ;;  %v17013_v27 = vld [vmem:[#allocation9 + $0x1a24] ss:$24 sps:$4 sm:$0xff]  }
 0x88b   : > { %9656 = vmatpush1.bf16.msra.mxu1 %v16996_v41  ;;  %v17020_v41 = vld [vmem:[#allocation9 + $0x1ab0] ss:$24 sps:$4 sm:$0xff]  }
 0x88c   : > { %9657 = vmatprep.subr.bf16.mxu1 %v17001_v1  ;;  %v17025_v1 = vld [vmem:[#allocation9 + $0x1ae4] ss:$24 sps:$4 sm:$0xff]  }
 0x88f   : > { %9658 = vmatpush1.bf16.msra.mxu1 %v16999_v37 }
 0x890   : > { %9725 = vmatprep.subr.bf16.mxu1 %v17004_v16 }
 0x892   : > { %9676 = vmatmul.mubr.bf16.vlgmr.msra.gmra.mrb[140].mxu1 %v18327_v32 }
 0x893   : > { %9726 = vmatpush1.bf16.msra.mxu1 %v17002_v46  ;;  %9757 = vmatprep.mubr.bf16.mxu1 %v17606_v0  ;;  %v17028_v46 = vld [vmem:[#allocation9 + $0x1b0c] ss:$24 sps:$4 sm:$0xff]  }
 0x894   : > { %9727 = vmatprep.subr.bf16.mxu1 %v17007_v34  ;;  %v17031_v34 = vld [vmem:[#allocation9 + $0x1b3c] ss:$24 sps:$4 sm:$0xff]  }
 0x897   : > { %9728 = vmatpush1.bf16.msra.mxu1 %v17005_v24  ;;  %v17029_v24 = vld [vmem:[#allocation9 + $0x1b38] ss:$24 sps:$4 sm:$0xff]  }
 0x898   : > { %9729 = vmatprep.subr.bf16.mxu1 %v17010_v29  ;;  %v17032_v29 = vld [vmem:[#allocation9 + $0x1b68] ss:$24 sps:$4 sm:$0xff]  }
 0x89b   : > { %9730 = vmatpush1.bf16.msra.mxu1 %v17008_v60  ;;  %v17035_v60 = vld [vmem:[#allocation9 + $0x1b98] ss:$24 sps:$4 sm:$0xff]  }
 0x89c   : > { %9731 = vmatprep.subr.bf16.mxu1 %v17013_v27  ;;  %v17040_v27 = vld [vmem:[#allocation9 + $0x1bcc] ss:$24 sps:$4 sm:$0xff]  }
 0x89f   : > { %9732 = vmatpush1.bf16.msra.mxu1 %v17011_v39  ;;  %v17038_v39 = vld [vmem:[#allocation9 + $0x1bc8] ss:$24 sps:$4 sm:$0xff]  }
 0x8a0   : > { %9733 = vmatprep.subr.bf16.mxu1 %v17016_v9  ;;  %v17043_v9 = vld [vmem:[#allocation9 + $0x1bfc] ss:$24 sps:$4 sm:$0xff]  }
 0x8a3   : > { %9734 = vmatpush1.bf16.msra.mxu1 %v17014_v62  ;;  %v17046_v62 = vld [vmem:[#allocation9 + $0x1c2c] ss:$24 sps:$4 sm:$0xff]  }
 0x8a4   : > { %9735 = vmatprep.subr.bf16.mxu1 %v17019_v4 }
 0x8a5   : > { %v7994_v47 = vpop.f32.mrb[116].mxu1  ;;  %v18554_v10 = vpop.f32.mrb[180].mxu0 }
 0x8a6   : > { %v8083_v2 = vadd.f32 %v7994_v47, %v18519_v5  ;;  %v7996_v36 = vpop.f32.mrb[117].mxu1  ;;  %v18557_v49 = vpop.f32.mrb[181].mxu0  ;;  %v17023_v5 = vld [vmem:[#allocation9 + $0x1ae0] ss:$24 sps:$4 sm:$0xff]  }
 0x8a7   : > { %v8084_v42 = vadd.f32 %v7996_v36, %v18522_v35  ;;  %v7998_v30 = vpop.f32.mrb[118].mxu1  ;;  %9736 = vmatpush1.bf16.msra.mxu1 %v17017_v54  ;;  %v11781_v63 = vpop.f32.mrb[182].mxu0  ;;  %v17026_v35 = vld [vmem:[#allocation9 + $0x1b08] ss:$24 sps:$4 sm:$0xff]  }
 0x8a8   : > { %v7999_v43 = vpop.f32.mrb[119].mxu1  ;;  %v11782_v19 = vpop.f32.mrb[183].mxu0  ;;  %9737 = vmatprep.subr.bf16.mxu1 %v17022_v20  ;;  %v18561_v37 = vadd.f32 %v18351_v59, %v8083_v2  ;;  %v17034_v59 = vld [vmem:[#allocation9 + $0x1b6c] ss:$24 sps:$4 sm:$0xff]   ;;  %v17044_v63 = vld [vmem:[#allocation9 + $0x1c28] ss:$24 sps:$4 sm:$0xff]  }
 0x8a9   : > { %v18564_v16 = vadd.f32 %v18354_v22, %v8084_v42  ;;  %v17037_v22 = vld [vmem:[#allocation9 + $0x1b9c] ss:$24 sps:$4 sm:$0xff]  }
 0x8aa   : > { %v17049_v19 = vld [vmem:[#allocation9 + $0x1c5c] ss:$24 sps:$4 sm:$0xff]  }
 0x8ab   : > { %9738 = vmatpush1.bf16.msra.mxu1 %v17020_v41 }
 0x8ac   : > { %9739 = vmatprep.subr.bf16.mxu1 %v17025_v1 }
 0x8af   : > { %9740 = vmatpush1.bf16.msra.mxu1 %v17023_v5 }
 0x8b0   : > { %10104 = vmatprep.subr.bf16.mxu1 %v17028_v46  ;;  %v17052_v46 = vld [vmem:[#allocation9 + $0x1c84] ss:$24 sps:$4 sm:$0xff]  }
 0x8b2   : > { %9758 = vmatmul.mubr.bf16.vlgmr.msra.gmra.mrb[144].mxu1 %v18327_v32  ;;  %v17041_v32 = vld [vmem:[#allocation9 + $0x1bf8] ss:$24 sps:$4 sm:$0xff]  }
 0x8b3   : > { %10105 = vmatpush1.bf16.msra.mxu1 %v17026_v35  ;;  %10136 = vmatprep.mubr.bf16.mxu1 %v17606_v0  ;;  %v17055_v35 = vld [vmem:[#allocation9 + $0x1cb4] ss:$24 sps:$4 sm:$0xff]  }
 0x8b4   : > { %10106 = vmatprep.subr.bf16.mxu1 %v17031_v34  ;;  %v17053_v34 = vld [vmem:[#allocation9 + $0x1cb0] ss:$24 sps:$4 sm:$0xff]  }
 0x8b7   : > { %10107 = vmatpush1.bf16.msra.mxu1 %v17029_v24  ;;  %v17056_v24 = vld [vmem:[#allocation9 + $0x1ce0] ss:$24 sps:$4 sm:$0xff]  }
 0x8b8   : > { %10108 = vmatprep.subr.bf16.mxu1 %v17034_v59  ;;  %v17059_v59 = vld [vmem:[#allocation9 + $0x1d10] ss:$24 sps:$4 sm:$0xff]  }
 0x8bb   : > { %10109 = vmatpush1.bf16.msra.mxu1 %v17032_v29  ;;  %v17064_v29 = vld [vmem:[#allocation9 + $0x1d44] ss:$24 sps:$4 sm:$0xff]  }
 0x8bc   : > { %10110 = vmatprep.subr.bf16.mxu1 %v17037_v22  ;;  %v17062_v22 = vld [vmem:[#allocation9 + $0x1d40] ss:$24 sps:$4 sm:$0xff]  }
 0x8bf   : > { %10111 = vmatpush1.bf16.msra.mxu1 %v17035_v60  ;;  %v17067_v60 = vld [vmem:[#allocation9 + $0x1d74] ss:$24 sps:$4 sm:$0xff]  }
 0x8c0   : > { %10112 = vmatprep.subr.bf16.mxu1 %v17040_v27  ;;  %v17070_v27 = vld [vmem:[#allocation9 + $0x1da4] ss:$24 sps:$4 sm:$0xff]  }
 0x8c3   : > { %10113 = vmatpush1.bf16.msra.mxu1 %v17038_v39 }
 0x8c4   : > { %10114 = vmatprep.subr.bf16.mxu1 %v17043_v9 }
 0x8c5   : > { %v8076_v4 = vpop.f32.mrb[120].mxu1  ;;  %v18568_v54 = vpop.f32.mrb[184].mxu0 }
 0x8c6   : > { %v8087_v20 = vadd.f32 %v8076_v4, %v18534_v28  ;;  %v8078_v47 = vpop.f32.mrb[121].mxu1  ;;  %v18571_v2 = vpop.f32.mrb[185].mxu0  ;;  %v17047_v28 = vld [vmem:[#allocation9 + $0x1c58] ss:$24 sps:$4 sm:$0xff]  }
 0x8c7   : > { %v8088_v36 = vadd.f32 %v8078_v47, %v18537_v33  ;;  %v8080_v42 = vpop.f32.mrb[122].mxu1  ;;  %10115 = vmatpush1.bf16.msra.mxu1 %v17041_v32  ;;  %v11863_v30 = vpop.f32.mrb[186].mxu0  ;;  %v17050_v33 = vld [vmem:[#allocation9 + $0x1c80] ss:$24 sps:$4 sm:$0xff]  }
 0x8c8   : > { %v8081_v41 = vpop.f32.mrb[123].mxu1  ;;  %v11864_v43 = vpop.f32.mrb[187].mxu0  ;;  %10116 = vmatprep.subr.bf16.mxu1 %v17046_v62  ;;  %v18575_v1 = vadd.f32 %v18367_v7, %v8087_v20  ;;  %v17058_v7 = vld [vmem:[#allocation9 + $0x1ce4] ss:$24 sps:$4 sm:$0xff]   ;;  %v17068_v42 = vld [vmem:[#allocation9 + $0x1da0] ss:$24 sps:$4 sm:$0xff]  }
 0x8c9   : > { %v18578_v5 = vadd.f32 %v18370_v50, %v8088_v36  ;;  %v17061_v50 = vld [vmem:[#allocation9 + $0x1d14] ss:$24 sps:$4 sm:$0xff]  }
 0x8ca   : > { %v17073_v41 = vld [vmem:[#allocation9 + $0x1dd4] ss:$24 sps:$4 sm:$0xff]  }
 0x8cb   : > { %10117 = vmatpush1.bf16.msra.mxu1 %v17044_v63 }
 0x8cc   : > { %10118 = vmatprep.subr.bf16.mxu1 %v17049_v19 }
 0x8cf   : > { %10119 = vmatpush1.bf16.msra.mxu1 %v17047_v28  ;;  %v17076_v28 = vld [vmem:[#allocation9 + $0x1c94] ss:$24 sps:$4 sm:$0xff]  }
 0x8d0   : > { %10483 = vmatprep.subr.bf16.mxu1 %v17052_v46  ;;  %v17079_v46 = vld [vmem:[#allocation9 + $0x1cc4] ss:$24 sps:$4 sm:$0xff]  }
 0x8d2   : > { %10137 = vmatmul.mubr.bf16.vlgmr.msra.gmra.mrb[148].mxu1 %v18345_v8  ;;  %v17065_v8 = vld [vmem:[#allocation9 + $0x1d70] ss:$24 sps:$4 sm:$0xff]  }
 0x8d3   : > { %10484 = vmatpush1.bf16.msra.mxu1 %v17050_v33  ;;  %10515 = vmatprep.mubr.bf16.mxu1 %v17606_v0  ;;  %v17077_v33 = vld [vmem:[#allocation9 + $0x1cc0] ss:$24 sps:$4 sm:$0xff]  }
 0x8d4   : > { %10485 = vmatprep.subr.bf16.mxu1 %v17055_v35  ;;  %v17080_v35 = vld [vmem:[#allocation9 + $0x1cf0] ss:$24 sps:$4 sm:$0xff]  }
 0x8d7   : > { %10486 = vmatpush1.bf16.msra.mxu1 %v17053_v34  ;;  %v17083_v34 = vld [vmem:[#allocation9 + $0x1d20] ss:$24 sps:$4 sm:$0xff]  }
 0x8d8   : > { %10487 = vmatprep.subr.bf16.mxu1 %v17058_v7  ;;  %v17088_v7 = vld [vmem:[#allocation9 + $0x1d54] ss:$24 sps:$4 sm:$0xff]  }
 0x8db   : > { %10488 = vmatpush1.bf16.msra.mxu1 %v17056_v24  ;;  %v17086_v24 = vld [vmem:[#allocation9 + $0x1d50] ss:$24 sps:$4 sm:$0xff]  }
 0x8dc   : > { %10489 = vmatprep.subr.bf16.mxu1 %v17061_v50  ;;  %v17091_v50 = vld [vmem:[#allocation9 + $0x1d84] ss:$24 sps:$4 sm:$0xff]  }
 0x8df   : > { %10490 = vmatpush1.bf16.msra.mxu1 %v17059_v59  ;;  %v17089_v59 = vld [vmem:[#allocation9 + $0x1d80] ss:$24 sps:$4 sm:$0xff]  }
 0x8e0   : > { %10491 = vmatprep.subr.bf16.mxu1 %v17064_v29  ;;  %v17094_v29 = vld [vmem:[#allocation9 + $0x1db4] ss:$24 sps:$4 sm:$0xff]  }
 0x8e3   : > { %10492 = vmatpush1.bf16.msra.mxu1 %v17062_v22 }
 0x8e4   : > { %10493 = vmatprep.subr.bf16.mxu1 %v17067_v60 }
 0x8e5   : > { %v8455_v39 = vpop.f32.mrb[124].mxu1  ;;  %v18582_v9 = vpop.f32.mrb[188].mxu0 }
 0x8e6   : > { %v8505_v32 = vadd.f32 %v8455_v39, %v18547_v25  ;;  %v8457_v62 = vpop.f32.mrb[125].mxu1  ;;  %v18585_v4 = vpop.f32.mrb[189].mxu0  ;;  %v17071_v25 = vld [vmem:[#allocation9 + $0x1dd0] ss:$24 sps:$4 sm:$0xff]  }
 0x8e7   : > { %v8506_v20 = vadd.f32 %v8457_v62, %v18550_v44  ;;  %v8459_v47 = vpop.f32.mrb[126].mxu1  ;;  %10494 = vmatpush1.bf16.msra.mxu1 %v17065_v8  ;;  %v12242_v36 = vpop.f32.mrb[190].mxu0  ;;  %v17074_v44 = vld [vmem:[#allocation9 + $0x1c90] ss:$24 sps:$4 sm:$0xff]  }
 0x8e8   : > { %v8460_v30 = vpop.f32.mrb[127].mxu1  ;;  %v12243_v63 = vpop.f32.mrb[191].mxu0  ;;  %10495 = vmatprep.subr.bf16.mxu1 %v17070_v27  ;;  %v18589_v43 = vadd.f32 %v18386_v13, %v8505_v32  ;;  %v17082_v13 = vld [vmem:[#allocation9 + $0x1cf4] ss:$24 sps:$4 sm:$0xff]   ;;  %v17092_v47 = vld [vmem:[#allocation9 + $0x1db0] ss:$24 sps:$4 sm:$0xff]  }
 0x8e9   : > { %v18592_v19 = vadd.f32 %v18389_v12, %v8506_v20  ;;  %v17085_v12 = vld [vmem:[#allocation9 + $0x1d24] ss:$24 sps:$4 sm:$0xff]  }
 0x8ea   : > { %v17097_v30 = vld [vmem:[#allocation9 + $0x1de4] ss:$24 sps:$4 sm:$0xff]  }
 0x8eb   : > { %10496 = vmatpush1.bf16.msra.mxu1 %v17068_v42 }
 0x8ec   : > { %10497 = vmatprep.subr.bf16.mxu1 %v17073_v41 }
 0x8ef   : > { %10498 = vmatpush1.bf16.msra.mxu1 %v17071_v25  ;;  %v17100_v25 = vld [vmem:[#allocation9 + $0x1e0c] ss:$24 sps:$4 sm:$0xff]  }
 0x8f0   : > { %10565 = vmatprep.subr.bf16.mxu1 %v17076_v28  ;;  %v17103_v28 = vld [vmem:[#allocation9 + $0x1e3c] ss:$24 sps:$4 sm:$0xff]  }
 0x8f2   : > { %10516 = vmatmul.mubr.bf16.vlgmr.msra.gmra.mrb[152].mxu1 %v18380_v45 }
 0x8f3   : > { %10566 = vmatpush1.bf16.msra.mxu1 %v17074_v44  ;;  %10597 = vmatprep.mubr.bf16.mxu1 %v17606_v0  ;;  %v17101_v44 = vld [vmem:[#allocation9 + $0x1e38] ss:$24 sps:$4 sm:$0xff]  }
 0x8f4   : > { %10567 = vmatprep.subr.bf16.mxu1 %v17079_v46  ;;  %v17104_v46 = vld [vmem:[#allocation9 + $0x1e68] ss:$24 sps:$4 sm:$0xff]  }
 0x8f7   : > { %10568 = vmatpush1.bf16.msra.mxu1 %v17077_v33  ;;  %v17107_v33 = vld [vmem:[#allocation9 + $0x1e98] ss:$24 sps:$4 sm:$0xff]  }
 0x8f8   : > { %10569 = vmatprep.subr.bf16.mxu1 %v17082_v13  ;;  %v17112_v13 = vld [vmem:[#allocation9 + $0x1ecc] ss:$24 sps:$4 sm:$0xff]  }
 0x8fb   : > { %10570 = vmatpush1.bf16.msra.mxu1 %v17080_v35  ;;  %v17110_v35 = vld [vmem:[#allocation9 + $0x1ec8] ss:$24 sps:$4 sm:$0xff]  }
 0x8fc   : > { %10571 = vmatprep.subr.bf16.mxu1 %v17085_v12  ;;  %v17115_v12 = vld [vmem:[#allocation9 + $0x1efc] ss:$24 sps:$4 sm:$0xff]  }
 0x8ff   : > { %10572 = vmatpush1.bf16.msra.mxu1 %v17083_v34  ;;  %v17118_v34 = vld [vmem:[#allocation9 + $0x1f2c] ss:$24 sps:$4 sm:$0xff]  }
 0x900   : > { %10573 = vmatprep.subr.bf16.mxu1 %v17088_v7 }
 0x903   : > { %10574 = vmatpush1.bf16.msra.mxu1 %v17086_v24 }
 0x904   : > { %10575 = vmatprep.subr.bf16.mxu1 %v17091_v50 }
 0x905   : > { %v8834_v22 = vpop.f32.mrb[128].mxu1  ;;  %v18596_v60 = vpop.f32.mrb[192].mxu0 }
 0x906   : > { %v8923_v8 = vadd.f32 %v8834_v22, %v18561_v37  ;;  %v8836_v27 = vpop.f32.mrb[129].mxu1  ;;  %v18599_v39 = vpop.f32.mrb[193].mxu0  ;;  %v17095_v37 = vld [vmem:[#allocation9 + $0x1de0] ss:$24 sps:$4 sm:$0xff]  }
 0x907   : > { %v8924_v32 = vadd.f32 %v8836_v27, %v18564_v16  ;;  %v8838_v62 = vpop.f32.mrb[130].mxu1  ;;  %10576 = vmatpush1.bf16.msra.mxu1 %v17089_v59  ;;  %v12619_v20 = vpop.f32.mrb[194].mxu0  ;;  %v17098_v16 = vld [vmem:[#allocation9 + $0x1e08] ss:$24 sps:$4 sm:$0xff]  }
 0x908   : > { %v8839_v36 = vpop.f32.mrb[131].mxu1  ;;  %v12620_v42 = vpop.f32.mrb[195].mxu0  ;;  %10577 = vmatprep.subr.bf16.mxu1 %v17094_v29  ;;  %v18603_v63 = vadd.f32 %v18405_v38, %v8923_v8  ;;  %v17106_v38 = vld [vmem:[#allocation9 + $0x1e6c] ss:$24 sps:$4 sm:$0xff]  }
 0x909   : > { %v18606_v41 = vadd.f32 %v18408_v15, %v8924_v32  ;;  %v17109_v15 = vld [vmem:[#allocation9 + $0x1e9c] ss:$24 sps:$4 sm:$0xff]   ;;  %v17116_v32 = vld [vmem:[#allocation9 + $0x1f28] ss:$24 sps:$4 sm:$0xff]  }
 0x90b   : > { %10578 = vmatpush1.bf16.msra.mxu1 %v17092_v47  ;;  %v17121_v47 = vld [vmem:[#allocation9 + $0x1f5c] ss:$24 sps:$4 sm:$0xff]  }
 0x90c   : > { %10579 = vmatprep.subr.bf16.mxu1 %v17097_v30  ;;  %v17124_v30 = vld [vmem:[#allocation9 + $0x1f84] ss:$24 sps:$4 sm:$0xff]  }
 0x90f   : > { %10580 = vmatpush1.bf16.msra.mxu1 %v17095_v37  ;;  %v17127_v37 = vld [vmem:[#allocation9 + $0x1fb4] ss:$24 sps:$4 sm:$0xff]  }
 0x910   : > { %10944 = vmatprep.subr.bf16.mxu1 %v17100_v25  ;;  %v17125_v25 = vld [vmem:[#allocation9 + $0x1fb0] ss:$24 sps:$4 sm:$0xff]  }
 0x912   : > { %10598 = vmatmul.mubr.bf16.vlgmr.msra.gmra.mrb[156].mxu1 %v18380_v45  ;;  %v17113_v45 = vld [vmem:[#allocation9 + $0x1ef8] ss:$24 sps:$4 sm:$0xff]  }
 0x913   : > { %10945 = vmatpush1.bf16.msra.mxu1 %v17098_v16  ;;  %10976 = vmatprep.mubr.bf16.mxu1 %v17606_v0  ;;  %v17128_v16 = vld [vmem:[#allocation9 + $0x1fe0] ss:$24 sps:$4 sm:$0xff]  }
 0x914   : > { %10946 = vmatprep.subr.bf16.mxu1 %v17103_v28  ;;  %v17131_v28 = vld [vmem:[#allocation9 + $0x2010] ss:$24 sps:$4 sm:$0xff]  }
 0x917   : > { %10947 = vmatpush1.bf16.msra.mxu1 %v17101_v44  ;;  %v17136_v44 = vld [vmem:[#allocation9 + $0x2044] ss:$24 sps:$4 sm:$0xff]  }
 0x918   : > { %10948 = vmatprep.subr.bf16.mxu1 %v17106_v38  ;;  %v17134_v38 = vld [vmem:[#allocation9 + $0x2040] ss:$24 sps:$4 sm:$0xff]  }
 0x91b   : > { %10949 = vmatpush1.bf16.msra.mxu1 %v17104_v46  ;;  %v17139_v46 = vld [vmem:[#allocation9 + $0x2074] ss:$24 sps:$4 sm:$0xff]  }
 0x91c   : > { %10950 = vmatprep.subr.bf16.mxu1 %v17109_v15  ;;  %v17142_v15 = vld [vmem:[#allocation9 + $0x20a4] ss:$24 sps:$4 sm:$0xff]  }
 0x91f   : > { %10951 = vmatpush1.bf16.msra.mxu1 %v17107_v33 }
 0x920   : > { %10952 = vmatprep.subr.bf16.mxu1 %v17112_v13 }
 0x923   : > { %10953 = vmatpush1.bf16.msra.mxu1 %v17110_v35 }
 0x924   : > { %10954 = vmatprep.subr.bf16.mxu1 %v17115_v12 }
 0x925   : > { %v8916_v7 = vpop.f32.mrb[132].mxu1  ;;  %v18610_v24 = vpop.f32.mrb[196].mxu0 }
 0x926   : > { %v8927_v50 = vadd.f32 %v8916_v7, %v18575_v1  ;;  %v8918_v59 = vpop.f32.mrb[133].mxu1  ;;  %v18613_v29 = vpop.f32.mrb[197].mxu0  ;;  %v17119_v1 = vld [vmem:[#allocation9 + $0x1f58] ss:$24 sps:$4 sm:$0xff]  }
 0x927   : > { %v8928_v22 = vadd.f32 %v8918_v59, %v18578_v5  ;;  %v8920_v8 = vpop.f32.mrb[134].mxu1  ;;  %10955 = vmatpush1.bf16.msra.mxu1 %v17113_v45  ;;  %v12701_v27 = vpop.f32.mrb[198].mxu0  ;;  %v17122_v5 = vld [vmem:[#allocation9 + $0x1f80] ss:$24 sps:$4 sm:$0xff]  }
 0x928   : > { %v8921_v62 = vpop.f32.mrb[135].mxu1  ;;  %v12702_v20 = vpop.f32.mrb[199].mxu0  ;;  %10956 = vmatprep.subr.bf16.mxu1 %v17118_v34  ;;  %v18617_v36 = vadd.f32 %v18421_v21, %v8927_v50  ;;  %v17130_v21 = vld [vmem:[#allocation9 + $0x1fe4] ss:$24 sps:$4 sm:$0xff]   ;;  %v17140_v34 = vld [vmem:[#allocation9 + $0x20a0] ss:$24 sps:$4 sm:$0xff]  }
 0x929   : > { %v18620_v42 = vadd.f32 %v18424_v55, %v8928_v22  ;;  %v17133_v55 = vld [vmem:[#allocation9 + $0x2014] ss:$24 sps:$4 sm:$0xff]   ;;  %v17143_v8 = vld [vmem:[#allocation9 + $0x20d0] ss:$24 sps:$4 sm:$0xff]   ;;  %v17155_v20 = vld [vmem:[#allocation9 + $0x2020] ss:$24 sps:$4 sm:$0xff]  }
 0x92a   : > { %v17145_v50 = vld [vmem:[#allocation9 + $0x20d4] ss:$24 sps:$4 sm:$0xff]   ;;  %v17152_v62 = vld [vmem:[#allocation9 + $0x1ff0] ss:$24 sps:$4 sm:$0xff]  }
 0x92b   : > { %10957 = vmatpush1.bf16.msra.mxu1 %v17116_v32  ;;  %v17148_v27 = vld [vmem:[#allocation9 + $0x1f94] ss:$24 sps:$4 sm:$0xff]   ;;  %v17149_v32 = vld [vmem:[#allocation9 + $0x1fc0] ss:$24 sps:$4 sm:$0xff]  }
 0x92c   : > { %10958 = vmatprep.subr.bf16.mxu1 %v17121_v47  ;;  %v17160_v47 = vld [vmem:[#allocation9 + $0x2054] ss:$24 sps:$4 sm:$0xff]  }
 0x92f   : > { %10959 = vmatpush1.bf16.msra.mxu1 %v17119_v1  ;;  %v17158_v1 = vld [vmem:[#allocation9 + $0x2050] ss:$24 sps:$4 sm:$0xff]  }
 0x930   : > { %11323 = vmatprep.subr.bf16.mxu1 %v17124_v30  ;;  %v17163_v30 = vld [vmem:[#allocation9 + $0x2084] ss:$24 sps:$4 sm:$0xff]  }
 0x932   : > { %10977 = vmatmul.mubr.bf16.vlgmr.msra.gmra.mrb[160].mxu1 %v18399_v26  ;;  %v17137_v26 = vld [vmem:[#allocation9 + $0x2070] ss:$24 sps:$4 sm:$0xff]  }
 0x933   : > { %11324 = vmatpush1.bf16.msra.mxu1 %v17122_v5  ;;  %11355 = vmatprep.mubr.bf16.mxu1 %v17606_v0  ;;  %v17161_v5 = vld [vmem:[#allocation9 + $0x2080] ss:$24 sps:$4 sm:$0xff]  }
 0x934   : > { %11325 = vmatprep.subr.bf16.mxu1 %v17127_v37  ;;  %v17166_v37 = vld [vmem:[#allocation9 + $0x20b4] ss:$24 sps:$4 sm:$0xff]  }
 0x937   : > { %11326 = vmatpush1.bf16.msra.mxu1 %v17125_v25 }
 0x938   : > { %11327 = vmatprep.subr.bf16.mxu1 %v17130_v21 }
 0x93b   : > { %11328 = vmatpush1.bf16.msra.mxu1 %v17128_v16 }
 0x93c   : > { %11329 = vmatprep.subr.bf16.mxu1 %v17133_v55 }
 0x93f   : > { %11330 = vmatpush1.bf16.msra.mxu1 %v17131_v28 }
 0x940   : > { %11331 = vmatprep.subr.bf16.mxu1 %v17136_v44  ;;  %v17164_v44 = vld [vmem:[#allocation9 + $0x20b0] ss:$24 sps:$4 sm:$0xff]  }
 0x943   : > { %11332 = vmatpush1.bf16.msra.mxu1 %v17134_v38 }
 0x944   : > { %11333 = vmatprep.subr.bf16.mxu1 %v17139_v46  ;;  %v17169_v46 = vld [vmem:[#allocation9 + $0x20e4] ss:$24 sps:$4 sm:$0xff]  }
 0x945   : > { %v9293_v33 = vpop.f32.mrb[136].mxu1 }
 0x946   : > { %v9343_v13 = vadd.f32 %v9293_v33, %v18589_v43  ;;  %v9295_v35 = vpop.f32.mrb[137].mxu1  ;;  %v17146_v43 = vld [vmem:[#allocation9 + $0x1f90] ss:$24 sps:$4 sm:$0xff]   ;;  %v17167_v33 = vld [vmem:[#allocation9 + $0x20e0] ss:$24 sps:$4 sm:$0xff]  }
 0x947   : > { %v9344_v12 = vadd.f32 %v9295_v35, %v18592_v19  ;;  %v9297_v45 = vpop.f32.mrb[138].mxu1  ;;  %11334 = vmatpush1.bf16.msra.mxu1 %v17137_v26  ;;  %v17151_v19 = vld [vmem:[#allocation9 + $0x1fc4] ss:$24 sps:$4 sm:$0xff]   ;;  %v17173_v35 = vld [vmem:[#allocation9 + $0x2138] ss:$24 sps:$4 sm:$0xff]  }
 0x948   : > { %v9298_v7 = vpop.f32.mrb[139].mxu1  ;;  %11335 = vmatprep.subr.bf16.mxu1 %v17142_v15  ;;  %v18627_v59 = vadd.f32 %v18440_v48, %v9343_v13  ;;  %v17154_v48 = vld [vmem:[#allocation9 + $0x1ff4] ss:$24 sps:$4 sm:$0xff]   ;;  %v17179_v45 = vld [vmem:[#allocation9 + $0x2198] ss:$24 sps:$4 sm:$0xff]  }
 0x949   : > { %v18630_v22 = vadd.f32 %v18443_v52, %v9344_v12  ;;  %v17157_v52 = vld [vmem:[#allocation9 + $0x2024] ss:$24 sps:$4 sm:$0xff]   ;;  %v17176_v12 = vld [vmem:[#allocation9 + $0x2168] ss:$24 sps:$4 sm:$0xff]  }
 0x94a   : > { %v17172_v13 = vld [vmem:[#allocation9 + $0x210c] ss:$24 sps:$4 sm:$0xff]   ;;  %v17182_v7 = vld [vmem:[#allocation9 + $0x21c8] ss:$24 sps:$4 sm:$0xff]  }
 0x94b   : > { %11336 = vmatpush1.bf16.msra.mxu1 %v17140_v34  ;;  %v17184_v34 = vld [vmem:[#allocation9 + $0x21cc] ss:$24 sps:$4 sm:$0xff]  }
 0x94c   : > { %11337 = vmatprep.subr.bf16.mxu1 %v17145_v50  ;;  %v17187_v50 = vld [vmem:[#allocation9 + $0x21fc] ss:$24 sps:$4 sm:$0xff]  }
 0x94f   : > { %11338 = vmatpush1.bf16.msra.mxu1 %v17143_v8  ;;  %v17190_v8 = vld [vmem:[#allocation9 + $0x222c] ss:$24 sps:$4 sm:$0xff]  }
 0x950   : > { %11405 = vmatprep.subr.bf16.mxu1 %v17148_v27 }
 0x952   : > { %11356 = vmatmul.mubr.bf16.vlgmr.msra.gmra.mrb[164].mxu1 %v18434_v3 }
 0x953   : > { %11406 = vmatpush1.bf16.msra.mxu1 %v17146_v43  ;;  %11437 = vmatprep.mubr.bf16.mxu1 %v17606_v0 }
 0x954   : > { %11407 = vmatprep.subr.bf16.mxu1 %v17151_v19 }
 0x957   : > { %11408 = vmatpush1.bf16.msra.mxu1 %v17149_v32 }
 0x958   : > { %11409 = vmatprep.subr.bf16.mxu1 %v17154_v48 }
 0x95b   : > { %11410 = vmatpush1.bf16.msra.mxu1 %v17152_v62  ;;  %v17188_v62 = vld [vmem:[#allocation9 + $0x2228] ss:$24 sps:$4 sm:$0xff]  }
 0x95c   : > { %11411 = vmatprep.subr.bf16.mxu1 %v17157_v52 }
 0x95f   : > { %11412 = vmatpush1.bf16.msra.mxu1 %v17155_v20  ;;  %v17193_v20 = vld [vmem:[#allocation9 + $0x225c] ss:$24 sps:$4 sm:$0xff]  }
 0x960   : > { %11413 = vmatprep.subr.bf16.mxu1 %v17160_v47 }
 0x963   : > { %11414 = vmatpush1.bf16.msra.mxu1 %v17158_v1 }
 0x964   : > { %11415 = vmatprep.subr.bf16.mxu1 %v17163_v30  ;;  %v17191_v30 = vld [vmem:[#allocation9 + $0x2258] ss:$24 sps:$4 sm:$0xff]  }
 0x965   : > { %v9677_v25 = vpop.f32.mrb[140].mxu1 }
 0x966   : > { %v9766_v21 = vadd.f32 %v9677_v25, %v18603_v63  ;;  %v9679_v16 = vpop.f32.mrb[141].mxu1  ;;  %v17170_v63 = vld [vmem:[#allocation9 + $0x2108] ss:$24 sps:$4 sm:$0xff]  }
 0x967   : > { %v9767_v55 = vadd.f32 %v9679_v16, %v18606_v41  ;;  %v9681_v28 = vpop.f32.mrb[142].mxu1  ;;  %11416 = vmatpush1.bf16.msra.mxu1 %v17161_v5  ;;  %v17175_v41 = vld [vmem:[#allocation9 + $0x213c] ss:$24 sps:$4 sm:$0xff]   ;;  %v17200_v25 = vld [vmem:[#allocation9 + $0x22e0] ss:$24 sps:$4 sm:$0xff]  }
 0x968   : > { %v9682_v38 = vpop.f32.mrb[143].mxu1  ;;  %11417 = vmatprep.subr.bf16.mxu1 %v17166_v37  ;;  %v18637_v26 = vadd.f32 %v18459_v40, %v9766_v21  ;;  %v17178_v40 = vld [vmem:[#allocation9 + $0x216c] ss:$24 sps:$4 sm:$0xff]   ;;  %v17197_v37 = vld [vmem:[#allocation9 + $0x22b0] ss:$24 sps:$4 sm:$0xff]  }
 0x969   : > { %v18640_v15 = vadd.f32 %v18462_v14, %v9767_v55  ;;  %v17181_v14 = vld [vmem:[#allocation9 + $0x219c] ss:$24 sps:$4 sm:$0xff]   ;;  %v17203_v21 = vld [vmem:[#allocation9 + $0x2310] ss:$24 sps:$4 sm:$0xff]   ;;  %v17206_v55 = vld [vmem:[#allocation9 + $0x2340] ss:$24 sps:$4 sm:$0xff]  }
 0x96a   : > { %v17196_v5 = vld [vmem:[#allocation9 + $0x2284] ss:$24 sps:$4 sm:$0xff]   ;;  %v17211_v28 = vld [vmem:[#allocation9 + $0x2374] ss:$24 sps:$4 sm:$0xff]  }
 0x96b   : > { %11418 = vmatpush1.bf16.msra.mxu1 %v17164_v44  ;;  %v17208_v16 = vld [vmem:[#allocation9 + $0x2344] ss:$24 sps:$4 sm:$0xff]  }
 0x96c   : > { %11419 = vmatprep.subr.bf16.mxu1 %v17169_v46  ;;  %v17214_v44 = vld [vmem:[#allocation9 + $0x23a4] ss:$24 sps:$4 sm:$0xff]  }
 0x96f   : > { %11420 = vmatpush1.bf16.msra.mxu1 %v17167_v33 }
 0x970   : > { %11784 = vmatprep.subr.bf16.mxu1 %v17172_v13 }
 0x972   : > { %11438 = vmatmul.mubr.bf16.vlgmr.msra.gmra.mrb[168].mxu1 %v18434_v3  ;;  %v17185_v3 = vld [vmem:[#allocation9 + $0x21f8] ss:$24 sps:$4 sm:$0xff]  }
 0x973   : > { %11785 = vmatpush1.bf16.msra.mxu1 %v17170_v63  ;;  %11816 = vmatprep.mubr.bf16.mxu1 %v17606_v0 }
 0x974   : > { %11786 = vmatprep.subr.bf16.mxu1 %v17175_v41  ;;  %v17212_v41 = vld [vmem:[#allocation9 + $0x23a0] ss:$24 sps:$4 sm:$0xff]  }
 0x977   : > { %11787 = vmatpush1.bf16.msra.mxu1 %v17173_v35 }
 0x978   : > { %11788 = vmatprep.subr.bf16.mxu1 %v17178_v40  ;;  %v17217_v40 = vld [vmem:[#allocation9 + $0x23d4] ss:$24 sps:$4 sm:$0xff]  }
 0x97b   : > { %11789 = vmatpush1.bf16.msra.mxu1 %v17176_v12 }
 0x97c   : > { %11790 = vmatprep.subr.bf16.mxu1 %v17181_v14 }
 0x97f   : > { %11791 = vmatpush1.bf16.msra.mxu1 %v17179_v45  ;;  %v17215_v45 = vld [vmem:[#allocation9 + $0x23d0] ss:$24 sps:$4 sm:$0xff]  }
 0x980   : > { %11792 = vmatprep.subr.bf16.mxu1 %v17184_v34  ;;  %v17220_v34 = vld [vmem:[#allocation9 + $0x2294] ss:$24 sps:$4 sm:$0xff]  }
 0x983   : > { %11793 = vmatpush1.bf16.msra.mxu1 %v17182_v7  ;;  %v17221_v7 = vld [vmem:[#allocation9 + $0x22c0] ss:$24 sps:$4 sm:$0xff]  }
 0x984   : > { %11794 = vmatprep.subr.bf16.mxu1 %v17187_v50  ;;  %v17224_v50 = vld [vmem:[#allocation9 + $0x22f0] ss:$24 sps:$4 sm:$0xff]  }
 0x985   : > { %v9759_v27 = vpop.f32.mrb[144].mxu1 }
 0x986   : > { %v9770_v43 = vadd.f32 %v9759_v27, %v18617_v36  ;;  %v9761_v19 = vpop.f32.mrb[145].mxu1  ;;  %v17194_v36 = vld [vmem:[#allocation9 + $0x2280] ss:$24 sps:$4 sm:$0xff]   ;;  %v17230_v27 = vld [vmem:[#allocation9 + $0x2350] ss:$24 sps:$4 sm:$0xff]  }
 0x987   : > { %v9771_v32 = vadd.f32 %v9761_v19, %v18620_v42  ;;  %v9763_v48 = vpop.f32.mrb[146].mxu1  ;;  %11795 = vmatpush1.bf16.msra.mxu1 %v17185_v3  ;;  %v17199_v42 = vld [vmem:[#allocation9 + $0x22b4] ss:$24 sps:$4 sm:$0xff]   ;;  %v17227_v3 = vld [vmem:[#allocation9 + $0x2320] ss:$24 sps:$4 sm:$0xff]  }
 0x988   : > { %v9764_v52 = vpop.f32.mrb[147].mxu1  ;;  %11796 = vmatprep.subr.bf16.mxu1 %v17190_v8  ;;  %v18647_v47 = vadd.f32 %v18475_v53, %v9770_v43  ;;  %v17202_v53 = vld [vmem:[#allocation9 + $0x22e4] ss:$24 sps:$4 sm:$0xff]   ;;  %v17232_v8 = vld [vmem:[#allocation9 + $0x2354] ss:$24 sps:$4 sm:$0xff]  }
 0x989   : > { %v18650_v1 = vadd.f32 %v18478_v17, %v9771_v32  ;;  %v17205_v17 = vld [vmem:[#allocation9 + $0x2314] ss:$24 sps:$4 sm:$0xff]   ;;  %v17235_v43 = vld [vmem:[#allocation9 + $0x2384] ss:$24 sps:$4 sm:$0xff]   ;;  %v17233_v19 = vld [vmem:[#allocation9 + $0x2380] ss:$24 sps:$4 sm:$0xff]  }
 0x98a   : > { %v17238_v32 = vld [vmem:[#allocation9 + $0x23b4] ss:$24 sps:$4 sm:$0xff]  }
 0x98b   : > { %11797 = vmatpush1.bf16.msra.mxu1 %v17188_v62 }
 0x98c   : > { %11798 = vmatprep.subr.bf16.mxu1 %v17193_v20 }
 0x98f   : > { %11799 = vmatpush1.bf16.msra.mxu1 %v17191_v30 }
 0x990   : > { %12163 = vmatprep.subr.bf16.mxu1 %v17196_v5  ;;  %v17236_v5 = vld [vmem:[#allocation9 + $0x23b0] ss:$24 sps:$4 sm:$0xff]  }
 0x992   : > { %11817 = vmatmul.mubr.bf16.vlgmr.msra.gmra.mrb[172].mxu1 %v18453_v57  ;;  %v17209_v57 = vld [vmem:[#allocation9 + $0x2370] ss:$24 sps:$4 sm:$0xff]  }
 0x993   : > { %12164 = vmatpush1.bf16.msra.mxu1 %v17194_v36  ;;  %12195 = vmatprep.mubr.bf16.mxu1 %v17606_v0 }
 0x994   : > { %12165 = vmatprep.subr.bf16.mxu1 %v17199_v42  ;;  %v17241_v42 = vld [vmem:[#allocation9 + $0x23e4] ss:$24 sps:$4 sm:$0xff]  }
 0x997   : > { %12166 = vmatpush1.bf16.msra.mxu1 %v17197_v37 }
 0x998   : > { %12167 = vmatprep.subr.bf16.mxu1 %v17202_v53 }
 0x99b   : > { %12168 = vmatpush1.bf16.msra.mxu1 %v17200_v25  ;;  %v17239_v25 = vld [vmem:[#allocation9 + $0x23e0] ss:$24 sps:$4 sm:$0xff]  }
 0x99c   : > { %12169 = vmatprep.subr.bf16.mxu1 %v17205_v17  ;;  %v17244_v17 = vld [vmem:[#allocation9 + $0x240c] ss:$24 sps:$4 sm:$0xff]  }
 0x99f   : > { %12170 = vmatpush1.bf16.msra.mxu1 %v17203_v21  ;;  %v17245_v21 = vld [vmem:[#allocation9 + $0x2438] ss:$24 sps:$4 sm:$0xff]  }
 0x9a0   : > { %12171 = vmatprep.subr.bf16.mxu1 %v17208_v16  ;;  %v17248_v16 = vld [vmem:[#allocation9 + $0x2468] ss:$24 sps:$4 sm:$0xff]  }
 0x9a3   : > { %12172 = vmatpush1.bf16.msra.mxu1 %v17206_v55  ;;  %v17251_v55 = vld [vmem:[#allocation9 + $0x2498] ss:$24 sps:$4 sm:$0xff]  }
 0x9a4   : > { %12173 = vmatprep.subr.bf16.mxu1 %v17211_v28  ;;  %v17256_v28 = vld [vmem:[#allocation9 + $0x24cc] ss:$24 sps:$4 sm:$0xff]  }
 0x9a5   : > { %v10138_v38 = vpop.f32.mrb[148].mxu1 }
 0x9a6   : > { %v10188_v46 = vadd.f32 %v10138_v38, %v18627_v59  ;;  %v10140_v33 = vpop.f32.mrb[149].mxu1  ;;  %v17218_v59 = vld [vmem:[#allocation9 + $0x2290] ss:$24 sps:$4 sm:$0xff]   ;;  %v17262_v38 = vld [vmem:[#allocation9 + $0x252c] ss:$24 sps:$4 sm:$0xff]  }
 0x9a7   : > { %v10189_v13 = vadd.f32 %v10140_v33, %v18630_v22  ;;  %v10142_v63 = vpop.f32.mrb[150].mxu1  ;;  %12174 = vmatpush1.bf16.msra.mxu1 %v17209_v57  ;;  %v17223_v22 = vld [vmem:[#allocation9 + $0x22c4] ss:$24 sps:$4 sm:$0xff]   ;;  %v17254_v57 = vld [vmem:[#allocation9 + $0x24c8] ss:$24 sps:$4 sm:$0xff]  }
 0x9a8   : > { %v10143_v35 = vpop.f32.mrb[151].mxu1  ;;  %12175 = vmatprep.subr.bf16.mxu1 %v17214_v44  ;;  %v18657_v12 = vadd.f32 %v18494_v58, %v10188_v46  ;;  %v17226_v58 = vld [vmem:[#allocation9 + $0x22f4] ss:$24 sps:$4 sm:$0xff]  }
 0x9a9   : > { %v18660_v14 = vadd.f32 %v18497_v51, %v10189_v13  ;;  %v17229_v51 = vld [vmem:[#allocation9 + $0x2324] ss:$24 sps:$4 sm:$0xff]  }
 0x9aa   : > { %v17259_v44 = vld [vmem:[#allocation9 + $0x24fc] ss:$24 sps:$4 sm:$0xff]  }
 0x9ab   : > { %12176 = vmatpush1.bf16.msra.mxu1 %v17212_v41  ;;  %v17260_v41 = vld [vmem:[#allocation9 + $0x2528] ss:$24 sps:$4 sm:$0xff]  }
 0x9ac   : > { %12177 = vmatprep.subr.bf16.mxu1 %v17217_v40  ;;  %v17265_v40 = vld [vmem:[#allocation9 + $0x255c] ss:$24 sps:$4 sm:$0xff]  }
 0x9af   : > { %12178 = vmatpush1.bf16.msra.mxu1 %v17215_v45 }
 0x9b0   : > { %12245 = vmatprep.subr.bf16.mxu1 %v17220_v34 }
 0x9b2   : > { %12196 = vmatmul.mubr.bf16.vlgmr.msra.gmra.mrb[176].mxu1 %v18488_v31 }
 0x9b3   : > { %12246 = vmatpush1.bf16.msra.mxu1 %v17218_v59  ;;  %12277 = vmatprep.mubr.bf16.mxu1 %v17606_v0  ;;  %v17263_v59 = vld [vmem:[#allocation9 + $0x2558] ss:$24 sps:$4 sm:$0xff]  }
 0x9b4   : > { %12247 = vmatprep.subr.bf16.mxu1 %v17223_v22  ;;  %v17266_v22 = vld [vmem:[#allocation12 + $0x40] sm:$0xff]  }
 0x9b7   : > { %12248 = vmatpush1.bf16.msra.mxu1 %v17221_v7  ;;  %v17316_v7 = vld [vmem:[#allocation2 + $0xc] sm:$0x1] }
 0x9b8   : > { %12249 = vmatprep.subr.bf16.mxu1 %v17226_v58  ;;  %v17269_v58 = vld [vmem:[#allocation12 + $0x8] sm:$0xff]  }
 0x9bb   : > { %12250 = vmatpush1.bf16.msra.mxu1 %v17224_v50  ;;  %v17270_v50 = vld [vmem:[#allocation12 + $0x50] sm:$0xff]  }
 0x9bc   : > { %12251 = vmatprep.subr.bf16.mxu1 %v17229_v51  ;;  %v17272_v51 = vld [vmem:[#allocation12 + $0x58] sm:$0xff]  }
 0x9bf   : > { %12252 = vmatpush1.bf16.msra.mxu1 %v17227_v3  ;;  %v17274_v3 = vld [vmem:[#allocation12 + $0x60] sm:$0xff]  }
 0x9c0   : > { %12253 = vmatprep.subr.bf16.mxu1 %v17232_v8  ;;  %v17275_v8 = vld [vmem:[#allocation12 + $0x20] sm:$0xff]  }
 0x9c3   : > { %12254 = vmatpush1.bf16.msra.mxu1 %v17230_v27 }
 0x9c4   : > { %12255 = vmatprep.subr.bf16.mxu1 %v17235_v43 }
 0x9c5   : > { %v10517_v48 = vpop.f32.mrb[152].mxu1 }
 0x9c6   : > { %v10606_v62 = vadd.f32 %v10517_v48, %v18637_v26  ;;  %v10519_v52 = vpop.f32.mrb[153].mxu1  ;;  %v17242_v26 = vld [vmem:[#allocation9 + $0x2408] ss:$24 sps:$4 sm:$0xff]  }
 0x9c7   : > { %v10607_v20 = vadd.f32 %v10519_v52, %v18640_v15  ;;  %v10521_v30 = vpop.f32.mrb[154].mxu1  ;;  %12256 = vmatpush1.bf16.msra.mxu1 %v17233_v19  ;;  %v17247_v15 = vld [vmem:[#allocation9 + $0x243c] ss:$24 sps:$4 sm:$0xff]  }
 0x9c8   : > { %v10522_v36 = vpop.f32.mrb[155].mxu1  ;;  %12257 = vmatprep.subr.bf16.mxu1 %v17238_v32  ;;  %v18667_v37 = vadd.f32 %v18512_v18, %v10606_v62  ;;  %v17250_v18 = vld [vmem:[#allocation9 + $0x246c] ss:$24 sps:$4 sm:$0xff]  }
 0x9c9   : > { %v18670_v53 = vadd.f32 %v18515_v61, %v10607_v20  ;;  %v17253_v61 = vld [vmem:[#allocation9 + $0x249c] ss:$24 sps:$4 sm:$0xff]  }
 0x9ca   : > { %v17276_v20 = vld [vmem:[#allocation12 + $0x68] sm:$0xff]   ;;  %v17278_v36 = vld [vmem:[#allocation12 + $0x70] sm:$0xff]  }
 0x9cb   : > { %12258 = vmatpush1.bf16.msra.mxu1 %v17236_v5  ;;  %v17277_v5 = vld [vmem:[#allocation12 + $0x28] sm:$0xff]  }
 0x9cc   : > { %12259 = vmatprep.subr.bf16.mxu1 %v17241_v42  ;;  %v17279_v42 = vld [vmem:[#allocation12 + $0x30] sm:$0xff]  }
 0x9cf   : > { %12260 = vmatpush1.bf16.msra.mxu1 %v17239_v25  ;;  %v17280_v25 = vld [vmem:[#allocation12 + $0x78] sm:$0xff]  }
 0x9d0   : > { %12622 = vmatprep.subr.bf16.mxu1 %v17244_v17 }
 0x9d2   : > { %12278 = vmatmul.mubr.bf16.vlgmr.msra.gmra.mrb[180].mxu1 %v18488_v31  ;;  %v17257_v31 = vld [vmem:[#allocation9 + $0x24f8] ss:$24 sps:$4 sm:$0xff]  }
 0x9d3   : > { %12623 = vmatpush1.bf16.msra.mxu1 %v17242_v26  ;;  %12654 = vmatprep.mubr.bf16.mxu1 %v17606_v0 }
 0x9d4   : > { %12624 = vmatprep.subr.bf16.mxu1 %v17247_v15 }
 0x9d7   : > { %12625 = vmatpush1.bf16.msra.mxu1 %v17245_v21 }
 0x9d8   : > { %12626 = vmatprep.subr.bf16.mxu1 %v17250_v18 }
 0x9db   : > { %12627 = vmatpush1.bf16.msra.mxu1 %v17248_v16 }
 0x9dc   : > { %12628 = vmatprep.subr.bf16.mxu1 %v17253_v61  ;;  %v17298_v61 = vld [vmem:[#allocation12 + $0xc0] sm:$0xff]  }
 0x9dd   : > { %14915 = vmatprep.subr.bf16.mxu0 %v17298_v61  ;;  %v17292_v61 = vld [vmem:[#allocation12 + $0x168] sm:$0xff]  }
 0x9df   : > { %12629 = vmatpush1.bf16.msra.mxu1 %v17251_v55  ;;  %v17299_v55 = vld [vmem:[#allocation12 + $0x80] sm:$0xff]  }
 0x9e0   : > { %12630 = vmatprep.subr.bf16.mxu1 %v17256_v28  ;;  %14916 = vmatpush3.bf16.msra.mxu0 %v17299_v55  ;;  %v17300_v28 = vld [vmem:[#allocation12 + $0xc8] sm:$0xff]  }
 0x9e1   : > { %14917 = vmatprep.subr.bf16.mxu0 %v17300_v28 }
 0x9e3   : > { %12631 = vmatpush1.bf16.msra.mxu1 %v17254_v57  ;;  %v17301_v57 = vld [vmem:[#allocation12 + $0x88] sm:$0xff]  }
 0x9e4   : > { %12632 = vmatprep.subr.bf16.mxu1 %v17259_v44  ;;  %v17302_v44 = vld [vmem:[#allocation12 + $0xd0] sm:$0xff]   ;;  %14918 = vmatpush3.bf16.msra.mxu0 %v17301_v57  ;;  %v17293_v57 = vld [vmem:[#allocation12 + $0x128] sm:$0xff]  }
 0x9e5   : > { %v10599_v46 = vpop.f32.mrb[156].mxu1  ;;  %14919 = vmatprep.subr.bf16.mxu0 %v17302_v44  ;;  %v17294_v44 = vld [vmem:[#allocation12 + $0x170] sm:$0xff]  }
 0x9e6   : > { %v10610_v0 = vadd.f32 %v10599_v46, %v18647_v47  ;;  %v10601_v33 = vpop.f32.mrb[157].mxu1  ;;  %v17267_v47 = vld [vmem:[#allocation12] sm:$0xff]  }
 0x9e7   : > { %v10611_v13 = vadd.f32 %v10601_v33, %v18650_v1  ;;  %v10603_v63 = vpop.f32.mrb[158].mxu1  ;;  %12633 = vmatpush1.bf16.msra.mxu1 %v17257_v31  ;;  %v17268_v1 = vld [vmem:[#allocation12 + $0x48] sm:$0xff]   ;;  %v17303_v31 = vld [vmem:[#allocation12 + $0x90] sm:$0xff]  }
 0x9e8   : > { %v10604_v35 = vpop.f32.mrb[159].mxu1  ;;  %12634 = vmatprep.subr.bf16.mxu1 %v17262_v38  ;;  %v18677_v45 = vadd.f32 %v18527_v11, %v10610_v0  ;;  %v17271_v11 = vld [vmem:[#allocation12 + $0x10] sm:$0xff]   ;;  %14920 = vmatpush3.bf16.msra.mxu0 %v17303_v31  ;;  %v17306_v38 = vld [vmem:[#allocation12 + $0xe0] sm:$0xff]  }
 0x9e9   : > { %v18680_v34 = vadd.f32 %v18530_v56, %v10611_v13  ;;  %v17273_v56 = vld [vmem:[#allocation12 + $0x18] sm:$0xff]  }
 0x9eb   : > { %12635 = vmatpush1.bf16.msra.mxu1 %v17260_v41  ;;  %v17309_v41 = vld [vmem:[#allocation12 + $0xa8] sm:$0xff]  }
 0x9ec   : > { %12636 = vmatprep.subr.bf16.mxu1 %v17265_v40 }
 0x9ef   : > { %12637 = vmatpush1.bf16.msra.mxu1 %v17263_v59 }
 0x9f0   : > { %14893 = vmatprep.subr.bf16.mxu1 %v17266_v22  ;;  %v17310_v22 = vld [vmem:[#allocation12 + $0xf0] sm:$0xff]  }
 0x9f2   : > { %12655 = vmatmul.mubr.bf16.vlgmr.msra.gmra.mrb[184].mxu1 %v17316_v7  ;;  %v17313_v7 = vld [vmem:[#allocation12 + $0xb8] sm:$0xff]  }
 0x9f3   : > { %14894 = vmatpush3.bf16.msra.mxu1 %v17267_v47  ;;  %v17311_v47 = vld [vmem:[#allocation12 + $0xb0] sm:$0xff]  }
 0x9f4   : > { %14895 = vmatprep.subr.bf16.mxu1 %v17268_v1  ;;  %v17312_v1 = vld [vmem:[#allocation12 + $0xf8] sm:$0xff]  }
 0x9f7   : > { %14896 = vmatpush3.bf16.msra.mxu1 %v17269_v58 }
 0x9f8   : > { %14897 = vmatprep.subr.bf16.mxu1 %v17270_v50 }
 0x9fb   : > { %14898 = vmatpush3.bf16.msra.mxu1 %v17271_v11 }
 0x9fc   : > { %14899 = vmatprep.subr.bf16.mxu1 %v17272_v51 }
 0x9ff   : > { %14900 = vmatpush3.bf16.msra.mxu1 %v17273_v56  ;;  %v12712_v56 = vlaneseq }
 0xa00   : > { %14901 = vmatprep.subr.bf16.mxu1 %v17274_v3 }
 0xa01   : > { %v18710_v3 = vshrl.u32 %v12712_v56, 7 }
 0xa03   : > { %14902 = vmatpush3.bf16.msra.mxu1 %v17275_v8  ;;  %v12714_v8 = vsub.s32 0, %v18710_v3  ;;  %v12730_v55 = vsub.s32 4, %v18710_v3  ;;  %v12734_v28 = vsub.s32 5, %v18710_v3 }
 0xa04   : > { %14903 = vmatprep.subr.bf16.mxu1 %v17276_v20 }
 0xa05   : > { %v10978_v27 = vpop.f32.mrb[160].mxu1 }
 0xa06   : > { %v11028_v43 = vadd.f32 %v10978_v27, %v18657_v12  ;;  %v10980_v19 = vpop.f32.mrb[161].mxu1  ;;  %v17281_v12 = vld [vmem:[#allocation12 + $0x38] sm:$0xff]  }
 0xa07   : > { %v11029_v32 = vadd.f32 %v10980_v19, %v18660_v14  ;;  %v10982_v48 = vpop.f32.mrb[162].mxu1  ;;  %14904 = vmatpush3.bf16.msra.mxu1 %v17277_v5  ;;  %v17282_v14 = vld [vmem:[#allocation12 + $0x140] sm:$0xff]   ;;  %v18713_v27 = vld [vmem:[#allocation11] sm:$0x3f] }
 0xa08   : > { %v10983_v62 = vpop.f32.mrb[163].mxu1  ;;  %v18685_v52 = vadd.f32 %v18540_v6, %v11028_v43  ;;  %14905 = vmatprep.subr.bf16.mxu1 %v17278_v36  ;;  %v12718_v43 = vsub.s32 1, %v18710_v3  ;;  %v12715_v48 = vrot.slane %v18713_v27, %v12714_v8 }
 0xa09   : > { %v18688_v30 = vadd.f32 %v18543_v23, %v11029_v32 }
 0xa0b   : > { %14906 = vmatpush3.bf16.msra.mxu1 %v17279_v42 }
 0xa0c   : > { %14907 = vmatprep.subr.bf16.mxu1 %v17280_v25 }
 0xa0f   : > { %14908 = vmatpush3.bf16.msra.mxu1 %v17281_v12 }
 0xa10   : > { %14937 = vmatprep.subr.bf16.mxu1 %v17282_v14 }
 0xa25   : > { %v11357_v17 = vpop.f32.mrb[164].mxu1 }
 0xa26   : > { %v11446_v6 = vadd.f32 %v11357_v17, %v18667_v37  ;;  %v11359_v26 = vpop.f32.mrb[165].mxu1  ;;  %v17304_v37 = vld [vmem:[#allocation12 + $0xd8] sm:$0xff]   ;;  %v17283_v17 = vld [vmem:[#allocation12 + $0x100] sm:$0xff]  }
 0xa27   : > { %v11447_v23 = vadd.f32 %v11359_v26, %v18670_v53  ;;  %v11361_v15 = vpop.f32.mrb[166].mxu1  ;;  %v17305_v53 = vld [vmem:[#allocation12 + $0x98] sm:$0xff]   ;;  %14921 = vmatprep.subr.bf16.mxu0 %v17304_v37  ;;  %v17284_v26 = vld [vmem:[#allocation12 + $0x148] sm:$0xff]  }
 0xa28   : > { %v11362_v21 = vpop.f32.mrb[167].mxu1  ;;  %v11866_v18 = vadd.f32 %v18554_v10, %v11446_v6  ;;  %14922 = vmatpush3.bf16.msra.mxu0 %v17305_v53  ;;  %v17307_v10 = vld [vmem:[#allocation12 + $0xa0] sm:$0xff]   ;;  %v17286_v15 = vld [vmem:[#allocation12 + $0x150] sm:$0xff]   ;;  %v12731_v53 = vrot.slane %v18713_v27, %v12730_v55 }
 0xa29   : > { %v11867_v16 = vadd.f32 %v18557_v49, %v11447_v23  ;;  %14923 = vmatprep.subr.bf16.mxu0 %v17306_v38  ;;  %v17308_v49 = vld [vmem:[#allocation12 + $0xe8] sm:$0xff]   ;;  %v17287_v21 = vld [vmem:[#allocation12 + $0x110] sm:$0xff]  }
 0xa2a   : > { %v17285_v23 = vld [vmem:[#allocation12 + $0x108] sm:$0xff]  }
 0xa2c   : > { %14924 = vmatpush3.bf16.msra.mxu0 %v17307_v10 }
 0xa2d   : > { %14925 = vmatprep.subr.bf16.mxu0 %v17308_v49  ;;  %v12735_v49 = vrot.slane %v18713_v27, %v12734_v28 }
 0xa30   : > { %14926 = vmatpush3.bf16.msra.mxu0 %v17309_v41 }
 0xa31   : > { %14927 = vmatprep.subr.bf16.mxu0 %v17310_v22 }
 0xa34   : > { %14928 = vmatpush3.bf16.msra.mxu0 %v17311_v47 }
 0xa35   : > { %14929 = vmatprep.subr.bf16.mxu0 %v17312_v1 }
 0xa38   : > { %14930 = vmatpush3.bf16.msra.mxu0 %v17313_v7 }
 0xa45   : > { %v11439_v46 = vpop.f32.mrb[168].mxu1 }
 0xa46   : > { %v11450_v0 = vadd.f32 %v11439_v46, %v18677_v45  ;;  %v11441_v33 = vpop.f32.mrb[169].mxu1 }
 0xa47   : > { %v11451_v13 = vadd.f32 %v11441_v33, %v18680_v34  ;;  %v11443_v63 = vpop.f32.mrb[170].mxu1 }
 0xa48   : > { %v11444_v35 = vpop.f32.mrb[171].mxu1  ;;  %v18697_v40 = vadd.f32 %v18568_v54, %v11450_v0  ;;  %v17295_v0 = vld [vmem:[#allocation12 + $0x130] sm:$0xff]   ;;  %v17296_v63 = vld [vmem:[#allocation12 + $0x178] sm:$0xff]  }
 0xa49   : > { %v18700_v59 = vadd.f32 %v18571_v2, %v11451_v13 }
 0xa65   : > { %v11818_v45 = vpop.f32.mrb[172].mxu1 }
 0xa66   : > { %v11868_v34 = vadd.f32 %v11818_v45, %v18685_v52  ;;  %v11820_v58 = vpop.f32.mrb[173].mxu1  ;;  %v12722_v45 = vsub.s32 2, %v18710_v3 }
 0xa67   : > { %v11869_v50 = vadd.f32 %v11820_v58, %v18688_v30  ;;  %v11822_v54 = vpop.f32.mrb[174].mxu1 }
 0xa68   : > { %v11823_v11 = vpop.f32.mrb[175].mxu1  ;;  %v18705_v2 = vadd.f32 %v18582_v9, %v11868_v34  ;;  %v12719_v9 = vrot.slane %v18713_v27, %v12718_v43  ;;  %v12723_v34 = vrot.slane %v18713_v27, %v12722_v45 }
 0xa69   : > { %v18708_v51 = vadd.f32 %v18585_v4, %v11869_v50 }
 0xa85   : > { %v12197_v19 = vpop.f32.mrb[176].mxu1 }
 0xa86   : > { %v12286_v32 = vadd.f32 %v12197_v19, %v11866_v18  ;;  %v12199_v62 = vpop.f32.mrb[177].mxu1  ;;  %v17290_v18 = vld [vmem:[#allocation12 + $0x160] sm:$0xff]  }
 0xa87   : > { %v12287_v52 = vadd.f32 %v12199_v62, %v11867_v16  ;;  %v12201_v20 = vpop.f32.mrb[178].mxu1  ;;  %v17291_v16 = vld [vmem:[#allocation12 + $0x120] sm:$0xff]  }
 0xa88   : > { %v12704_v4 = vadd.f32 %v18596_v60, %v12286_v32  ;;  %v12202_v30 = vpop.f32.mrb[179].mxu1  ;;  %v17288_v60 = vld [vmem:[#allocation12 + $0x158] sm:$0xff]  }
 0xa89   : > { %v12705_v5 = vadd.f32 %v18599_v39, %v12287_v52  ;;  %v17289_v39 = vld [vmem:[#allocation12 + $0x118] sm:$0xff]  }
 0xa8a   : > { %v12742_v36 = vadd.f32 %v12715_v48, %v12704_v4 }
 0xa8b   : > { %v12743_v42 = vadd.f32 %v12719_v9, %v12705_v5 }
 0xa8c   : > { %v12748_v25 = vmax.f32 %v12742_v36, 0.0 }
 0xa8d   : > { %v12749_v12 = vmax.f32 %v12743_v42, 0.0  ;;  %v12856_v42 = vld [vmem:[#allocation14] sm:$0x1] }
 0xa8e   : > { %v12754_v6 = vpack.c.bf16 %v12748_v25, %v12748_v25 }
 0xa8f   : > { %v12755_v14 = vpack.c.bf16 %v12749_v12, %v12749_v12 }
 0xa91   : > { %13177 = vmatprep.mubr.bf16.mxu1 %v12755_v14 }
 0xa92   : > { %13178 = vmatmul.mubr.bf16.vlgmr.msra.gmra.mrb[188].mxu1 %v12754_v6 }
 0xa93   : > { %14938 = vmatpush3.bf16.msra.mxu1 %v17283_v17 }
 0xa94   : > { %14939 = vmatprep.subr.bf16.mxu1 %v17284_v26 }
 0xa97   : > { %14940 = vmatpush3.bf16.msra.mxu1 %v17285_v23 }
 0xa98   : > { %14941 = vmatprep.subr.bf16.mxu1 %v17286_v15 }
 0xa9b   : > { %14942 = vmatpush3.bf16.msra.mxu1 %v17287_v21 }
 0xa9c   : > { %14943 = vmatprep.subr.bf16.mxu1 %v17288_v60 }
 0xa9f   : > { %14944 = vmatpush3.bf16.msra.mxu1 %v17289_v39 }
 0xaa0   : > { %14945 = vmatprep.subr.bf16.mxu1 %v17290_v18 }
 0xaa3   : > { %14946 = vmatpush3.bf16.msra.mxu1 %v17291_v16 }
 0xaa4   : > { %14947 = vmatprep.subr.bf16.mxu1 %v17292_v61 }
 0xaa5   : > { %v12279_v31 = vpop.f32.mrb[180].mxu1 }
 0xaa6   : > { %v12290_v37 = vadd.f32 %v12279_v31, %v18697_v40  ;;  %v12281_v38 = vpop.f32.mrb[181].mxu1  ;;  %v17297_v40 = vld [vmem:[#allocation12 + $0x138] sm:$0xff]  }
 0xaa7   : > { %v12291_v10 = vadd.f32 %v12281_v38, %v18700_v59  ;;  %v12283_v46 = vpop.f32.mrb[182].mxu1  ;;  %14948 = vmatpush3.bf16.msra.mxu1 %v17293_v57 }
 0xaa8   : > { %v12708_v33 = vadd.f32 %v18610_v24, %v12290_v37  ;;  %v12284_v13 = vpop.f32.mrb[183].mxu1  ;;  %14949 = vmatprep.subr.bf16.mxu1 %v17294_v44  ;;  %v12726_v24 = vsub.s32 3, %v18710_v3 }
 0xaa9   : > { %v12709_v41 = vadd.f32 %v18613_v29, %v12291_v10 }
 0xaaa   : > { %v12746_v35 = vadd.f32 %v12731_v53, %v12708_v33  ;;  %v12727_v29 = vrot.slane %v18713_v27, %v12726_v24 }
 0xaab   : > { %v12747_v22 = vadd.f32 %v12735_v49, %v12709_v41  ;;  %14950 = vmatpush3.bf16.msra.mxu1 %v17295_v0 }
 0xaac   : > { %v12752_v47 = vmax.f32 %v12746_v35, 0.0  ;;  %14951 = vmatprep.subr.bf16.mxu1 %v17296_v63 }
 0xaad   : > { %v12753_v1 = vmax.f32 %v12747_v22, 0.0 }
 0xaae   : > { %v12758_v7 = vpack.c.bf16 %v12752_v47, %v12752_v47 }
 0xaaf   : > { %14952 = vmatpush3.bf16.msra.mxu1 %v17297_v40  ;;  %v12759_v59 = vpack.c.bf16 %v12753_v1, %v12753_v1 }
 0xab1   : > { %13257 = vmatprep.mubr.bf16.mxu1 %v12759_v59 }
 0xab2   : > { %13258 = vmatmul.mubr.bf16.vlgmr.msra.gmra.mrb[192].mxu1 %v12758_v7 }
 0xac5   : > { %v12656_v58 = vpop.f32.mrb[184].mxu1 }
 0xac6   : > { %v12706_v50 = vadd.f32 %v12656_v58, %v18705_v2  ;;  %v12658_v54 = vpop.f32.mrb[185].mxu1 }
 0xac7   : > { %v12707_v11 = vadd.f32 %v12658_v54, %v18708_v51  ;;  %v12660_v56 = vpop.f32.mrb[186].mxu1 }
 0xac8   : > { %v12744_v8 = vadd.f32 %v12723_v34, %v12706_v50  ;;  %v12661_v43 = vpop.f32.mrb[187].mxu1 }
 0xac9   : > { %v12745_v19 = vadd.f32 %v12727_v29, %v12707_v11 }
 0xaca   : > { %v12750_v32 = vmax.f32 %v12744_v8, 0.0 }
 0xacb   : > { %v12751_v48 = vmax.f32 %v12745_v19, 0.0 }
 0xacc   : > { %v12756_v52 = vpack.c.bf16 %v12750_v32, %v12750_v32 }
 0xacd   : > { %v12757_v62 = vpack.c.bf16 %v12751_v48, %v12751_v48 }
 0xacf   : > { %13217 = vmatprep.mubr.bf16.mxu0 %v12757_v62 }
 0xad0   : > { %13218 = vmatmul.mubr.bf16.vlgmr.msra.gmra.mrb[200].mxu0 %v12756_v52 }
 0xb65   : > { %v14909_v3 = vpop.f32.mrb[188].mxu1 }
 0xb66   : > { %v14910_v9 = vpop.f32.mrb[189].mxu1 }
 0xb67   : > { %v14911_v20 = vadd.f32 %v14910_v9, %v14909_v3  ;;  %v14912_v27 = vpop.f32.mrb[190].mxu1 }
 0xb68   : > { %v14913_v2 = vpop.f32.mrb[191].mxu1 }
 0xb69   : > { %v13180_v14 = vadd.f32 %v14911_v20, %v12856_v42 }
 0xb85   : > { %v14953_v4 = vpop.f32.mrb[192].mxu1 }
 0xb86   : > { %v14954_v30 = vpop.f32.mrb[193].mxu1 }
 0xb87   : > { %v14955_v51 = vadd.f32 %v14954_v30, %v14953_v4  ;;  %v14956_v5 = vpop.f32.mrb[194].mxu1 }
 0xb88   : > { %v14957_v36 = vpop.f32.mrb[195].mxu1 }
 0xba3   : > { %v14931_v25 = vpop.f32.mrb[200].mxu0 }
 0xba4   : > { %v14932_v12 = vpop.f32.mrb[201].mxu0 }
 0xba5   : > { %v14933_v17 = vadd.f32 %v14932_v12, %v14931_v25  ;;  %v14934_v6 = vpop.f32.mrb[202].mxu0 }
 0xba6   : > { %v14935_v26 = vpop.f32.mrb[203].mxu0 }
 0xba7   : > { %v13220_v23 = vadd.f32 %v14933_v17, %v13180_v14 }
 0xba9   : > { %v13260_v15 = vadd.f32 %v14955_v51, %v13220_v23 }
 0xbab   : > { %13265 = vst [vmem:[%s393_s26] sm:$0x1] %v13260_v15 }
 0xbac   : > { %17526 = shalt.err (!%p17523_p9)
}
 0xbad   : > { %s17527_s18 = scalar_lea.hbm %s18739_s22, 16  ;;  %s17531_s12 = scalar_lea.hbm %s18789_s8, 32 }
 0xbae   : > { %p17528_p10 = scmp.ne.s32.totalorder %s18739_s22, %s17527_s18  ;;  %p17532_p1 = scmp.lt.u32.totalorder %s18739_s22, %s18789_s8 }
 0xbaf   : > { %p17533_p2 = scmp.lt.u32.totalorder %s17531_s12, %s17527_s18  ;;  %p17535_p4 = scmp.lt.u32.totalorder %s17527_s18, %s18739_s22 }
 0xbb0   : > { %p17529_p13 = pnand %p17528_p10, %p18819_p7 }
 0xbb1   : > { %p17534_p3 = por %p17533_p2, %p17532_p1 }
 0xbb2   : > { %p17530_p12 = pneg %p17529_p13 }
 0xbb3   : > { %p17536_p8 = por %p17535_p4, %p17534_p3 }
 0xbb5   : > { %p17537_p11 = pnand %p17536_p8, %p17530_p12 }
 0xbb7   : > { %17540 = shalt.err (!%p17537_p11)
}
 0xbb8   : > { %15150 = dma.vmem_to_hbm [thread:$0]  (%p18819_p7), %s18741_s21, 16, %s18739_s22, %s13267_s10  }
 0xbb9 PF: > { %p15192_p5 = scmp.ge.s32.totalorder %s17591_s30, 2  ;;  %s13291_s29 = sand.u32 1, %s17579_s27  }
 0xbba   : > { %p18820_p6 = scmp.ne.s32.totalorder %s18803_s16, 0  ;;  %s13292_s23 = scalar_lea.sflag [#allocation5], %s13291_s29 }
 0xbbc   : > { %p15175_p0 = pnand %p15192_p5, %p18820_p6 }
 0xbbe   : > { %17574 = dma.done.wait (!%p15175_p0), %s13292_s23, 16  }
 0xbbf   : > { %17576 = vsyncadd (!%p15175_p0), %s13292_s23, 4294967280  ;;  %s18821_s30 = sld [smem:[#allocation22_spill]]  ;;  %s18822_s26 = sld [smem:[#allocation21_spill]] }
 0xbc0   : > { %s18823_s29 = sld [smem:[#allocation23_spill]]  ;;  %s18824_s27 = smov %s17583_s28 }
 0xbc5   : > { %p22_p9 = scmp.ge.s32.totalorder %s18821_s30, 4   ;;  %s18825_s28 = smov %s18822_s26 }
 0xbc7   :  { %24 = sbr.rel (!%p22_p9) target bundleno = 9 (0x9), region = 140 }
 0xbce   :  { %13296 = vsyncpa [#allocation4], 1 }
 0xbcf   :  { %13298 = vsyncpa [#allocation4 + $0x1], 1 }
 0xbd0   :  { %13299 = vsyncpa [#allocation7], 1 }
 0xbd1   :  { %13300 = vsyncpa [#allocation10], 1 }
 0xbd2   :  { %13301 = vsyncpa [#allocation13], 1 }
 0xbd3   :  { %13302 = vsyncpa [#allocation5], 1 }
 0xbd4   :  { %13304 = vsyncpa [#allocation5 + $0x1], 1 }

</bundles_post_ra>
